<compile_context>
chip_gen: v7x
topology: tpu7x:2x2x1
jax: 0.10.0
libtpu: 0.0.40
codegen_flags: <defaults>
</compile_context>

<pallas_src>
import functools

import jax
import jax.numpy as jnp
from jax import lax
from jax.experimental import pallas as pl
from jax.experimental.pallas import tpu as pltpu


def _sigmoid(x):
    # sigmoid(x) = 0.5 * (tanh(0.5 * x) + 1): one EUP op instead of exp + recip.
    return 0.5 * (jnp.tanh(0.5 * x) + 1.0)


def _reorder_gates(arr):
    """Permute gate columns (i, f, g, o) -> (i, f, o, g) along the last axis.

    Lets the kernel evaluate the three sigmoid gates with a single contiguous
    call (3 EUP issues per layer-step instead of 5)."""
    i, f, g, o = jnp.split(arr, 4, axis=-1)
    return jnp.concatenate([i, f, o, g], axis=-1)


def _lstm_chunk_kernel(x_ref, h0_ref, c0_ref, w_ih_ref, w_hh_ref, b_ref,
                       out_ref, hT_ref, cT_ref,
                       h_chunk_ref, ig_ref,
                       *, n_layers, hidden_size, time_chunk, seq_len,
                       num_chunks, reverse, matmul_dtype, act_dtype):
    """One (batch_block, time_chunk) tile of the stacked-LSTM recurrence.

    Layer-major restructure: per layer, the input projection of the whole
    chunk is one big MXU matmul (M = Tc*Bb); only the (Bb, H) @ (H, 4H)
    recurrent dot remains on the serial per-timestep path.

    x_ref    : (Tc, Bb, D)   time-major input chunk (f32)
    h0/c0    : (L, Bb, H)    initial state, read only at chunk == 0
    w_ih     : (L, D, 4H)    input-projection weights (matmul dtype, i,f,o,g)
    w_hh     : (L, H, 4H)    recurrent weights        (matmul dtype, i,f,o,g)
    b        : (L, 1, 4H)    gate bias (f32, i,f,o,g)
    out      : (Tc, Bb, H)   per-step top-layer hidden (f32)
    hT/cT    : (L, Bb, H)    resident carried state == final-state outputs
    h_chunk  : (Tc*Bb, H)    VMEM scratch: inter-layer activations (mm dtype)
    ig       : (Tc*Bb, 4H)   VMEM scratch: chunk-wide gate pre-activations
    """
    L, H, Tc = n_layers, hidden_size, time_chunk
    f32 = jnp.float32
    chunk = pl.program_id(1)

    # Seed the carried state: it lives in the resident hT/cT output blocks
    # (their index map is constant over the time-chunk axis).
    @pl.when(chunk == 0)
    def _():
        hT_ref[...] = h0_ref[...]
        cT_ref[...] = c0_ref[...]

    Bb = hT_ref.shape[1]

    # Carried state -> vregs once per chunk.
    hs = [hT_ref[l] for l in range(L)]
    cs = [cT_ref[l] for l in range(L)]

    # Padding bookkeeping (statically disabled when T divides evenly).
    needs_mask = (num_chunks * Tc != seq_len)
    pad_from_s = seq_len - (num_chunks - 1) * Tc      # first maybe-padded step
    storage_chunk = (num_chunks - 1 - chunk) if reverse else chunk

    # reverse=True: process later timesteps first; storage slots unchanged.
    time_order = tuple(range(Tc - 1, -1, -1)) if reverse else tuple(range(Tc))

    for l in range(L):
        last = (l == L - 1)

        # ---- chunk-wide input projection: one big MXU matmul (M = Tc*Bb) ----
        if l == 0:
            # Cast the x chunk to the matmul dtype once (no f32 round trip).
            layer_in = x_ref[...].reshape(Tc * Bb, x_ref.shape[-1])
            layer_in = layer_in.astype(matmul_dtype)
        else:
            layer_in = h_chunk_ref[...]               # already matmul dtype
        ig_ref[...] = (
            jnp.dot(layer_in, w_ih_ref[l], preferred_element_type=f32)
            + b_ref[l])

        # ---- serial recurrence: only the (Bb,H)@(H,4H) dot per step ----
        w_hh_l = w_hh_ref[l]
        h_l = hs[l]
        c_l = cs[l]
        for s in time_order:
            gates = (ig_ref[pl.ds(s * Bb, Bb), :]
                     + jnp.dot(h_l.astype(matmul_dtype), w_hh_l,
                               preferred_element_type=f32))
            ga = gates.astype(act_dtype)
            sg = _sigmoid(ga[:, 0:3 * H]).astype(f32)   # i, f, o in one call
            i_g = sg[:, 0 * H:1 * H]
            f_g = sg[:, 1 * H:2 * H]
            o_g = sg[:, 2 * H:3 * H]
            g_g = jnp.tanh(ga[:, 3 * H:4 * H]).astype(f32)
            c_new = f_g * c_l + i_g * g_g
            h_new = o_g * jnp.tanh(c_new.astype(act_dtype)).astype(f32)
            if needs_mask and s >= pad_from_s:
                # Possibly a padded timestep (only in the last storage chunk):
                # freeze the carried state there.
                valid = (storage_chunk * Tc + s) < seq_len
                h_l = jnp.where(valid, h_new, h_l)
                c_l = jnp.where(valid, c_new, c_l)
            else:
                h_l = h_new
                c_l = c_new
            if last:
                out_ref[s] = h_l.astype(out_ref.dtype)
            else:
                h_chunk_ref[pl.ds(s * Bb, Bb), :] = h_l.astype(h_chunk_ref.dtype)
        hs[l] = h_l
        cs[l] = c_l

    # Carried state back into the resident output blocks; Pallas flushes them
    # to HBM when the batch block changes / at the end of the grid.
    for l in range(L):
        hT_ref[l] = hs[l]
        cT_ref[l] = cs[l]


def recurrent_forward(inputs, params, pre_hidden=None, reverse=False, *,
                      matmul_dtype=jnp.bfloat16, act_dtype=jnp.float32,
                      time_chunk=None, batch_blocks=None, time_major=False):
    """Pallas equivalent of Recurrent.forward (get_attention=False path).

    inputs : (B, T, D) float32  (or (T, B, D) when time_major=True)
    params : dict with w_ih (L, D, 4H), w_hh (L, H, 4H), b (L, 1, 4H) in
             (i, f, g, o) gate order, plus 'h0_init' (L, B, H) used when
             pre_hidden is None.
    returns: outputs (B, T, H) (or (T, B, H) if time_major), (h_T, c_T)
    """
    # TODO(synk): the get_attention=True branch needs the external `attention`
    # module; only the get_attention=False path is kernelized.
    x_tm = inputs if time_major else jnp.transpose(inputs, (1, 0, 2))
    T, B, D = x_tm.shape
    L, Din, fourH = params["w_ih"].shape
    H = fourH // 4
    assert Din == D and D == H, "stacked cell requires input_size == hidden_size"

    if pre_hidden is None:
        # PyTorch uses xavier_normal_ on an expanded zero tensor; we use a
        # deterministic xavier-style h0 and zero c0 (synthetic init).
        h0 = params["h0_init"].astype(jnp.float32)
        c0 = jnp.zeros((L, B, H), jnp.float32)
    else:
        h0, c0 = pre_hidden
        h0 = h0.astype(jnp.float32)
        c0 = c0.astype(jnp.float32)

    # Gate-column reorder (i,f,g,o) -> (i,f,o,g); bf16 MXU operands by default
    # (f32 accumulation), bias stays f32.
    w_ih = _reorder_gates(params["w_ih"]).astype(matmul_dtype)     # (L, D, 4H)
    w_hh = _reorder_gates(params["w_hh"]).astype(matmul_dtype)     # (L, H, 4H)
    bias = _reorder_gates(params["b"]).astype(jnp.float32)         # (L, 1, 4H)

    # ---- time chunking (amortize ~0.35us Pallas overhead per grid step) ----
    if time_chunk is None:
        time_chunk = next((c for c in (32, 16, 8) if T % c == 0), min(T, 16))
    T_pad = -(-T // time_chunk) * time_chunk
    n_chunks = T_pad // time_chunk

    # ---- batch blocking: default 1 (never starve the MXU on 1-TC parts) ----
    B_pad = -(-B // 8) * 8                                  # sublane alignment
    if batch_blocks is None:
        batch_blocks = 1
    assert B_pad % batch_blocks == 0
    Bb = B_pad // batch_blocks
    assert Bb % 8 == 0

    # Zero-pad batch/time; padded rows are independent, padded steps are
    # masked inside the kernel, both sliced off below.
    if (T_pad != T) or (B_pad != B):
        x_tm = jnp.pad(x_tm, ((0, T_pad - T), (0, B_pad - B), (0, 0)))
    if B_pad != B:
        h0 = jnp.pad(h0, ((0, 0), (0, B_pad - B), (0, 0)))
        c0 = jnp.pad(c0, ((0, 0), (0, B_pad - B), (0, 0)))

    def chunk_idx(c):
        return (n_chunks - 1 - c) if reverse else c

    kernel = functools.partial(
        _lstm_chunk_kernel, n_layers=L, hidden_size=H, time_chunk=time_chunk,
        seq_len=T, num_chunks=n_chunks, reverse=reverse,
        matmul_dtype=matmul_dtype, act_dtype=act_dtype)

    # Explicit VMEM budget (v7x only has 64 MiB physical VMEM).
    mm_bytes = jnp.dtype(matmul_dtype).itemsize
    est = (2 * time_chunk * Bb * D * 4                 # x blocks (dbl buffer)
           + 2 * time_chunk * Bb * H * 4               # out blocks
           + 4 * 2 * L * Bb * H * 4                    # h0/c0/hT/cT blocks
           + 2 * L * D * 4 * H * mm_bytes              # w_ih
           + 2 * L * H * 4 * H * mm_bytes              # w_hh
           + 2 * L * 4 * H * 4                         # bias
           + time_chunk * Bb * H * mm_bytes            # h_chunk scratch
           + 2 * time_chunk * Bb * 4 * H * 4)          # ig scratch + live regs
    vmem_limit = int(min(64 * 2 ** 20, max(32 * 2 ** 20, 2 * est)))

    out_tm, h_T, c_T = pl.pallas_call(
        kernel,
        out_shape=(
            jax.ShapeDtypeStruct((T_pad, B_pad, H), jnp.float32),
            jax.ShapeDtypeStruct((L, B_pad, H), jnp.float32),
            jax.ShapeDtypeStruct((L, B_pad, H), jnp.float32),
        ),
        grid_spec=pltpu.PrefetchScalarGridSpec(
            num_scalar_prefetch=0,
            grid=(batch_blocks, n_chunks),
            in_specs=[
                pl.BlockSpec((time_chunk, Bb, D),
                             lambda b, c: (chunk_idx(c), b, 0)),           # x
                pl.BlockSpec((L, Bb, H), lambda b, c: (0, b, 0)),          # h0
                pl.BlockSpec((L, Bb, H), lambda b, c: (0, b, 0)),          # c0
                pl.BlockSpec((L, D, 4 * H), lambda b, c: (0, 0, 0)),       # W_ih
                pl.BlockSpec((L, H, 4 * H), lambda b, c: (0, 0, 0)),       # W_hh
                pl.BlockSpec((L, 1, 4 * H), lambda b, c: (0, 0, 0)),       # bias
            ],
            out_specs=(
                pl.BlockSpec((time_chunk, Bb, H),
                             lambda b, c: (chunk_idx(c), b, 0)),           # out
                pl.BlockSpec((L, Bb, H), lambda b, c: (0, b, 0)),          # h_T
                pl.BlockSpec((L, Bb, H), lambda b, c: (0, b, 0)),          # c_T
            ),
            scratch_shapes=[
                pltpu.VMEM((time_chunk * Bb, H), matmul_dtype),     # h_chunk
                pltpu.VMEM((time_chunk * Bb, 4 * H), jnp.float32),  # ig
            ],
        ),
        compiler_params=pltpu.CompilerParams(
            dimension_semantics=("parallel", "arbitrary"),
            vmem_limit_bytes=vmem_limit,
        ),
    )(x_tm, h0, c0, w_ih, w_hh, bias)

    out_tm = out_tm[:T, :B]
    h_T = h_T[:, :B]
    c_T = c_T[:, :B]
    outputs = out_tm if time_major else jnp.transpose(out_tm, (1, 0, 2))
    return outputs, (h_T, c_T)


def _reference_forward(inputs, params, pre_hidden=None, reverse=False,
                       matmul_dtype=jnp.float32):
    """Pure-JAX reference (lax.scan) mirroring the PyTorch loop."""
    B, T, D = inputs.shape
    L, _, fourH = params["w_ih"].shape
    H = fourH // 4
    if pre_hidden is None:
        h0 = params["h0_init"].astype(jnp.float32)
        c0 = jnp.zeros((L, B, H), jnp.float32)
    else:
        h0, c0 = pre_hidden
        h0 = h0.astype(jnp.float32)
        c0 = c0.astype(jnp.float32)
    w_ih = params["w_ih"].astype(matmul_dtype)
    w_hh = params["w_hh"].astype(matmul_dtype)
    b = params["b"]
    x_tm = jnp.transpose(inputs, (1, 0, 2))
    if reverse:
        x_tm = x_tm[::-1]

    def cell(carry, x_t):
        h, c = carry
        inp = x_t
        hs, cs = [], []
        for l in range(L):
            gates = (jnp.dot(inp.astype(matmul_dtype), w_ih[l],
                             preferred_element_type=jnp.float32)
                     + jnp.dot(h[l].astype(matmul_dtype), w_hh[l],
                               preferred_element_type=jnp.float32)
                     + b[l])
            i_g = jax.nn.sigmoid(gates[:, 0 * H:1 * H])
            f_g = jax.nn.sigmoid(gates[:, 1 * H:2 * H])
            g_g = jnp.tanh(gates[:, 2 * H:3 * H])
            o_g = jax.nn.sigmoid(gates[:, 3 * H:4 * H])
            c_new = f_g * c[l] + i_g * g_g
            h_new = o_g * jnp.tanh(c_new)
            hs.append(h_new)
            cs.append(c_new)
            inp = h_new
        return (jnp.stack(hs), jnp.stack(cs)), inp

    (h_T, c_T), outs = lax.scan(cell, (h0, c0), x_tm)
    if reverse:
        outs = outs[::-1]
    return jnp.transpose(outs, (1, 0, 2)), (h_T, c_T)


def _init_params(key, n_layers, input_size, hidden_size, batch_size):
    assert input_size == hidden_size
    D, H, L = input_size, hidden_size, n_layers
    ks = jax.random.split(key, 4)
    scale = 1.0 / jnp.sqrt(H)
    w_ih = scale * jax.random.normal(ks[0], (L, D, 4 * H), jnp.float32)
    w_hh = scale * jax.random.normal(ks[1], (L, H, 4 * H), jnp.float32)
    b = scale * jax.random.normal(ks[2], (L, 1, 4 * H), jnp.float32)
    # xavier-normal-ish deterministic h0 (stands in for nn.init.xavier_normal_)
    xav = jnp.sqrt(2.0 / (batch_size + H))
    h0_init = xav * jax.random.normal(ks[3], (L, batch_size, H), jnp.float32)
    return {"w_ih": w_ih, "w_hh": w_hh, "b": b, "h0_init": h0_init}


if __name__ == "__main__":
    key = jax.random.PRNGKey(0)

    # (B, T, D == H, L, combos of (matmul_dtype, reverse, use_pre_hidden))
    test_cases = [
        # Lane-dense main case: 3 time chunks of 16 steps, bf16 MXU operands.
        (8, 48, 128, 2, [(jnp.bfloat16, False, False),
                         (jnp.bfloat16, True, False),
                         (jnp.float32, False, False)]),
        # Padding path: B=6 -> 8 rows, T=20 -> 32 steps (masked), small H,
        # plus an explicit pre_hidden case.
        (6, 20, 32, 2, [(jnp.float32, False, False),
                        (jnp.float32, True, True),
                        (jnp.bfloat16, False, False)]),
    ]

    for (B, T, H, L, combos) in test_cases:
        key, k_x, k_p, k_h, k_c = jax.random.split(key, 5)
        x = jax.random.normal(k_x, (B, T, H), jnp.float32)
        params = _init_params(k_p, L, H, H, B)
        pre_h = (0.5 * jax.random.normal(k_h, (L, B, H), jnp.float32),
                 0.5 * jax.random.normal(k_c, (L, B, H), jnp.float32))
        for mm_dtype, reverse, use_pre in combos:
            hidden_in = pre_h if use_pre else None
            tol = 5e-4 if mm_dtype == jnp.float32 else 3e-3
            out, (hT, cT) = recurrent_forward(
                x, params, pre_hidden=hidden_in, reverse=reverse,
                matmul_dtype=mm_dtype)
            jax.block_until_ready((out, hT, cT))
            ref_out, (ref_hT, ref_cT) = _reference_forward(
                x, params, hidden_in, reverse, matmul_dtype=mm_dtype)
            assert out.shape == (B, T, H)
            assert hT.shape == (L, B, H) and cT.shape == (L, B, H)
            assert jnp.allclose(out, ref_out, atol=tol, rtol=tol), \
                ("outputs mismatch", B, T, H, reverse, str(mm_dtype))
            assert jnp.allclose(hT, ref_hT, atol=tol, rtol=tol), \
                ("h_T mismatch", B, T, H, reverse, str(mm_dtype))
            assert jnp.allclose(cT, ref_cT, atol=tol, rtol=tol), \
                ("c_T mismatch", B, T, H, reverse, str(mm_dtype))

    print("KERNEL_OK")
</pallas_src>

<mosaic_0001>
module attributes {stable_mosaic.version = 11 : i64} {
  func.func @_lstm_chunk_kernel(%arg0: i32, %arg1: i32, %arg2: memref<16x8x128xf32, #tpu.memory_space<vmem>>, %arg3: memref<2x8x128xf32, #tpu.memory_space<vmem>>, %arg4: memref<2x8x128xf32, #tpu.memory_space<vmem>>, %arg5: memref<2x128x512xbf16, #tpu.memory_space<vmem>>, %arg6: memref<2x128x512xbf16, #tpu.memory_space<vmem>>, %arg7: memref<2x1x512xf32, #tpu.memory_space<vmem>>, %arg8: memref<16x8x128xf32, #tpu.memory_space<vmem>>, %arg9: memref<2x8x128xf32, #tpu.memory_space<vmem>>, %arg10: memref<2x8x128xf32, #tpu.memory_space<vmem>>, %arg11: memref<128x128xbf16, #tpu.memory_space<vmem>>, %arg12: memref<128x512xf32, #tpu.memory_space<vmem>>) attributes {dimension_semantics = [#tpu.dimension_semantics<parallel>, #tpu.dimension_semantics<arbitrary>], iteration_bounds = array<i64: 1, 3>, scalar_prefetch = 0 : i64, scratch_operands = 2 : i64, tpu.core_type = #tpu.core_type<tc>, window_params = [{transform_indices = @transform_0, window_bounds = array<i64: 16, 8, 128>}, {transform_indices = @transform_1, window_bounds = array<i64: 2, 8, 128>}, {transform_indices = @transform_2, window_bounds = array<i64: 2, 8, 128>}, {pipeline_mode = #tpu.pipeline_mode<synchronous>, transform_indices = @transform_3, window_bounds = array<i64: 2, 128, 512>}, {pipeline_mode = #tpu.pipeline_mode<synchronous>, transform_indices = @transform_4, window_bounds = array<i64: 2, 128, 512>}, {pipeline_mode = #tpu.pipeline_mode<synchronous>, transform_indices = @transform_5, window_bounds = array<i64: 2, 1, 512>}, {transform_indices = @transform_6, window_bounds = array<i64: 16, 8, 128>}, {transform_indices = @transform_7, window_bounds = array<i64: 2, 8, 128>}, {transform_indices = @transform_8, window_bounds = array<i64: 2, 8, 128>}]} {
    %c0_i32 = arith.constant 0 : i32
    %0 = arith.cmpi eq, %arg1, %c0_i32 : i32
    %1 = arith.extui %0 : i1 to i32
    %c0_i32_0 = arith.constant 0 : i32
    %2 = arith.cmpi ne, %1, %c0_i32_0 : i32
    scf.if %2 {
      %c0_295 = arith.constant 0 : index
      %c0_296 = arith.constant 0 : index
      %c0_297 = arith.constant 0 : index
      %831 = vector.load %arg3[%c0_295, %c0_296, %c0_297] : memref<2x8x128xf32, #tpu.memory_space<vmem>>, vector<2x8x128xf32>
      %c0_298 = arith.constant 0 : index
      %c0_299 = arith.constant 0 : index
      %c0_300 = arith.constant 0 : index
      %832 = vector.load %arg9[%c0_298, %c0_299, %c0_300] : memref<2x8x128xf32, #tpu.memory_space<vmem>>, vector<2x8x128xf32>
      tpu.vector_store %arg9[%c0_298, %c0_299, %c0_300], %831 {strides = array<i32>} : memref<2x8x128xf32, #tpu.memory_space<vmem>>, vector<2x8x128xf32>,
      %c0_301 = arith.constant 0 : index
      %c0_302 = arith.constant 0 : index
      %c0_303 = arith.constant 0 : index
      %833 = vector.load %arg4[%c0_301, %c0_302, %c0_303] : memref<2x8x128xf32, #tpu.memory_space<vmem>>, vector<2x8x128xf32>
      %c0_304 = arith.constant 0 : index
      %c0_305 = arith.constant 0 : index
      %c0_306 = arith.constant 0 : index
      %834 = vector.load %arg10[%c0_304, %c0_305, %c0_306] : memref<2x8x128xf32, #tpu.memory_space<vmem>>, vector<2x8x128xf32>
      tpu.vector_store %arg10[%c0_304, %c0_305, %c0_306], %833 {strides = array<i32>} : memref<2x8x128xf32, #tpu.memory_space<vmem>>, vector<2x8x128xf32>,
    } else {
    }
    %c0 = arith.constant 0 : index
    %c0_1 = arith.constant 0 : index
    %c0_2 = arith.constant 0 : index
    %3 = vector.load %arg9[%c0, %c0_1, %c0_2] : memref<2x8x128xf32, #tpu.memory_space<vmem>>, vector<1x8x128xf32>
    %4 = vector.shape_cast %3 : vector<1x8x128xf32> to vector<8x128xf32>
    %c1 = arith.constant 1 : index
    %c0_3 = arith.constant 0 : index
    %c0_4 = arith.constant 0 : index
    %5 = vector.load %arg9[%c1, %c0_3, %c0_4] : memref<2x8x128xf32, #tpu.memory_space<vmem>>, vector<1x8x128xf32>
    %6 = vector.shape_cast %5 : vector<1x8x128xf32> to vector<8x128xf32>
    %c0_5 = arith.constant 0 : index
    %c0_6 = arith.constant 0 : index
    %c0_7 = arith.constant 0 : index
    %7 = vector.load %arg10[%c0_5, %c0_6, %c0_7] : memref<2x8x128xf32, #tpu.memory_space<vmem>>, vector<1x8x128xf32>
    %8 = vector.shape_cast %7 : vector<1x8x128xf32> to vector<8x128xf32>
    %c1_8 = arith.constant 1 : index
    %c0_9 = arith.constant 0 : index
    %c0_10 = arith.constant 0 : index
    %9 = vector.load %arg10[%c1_8, %c0_9, %c0_10] : memref<2x8x128xf32, #tpu.memory_space<vmem>>, vector<1x8x128xf32>
    %10 = vector.shape_cast %9 : vector<1x8x128xf32> to vector<8x128xf32>
    %c0_11 = arith.constant 0 : index
    %c0_12 = arith.constant 0 : index
    %c0_13 = arith.constant 0 : index
    %11 = vector.load %arg2[%c0_11, %c0_12, %c0_13] : memref<16x8x128xf32, #tpu.memory_space<vmem>>, vector<16x8x128xf32>
    %12 = vector.shape_cast %11 : vector<16x8x128xf32> to vector<128x128xf32>
    %13 = arith.truncf %12 : vector<128x128xf32> to vector<128x128xbf16>
    %c0_14 = arith.constant 0 : index
    %c0_15 = arith.constant 0 : index
    %c0_16 = arith.constant 0 : index
    %14 = vector.load %arg5[%c0_14, %c0_15, %c0_16] : memref<2x128x512xbf16, #tpu.memory_space<vmem>>, vector<1x128x512xbf16>
    %15 = vector.shape_cast %14 : vector<1x128x512xbf16> to vector<128x512xbf16>
    %cst = arith.constant dense<0.000000e+00> : vector<128x512xf32>
    %16 = tpu.matmul %13, %15, %cst {dimension_numbers = #tpu.dot_dimension_numbers<[1], [0], [0], [1], [0, 0, 1, 1], [], []>} : vector<128x128xbf16>, vector<128x512xbf16>, vector<128x512xf32> -> vector<128x512xf32>
    %c0_17 = arith.constant 0 : index
    %c0_18 = arith.constant 0 : index
    %c0_19 = arith.constant 0 : index
    %17 = vector.load %arg7[%c0_17, %c0_18, %c0_19] : memref<2x1x512xf32, #tpu.memory_space<vmem>>, vector<1x1x512xf32>
    %18 = vector.shape_cast %17 : vector<1x1x512xf32> to vector<1x512xf32>
    %19 = vector.broadcast %18 : vector<1x512xf32> to vector<128x512xf32>
    %20 = arith.addf %16, %19 : vector<128x512xf32>
    %c0_20 = arith.constant 0 : index
    %c0_21 = arith.constant 0 : index
    %21 = vector.load %arg12[%c0_20, %c0_21] : memref<128x512xf32, #tpu.memory_space<vmem>>, vector<128x512xf32>
    tpu.vector_store %arg12[%c0_20, %c0_21], %20 {strides = array<i32>} : memref<128x512xf32, #tpu.memory_space<vmem>>, vector<128x512xf32>,
    %c0_22 = arith.constant 0 : index
    %c0_23 = arith.constant 0 : index
    %c0_24 = arith.constant 0 : index
    %22 = vector.load %arg6[%c0_22, %c0_23, %c0_24] : memref<2x128x512xbf16, #tpu.memory_space<vmem>>, vector<1x128x512xbf16>
    %23 = vector.shape_cast %22 : vector<1x128x512xbf16> to vector<128x512xbf16>
    %c0_25 = arith.constant 0 : index
    %c0_26 = arith.constant 0 : index
    %24 = vector.load %arg12[%c0_25, %c0_26] : memref<128x512xf32, #tpu.memory_space<vmem>>, vector<8x512xf32>
    %25 = arith.truncf %4 : vector<8x128xf32> to vector<8x128xbf16>
    %cst_27 = arith.constant dense<0.000000e+00> : vector<8x512xf32>
    %26 = tpu.matmul %25, %23, %cst_27 {dimension_numbers = #tpu.dot_dimension_numbers<[1], [0], [0], [1], [0, 0, 1, 1], [], []>} : vector<8x128xbf16>, vector<128x512xbf16>, vector<8x512xf32> -> vector<8x512xf32>
    %27 = arith.addf %24, %26 : vector<8x512xf32>
    %28 = vector.extract_strided_slice %27 {offsets = [0, 0], sizes = [8, 384], strides = [1, 1]} : vector<8x512xf32> to vector<8x384xf32>
    %cst_28 = arith.constant 5.000000e-01 : f32
    %29 = vector.broadcast %cst_28 : f32 to vector<8x384xf32>
    %30 = arith.mulf %29, %28 : vector<8x384xf32>
    %31 = math.tanh %30 : vector<8x384xf32>
    %cst_29 = arith.constant 1.000000e+00 : f32
    %32 = vector.broadcast %cst_29 : f32 to vector<8x384xf32>
    %33 = arith.addf %31, %32 : vector<8x384xf32>
    %cst_30 = arith.constant 5.000000e-01 : f32
    %34 = vector.broadcast %cst_30 : f32 to vector<8x384xf32>
    %35 = arith.mulf %34, %33 : vector<8x384xf32>
    %36 = vector.extract_strided_slice %35 {offsets = [0, 0], sizes = [8, 128], strides = [1, 1]} : vector<8x384xf32> to vector<8x128xf32>
    %37 = vector.extract_strided_slice %35 {offsets = [0, 128], sizes = [8, 128], strides = [1, 1]} : vector<8x384xf32> to vector<8x128xf32>
    %38 = vector.extract_strided_slice %35 {offsets = [0, 256], sizes = [8, 128], strides = [1, 1]} : vector<8x384xf32> to vector<8x128xf32>
    %39 = vector.extract_strided_slice %27 {offsets = [0, 384], sizes = [8, 128], strides = [1, 1]} : vector<8x512xf32> to vector<8x128xf32>
    %40 = math.tanh %39 : vector<8x128xf32>
    %41 = arith.mulf %37, %8 : vector<8x128xf32>
    %42 = arith.mulf %36, %40 : vector<8x128xf32>
    %43 = arith.addf %41, %42 : vector<8x128xf32>
    %44 = math.tanh %43 : vector<8x128xf32>
    %45 = arith.mulf %38, %44 : vector<8x128xf32>
    %46 = arith.truncf %45 : vector<8x128xf32> to vector<8x128xbf16>
    %c0_31 = arith.constant 0 : index
    %c0_32 = arith.constant 0 : index
    %47 = vector.load %arg11[%c0_31, %c0_32] : memref<128x128xbf16, #tpu.memory_space<vmem>>, vector<8x128xbf16>
    tpu.vector_store %arg11[%c0_31, %c0_32], %46 {strides = array<i32>} : memref<128x128xbf16, #tpu.memory_space<vmem>>, vector<8x128xbf16>,
    %c8 = arith.constant 8 : index
    %c0_33 = arith.constant 0 : index
    %48 = vector.load %arg12[%c8, %c0_33] : memref<128x512xf32, #tpu.memory_space<vmem>>, vector<8x512xf32>
    %49 = arith.truncf %45 : vector<8x128xf32> to vector<8x128xbf16>
    %cst_34 = arith.constant dense<0.000000e+00> : vector<8x512xf32>
    %50 = tpu.matmul %49, %23, %cst_34 {dimension_numbers = #tpu.dot_dimension_numbers<[1], [0], [0], [1], [0, 0, 1, 1], [], []>} : vector<8x128xbf16>, vector<128x512xbf16>, vector<8x512xf32> -> vector<8x512xf32>
    %51 = arith.addf %48, %50 : vector<8x512xf32>
    %52 = vector.extract_strided_slice %51 {offsets = [0, 0], sizes = [8, 384], strides = [1, 1]} : vector<8x512xf32> to vector<8x384xf32>
    %cst_35 = arith.constant 5.000000e-01 : f32
    %53 = vector.broadcast %cst_35 : f32 to vector<8x384xf32>
    %54 = arith.mulf %53, %52 : vector<8x384xf32>
    %55 = math.tanh %54 : vector<8x384xf32>
    %cst_36 = arith.constant 1.000000e+00 : f32
    %56 = vector.broadcast %cst_36 : f32 to vector<8x384xf32>
    %57 = arith.addf %55, %56 : vector<8x384xf32>
    %cst_37 = arith.constant 5.000000e-01 : f32
    %58 = vector.broadcast %cst_37 : f32 to vector<8x384xf32>
    %59 = arith.mulf %58, %57 : vector<8x384xf32>
    %60 = vector.extract_strided_slice %59 {offsets = [0, 0], sizes = [8, 128], strides = [1, 1]} : vector<8x384xf32> to vector<8x128xf32>
    %61 = vector.extract_strided_slice %59 {offsets = [0, 128], sizes = [8, 128], strides = [1, 1]} : vector<8x384xf32> to vector<8x128xf32>
    %62 = vector.extract_strided_slice %59 {offsets = [0, 256], sizes = [8, 128], strides = [1, 1]} : vector<8x384xf32> to vector<8x128xf32>
    %63 = vector.extract_strided_slice %51 {offsets = [0, 384], sizes = [8, 128], strides = [1, 1]} : vector<8x512xf32> to vector<8x128xf32>
    %64 = math.tanh %63 : vector<8x128xf32>
    %65 = arith.mulf %61, %43 : vector<8x128xf32>
    %66 = arith.mulf %60, %64 : vector<8x128xf32>
    %67 = arith.addf %65, %66 : vector<8x128xf32>
    %68 = math.tanh %67 : vector<8x128xf32>
    %69 = arith.mulf %62, %68 : vector<8x128xf32>
    %70 = arith.truncf %69 : vector<8x128xf32> to vector<8x128xbf16>
    %c8_38 = arith.constant 8 : index
    %c0_39 = arith.constant 0 : index
    %71 = vector.load %arg11[%c8_38, %c0_39] : memref<128x128xbf16, #tpu.memory_space<vmem>>, vector<8x128xbf16>
    tpu.vector_store %arg11[%c8_38, %c0_39], %70 {strides = array<i32>} : memref<128x128xbf16, #tpu.memory_space<vmem>>, vector<8x128xbf16>,
    %c16 = arith.constant 16 : index
    %c0_40 = arith.constant 0 : index
    %72 = vector.load %arg12[%c16, %c0_40] : memref<128x512xf32, #tpu.memory_space<vmem>>, vector<8x512xf32>
    %73 = arith.truncf %69 : vector<8x128xf32> to vector<8x128xbf16>
    %cst_41 = arith.constant dense<0.000000e+00> : vector<8x512xf32>
    %74 = tpu.matmul %73, %23, %cst_41 {dimension_numbers = #tpu.dot_dimension_numbers<[1], [0], [0], [1], [0, 0, 1, 1], [], []>} : vector<8x128xbf16>, vector<128x512xbf16>, vector<8x512xf32> -> vector<8x512xf32>
    %75 = arith.addf %72, %74 : vector<8x512xf32>
    %76 = vector.extract_strided_slice %75 {offsets = [0, 0], sizes = [8, 384], strides = [1, 1]} : vector<8x512xf32> to vector<8x384xf32>
    %cst_42 = arith.constant 5.000000e-01 : f32
    %77 = vector.broadcast %cst_42 : f32 to vector<8x384xf32>
    %78 = arith.mulf %77, %76 : vector<8x384xf32>
    %79 = math.tanh %78 : vector<8x384xf32>
    %cst_43 = arith.constant 1.000000e+00 : f32
    %80 = vector.broadcast %cst_43 : f32 to vector<8x384xf32>
    %81 = arith.addf %79, %80 : vector<8x384xf32>
    %cst_44 = arith.constant 5.000000e-01 : f32
    %82 = vector.broadcast %cst_44 : f32 to vector<8x384xf32>
    %83 = arith.mulf %82, %81 : vector<8x384xf32>
    %84 = vector.extract_strided_slice %83 {offsets = [0, 0], sizes = [8, 128], strides = [1, 1]} : vector<8x384xf32> to vector<8x128xf32>
    %85 = vector.extract_strided_slice %83 {offsets = [0, 128], sizes = [8, 128], strides = [1, 1]} : vector<8x384xf32> to vector<8x128xf32>
    %86 = vector.extract_strided_slice %83 {offsets = [0, 256], sizes = [8, 128], strides = [1, 1]} : vector<8x384xf32> to vector<8x128xf32>
    %87 = vector.extract_strided_slice %75 {offsets = [0, 384], sizes = [8, 128], strides = [1, 1]} : vector<8x512xf32> to vector<8x128xf32>
    %88 = math.tanh %87 : vector<8x128xf32>
    %89 = arith.mulf %85, %67 : vector<8x128xf32>
    %90 = arith.mulf %84, %88 : vector<8x128xf32>
    %91 = arith.addf %89, %90 : vector<8x128xf32>
    %92 = math.tanh %91 : vector<8x128xf32>
    %93 = arith.mulf %86, %92 : vector<8x128xf32>
    %94 = arith.truncf %93 : vector<8x128xf32> to vector<8x128xbf16>
    %c16_45 = arith.constant 16 : index
    %c0_46 = arith.constant 0 : index
    %95 = vector.load %arg11[%c16_45, %c0_46] : memref<128x128xbf16, #tpu.memory_space<vmem>>, vector<8x128xbf16>
    tpu.vector_store %arg11[%c16_45, %c0_46], %94 {strides = array<i32>} : memref<128x128xbf16, #tpu.memory_space<vmem>>, vector<8x128xbf16>,
    %c24 = arith.constant 24 : index
    %c0_47 = arith.constant 0 : index
    %96 = vector.load %arg12[%c24, %c0_47] : memref<128x512xf32, #tpu.memory_space<vmem>>, vector<8x512xf32>
    %97 = arith.truncf %93 : vector<8x128xf32> to vector<8x128xbf16>
    %cst_48 = arith.constant dense<0.000000e+00> : vector<8x512xf32>
    %98 = tpu.matmul %97, %23, %cst_48 {dimension_numbers = #tpu.dot_dimension_numbers<[1], [0], [0], [1], [0, 0, 1, 1], [], []>} : vector<8x128xbf16>, vector<128x512xbf16>, vector<8x512xf32> -> vector<8x512xf32>
    %99 = arith.addf %96, %98 : vector<8x512xf32>
    %100 = vector.extract_strided_slice %99 {offsets = [0, 0], sizes = [8, 384], strides = [1, 1]} : vector<8x512xf32> to vector<8x384xf32>
    %cst_49 = arith.constant 5.000000e-01 : f32
    %101 = vector.broadcast %cst_49 : f32 to vector<8x384xf32>
    %102 = arith.mulf %101, %100 : vector<8x384xf32>
    %103 = math.tanh %102 : vector<8x384xf32>
    %cst_50 = arith.constant 1.000000e+00 : f32
    %104 = vector.broadcast %cst_50 : f32 to vector<8x384xf32>
    %105 = arith.addf %103, %104 : vector<8x384xf32>
    %cst_51 = arith.constant 5.000000e-01 : f32
    %106 = vector.broadcast %cst_51 : f32 to vector<8x384xf32>
    %107 = arith.mulf %106, %105 : vector<8x384xf32>
    %108 = vector.extract_strided_slice %107 {offsets = [0, 0], sizes = [8, 128], strides = [1, 1]} : vector<8x384xf32> to vector<8x128xf32>
    %109 = vector.extract_strided_slice %107 {offsets = [0, 128], sizes = [8, 128], strides = [1, 1]} : vector<8x384xf32> to vector<8x128xf32>
    %110 = vector.extract_strided_slice %107 {offsets = [0, 256], sizes = [8, 128], strides = [1, 1]} : vector<8x384xf32> to vector<8x128xf32>
    %111 = vector.extract_strided_slice %99 {offsets = [0, 384], sizes = [8, 128], strides = [1, 1]} : vector<8x512xf32> to vector<8x128xf32>
    %112 = math.tanh %111 : vector<8x128xf32>
    %113 = arith.mulf %109, %91 : vector<8x128xf32>
    %114 = arith.mulf %108, %112 : vector<8x128xf32>
    %115 = arith.addf %113, %114 : vector<8x128xf32>
    %116 = math.tanh %115 : vector<8x128xf32>
    %117 = arith.mulf %110, %116 : vector<8x128xf32>
    %118 = arith.truncf %117 : vector<8x128xf32> to vector<8x128xbf16>
    %c24_52 = arith.constant 24 : index
    %c0_53 = arith.constant 0 : index
    %119 = vector.load %arg11[%c24_52, %c0_53] : memref<128x128xbf16, #tpu.memory_space<vmem>>, vector<8x128xbf16>
    tpu.vector_store %arg11[%c24_52, %c0_53], %118 {strides = array<i32>} : memref<128x128xbf16, #tpu.memory_space<vmem>>, vector<8x128xbf16>,
    %c32 = arith.constant 32 : index
    %c0_54 = arith.constant 0 : index
    %120 = vector.load %arg12[%c32, %c0_54] : memref<128x512xf32, #tpu.memory_space<vmem>>, vector<8x512xf32>
    %121 = arith.truncf %117 : vector<8x128xf32> to vector<8x128xbf16>
    %cst_55 = arith.constant dense<0.000000e+00> : vector<8x512xf32>
    %122 = tpu.matmul %121, %23, %cst_55 {dimension_numbers = #tpu.dot_dimension_numbers<[1], [0], [0], [1], [0, 0, 1, 1], [], []>} : vector<8x128xbf16>, vector<128x512xbf16>, vector<8x512xf32> -> vector<8x512xf32>
    %123 = arith.addf %120, %122 : vector<8x512xf32>
    %124 = vector.extract_strided_slice %123 {offsets = [0, 0], sizes = [8, 384], strides = [1, 1]} : vector<8x512xf32> to vector<8x384xf32>
    %cst_56 = arith.constant 5.000000e-01 : f32
    %125 = vector.broadcast %cst_56 : f32 to vector<8x384xf32>
    %126 = arith.mulf %125, %124 : vector<8x384xf32>
    %127 = math.tanh %126 : vector<8x384xf32>
    %cst_57 = arith.constant 1.000000e+00 : f32
    %128 = vector.broadcast %cst_57 : f32 to vector<8x384xf32>
    %129 = arith.addf %127, %128 : vector<8x384xf32>
    %cst_58 = arith.constant 5.000000e-01 : f32
    %130 = vector.broadcast %cst_58 : f32 to vector<8x384xf32>
    %131 = arith.mulf %130, %129 : vector<8x384xf32>
    %132 = vector.extract_strided_slice %131 {offsets = [0, 0], sizes = [8, 128], strides = [1, 1]} : vector<8x384xf32> to vector<8x128xf32>
    %133 = vector.extract_strided_slice %131 {offsets = [0, 128], sizes = [8, 128], strides = [1, 1]} : vector<8x384xf32> to vector<8x128xf32>
    %134 = vector.extract_strided_slice %131 {offsets = [0, 256], sizes = [8, 128], strides = [1, 1]} : vector<8x384xf32> to vector<8x128xf32>
    %135 = vector.extract_strided_slice %123 {offsets = [0, 384], sizes = [8, 128], strides = [1, 1]} : vector<8x512xf32> to vector<8x128xf32>
    %136 = math.tanh %135 : vector<8x128xf32>
    %137 = arith.mulf %133, %115 : vector<8x128xf32>
    %138 = arith.mulf %132, %136 : vector<8x128xf32>
    %139 = arith.addf %137, %138 : vector<8x128xf32>
    %140 = math.tanh %139 : vector<8x128xf32>
    %141 = arith.mulf %134, %140 : vector<8x128xf32>
    %142 = arith.truncf %141 : vector<8x128xf32> to vector<8x128xbf16>
    %c32_59 = arith.constant 32 : index
    %c0_60 = arith.constant 0 : index
    %143 = vector.load %arg11[%c32_59, %c0_60] : memref<128x128xbf16, #tpu.memory_space<vmem>>, vector<8x128xbf16>
    tpu.vector_store %arg11[%c32_59, %c0_60], %142 {strides = array<i32>} : memref<128x128xbf16, #tpu.memory_space<vmem>>, vector<8x128xbf16>,
    %c40 = arith.constant 40 : index
    %c0_61 = arith.constant 0 : index
    %144 = vector.load %arg12[%c40, %c0_61] : memref<128x512xf32, #tpu.memory_space<vmem>>, vector<8x512xf32>
    %145 = arith.truncf %141 : vector<8x128xf32> to vector<8x128xbf16>
    %cst_62 = arith.constant dense<0.000000e+00> : vector<8x512xf32>
    %146 = tpu.matmul %145, %23, %cst_62 {dimension_numbers = #tpu.dot_dimension_numbers<[1], [0], [0], [1], [0, 0, 1, 1], [], []>} : vector<8x128xbf16>, vector<128x512xbf16>, vector<8x512xf32> -> vector<8x512xf32>
    %147 = arith.addf %144, %146 : vector<8x512xf32>
    %148 = vector.extract_strided_slice %147 {offsets = [0, 0], sizes = [8, 384], strides = [1, 1]} : vector<8x512xf32> to vector<8x384xf32>
    %cst_63 = arith.constant 5.000000e-01 : f32
    %149 = vector.broadcast %cst_63 : f32 to vector<8x384xf32>
    %150 = arith.mulf %149, %148 : vector<8x384xf32>
    %151 = math.tanh %150 : vector<8x384xf32>
    %cst_64 = arith.constant 1.000000e+00 : f32
    %152 = vector.broadcast %cst_64 : f32 to vector<8x384xf32>
    %153 = arith.addf %151, %152 : vector<8x384xf32>
    %cst_65 = arith.constant 5.000000e-01 : f32
    %154 = vector.broadcast %cst_65 : f32 to vector<8x384xf32>
    %155 = arith.mulf %154, %153 : vector<8x384xf32>
    %156 = vector.extract_strided_slice %155 {offsets = [0, 0], sizes = [8, 128], strides = [1, 1]} : vector<8x384xf32> to vector<8x128xf32>
    %157 = vector.extract_strided_slice %155 {offsets = [0, 128], sizes = [8, 128], strides = [1, 1]} : vector<8x384xf32> to vector<8x128xf32>
    %158 = vector.extract_strided_slice %155 {offsets = [0, 256], sizes = [8, 128], strides = [1, 1]} : vector<8x384xf32> to vector<8x128xf32>
    %159 = vector.extract_strided_slice %147 {offsets = [0, 384], sizes = [8, 128], strides = [1, 1]} : vector<8x512xf32> to vector<8x128xf32>
    %160 = math.tanh %159 : vector<8x128xf32>
    %161 = arith.mulf %157, %139 : vector<8x128xf32>
    %162 = arith.mulf %156, %160 : vector<8x128xf32>
    %163 = arith.addf %161, %162 : vector<8x128xf32>
    %164 = math.tanh %163 : vector<8x128xf32>
    %165 = arith.mulf %158, %164 : vector<8x128xf32>
    %166 = arith.truncf %165 : vector<8x128xf32> to vector<8x128xbf16>
    %c40_66 = arith.constant 40 : index
    %c0_67 = arith.constant 0 : index
    %167 = vector.load %arg11[%c40_66, %c0_67] : memref<128x128xbf16, #tpu.memory_space<vmem>>, vector<8x128xbf16>
    tpu.vector_store %arg11[%c40_66, %c0_67], %166 {strides = array<i32>} : memref<128x128xbf16, #tpu.memory_space<vmem>>, vector<8x128xbf16>,
    %c48 = arith.constant 48 : index
    %c0_68 = arith.constant 0 : index
    %168 = vector.load %arg12[%c48, %c0_68] : memref<128x512xf32, #tpu.memory_space<vmem>>, vector<8x512xf32>
    %169 = arith.truncf %165 : vector<8x128xf32> to vector<8x128xbf16>
    %cst_69 = arith.constant dense<0.000000e+00> : vector<8x512xf32>
    %170 = tpu.matmul %169, %23, %cst_69 {dimension_numbers = #tpu.dot_dimension_numbers<[1], [0], [0], [1], [0, 0, 1, 1], [], []>} : vector<8x128xbf16>, vector<128x512xbf16>, vector<8x512xf32> -> vector<8x512xf32>
    %171 = arith.addf %168, %170 : vector<8x512xf32>
    %172 = vector.extract_strided_slice %171 {offsets = [0, 0], sizes = [8, 384], strides = [1, 1]} : vector<8x512xf32> to vector<8x384xf32>
    %cst_70 = arith.constant 5.000000e-01 : f32
    %173 = vector.broadcast %cst_70 : f32 to vector<8x384xf32>
    %174 = arith.mulf %173, %172 : vector<8x384xf32>
    %175 = math.tanh %174 : vector<8x384xf32>
    %cst_71 = arith.constant 1.000000e+00 : f32
    %176 = vector.broadcast %cst_71 : f32 to vector<8x384xf32>
    %177 = arith.addf %175, %176 : vector<8x384xf32>
    %cst_72 = arith.constant 5.000000e-01 : f32
    %178 = vector.broadcast %cst_72 : f32 to vector<8x384xf32>
    %179 = arith.mulf %178, %177 : vector<8x384xf32>
    %180 = vector.extract_strided_slice %179 {offsets = [0, 0], sizes = [8, 128], strides = [1, 1]} : vector<8x384xf32> to vector<8x128xf32>
    %181 = vector.extract_strided_slice %179 {offsets = [0, 128], sizes = [8, 128], strides = [1, 1]} : vector<8x384xf32> to vector<8x128xf32>
    %182 = vector.extract_strided_slice %179 {offsets = [0, 256], sizes = [8, 128], strides = [1, 1]} : vector<8x384xf32> to vector<8x128xf32>
    %183 = vector.extract_strided_slice %171 {offsets = [0, 384], sizes = [8, 128], strides = [1, 1]} : vector<8x512xf32> to vector<8x128xf32>
    %184 = math.tanh %183 : vector<8x128xf32>
    %185 = arith.mulf %181, %163 : vector<8x128xf32>
    %186 = arith.mulf %180, %184 : vector<8x128xf32>
    %187 = arith.addf %185, %186 : vector<8x128xf32>
    %188 = math.tanh %187 : vector<8x128xf32>
    %189 = arith.mulf %182, %188 : vector<8x128xf32>
    %190 = arith.truncf %189 : vector<8x128xf32> to vector<8x128xbf16>
    %c48_73 = arith.constant 48 : index
    %c0_74 = arith.constant 0 : index
    %191 = vector.load %arg11[%c48_73, %c0_74] : memref<128x128xbf16, #tpu.memory_space<vmem>>, vector<8x128xbf16>
    tpu.vector_store %arg11[%c48_73, %c0_74], %190 {strides = array<i32>} : memref<128x128xbf16, #tpu.memory_space<vmem>>, vector<8x128xbf16>,
    %c56 = arith.constant 56 : index
    %c0_75 = arith.constant 0 : index
    %192 = vector.load %arg12[%c56, %c0_75] : memref<128x512xf32, #tpu.memory_space<vmem>>, vector<8x512xf32>
    %193 = arith.truncf %189 : vector<8x128xf32> to vector<8x128xbf16>
    %cst_76 = arith.constant dense<0.000000e+00> : vector<8x512xf32>
    %194 = tpu.matmul %193, %23, %cst_76 {dimension_numbers = #tpu.dot_dimension_numbers<[1], [0], [0], [1], [0, 0, 1, 1], [], []>} : vector<8x128xbf16>, vector<128x512xbf16>, vector<8x512xf32> -> vector<8x512xf32>
    %195 = arith.addf %192, %194 : vector<8x512xf32>
    %196 = vector.extract_strided_slice %195 {offsets = [0, 0], sizes = [8, 384], strides = [1, 1]} : vector<8x512xf32> to vector<8x384xf32>
    %cst_77 = arith.constant 5.000000e-01 : f32
    %197 = vector.broadcast %cst_77 : f32 to vector<8x384xf32>
    %198 = arith.mulf %197, %196 : vector<8x384xf32>
    %199 = math.tanh %198 : vector<8x384xf32>
    %cst_78 = arith.constant 1.000000e+00 : f32
    %200 = vector.broadcast %cst_78 : f32 to vector<8x384xf32>
    %201 = arith.addf %199, %200 : vector<8x384xf32>
    %cst_79 = arith.constant 5.000000e-01 : f32
    %202 = vector.broadcast %cst_79 : f32 to vector<8x384xf32>
    %203 = arith.mulf %202, %201 : vector<8x384xf32>
    %204 = vector.extract_strided_slice %203 {offsets = [0, 0], sizes = [8, 128], strides = [1, 1]} : vector<8x384xf32> to vector<8x128xf32>
    %205 = vector.extract_strided_slice %203 {offsets = [0, 128], sizes = [8, 128], strides = [1, 1]} : vector<8x384xf32> to vector<8x128xf32>
    %206 = vector.extract_strided_slice %203 {offsets = [0, 256], sizes = [8, 128], strides = [1, 1]} : vector<8x384xf32> to vector<8x128xf32>
    %207 = vector.extract_strided_slice %195 {offsets = [0, 384], sizes = [8, 128], strides = [1, 1]} : vector<8x512xf32> to vector<8x128xf32>
    %208 = math.tanh %207 : vector<8x128xf32>
    %209 = arith.mulf %205, %187 : vector<8x128xf32>
    %210 = arith.mulf %204, %208 : vector<8x128xf32>
    %211 = arith.addf %209, %210 : vector<8x128xf32>
    %212 = math.tanh %211 : vector<8x128xf32>
    %213 = arith.mulf %206, %212 : vector<8x128xf32>
    %214 = arith.truncf %213 : vector<8x128xf32> to vector<8x128xbf16>
    %c56_80 = arith.constant 56 : index
    %c0_81 = arith.constant 0 : index
    %215 = vector.load %arg11[%c56_80, %c0_81] : memref<128x128xbf16, #tpu.memory_space<vmem>>, vector<8x128xbf16>
    tpu.vector_store %arg11[%c56_80, %c0_81], %214 {strides = array<i32>} : memref<128x128xbf16, #tpu.memory_space<vmem>>, vector<8x128xbf16>,
    %c64 = arith.constant 64 : index
    %c0_82 = arith.constant 0 : index
    %216 = vector.load %arg12[%c64, %c0_82] : memref<128x512xf32, #tpu.memory_space<vmem>>, vector<8x512xf32>
    %217 = arith.truncf %213 : vector<8x128xf32> to vector<8x128xbf16>
    %cst_83 = arith.constant dense<0.000000e+00> : vector<8x512xf32>
    %218 = tpu.matmul %217, %23, %cst_83 {dimension_numbers = #tpu.dot_dimension_numbers<[1], [0], [0], [1], [0, 0, 1, 1], [], []>} : vector<8x128xbf16>, vector<128x512xbf16>, vector<8x512xf32> -> vector<8x512xf32>
    %219 = arith.addf %216, %218 : vector<8x512xf32>
    %220 = vector.extract_strided_slice %219 {offsets = [0, 0], sizes = [8, 384], strides = [1, 1]} : vector<8x512xf32> to vector<8x384xf32>
    %cst_84 = arith.constant 5.000000e-01 : f32
    %221 = vector.broadcast %cst_84 : f32 to vector<8x384xf32>
    %222 = arith.mulf %221, %220 : vector<8x384xf32>
    %223 = math.tanh %222 : vector<8x384xf32>
    %cst_85 = arith.constant 1.000000e+00 : f32
    %224 = vector.broadcast %cst_85 : f32 to vector<8x384xf32>
    %225 = arith.addf %223, %224 : vector<8x384xf32>
    %cst_86 = arith.constant 5.000000e-01 : f32
    %226 = vector.broadcast %cst_86 : f32 to vector<8x384xf32>
    %227 = arith.mulf %226, %225 : vector<8x384xf32>
    %228 = vector.extract_strided_slice %227 {offsets = [0, 0], sizes = [8, 128], strides = [1, 1]} : vector<8x384xf32> to vector<8x128xf32>
    %229 = vector.extract_strided_slice %227 {offsets = [0, 128], sizes = [8, 128], strides = [1, 1]} : vector<8x384xf32> to vector<8x128xf32>
    %230 = vector.extract_strided_slice %227 {offsets = [0, 256], sizes = [8, 128], strides = [1, 1]} : vector<8x384xf32> to vector<8x128xf32>
    %231 = vector.extract_strided_slice %219 {offsets = [0, 384], sizes = [8, 128], strides = [1, 1]} : vector<8x512xf32> to vector<8x128xf32>
    %232 = math.tanh %231 : vector<8x128xf32>
    %233 = arith.mulf %229, %211 : vector<8x128xf32>
    %234 = arith.mulf %228, %232 : vector<8x128xf32>
    %235 = arith.addf %233, %234 : vector<8x128xf32>
    %236 = math.tanh %235 : vector<8x128xf32>
    %237 = arith.mulf %230, %236 : vector<8x128xf32>
    %238 = arith.truncf %237 : vector<8x128xf32> to vector<8x128xbf16>
    %c64_87 = arith.constant 64 : index
    %c0_88 = arith.constant 0 : index
    %239 = vector.load %arg11[%c64_87, %c0_88] : memref<128x128xbf16, #tpu.memory_space<vmem>>, vector<8x128xbf16>
    tpu.vector_store %arg11[%c64_87, %c0_88], %238 {strides = array<i32>} : memref<128x128xbf16, #tpu.memory_space<vmem>>, vector<8x128xbf16>,
    %c72 = arith.constant 72 : index
    %c0_89 = arith.constant 0 : index
    %240 = vector.load %arg12[%c72, %c0_89] : memref<128x512xf32, #tpu.memory_space<vmem>>, vector<8x512xf32>
    %241 = arith.truncf %237 : vector<8x128xf32> to vector<8x128xbf16>
    %cst_90 = arith.constant dense<0.000000e+00> : vector<8x512xf32>
    %242 = tpu.matmul %241, %23, %cst_90 {dimension_numbers = #tpu.dot_dimension_numbers<[1], [0], [0], [1], [0, 0, 1, 1], [], []>} : vector<8x128xbf16>, vector<128x512xbf16>, vector<8x512xf32> -> vector<8x512xf32>
    %243 = arith.addf %240, %242 : vector<8x512xf32>
    %244 = vector.extract_strided_slice %243 {offsets = [0, 0], sizes = [8, 384], strides = [1, 1]} : vector<8x512xf32> to vector<8x384xf32>
    %cst_91 = arith.constant 5.000000e-01 : f32
    %245 = vector.broadcast %cst_91 : f32 to vector<8x384xf32>
    %246 = arith.mulf %245, %244 : vector<8x384xf32>
    %247 = math.tanh %246 : vector<8x384xf32>
    %cst_92 = arith.constant 1.000000e+00 : f32
    %248 = vector.broadcast %cst_92 : f32 to vector<8x384xf32>
    %249 = arith.addf %247, %248 : vector<8x384xf32>
    %cst_93 = arith.constant 5.000000e-01 : f32
    %250 = vector.broadcast %cst_93 : f32 to vector<8x384xf32>
    %251 = arith.mulf %250, %249 : vector<8x384xf32>
    %252 = vector.extract_strided_slice %251 {offsets = [0, 0], sizes = [8, 128], strides = [1, 1]} : vector<8x384xf32> to vector<8x128xf32>
    %253 = vector.extract_strided_slice %251 {offsets = [0, 128], sizes = [8, 128], strides = [1, 1]} : vector<8x384xf32> to vector<8x128xf32>
    %254 = vector.extract_strided_slice %251 {offsets = [0, 256], sizes = [8, 128], strides = [1, 1]} : vector<8x384xf32> to vector<8x128xf32>
    %255 = vector.extract_strided_slice %243 {offsets = [0, 384], sizes = [8, 128], strides = [1, 1]} : vector<8x512xf32> to vector<8x128xf32>
    %256 = math.tanh %255 : vector<8x128xf32>
    %257 = arith.mulf %253, %235 : vector<8x128xf32>
    %258 = arith.mulf %252, %256 : vector<8x128xf32>
    %259 = arith.addf %257, %258 : vector<8x128xf32>
    %260 = math.tanh %259 : vector<8x128xf32>
    %261 = arith.mulf %254, %260 : vector<8x128xf32>
    %262 = arith.truncf %261 : vector<8x128xf32> to vector<8x128xbf16>
    %c72_94 = arith.constant 72 : index
    %c0_95 = arith.constant 0 : index
    %263 = vector.load %arg11[%c72_94, %c0_95] : memref<128x128xbf16, #tpu.memory_space<vmem>>, vector<8x128xbf16>
    tpu.vector_store %arg11[%c72_94, %c0_95], %262 {strides = array<i32>} : memref<128x128xbf16, #tpu.memory_space<vmem>>, vector<8x128xbf16>,
    %c80 = arith.constant 80 : index
    %c0_96 = arith.constant 0 : index
    %264 = vector.load %arg12[%c80, %c0_96] : memref<128x512xf32, #tpu.memory_space<vmem>>, vector<8x512xf32>
    %265 = arith.truncf %261 : vector<8x128xf32> to vector<8x128xbf16>
    %cst_97 = arith.constant dense<0.000000e+00> : vector<8x512xf32>
    %266 = tpu.matmul %265, %23, %cst_97 {dimension_numbers = #tpu.dot_dimension_numbers<[1], [0], [0], [1], [0, 0, 1, 1], [], []>} : vector<8x128xbf16>, vector<128x512xbf16>, vector<8x512xf32> -> vector<8x512xf32>
    %267 = arith.addf %264, %266 : vector<8x512xf32>
    %268 = vector.extract_strided_slice %267 {offsets = [0, 0], sizes = [8, 384], strides = [1, 1]} : vector<8x512xf32> to vector<8x384xf32>
    %cst_98 = arith.constant 5.000000e-01 : f32
    %269 = vector.broadcast %cst_98 : f32 to vector<8x384xf32>
    %270 = arith.mulf %269, %268 : vector<8x384xf32>
    %271 = math.tanh %270 : vector<8x384xf32>
    %cst_99 = arith.constant 1.000000e+00 : f32
    %272 = vector.broadcast %cst_99 : f32 to vector<8x384xf32>
    %273 = arith.addf %271, %272 : vector<8x384xf32>
    %cst_100 = arith.constant 5.000000e-01 : f32
    %274 = vector.broadcast %cst_100 : f32 to vector<8x384xf32>
    %275 = arith.mulf %274, %273 : vector<8x384xf32>
    %276 = vector.extract_strided_slice %275 {offsets = [0, 0], sizes = [8, 128], strides = [1, 1]} : vector<8x384xf32> to vector<8x128xf32>
    %277 = vector.extract_strided_slice %275 {offsets = [0, 128], sizes = [8, 128], strides = [1, 1]} : vector<8x384xf32> to vector<8x128xf32>
    %278 = vector.extract_strided_slice %275 {offsets = [0, 256], sizes = [8, 128], strides = [1, 1]} : vector<8x384xf32> to vector<8x128xf32>
    %279 = vector.extract_strided_slice %267 {offsets = [0, 384], sizes = [8, 128], strides = [1, 1]} : vector<8x512xf32> to vector<8x128xf32>
    %280 = math.tanh %279 : vector<8x128xf32>
    %281 = arith.mulf %277, %259 : vector<8x128xf32>
    %282 = arith.mulf %276, %280 : vector<8x128xf32>
    %283 = arith.addf %281, %282 : vector<8x128xf32>
    %284 = math.tanh %283 : vector<8x128xf32>
    %285 = arith.mulf %278, %284 : vector<8x128xf32>
    %286 = arith.truncf %285 : vector<8x128xf32> to vector<8x128xbf16>
    %c80_101 = arith.constant 80 : index
    %c0_102 = arith.constant 0 : index
    %287 = vector.load %arg11[%c80_101, %c0_102] : memref<128x128xbf16, #tpu.memory_space<vmem>>, vector<8x128xbf16>
    tpu.vector_store %arg11[%c80_101, %c0_102], %286 {strides = array<i32>} : memref<128x128xbf16, #tpu.memory_space<vmem>>, vector<8x128xbf16>,
    %c88 = arith.constant 88 : index
    %c0_103 = arith.constant 0 : index
    %288 = vector.load %arg12[%c88, %c0_103] : memref<128x512xf32, #tpu.memory_space<vmem>>, vector<8x512xf32>
    %289 = arith.truncf %285 : vector<8x128xf32> to vector<8x128xbf16>
    %cst_104 = arith.constant dense<0.000000e+00> : vector<8x512xf32>
    %290 = tpu.matmul %289, %23, %cst_104 {dimension_numbers = #tpu.dot_dimension_numbers<[1], [0], [0], [1], [0, 0, 1, 1], [], []>} : vector<8x128xbf16>, vector<128x512xbf16>, vector<8x512xf32> -> vector<8x512xf32>
    %291 = arith.addf %288, %290 : vector<8x512xf32>
    %292 = vector.extract_strided_slice %291 {offsets = [0, 0], sizes = [8, 384], strides = [1, 1]} : vector<8x512xf32> to vector<8x384xf32>
    %cst_105 = arith.constant 5.000000e-01 : f32
    %293 = vector.broadcast %cst_105 : f32 to vector<8x384xf32>
    %294 = arith.mulf %293, %292 : vector<8x384xf32>
    %295 = math.tanh %294 : vector<8x384xf32>
    %cst_106 = arith.constant 1.000000e+00 : f32
    %296 = vector.broadcast %cst_106 : f32 to vector<8x384xf32>
    %297 = arith.addf %295, %296 : vector<8x384xf32>
    %cst_107 = arith.constant 5.000000e-01 : f32
    %298 = vector.broadcast %cst_107 : f32 to vector<8x384xf32>
    %299 = arith.mulf %298, %297 : vector<8x384xf32>
    %300 = vector.extract_strided_slice %299 {offsets = [0, 0], sizes = [8, 128], strides = [1, 1]} : vector<8x384xf32> to vector<8x128xf32>
    %301 = vector.extract_strided_slice %299 {offsets = [0, 128], sizes = [8, 128], strides = [1, 1]} : vector<8x384xf32> to vector<8x128xf32>
    %302 = vector.extract_strided_slice %299 {offsets = [0, 256], sizes = [8, 128], strides = [1, 1]} : vector<8x384xf32> to vector<8x128xf32>
    %303 = vector.extract_strided_slice %291 {offsets = [0, 384], sizes = [8, 128], strides = [1, 1]} : vector<8x512xf32> to vector<8x128xf32>
    %304 = math.tanh %303 : vector<8x128xf32>
    %305 = arith.mulf %301, %283 : vector<8x128xf32>
    %306 = arith.mulf %300, %304 : vector<8x128xf32>
    %307 = arith.addf %305, %306 : vector<8x128xf32>
    %308 = math.tanh %307 : vector<8x128xf32>
    %309 = arith.mulf %302, %308 : vector<8x128xf32>
    %310 = arith.truncf %309 : vector<8x128xf32> to vector<8x128xbf16>
    %c88_108 = arith.constant 88 : index
    %c0_109 = arith.constant 0 : index
    %311 = vector.load %arg11[%c88_108, %c0_109] : memref<128x128xbf16, #tpu.memory_space<vmem>>, vector<8x128xbf16>
    tpu.vector_store %arg11[%c88_108, %c0_109], %310 {strides = array<i32>} : memref<128x128xbf16, #tpu.memory_space<vmem>>, vector<8x128xbf16>,
    %c96 = arith.constant 96 : index
    %c0_110 = arith.constant 0 : index
    %312 = vector.load %arg12[%c96, %c0_110] : memref<128x512xf32, #tpu.memory_space<vmem>>, vector<8x512xf32>
    %313 = arith.truncf %309 : vector<8x128xf32> to vector<8x128xbf16>
    %cst_111 = arith.constant dense<0.000000e+00> : vector<8x512xf32>
    %314 = tpu.matmul %313, %23, %cst_111 {dimension_numbers = #tpu.dot_dimension_numbers<[1], [0], [0], [1], [0, 0, 1, 1], [], []>} : vector<8x128xbf16>, vector<128x512xbf16>, vector<8x512xf32> -> vector<8x512xf32>
    %315 = arith.addf %312, %314 : vector<8x512xf32>
    %316 = vector.extract_strided_slice %315 {offsets = [0, 0], sizes = [8, 384], strides = [1, 1]} : vector<8x512xf32> to vector<8x384xf32>
    %cst_112 = arith.constant 5.000000e-01 : f32
    %317 = vector.broadcast %cst_112 : f32 to vector<8x384xf32>
    %318 = arith.mulf %317, %316 : vector<8x384xf32>
    %319 = math.tanh %318 : vector<8x384xf32>
    %cst_113 = arith.constant 1.000000e+00 : f32
    %320 = vector.broadcast %cst_113 : f32 to vector<8x384xf32>
    %321 = arith.addf %319, %320 : vector<8x384xf32>
    %cst_114 = arith.constant 5.000000e-01 : f32
    %322 = vector.broadcast %cst_114 : f32 to vector<8x384xf32>
    %323 = arith.mulf %322, %321 : vector<8x384xf32>
    %324 = vector.extract_strided_slice %323 {offsets = [0, 0], sizes = [8, 128], strides = [1, 1]} : vector<8x384xf32> to vector<8x128xf32>
    %325 = vector.extract_strided_slice %323 {offsets = [0, 128], sizes = [8, 128], strides = [1, 1]} : vector<8x384xf32> to vector<8x128xf32>
    %326 = vector.extract_strided_slice %323 {offsets = [0, 256], sizes = [8, 128], strides = [1, 1]} : vector<8x384xf32> to vector<8x128xf32>
    %327 = vector.extract_strided_slice %315 {offsets = [0, 384], sizes = [8, 128], strides = [1, 1]} : vector<8x512xf32> to vector<8x128xf32>
    %328 = math.tanh %327 : vector<8x128xf32>
    %329 = arith.mulf %325, %307 : vector<8x128xf32>
    %330 = arith.mulf %324, %328 : vector<8x128xf32>
    %331 = arith.addf %329, %330 : vector<8x128xf32>
    %332 = math.tanh %331 : vector<8x128xf32>
    %333 = arith.mulf %326, %332 : vector<8x128xf32>
    %334 = arith.truncf %333 : vector<8x128xf32> to vector<8x128xbf16>
    %c96_115 = arith.constant 96 : index
    %c0_116 = arith.constant 0 : index
    %335 = vector.load %arg11[%c96_115, %c0_116] : memref<128x128xbf16, #tpu.memory_space<vmem>>, vector<8x128xbf16>
    tpu.vector_store %arg11[%c96_115, %c0_116], %334 {strides = array<i32>} : memref<128x128xbf16, #tpu.memory_space<vmem>>, vector<8x128xbf16>,
    %c104 = arith.constant 104 : index
    %c0_117 = arith.constant 0 : index
    %336 = vector.load %arg12[%c104, %c0_117] : memref<128x512xf32, #tpu.memory_space<vmem>>, vector<8x512xf32>
    %337 = arith.truncf %333 : vector<8x128xf32> to vector<8x128xbf16>
    %cst_118 = arith.constant dense<0.000000e+00> : vector<8x512xf32>
    %338 = tpu.matmul %337, %23, %cst_118 {dimension_numbers = #tpu.dot_dimension_numbers<[1], [0], [0], [1], [0, 0, 1, 1], [], []>} : vector<8x128xbf16>, vector<128x512xbf16>, vector<8x512xf32> -> vector<8x512xf32>
    %339 = arith.addf %336, %338 : vector<8x512xf32>
    %340 = vector.extract_strided_slice %339 {offsets = [0, 0], sizes = [8, 384], strides = [1, 1]} : vector<8x512xf32> to vector<8x384xf32>
    %cst_119 = arith.constant 5.000000e-01 : f32
    %341 = vector.broadcast %cst_119 : f32 to vector<8x384xf32>
    %342 = arith.mulf %341, %340 : vector<8x384xf32>
    %343 = math.tanh %342 : vector<8x384xf32>
    %cst_120 = arith.constant 1.000000e+00 : f32
    %344 = vector.broadcast %cst_120 : f32 to vector<8x384xf32>
    %345 = arith.addf %343, %344 : vector<8x384xf32>
    %cst_121 = arith.constant 5.000000e-01 : f32
    %346 = vector.broadcast %cst_121 : f32 to vector<8x384xf32>
    %347 = arith.mulf %346, %345 : vector<8x384xf32>
    %348 = vector.extract_strided_slice %347 {offsets = [0, 0], sizes = [8, 128], strides = [1, 1]} : vector<8x384xf32> to vector<8x128xf32>
    %349 = vector.extract_strided_slice %347 {offsets = [0, 128], sizes = [8, 128], strides = [1, 1]} : vector<8x384xf32> to vector<8x128xf32>
    %350 = vector.extract_strided_slice %347 {offsets = [0, 256], sizes = [8, 128], strides = [1, 1]} : vector<8x384xf32> to vector<8x128xf32>
    %351 = vector.extract_strided_slice %339 {offsets = [0, 384], sizes = [8, 128], strides = [1, 1]} : vector<8x512xf32> to vector<8x128xf32>
    %352 = math.tanh %351 : vector<8x128xf32>
    %353 = arith.mulf %349, %331 : vector<8x128xf32>
    %354 = arith.mulf %348, %352 : vector<8x128xf32>
    %355 = arith.addf %353, %354 : vector<8x128xf32>
    %356 = math.tanh %355 : vector<8x128xf32>
    %357 = arith.mulf %350, %356 : vector<8x128xf32>
    %358 = arith.truncf %357 : vector<8x128xf32> to vector<8x128xbf16>
    %c104_122 = arith.constant 104 : index
    %c0_123 = arith.constant 0 : index
    %359 = vector.load %arg11[%c104_122, %c0_123] : memref<128x128xbf16, #tpu.memory_space<vmem>>, vector<8x128xbf16>
    tpu.vector_store %arg11[%c104_122, %c0_123], %358 {strides = array<i32>} : memref<128x128xbf16, #tpu.memory_space<vmem>>, vector<8x128xbf16>,
    %c112 = arith.constant 112 : index
    %c0_124 = arith.constant 0 : index
    %360 = vector.load %arg12[%c112, %c0_124] : memref<128x512xf32, #tpu.memory_space<vmem>>, vector<8x512xf32>
    %361 = arith.truncf %357 : vector<8x128xf32> to vector<8x128xbf16>
    %cst_125 = arith.constant dense<0.000000e+00> : vector<8x512xf32>
    %362 = tpu.matmul %361, %23, %cst_125 {dimension_numbers = #tpu.dot_dimension_numbers<[1], [0], [0], [1], [0, 0, 1, 1], [], []>} : vector<8x128xbf16>, vector<128x512xbf16>, vector<8x512xf32> -> vector<8x512xf32>
    %363 = arith.addf %360, %362 : vector<8x512xf32>
    %364 = vector.extract_strided_slice %363 {offsets = [0, 0], sizes = [8, 384], strides = [1, 1]} : vector<8x512xf32> to vector<8x384xf32>
    %cst_126 = arith.constant 5.000000e-01 : f32
    %365 = vector.broadcast %cst_126 : f32 to vector<8x384xf32>
    %366 = arith.mulf %365, %364 : vector<8x384xf32>
    %367 = math.tanh %366 : vector<8x384xf32>
    %cst_127 = arith.constant 1.000000e+00 : f32
    %368 = vector.broadcast %cst_127 : f32 to vector<8x384xf32>
    %369 = arith.addf %367, %368 : vector<8x384xf32>
    %cst_128 = arith.constant 5.000000e-01 : f32
    %370 = vector.broadcast %cst_128 : f32 to vector<8x384xf32>
    %371 = arith.mulf %370, %369 : vector<8x384xf32>
    %372 = vector.extract_strided_slice %371 {offsets = [0, 0], sizes = [8, 128], strides = [1, 1]} : vector<8x384xf32> to vector<8x128xf32>
    %373 = vector.extract_strided_slice %371 {offsets = [0, 128], sizes = [8, 128], strides = [1, 1]} : vector<8x384xf32> to vector<8x128xf32>
    %374 = vector.extract_strided_slice %371 {offsets = [0, 256], sizes = [8, 128], strides = [1, 1]} : vector<8x384xf32> to vector<8x128xf32>
    %375 = vector.extract_strided_slice %363 {offsets = [0, 384], sizes = [8, 128], strides = [1, 1]} : vector<8x512xf32> to vector<8x128xf32>
    %376 = math.tanh %375 : vector<8x128xf32>
    %377 = arith.mulf %373, %355 : vector<8x128xf32>
    %378 = arith.mulf %372, %376 : vector<8x128xf32>
    %379 = arith.addf %377, %378 : vector<8x128xf32>
    %380 = math.tanh %379 : vector<8x128xf32>
    %381 = arith.mulf %374, %380 : vector<8x128xf32>
    %382 = arith.truncf %381 : vector<8x128xf32> to vector<8x128xbf16>
    %c112_129 = arith.constant 112 : index
    %c0_130 = arith.constant 0 : index
    %383 = vector.load %arg11[%c112_129, %c0_130] : memref<128x128xbf16, #tpu.memory_space<vmem>>, vector<8x128xbf16>
    tpu.vector_store %arg11[%c112_129, %c0_130], %382 {strides = array<i32>} : memref<128x128xbf16, #tpu.memory_space<vmem>>, vector<8x128xbf16>,
    %c120 = arith.constant 120 : index
    %c0_131 = arith.constant 0 : index
    %384 = vector.load %arg12[%c120, %c0_131] : memref<128x512xf32, #tpu.memory_space<vmem>>, vector<8x512xf32>
    %385 = arith.truncf %381 : vector<8x128xf32> to vector<8x128xbf16>
    %cst_132 = arith.constant dense<0.000000e+00> : vector<8x512xf32>
    %386 = tpu.matmul %385, %23, %cst_132 {dimension_numbers = #tpu.dot_dimension_numbers<[1], [0], [0], [1], [0, 0, 1, 1], [], []>} : vector<8x128xbf16>, vector<128x512xbf16>, vector<8x512xf32> -> vector<8x512xf32>
    %387 = arith.addf %384, %386 : vector<8x512xf32>
    %388 = vector.extract_strided_slice %387 {offsets = [0, 0], sizes = [8, 384], strides = [1, 1]} : vector<8x512xf32> to vector<8x384xf32>
    %cst_133 = arith.constant 5.000000e-01 : f32
    %389 = vector.broadcast %cst_133 : f32 to vector<8x384xf32>
    %390 = arith.mulf %389, %388 : vector<8x384xf32>
    %391 = math.tanh %390 : vector<8x384xf32>
    %cst_134 = arith.constant 1.000000e+00 : f32
    %392 = vector.broadcast %cst_134 : f32 to vector<8x384xf32>
    %393 = arith.addf %391, %392 : vector<8x384xf32>
    %cst_135 = arith.constant 5.000000e-01 : f32
    %394 = vector.broadcast %cst_135 : f32 to vector<8x384xf32>
    %395 = arith.mulf %394, %393 : vector<8x384xf32>
    %396 = vector.extract_strided_slice %395 {offsets = [0, 0], sizes = [8, 128], strides = [1, 1]} : vector<8x384xf32> to vector<8x128xf32>
    %397 = vector.extract_strided_slice %395 {offsets = [0, 128], sizes = [8, 128], strides = [1, 1]} : vector<8x384xf32> to vector<8x128xf32>
    %398 = vector.extract_strided_slice %395 {offsets = [0, 256], sizes = [8, 128], strides = [1, 1]} : vector<8x384xf32> to vector<8x128xf32>
    %399 = vector.extract_strided_slice %387 {offsets = [0, 384], sizes = [8, 128], strides = [1, 1]} : vector<8x512xf32> to vector<8x128xf32>
    %400 = math.tanh %399 : vector<8x128xf32>
    %401 = arith.mulf %397, %379 : vector<8x128xf32>
    %402 = arith.mulf %396, %400 : vector<8x128xf32>
    %403 = arith.addf %401, %402 : vector<8x128xf32>
    %404 = math.tanh %403 : vector<8x128xf32>
    %405 = arith.mulf %398, %404 : vector<8x128xf32>
    %406 = arith.truncf %405 : vector<8x128xf32> to vector<8x128xbf16>
    %c120_136 = arith.constant 120 : index
    %c0_137 = arith.constant 0 : index
    %407 = vector.load %arg11[%c120_136, %c0_137] : memref<128x128xbf16, #tpu.memory_space<vmem>>, vector<8x128xbf16>
    tpu.vector_store %arg11[%c120_136, %c0_137], %406 {strides = array<i32>} : memref<128x128xbf16, #tpu.memory_space<vmem>>, vector<8x128xbf16>,
    %c0_138 = arith.constant 0 : index
    %c0_139 = arith.constant 0 : index
    %408 = vector.load %arg11[%c0_138, %c0_139] : memref<128x128xbf16, #tpu.memory_space<vmem>>, vector<128x128xbf16>
    %c1_140 = arith.constant 1 : index
    %c0_141 = arith.constant 0 : index
    %c0_142 = arith.constant 0 : index
    %409 = vector.load %arg5[%c1_140, %c0_141, %c0_142] : memref<2x128x512xbf16, #tpu.memory_space<vmem>>, vector<1x128x512xbf16>
    %410 = vector.shape_cast %409 : vector<1x128x512xbf16> to vector<128x512xbf16>
    %cst_143 = arith.constant dense<0.000000e+00> : vector<128x512xf32>
    %411 = tpu.matmul %408, %410, %cst_143 {dimension_numbers = #tpu.dot_dimension_numbers<[1], [0], [0], [1], [0, 0, 1, 1], [], []>} : vector<128x128xbf16>, vector<128x512xbf16>, vector<128x512xf32> -> vector<128x512xf32>
    %c1_144 = arith.constant 1 : index
    %c0_145 = arith.constant 0 : index
    %c0_146 = arith.constant 0 : index
    %412 = vector.load %arg7[%c1_144, %c0_145, %c0_146] : memref<2x1x512xf32, #tpu.memory_space<vmem>>, vector<1x1x512xf32>
    %413 = vector.shape_cast %412 : vector<1x1x512xf32> to vector<1x512xf32>
    %414 = vector.broadcast %413 : vector<1x512xf32> to vector<128x512xf32>
    %415 = arith.addf %411, %414 : vector<128x512xf32>
    %c0_147 = arith.constant 0 : index
    %c0_148 = arith.constant 0 : index
    %416 = vector.load %arg12[%c0_147, %c0_148] : memref<128x512xf32, #tpu.memory_space<vmem>>, vector<128x512xf32>
    tpu.vector_store %arg12[%c0_147, %c0_148], %415 {strides = array<i32>} : memref<128x512xf32, #tpu.memory_space<vmem>>, vector<128x512xf32>,
    %c1_149 = arith.constant 1 : index
    %c0_150 = arith.constant 0 : index
    %c0_151 = arith.constant 0 : index
    %417 = vector.load %arg6[%c1_149, %c0_150, %c0_151] : memref<2x128x512xbf16, #tpu.memory_space<vmem>>, vector<1x128x512xbf16>
    %418 = vector.shape_cast %417 : vector<1x128x512xbf16> to vector<128x512xbf16>
    %c0_152 = arith.constant 0 : index
    %c0_153 = arith.constant 0 : index
    %419 = vector.load %arg12[%c0_152, %c0_153] : memref<128x512xf32, #tpu.memory_space<vmem>>, vector<8x512xf32>
    %420 = arith.truncf %6 : vector<8x128xf32> to vector<8x128xbf16>
    %cst_154 = arith.constant dense<0.000000e+00> : vector<8x512xf32>
    %421 = tpu.matmul %420, %418, %cst_154 {dimension_numbers = #tpu.dot_dimension_numbers<[1], [0], [0], [1], [0, 0, 1, 1], [], []>} : vector<8x128xbf16>, vector<128x512xbf16>, vector<8x512xf32> -> vector<8x512xf32>
    %422 = arith.addf %419, %421 : vector<8x512xf32>
    %423 = vector.extract_strided_slice %422 {offsets = [0, 0], sizes = [8, 384], strides = [1, 1]} : vector<8x512xf32> to vector<8x384xf32>
    %cst_155 = arith.constant 5.000000e-01 : f32
    %424 = vector.broadcast %cst_155 : f32 to vector<8x384xf32>
    %425 = arith.mulf %424, %423 : vector<8x384xf32>
    %426 = math.tanh %425 : vector<8x384xf32>
    %cst_156 = arith.constant 1.000000e+00 : f32
    %427 = vector.broadcast %cst_156 : f32 to vector<8x384xf32>
    %428 = arith.addf %426, %427 : vector<8x384xf32>
    %cst_157 = arith.constant 5.000000e-01 : f32
    %429 = vector.broadcast %cst_157 : f32 to vector<8x384xf32>
    %430 = arith.mulf %429, %428 : vector<8x384xf32>
    %431 = vector.extract_strided_slice %430 {offsets = [0, 0], sizes = [8, 128], strides = [1, 1]} : vector<8x384xf32> to vector<8x128xf32>
    %432 = vector.extract_strided_slice %430 {offsets = [0, 128], sizes = [8, 128], strides = [1, 1]} : vector<8x384xf32> to vector<8x128xf32>
    %433 = vector.extract_strided_slice %430 {offsets = [0, 256], sizes = [8, 128], strides = [1, 1]} : vector<8x384xf32> to vector<8x128xf32>
    %434 = vector.extract_strided_slice %422 {offsets = [0, 384], sizes = [8, 128], strides = [1, 1]} : vector<8x512xf32> to vector<8x128xf32>
    %435 = math.tanh %434 : vector<8x128xf32>
    %436 = arith.mulf %432, %10 : vector<8x128xf32>
    %437 = arith.mulf %431, %435 : vector<8x128xf32>
    %438 = arith.addf %436, %437 : vector<8x128xf32>
    %439 = math.tanh %438 : vector<8x128xf32>
    %440 = arith.mulf %433, %439 : vector<8x128xf32>
    %c0_158 = arith.constant 0 : index
    %c0_159 = arith.constant 0 : index
    %c0_160 = arith.constant 0 : index
    %441 = vector.load %arg8[%c0_158, %c0_159, %c0_160] : memref<16x8x128xf32, #tpu.memory_space<vmem>>, vector<1x8x128xf32>
    %442 = vector.shape_cast %441 : vector<1x8x128xf32> to vector<8x128xf32>
    %443 = vector.shape_cast %440 : vector<8x128xf32> to vector<1x8x128xf32>
    tpu.vector_store %arg8[%c0_158, %c0_159, %c0_160], %443 {strides = array<i32>} : memref<16x8x128xf32, #tpu.memory_space<vmem>>, vector<1x8x128xf32>,
    %c8_161 = arith.constant 8 : index
    %c0_162 = arith.constant 0 : index
    %444 = vector.load %arg12[%c8_161, %c0_162] : memref<128x512xf32, #tpu.memory_space<vmem>>, vector<8x512xf32>
    %445 = arith.truncf %440 : vector<8x128xf32> to vector<8x128xbf16>
    %cst_163 = arith.constant dense<0.000000e+00> : vector<8x512xf32>
    %446 = tpu.matmul %445, %418, %cst_163 {dimension_numbers = #tpu.dot_dimension_numbers<[1], [0], [0], [1], [0, 0, 1, 1], [], []>} : vector<8x128xbf16>, vector<128x512xbf16>, vector<8x512xf32> -> vector<8x512xf32>
    %447 = arith.addf %444, %446 : vector<8x512xf32>
    %448 = vector.extract_strided_slice %447 {offsets = [0, 0], sizes = [8, 384], strides = [1, 1]} : vector<8x512xf32> to vector<8x384xf32>
    %cst_164 = arith.constant 5.000000e-01 : f32
    %449 = vector.broadcast %cst_164 : f32 to vector<8x384xf32>
    %450 = arith.mulf %449, %448 : vector<8x384xf32>
    %451 = math.tanh %450 : vector<8x384xf32>
    %cst_165 = arith.constant 1.000000e+00 : f32
    %452 = vector.broadcast %cst_165 : f32 to vector<8x384xf32>
    %453 = arith.addf %451, %452 : vector<8x384xf32>
    %cst_166 = arith.constant 5.000000e-01 : f32
    %454 = vector.broadcast %cst_166 : f32 to vector<8x384xf32>
    %455 = arith.mulf %454, %453 : vector<8x384xf32>
    %456 = vector.extract_strided_slice %455 {offsets = [0, 0], sizes = [8, 128], strides = [1, 1]} : vector<8x384xf32> to vector<8x128xf32>
    %457 = vector.extract_strided_slice %455 {offsets = [0, 128], sizes = [8, 128], strides = [1, 1]} : vector<8x384xf32> to vector<8x128xf32>
    %458 = vector.extract_strided_slice %455 {offsets = [0, 256], sizes = [8, 128], strides = [1, 1]} : vector<8x384xf32> to vector<8x128xf32>
    %459 = vector.extract_strided_slice %447 {offsets = [0, 384], sizes = [8, 128], strides = [1, 1]} : vector<8x512xf32> to vector<8x128xf32>
    %460 = math.tanh %459 : vector<8x128xf32>
    %461 = arith.mulf %457, %438 : vector<8x128xf32>
    %462 = arith.mulf %456, %460 : vector<8x128xf32>
    %463 = arith.addf %461, %462 : vector<8x128xf32>
    %464 = math.tanh %463 : vector<8x128xf32>
    %465 = arith.mulf %458, %464 : vector<8x128xf32>
    %c1_167 = arith.constant 1 : index
    %c0_168 = arith.constant 0 : index
    %c0_169 = arith.constant 0 : index
    %466 = vector.load %arg8[%c1_167, %c0_168, %c0_169] : memref<16x8x128xf32, #tpu.memory_space<vmem>>, vector<1x8x128xf32>
    %467 = vector.shape_cast %466 : vector<1x8x128xf32> to vector<8x128xf32>
    %468 = vector.shape_cast %465 : vector<8x128xf32> to vector<1x8x128xf32>
    tpu.vector_store %arg8[%c1_167, %c0_168, %c0_169], %468 {strides = array<i32>} : memref<16x8x128xf32, #tpu.memory_space<vmem>>, vector<1x8x128xf32>,
    %c16_170 = arith.constant 16 : index
    %c0_171 = arith.constant 0 : index
    %469 = vector.load %arg12[%c16_170, %c0_171] : memref<128x512xf32, #tpu.memory_space<vmem>>, vector<8x512xf32>
    %470 = arith.truncf %465 : vector<8x128xf32> to vector<8x128xbf16>
    %cst_172 = arith.constant dense<0.000000e+00> : vector<8x512xf32>
    %471 = tpu.matmul %470, %418, %cst_172 {dimension_numbers = #tpu.dot_dimension_numbers<[1], [0], [0], [1], [0, 0, 1, 1], [], []>} : vector<8x128xbf16>, vector<128x512xbf16>, vector<8x512xf32> -> vector<8x512xf32>
    %472 = arith.addf %469, %471 : vector<8x512xf32>
    %473 = vector.extract_strided_slice %472 {offsets = [0, 0], sizes = [8, 384], strides = [1, 1]} : vector<8x512xf32> to vector<8x384xf32>
    %cst_173 = arith.constant 5.000000e-01 : f32
    %474 = vector.broadcast %cst_173 : f32 to vector<8x384xf32>
    %475 = arith.mulf %474, %473 : vector<8x384xf32>
    %476 = math.tanh %475 : vector<8x384xf32>
    %cst_174 = arith.constant 1.000000e+00 : f32
    %477 = vector.broadcast %cst_174 : f32 to vector<8x384xf32>
    %478 = arith.addf %476, %477 : vector<8x384xf32>
    %cst_175 = arith.constant 5.000000e-01 : f32
    %479 = vector.broadcast %cst_175 : f32 to vector<8x384xf32>
    %480 = arith.mulf %479, %478 : vector<8x384xf32>
    %481 = vector.extract_strided_slice %480 {offsets = [0, 0], sizes = [8, 128], strides = [1, 1]} : vector<8x384xf32> to vector<8x128xf32>
    %482 = vector.extract_strided_slice %480 {offsets = [0, 128], sizes = [8, 128], strides = [1, 1]} : vector<8x384xf32> to vector<8x128xf32>
    %483 = vector.extract_strided_slice %480 {offsets = [0, 256], sizes = [8, 128], strides = [1, 1]} : vector<8x384xf32> to vector<8x128xf32>
    %484 = vector.extract_strided_slice %472 {offsets = [0, 384], sizes = [8, 128], strides = [1, 1]} : vector<8x512xf32> to vector<8x128xf32>
    %485 = math.tanh %484 : vector<8x128xf32>
    %486 = arith.mulf %482, %463 : vector<8x128xf32>
    %487 = arith.mulf %481, %485 : vector<8x128xf32>
    %488 = arith.addf %486, %487 : vector<8x128xf32>
    %489 = math.tanh %488 : vector<8x128xf32>
    %490 = arith.mulf %483, %489 : vector<8x128xf32>
    %c2 = arith.constant 2 : index
    %c0_176 = arith.constant 0 : index
    %c0_177 = arith.constant 0 : index
    %491 = vector.load %arg8[%c2, %c0_176, %c0_177] : memref<16x8x128xf32, #tpu.memory_space<vmem>>, vector<1x8x128xf32>
    %492 = vector.shape_cast %491 : vector<1x8x128xf32> to vector<8x128xf32>
    %493 = vector.shape_cast %490 : vector<8x128xf32> to vector<1x8x128xf32>
    tpu.vector_store %arg8[%c2, %c0_176, %c0_177], %493 {strides = array<i32>} : memref<16x8x128xf32, #tpu.memory_space<vmem>>, vector<1x8x128xf32>,
    %c24_178 = arith.constant 24 : index
    %c0_179 = arith.constant 0 : index
    %494 = vector.load %arg12[%c24_178, %c0_179] : memref<128x512xf32, #tpu.memory_space<vmem>>, vector<8x512xf32>
    %495 = arith.truncf %490 : vector<8x128xf32> to vector<8x128xbf16>
    %cst_180 = arith.constant dense<0.000000e+00> : vector<8x512xf32>
    %496 = tpu.matmul %495, %418, %cst_180 {dimension_numbers = #tpu.dot_dimension_numbers<[1], [0], [0], [1], [0, 0, 1, 1], [], []>} : vector<8x128xbf16>, vector<128x512xbf16>, vector<8x512xf32> -> vector<8x512xf32>
    %497 = arith.addf %494, %496 : vector<8x512xf32>
    %498 = vector.extract_strided_slice %497 {offsets = [0, 0], sizes = [8, 384], strides = [1, 1]} : vector<8x512xf32> to vector<8x384xf32>
    %cst_181 = arith.constant 5.000000e-01 : f32
    %499 = vector.broadcast %cst_181 : f32 to vector<8x384xf32>
    %500 = arith.mulf %499, %498 : vector<8x384xf32>
    %501 = math.tanh %500 : vector<8x384xf32>
    %cst_182 = arith.constant 1.000000e+00 : f32
    %502 = vector.broadcast %cst_182 : f32 to vector<8x384xf32>
    %503 = arith.addf %501, %502 : vector<8x384xf32>
    %cst_183 = arith.constant 5.000000e-01 : f32
    %504 = vector.broadcast %cst_183 : f32 to vector<8x384xf32>
    %505 = arith.mulf %504, %503 : vector<8x384xf32>
    %506 = vector.extract_strided_slice %505 {offsets = [0, 0], sizes = [8, 128], strides = [1, 1]} : vector<8x384xf32> to vector<8x128xf32>
    %507 = vector.extract_strided_slice %505 {offsets = [0, 128], sizes = [8, 128], strides = [1, 1]} : vector<8x384xf32> to vector<8x128xf32>
    %508 = vector.extract_strided_slice %505 {offsets = [0, 256], sizes = [8, 128], strides = [1, 1]} : vector<8x384xf32> to vector<8x128xf32>
    %509 = vector.extract_strided_slice %497 {offsets = [0, 384], sizes = [8, 128], strides = [1, 1]} : vector<8x512xf32> to vector<8x128xf32>
    %510 = math.tanh %509 : vector<8x128xf32>
    %511 = arith.mulf %507, %488 : vector<8x128xf32>
    %512 = arith.mulf %506, %510 : vector<8x128xf32>
    %513 = arith.addf %511, %512 : vector<8x128xf32>
    %514 = math.tanh %513 : vector<8x128xf32>
    %515 = arith.mulf %508, %514 : vector<8x128xf32>
    %c3 = arith.constant 3 : index
    %c0_184 = arith.constant 0 : index
    %c0_185 = arith.constant 0 : index
    %516 = vector.load %arg8[%c3, %c0_184, %c0_185] : memref<16x8x128xf32, #tpu.memory_space<vmem>>, vector<1x8x128xf32>
    %517 = vector.shape_cast %516 : vector<1x8x128xf32> to vector<8x128xf32>
    %518 = vector.shape_cast %515 : vector<8x128xf32> to vector<1x8x128xf32>
    tpu.vector_store %arg8[%c3, %c0_184, %c0_185], %518 {strides = array<i32>} : memref<16x8x128xf32, #tpu.memory_space<vmem>>, vector<1x8x128xf32>,
    %c32_186 = arith.constant 32 : index
    %c0_187 = arith.constant 0 : index
    %519 = vector.load %arg12[%c32_186, %c0_187] : memref<128x512xf32, #tpu.memory_space<vmem>>, vector<8x512xf32>
    %520 = arith.truncf %515 : vector<8x128xf32> to vector<8x128xbf16>
    %cst_188 = arith.constant dense<0.000000e+00> : vector<8x512xf32>
    %521 = tpu.matmul %520, %418, %cst_188 {dimension_numbers = #tpu.dot_dimension_numbers<[1], [0], [0], [1], [0, 0, 1, 1], [], []>} : vector<8x128xbf16>, vector<128x512xbf16>, vector<8x512xf32> -> vector<8x512xf32>
    %522 = arith.addf %519, %521 : vector<8x512xf32>
    %523 = vector.extract_strided_slice %522 {offsets = [0, 0], sizes = [8, 384], strides = [1, 1]} : vector<8x512xf32> to vector<8x384xf32>
    %cst_189 = arith.constant 5.000000e-01 : f32
    %524 = vector.broadcast %cst_189 : f32 to vector<8x384xf32>
    %525 = arith.mulf %524, %523 : vector<8x384xf32>
    %526 = math.tanh %525 : vector<8x384xf32>
    %cst_190 = arith.constant 1.000000e+00 : f32
    %527 = vector.broadcast %cst_190 : f32 to vector<8x384xf32>
    %528 = arith.addf %526, %527 : vector<8x384xf32>
    %cst_191 = arith.constant 5.000000e-01 : f32
    %529 = vector.broadcast %cst_191 : f32 to vector<8x384xf32>
    %530 = arith.mulf %529, %528 : vector<8x384xf32>
    %531 = vector.extract_strided_slice %530 {offsets = [0, 0], sizes = [8, 128], strides = [1, 1]} : vector<8x384xf32> to vector<8x128xf32>
    %532 = vector.extract_strided_slice %530 {offsets = [0, 128], sizes = [8, 128], strides = [1, 1]} : vector<8x384xf32> to vector<8x128xf32>
    %533 = vector.extract_strided_slice %530 {offsets = [0, 256], sizes = [8, 128], strides = [1, 1]} : vector<8x384xf32> to vector<8x128xf32>
    %534 = vector.extract_strided_slice %522 {offsets = [0, 384], sizes = [8, 128], strides = [1, 1]} : vector<8x512xf32> to vector<8x128xf32>
    %535 = math.tanh %534 : vector<8x128xf32>
    %536 = arith.mulf %532, %513 : vector<8x128xf32>
    %537 = arith.mulf %531, %535 : vector<8x128xf32>
    %538 = arith.addf %536, %537 : vector<8x128xf32>
    %539 = math.tanh %538 : vector<8x128xf32>
    %540 = arith.mulf %533, %539 : vector<8x128xf32>
    %c4 = arith.constant 4 : index
    %c0_192 = arith.constant 0 : index
    %c0_193 = arith.constant 0 : index
    %541 = vector.load %arg8[%c4, %c0_192, %c0_193] : memref<16x8x128xf32, #tpu.memory_space<vmem>>, vector<1x8x128xf32>
    %542 = vector.shape_cast %541 : vector<1x8x128xf32> to vector<8x128xf32>
    %543 = vector.shape_cast %540 : vector<8x128xf32> to vector<1x8x128xf32>
    tpu.vector_store %arg8[%c4, %c0_192, %c0_193], %543 {strides = array<i32>} : memref<16x8x128xf32, #tpu.memory_space<vmem>>, vector<1x8x128xf32>,
    %c40_194 = arith.constant 40 : index
    %c0_195 = arith.constant 0 : index
    %544 = vector.load %arg12[%c40_194, %c0_195] : memref<128x512xf32, #tpu.memory_space<vmem>>, vector<8x512xf32>
    %545 = arith.truncf %540 : vector<8x128xf32> to vector<8x128xbf16>
    %cst_196 = arith.constant dense<0.000000e+00> : vector<8x512xf32>
    %546 = tpu.matmul %545, %418, %cst_196 {dimension_numbers = #tpu.dot_dimension_numbers<[1], [0], [0], [1], [0, 0, 1, 1], [], []>} : vector<8x128xbf16>, vector<128x512xbf16>, vector<8x512xf32> -> vector<8x512xf32>
    %547 = arith.addf %544, %546 : vector<8x512xf32>
    %548 = vector.extract_strided_slice %547 {offsets = [0, 0], sizes = [8, 384], strides = [1, 1]} : vector<8x512xf32> to vector<8x384xf32>
    %cst_197 = arith.constant 5.000000e-01 : f32
    %549 = vector.broadcast %cst_197 : f32 to vector<8x384xf32>
    %550 = arith.mulf %549, %548 : vector<8x384xf32>
    %551 = math.tanh %550 : vector<8x384xf32>
    %cst_198 = arith.constant 1.000000e+00 : f32
    %552 = vector.broadcast %cst_198 : f32 to vector<8x384xf32>
    %553 = arith.addf %551, %552 : vector<8x384xf32>
    %cst_199 = arith.constant 5.000000e-01 : f32
    %554 = vector.broadcast %cst_199 : f32 to vector<8x384xf32>
    %555 = arith.mulf %554, %553 : vector<8x384xf32>
    %556 = vector.extract_strided_slice %555 {offsets = [0, 0], sizes = [8, 128], strides = [1, 1]} : vector<8x384xf32> to vector<8x128xf32>
    %557 = vector.extract_strided_slice %555 {offsets = [0, 128], sizes = [8, 128], strides = [1, 1]} : vector<8x384xf32> to vector<8x128xf32>
    %558 = vector.extract_strided_slice %555 {offsets = [0, 256], sizes = [8, 128], strides = [1, 1]} : vector<8x384xf32> to vector<8x128xf32>
    %559 = vector.extract_strided_slice %547 {offsets = [0, 384], sizes = [8, 128], strides = [1, 1]} : vector<8x512xf32> to vector<8x128xf32>
    %560 = math.tanh %559 : vector<8x128xf32>
    %561 = arith.mulf %557, %538 : vector<8x128xf32>
    %562 = arith.mulf %556, %560 : vector<8x128xf32>
    %563 = arith.addf %561, %562 : vector<8x128xf32>
    %564 = math.tanh %563 : vector<8x128xf32>
    %565 = arith.mulf %558, %564 : vector<8x128xf32>
    %c5 = arith.constant 5 : index
    %c0_200 = arith.constant 0 : index
    %c0_201 = arith.constant 0 : index
    %566 = vector.load %arg8[%c5, %c0_200, %c0_201] : memref<16x8x128xf32, #tpu.memory_space<vmem>>, vector<1x8x128xf32>
    %567 = vector.shape_cast %566 : vector<1x8x128xf32> to vector<8x128xf32>
    %568 = vector.shape_cast %565 : vector<8x128xf32> to vector<1x8x128xf32>
    tpu.vector_store %arg8[%c5, %c0_200, %c0_201], %568 {strides = array<i32>} : memref<16x8x128xf32, #tpu.memory_space<vmem>>, vector<1x8x128xf32>,
    %c48_202 = arith.constant 48 : index
    %c0_203 = arith.constant 0 : index
    %569 = vector.load %arg12[%c48_202, %c0_203] : memref<128x512xf32, #tpu.memory_space<vmem>>, vector<8x512xf32>
    %570 = arith.truncf %565 : vector<8x128xf32> to vector<8x128xbf16>
    %cst_204 = arith.constant dense<0.000000e+00> : vector<8x512xf32>
    %571 = tpu.matmul %570, %418, %cst_204 {dimension_numbers = #tpu.dot_dimension_numbers<[1], [0], [0], [1], [0, 0, 1, 1], [], []>} : vector<8x128xbf16>, vector<128x512xbf16>, vector<8x512xf32> -> vector<8x512xf32>
    %572 = arith.addf %569, %571 : vector<8x512xf32>
    %573 = vector.extract_strided_slice %572 {offsets = [0, 0], sizes = [8, 384], strides = [1, 1]} : vector<8x512xf32> to vector<8x384xf32>
    %cst_205 = arith.constant 5.000000e-01 : f32
    %574 = vector.broadcast %cst_205 : f32 to vector<8x384xf32>
    %575 = arith.mulf %574, %573 : vector<8x384xf32>
    %576 = math.tanh %575 : vector<8x384xf32>
    %cst_206 = arith.constant 1.000000e+00 : f32
    %577 = vector.broadcast %cst_206 : f32 to vector<8x384xf32>
    %578 = arith.addf %576, %577 : vector<8x384xf32>
    %cst_207 = arith.constant 5.000000e-01 : f32
    %579 = vector.broadcast %cst_207 : f32 to vector<8x384xf32>
    %580 = arith.mulf %579, %578 : vector<8x384xf32>
    %581 = vector.extract_strided_slice %580 {offsets = [0, 0], sizes = [8, 128], strides = [1, 1]} : vector<8x384xf32> to vector<8x128xf32>
    %582 = vector.extract_strided_slice %580 {offsets = [0, 128], sizes = [8, 128], strides = [1, 1]} : vector<8x384xf32> to vector<8x128xf32>
    %583 = vector.extract_strided_slice %580 {offsets = [0, 256], sizes = [8, 128], strides = [1, 1]} : vector<8x384xf32> to vector<8x128xf32>
    %584 = vector.extract_strided_slice %572 {offsets = [0, 384], sizes = [8, 128], strides = [1, 1]} : vector<8x512xf32> to vector<8x128xf32>
    %585 = math.tanh %584 : vector<8x128xf32>
    %586 = arith.mulf %582, %563 : vector<8x128xf32>
    %587 = arith.mulf %581, %585 : vector<8x128xf32>
    %588 = arith.addf %586, %587 : vector<8x128xf32>
    %589 = math.tanh %588 : vector<8x128xf32>
    %590 = arith.mulf %583, %589 : vector<8x128xf32>
    %c6 = arith.constant 6 : index
    %c0_208 = arith.constant 0 : index
    %c0_209 = arith.constant 0 : index
    %591 = vector.load %arg8[%c6, %c0_208, %c0_209] : memref<16x8x128xf32, #tpu.memory_space<vmem>>, vector<1x8x128xf32>
    %592 = vector.shape_cast %591 : vector<1x8x128xf32> to vector<8x128xf32>
    %593 = vector.shape_cast %590 : vector<8x128xf32> to vector<1x8x128xf32>
    tpu.vector_store %arg8[%c6, %c0_208, %c0_209], %593 {strides = array<i32>} : memref<16x8x128xf32, #tpu.memory_space<vmem>>, vector<1x8x128xf32>,
    %c56_210 = arith.constant 56 : index
    %c0_211 = arith.constant 0 : index
    %594 = vector.load %arg12[%c56_210, %c0_211] : memref<128x512xf32, #tpu.memory_space<vmem>>, vector<8x512xf32>
    %595 = arith.truncf %590 : vector<8x128xf32> to vector<8x128xbf16>
    %cst_212 = arith.constant dense<0.000000e+00> : vector<8x512xf32>
    %596 = tpu.matmul %595, %418, %cst_212 {dimension_numbers = #tpu.dot_dimension_numbers<[1], [0], [0], [1], [0, 0, 1, 1], [], []>} : vector<8x128xbf16>, vector<128x512xbf16>, vector<8x512xf32> -> vector<8x512xf32>
    %597 = arith.addf %594, %596 : vector<8x512xf32>
    %598 = vector.extract_strided_slice %597 {offsets = [0, 0], sizes = [8, 384], strides = [1, 1]} : vector<8x512xf32> to vector<8x384xf32>
    %cst_213 = arith.constant 5.000000e-01 : f32
    %599 = vector.broadcast %cst_213 : f32 to vector<8x384xf32>
    %600 = arith.mulf %599, %598 : vector<8x384xf32>
    %601 = math.tanh %600 : vector<8x384xf32>
    %cst_214 = arith.constant 1.000000e+00 : f32
    %602 = vector.broadcast %cst_214 : f32 to vector<8x384xf32>
    %603 = arith.addf %601, %602 : vector<8x384xf32>
    %cst_215 = arith.constant 5.000000e-01 : f32
    %604 = vector.broadcast %cst_215 : f32 to vector<8x384xf32>
    %605 = arith.mulf %604, %603 : vector<8x384xf32>
    %606 = vector.extract_strided_slice %605 {offsets = [0, 0], sizes = [8, 128], strides = [1, 1]} : vector<8x384xf32> to vector<8x128xf32>
    %607 = vector.extract_strided_slice %605 {offsets = [0, 128], sizes = [8, 128], strides = [1, 1]} : vector<8x384xf32> to vector<8x128xf32>
    %608 = vector.extract_strided_slice %605 {offsets = [0, 256], sizes = [8, 128], strides = [1, 1]} : vector<8x384xf32> to vector<8x128xf32>
    %609 = vector.extract_strided_slice %597 {offsets = [0, 384], sizes = [8, 128], strides = [1, 1]} : vector<8x512xf32> to vector<8x128xf32>
    %610 = math.tanh %609 : vector<8x128xf32>
    %611 = arith.mulf %607, %588 : vector<8x128xf32>
    %612 = arith.mulf %606, %610 : vector<8x128xf32>
    %613 = arith.addf %611, %612 : vector<8x128xf32>
    %614 = math.tanh %613 : vector<8x128xf32>
    %615 = arith.mulf %608, %614 : vector<8x128xf32>
    %c7 = arith.constant 7 : index
    %c0_216 = arith.constant 0 : index
    %c0_217 = arith.constant 0 : index
    %616 = vector.load %arg8[%c7, %c0_216, %c0_217] : memref<16x8x128xf32, #tpu.memory_space<vmem>>, vector<1x8x128xf32>
    %617 = vector.shape_cast %616 : vector<1x8x128xf32> to vector<8x128xf32>
    %618 = vector.shape_cast %615 : vector<8x128xf32> to vector<1x8x128xf32>
    tpu.vector_store %arg8[%c7, %c0_216, %c0_217], %618 {strides = array<i32>} : memref<16x8x128xf32, #tpu.memory_space<vmem>>, vector<1x8x128xf32>,
    %c64_218 = arith.constant 64 : index
    %c0_219 = arith.constant 0 : index
    %619 = vector.load %arg12[%c64_218, %c0_219] : memref<128x512xf32, #tpu.memory_space<vmem>>, vector<8x512xf32>
    %620 = arith.truncf %615 : vector<8x128xf32> to vector<8x128xbf16>
    %cst_220 = arith.constant dense<0.000000e+00> : vector<8x512xf32>
    %621 = tpu.matmul %620, %418, %cst_220 {dimension_numbers = #tpu.dot_dimension_numbers<[1], [0], [0], [1], [0, 0, 1, 1], [], []>} : vector<8x128xbf16>, vector<128x512xbf16>, vector<8x512xf32> -> vector<8x512xf32>
    %622 = arith.addf %619, %621 : vector<8x512xf32>
    %623 = vector.extract_strided_slice %622 {offsets = [0, 0], sizes = [8, 384], strides = [1, 1]} : vector<8x512xf32> to vector<8x384xf32>
    %cst_221 = arith.constant 5.000000e-01 : f32
    %624 = vector.broadcast %cst_221 : f32 to vector<8x384xf32>
    %625 = arith.mulf %624, %623 : vector<8x384xf32>
    %626 = math.tanh %625 : vector<8x384xf32>
    %cst_222 = arith.constant 1.000000e+00 : f32
    %627 = vector.broadcast %cst_222 : f32 to vector<8x384xf32>
    %628 = arith.addf %626, %627 : vector<8x384xf32>
    %cst_223 = arith.constant 5.000000e-01 : f32
    %629 = vector.broadcast %cst_223 : f32 to vector<8x384xf32>
    %630 = arith.mulf %629, %628 : vector<8x384xf32>
    %631 = vector.extract_strided_slice %630 {offsets = [0, 0], sizes = [8, 128], strides = [1, 1]} : vector<8x384xf32> to vector<8x128xf32>
    %632 = vector.extract_strided_slice %630 {offsets = [0, 128], sizes = [8, 128], strides = [1, 1]} : vector<8x384xf32> to vector<8x128xf32>
    %633 = vector.extract_strided_slice %630 {offsets = [0, 256], sizes = [8, 128], strides = [1, 1]} : vector<8x384xf32> to vector<8x128xf32>
    %634 = vector.extract_strided_slice %622 {offsets = [0, 384], sizes = [8, 128], strides = [1, 1]} : vector<8x512xf32> to vector<8x128xf32>
    %635 = math.tanh %634 : vector<8x128xf32>
    %636 = arith.mulf %632, %613 : vector<8x128xf32>
    %637 = arith.mulf %631, %635 : vector<8x128xf32>
    %638 = arith.addf %636, %637 : vector<8x128xf32>
    %639 = math.tanh %638 : vector<8x128xf32>
    %640 = arith.mulf %633, %639 : vector<8x128xf32>
    %c8_224 = arith.constant 8 : index
    %c0_225 = arith.constant 0 : index
    %c0_226 = arith.constant 0 : index
    %641 = vector.load %arg8[%c8_224, %c0_225, %c0_226] : memref<16x8x128xf32, #tpu.memory_space<vmem>>, vector<1x8x128xf32>
    %642 = vector.shape_cast %641 : vector<1x8x128xf32> to vector<8x128xf32>
    %643 = vector.shape_cast %640 : vector<8x128xf32> to vector<1x8x128xf32>
    tpu.vector_store %arg8[%c8_224, %c0_225, %c0_226], %643 {strides = array<i32>} : memref<16x8x128xf32, #tpu.memory_space<vmem>>, vector<1x8x128xf32>,
    %c72_227 = arith.constant 72 : index
    %c0_228 = arith.constant 0 : index
    %644 = vector.load %arg12[%c72_227, %c0_228] : memref<128x512xf32, #tpu.memory_space<vmem>>, vector<8x512xf32>
    %645 = arith.truncf %640 : vector<8x128xf32> to vector<8x128xbf16>
    %cst_229 = arith.constant dense<0.000000e+00> : vector<8x512xf32>
    %646 = tpu.matmul %645, %418, %cst_229 {dimension_numbers = #tpu.dot_dimension_numbers<[1], [0], [0], [1], [0, 0, 1, 1], [], []>} : vector<8x128xbf16>, vector<128x512xbf16>, vector<8x512xf32> -> vector<8x512xf32>
    %647 = arith.addf %644, %646 : vector<8x512xf32>
    %648 = vector.extract_strided_slice %647 {offsets = [0, 0], sizes = [8, 384], strides = [1, 1]} : vector<8x512xf32> to vector<8x384xf32>
    %cst_230 = arith.constant 5.000000e-01 : f32
    %649 = vector.broadcast %cst_230 : f32 to vector<8x384xf32>
    %650 = arith.mulf %649, %648 : vector<8x384xf32>
    %651 = math.tanh %650 : vector<8x384xf32>
    %cst_231 = arith.constant 1.000000e+00 : f32
    %652 = vector.broadcast %cst_231 : f32 to vector<8x384xf32>
    %653 = arith.addf %651, %652 : vector<8x384xf32>
    %cst_232 = arith.constant 5.000000e-01 : f32
    %654 = vector.broadcast %cst_232 : f32 to vector<8x384xf32>
    %655 = arith.mulf %654, %653 : vector<8x384xf32>
    %656 = vector.extract_strided_slice %655 {offsets = [0, 0], sizes = [8, 128], strides = [1, 1]} : vector<8x384xf32> to vector<8x128xf32>
    %657 = vector.extract_strided_slice %655 {offsets = [0, 128], sizes = [8, 128], strides = [1, 1]} : vector<8x384xf32> to vector<8x128xf32>
    %658 = vector.extract_strided_slice %655 {offsets = [0, 256], sizes = [8, 128], strides = [1, 1]} : vector<8x384xf32> to vector<8x128xf32>
    %659 = vector.extract_strided_slice %647 {offsets = [0, 384], sizes = [8, 128], strides = [1, 1]} : vector<8x512xf32> to vector<8x128xf32>
    %660 = math.tanh %659 : vector<8x128xf32>
    %661 = arith.mulf %657, %638 : vector<8x128xf32>
    %662 = arith.mulf %656, %660 : vector<8x128xf32>
    %663 = arith.addf %661, %662 : vector<8x128xf32>
    %664 = math.tanh %663 : vector<8x128xf32>
    %665 = arith.mulf %658, %664 : vector<8x128xf32>
    %c9 = arith.constant 9 : index
    %c0_233 = arith.constant 0 : index
    %c0_234 = arith.constant 0 : index
    %666 = vector.load %arg8[%c9, %c0_233, %c0_234] : memref<16x8x128xf32, #tpu.memory_space<vmem>>, vector<1x8x128xf32>
    %667 = vector.shape_cast %666 : vector<1x8x128xf32> to vector<8x128xf32>
    %668 = vector.shape_cast %665 : vector<8x128xf32> to vector<1x8x128xf32>
    tpu.vector_store %arg8[%c9, %c0_233, %c0_234], %668 {strides = array<i32>} : memref<16x8x128xf32, #tpu.memory_space<vmem>>, vector<1x8x128xf32>,
    %c80_235 = arith.constant 80 : index
    %c0_236 = arith.constant 0 : index
    %669 = vector.load %arg12[%c80_235, %c0_236] : memref<128x512xf32, #tpu.memory_space<vmem>>, vector<8x512xf32>
    %670 = arith.truncf %665 : vector<8x128xf32> to vector<8x128xbf16>
    %cst_237 = arith.constant dense<0.000000e+00> : vector<8x512xf32>
    %671 = tpu.matmul %670, %418, %cst_237 {dimension_numbers = #tpu.dot_dimension_numbers<[1], [0], [0], [1], [0, 0, 1, 1], [], []>} : vector<8x128xbf16>, vector<128x512xbf16>, vector<8x512xf32> -> vector<8x512xf32>
    %672 = arith.addf %669, %671 : vector<8x512xf32>
    %673 = vector.extract_strided_slice %672 {offsets = [0, 0], sizes = [8, 384], strides = [1, 1]} : vector<8x512xf32> to vector<8x384xf32>
    %cst_238 = arith.constant 5.000000e-01 : f32
    %674 = vector.broadcast %cst_238 : f32 to vector<8x384xf32>
    %675 = arith.mulf %674, %673 : vector<8x384xf32>
    %676 = math.tanh %675 : vector<8x384xf32>
    %cst_239 = arith.constant 1.000000e+00 : f32
    %677 = vector.broadcast %cst_239 : f32 to vector<8x384xf32>
    %678 = arith.addf %676, %677 : vector<8x384xf32>
    %cst_240 = arith.constant 5.000000e-01 : f32
    %679 = vector.broadcast %cst_240 : f32 to vector<8x384xf32>
    %680 = arith.mulf %679, %678 : vector<8x384xf32>
    %681 = vector.extract_strided_slice %680 {offsets = [0, 0], sizes = [8, 128], strides = [1, 1]} : vector<8x384xf32> to vector<8x128xf32>
    %682 = vector.extract_strided_slice %680 {offsets = [0, 128], sizes = [8, 128], strides = [1, 1]} : vector<8x384xf32> to vector<8x128xf32>
    %683 = vector.extract_strided_slice %680 {offsets = [0, 256], sizes = [8, 128], strides = [1, 1]} : vector<8x384xf32> to vector<8x128xf32>
    %684 = vector.extract_strided_slice %672 {offsets = [0, 384], sizes = [8, 128], strides = [1, 1]} : vector<8x512xf32> to vector<8x128xf32>
    %685 = math.tanh %684 : vector<8x128xf32>
    %686 = arith.mulf %682, %663 : vector<8x128xf32>
    %687 = arith.mulf %681, %685 : vector<8x128xf32>
    %688 = arith.addf %686, %687 : vector<8x128xf32>
    %689 = math.tanh %688 : vector<8x128xf32>
    %690 = arith.mulf %683, %689 : vector<8x128xf32>
    %c10 = arith.constant 10 : index
    %c0_241 = arith.constant 0 : index
    %c0_242 = arith.constant 0 : index
    %691 = vector.load %arg8[%c10, %c0_241, %c0_242] : memref<16x8x128xf32, #tpu.memory_space<vmem>>, vector<1x8x128xf32>
    %692 = vector.shape_cast %691 : vector<1x8x128xf32> to vector<8x128xf32>
    %693 = vector.shape_cast %690 : vector<8x128xf32> to vector<1x8x128xf32>
    tpu.vector_store %arg8[%c10, %c0_241, %c0_242], %693 {strides = array<i32>} : memref<16x8x128xf32, #tpu.memory_space<vmem>>, vector<1x8x128xf32>,
    %c88_243 = arith.constant 88 : index
    %c0_244 = arith.constant 0 : index
    %694 = vector.load %arg12[%c88_243, %c0_244] : memref<128x512xf32, #tpu.memory_space<vmem>>, vector<8x512xf32>
    %695 = arith.truncf %690 : vector<8x128xf32> to vector<8x128xbf16>
    %cst_245 = arith.constant dense<0.000000e+00> : vector<8x512xf32>
    %696 = tpu.matmul %695, %418, %cst_245 {dimension_numbers = #tpu.dot_dimension_numbers<[1], [0], [0], [1], [0, 0, 1, 1], [], []>} : vector<8x128xbf16>, vector<128x512xbf16>, vector<8x512xf32> -> vector<8x512xf32>
    %697 = arith.addf %694, %696 : vector<8x512xf32>
    %698 = vector.extract_strided_slice %697 {offsets = [0, 0], sizes = [8, 384], strides = [1, 1]} : vector<8x512xf32> to vector<8x384xf32>
    %cst_246 = arith.constant 5.000000e-01 : f32
    %699 = vector.broadcast %cst_246 : f32 to vector<8x384xf32>
    %700 = arith.mulf %699, %698 : vector<8x384xf32>
    %701 = math.tanh %700 : vector<8x384xf32>
    %cst_247 = arith.constant 1.000000e+00 : f32
    %702 = vector.broadcast %cst_247 : f32 to vector<8x384xf32>
    %703 = arith.addf %701, %702 : vector<8x384xf32>
    %cst_248 = arith.constant 5.000000e-01 : f32
    %704 = vector.broadcast %cst_248 : f32 to vector<8x384xf32>
    %705 = arith.mulf %704, %703 : vector<8x384xf32>
    %706 = vector.extract_strided_slice %705 {offsets = [0, 0], sizes = [8, 128], strides = [1, 1]} : vector<8x384xf32> to vector<8x128xf32>
    %707 = vector.extract_strided_slice %705 {offsets = [0, 128], sizes = [8, 128], strides = [1, 1]} : vector<8x384xf32> to vector<8x128xf32>
    %708 = vector.extract_strided_slice %705 {offsets = [0, 256], sizes = [8, 128], strides = [1, 1]} : vector<8x384xf32> to vector<8x128xf32>
    %709 = vector.extract_strided_slice %697 {offsets = [0, 384], sizes = [8, 128], strides = [1, 1]} : vector<8x512xf32> to vector<8x128xf32>
    %710 = math.tanh %709 : vector<8x128xf32>
    %711 = arith.mulf %707, %688 : vector<8x128xf32>
    %712 = arith.mulf %706, %710 : vector<8x128xf32>
    %713 = arith.addf %711, %712 : vector<8x128xf32>
    %714 = math.tanh %713 : vector<8x128xf32>
    %715 = arith.mulf %708, %714 : vector<8x128xf32>
    %c11 = arith.constant 11 : index
    %c0_249 = arith.constant 0 : index
    %c0_250 = arith.constant 0 : index
    %716 = vector.load %arg8[%c11, %c0_249, %c0_250] : memref<16x8x128xf32, #tpu.memory_space<vmem>>, vector<1x8x128xf32>
    %717 = vector.shape_cast %716 : vector<1x8x128xf32> to vector<8x128xf32>
    %718 = vector.shape_cast %715 : vector<8x128xf32> to vector<1x8x128xf32>
    tpu.vector_store %arg8[%c11, %c0_249, %c0_250], %718 {strides = array<i32>} : memref<16x8x128xf32, #tpu.memory_space<vmem>>, vector<1x8x128xf32>,
    %c96_251 = arith.constant 96 : index
    %c0_252 = arith.constant 0 : index
    %719 = vector.load %arg12[%c96_251, %c0_252] : memref<128x512xf32, #tpu.memory_space<vmem>>, vector<8x512xf32>
    %720 = arith.truncf %715 : vector<8x128xf32> to vector<8x128xbf16>
    %cst_253 = arith.constant dense<0.000000e+00> : vector<8x512xf32>
    %721 = tpu.matmul %720, %418, %cst_253 {dimension_numbers = #tpu.dot_dimension_numbers<[1], [0], [0], [1], [0, 0, 1, 1], [], []>} : vector<8x128xbf16>, vector<128x512xbf16>, vector<8x512xf32> -> vector<8x512xf32>
    %722 = arith.addf %719, %721 : vector<8x512xf32>
    %723 = vector.extract_strided_slice %722 {offsets = [0, 0], sizes = [8, 384], strides = [1, 1]} : vector<8x512xf32> to vector<8x384xf32>
    %cst_254 = arith.constant 5.000000e-01 : f32
    %724 = vector.broadcast %cst_254 : f32 to vector<8x384xf32>
    %725 = arith.mulf %724, %723 : vector<8x384xf32>
    %726 = math.tanh %725 : vector<8x384xf32>
    %cst_255 = arith.constant 1.000000e+00 : f32
    %727 = vector.broadcast %cst_255 : f32 to vector<8x384xf32>
    %728 = arith.addf %726, %727 : vector<8x384xf32>
    %cst_256 = arith.constant 5.000000e-01 : f32
    %729 = vector.broadcast %cst_256 : f32 to vector<8x384xf32>
    %730 = arith.mulf %729, %728 : vector<8x384xf32>
    %731 = vector.extract_strided_slice %730 {offsets = [0, 0], sizes = [8, 128], strides = [1, 1]} : vector<8x384xf32> to vector<8x128xf32>
    %732 = vector.extract_strided_slice %730 {offsets = [0, 128], sizes = [8, 128], strides = [1, 1]} : vector<8x384xf32> to vector<8x128xf32>
    %733 = vector.extract_strided_slice %730 {offsets = [0, 256], sizes = [8, 128], strides = [1, 1]} : vector<8x384xf32> to vector<8x128xf32>
    %734 = vector.extract_strided_slice %722 {offsets = [0, 384], sizes = [8, 128], strides = [1, 1]} : vector<8x512xf32> to vector<8x128xf32>
    %735 = math.tanh %734 : vector<8x128xf32>
    %736 = arith.mulf %732, %713 : vector<8x128xf32>
    %737 = arith.mulf %731, %735 : vector<8x128xf32>
    %738 = arith.addf %736, %737 : vector<8x128xf32>
    %739 = math.tanh %738 : vector<8x128xf32>
    %740 = arith.mulf %733, %739 : vector<8x128xf32>
    %c12 = arith.constant 12 : index
    %c0_257 = arith.constant 0 : index
    %c0_258 = arith.constant 0 : index
    %741 = vector.load %arg8[%c12, %c0_257, %c0_258] : memref<16x8x128xf32, #tpu.memory_space<vmem>>, vector<1x8x128xf32>
    %742 = vector.shape_cast %741 : vector<1x8x128xf32> to vector<8x128xf32>
    %743 = vector.shape_cast %740 : vector<8x128xf32> to vector<1x8x128xf32>
    tpu.vector_store %arg8[%c12, %c0_257, %c0_258], %743 {strides = array<i32>} : memref<16x8x128xf32, #tpu.memory_space<vmem>>, vector<1x8x128xf32>,
    %c104_259 = arith.constant 104 : index
    %c0_260 = arith.constant 0 : index
    %744 = vector.load %arg12[%c104_259, %c0_260] : memref<128x512xf32, #tpu.memory_space<vmem>>, vector<8x512xf32>
    %745 = arith.truncf %740 : vector<8x128xf32> to vector<8x128xbf16>
    %cst_261 = arith.constant dense<0.000000e+00> : vector<8x512xf32>
    %746 = tpu.matmul %745, %418, %cst_261 {dimension_numbers = #tpu.dot_dimension_numbers<[1], [0], [0], [1], [0, 0, 1, 1], [], []>} : vector<8x128xbf16>, vector<128x512xbf16>, vector<8x512xf32> -> vector<8x512xf32>
    %747 = arith.addf %744, %746 : vector<8x512xf32>
    %748 = vector.extract_strided_slice %747 {offsets = [0, 0], sizes = [8, 384], strides = [1, 1]} : vector<8x512xf32> to vector<8x384xf32>
    %cst_262 = arith.constant 5.000000e-01 : f32
    %749 = vector.broadcast %cst_262 : f32 to vector<8x384xf32>
    %750 = arith.mulf %749, %748 : vector<8x384xf32>
    %751 = math.tanh %750 : vector<8x384xf32>
    %cst_263 = arith.constant 1.000000e+00 : f32
    %752 = vector.broadcast %cst_263 : f32 to vector<8x384xf32>
    %753 = arith.addf %751, %752 : vector<8x384xf32>
    %cst_264 = arith.constant 5.000000e-01 : f32
    %754 = vector.broadcast %cst_264 : f32 to vector<8x384xf32>
    %755 = arith.mulf %754, %753 : vector<8x384xf32>
    %756 = vector.extract_strided_slice %755 {offsets = [0, 0], sizes = [8, 128], strides = [1, 1]} : vector<8x384xf32> to vector<8x128xf32>
    %757 = vector.extract_strided_slice %755 {offsets = [0, 128], sizes = [8, 128], strides = [1, 1]} : vector<8x384xf32> to vector<8x128xf32>
    %758 = vector.extract_strided_slice %755 {offsets = [0, 256], sizes = [8, 128], strides = [1, 1]} : vector<8x384xf32> to vector<8x128xf32>
    %759 = vector.extract_strided_slice %747 {offsets = [0, 384], sizes = [8, 128], strides = [1, 1]} : vector<8x512xf32> to vector<8x128xf32>
    %760 = math.tanh %759 : vector<8x128xf32>
    %761 = arith.mulf %757, %738 : vector<8x128xf32>
    %762 = arith.mulf %756, %760 : vector<8x128xf32>
    %763 = arith.addf %761, %762 : vector<8x128xf32>
    %764 = math.tanh %763 : vector<8x128xf32>
    %765 = arith.mulf %758, %764 : vector<8x128xf32>
    %c13 = arith.constant 13 : index
    %c0_265 = arith.constant 0 : index
    %c0_266 = arith.constant 0 : index
    %766 = vector.load %arg8[%c13, %c0_265, %c0_266] : memref<16x8x128xf32, #tpu.memory_space<vmem>>, vector<1x8x128xf32>
    %767 = vector.shape_cast %766 : vector<1x8x128xf32> to vector<8x128xf32>
    %768 = vector.shape_cast %765 : vector<8x128xf32> to vector<1x8x128xf32>
    tpu.vector_store %arg8[%c13, %c0_265, %c0_266], %768 {strides = array<i32>} : memref<16x8x128xf32, #tpu.memory_space<vmem>>, vector<1x8x128xf32>,
    %c112_267 = arith.constant 112 : index
    %c0_268 = arith.constant 0 : index
    %769 = vector.load %arg12[%c112_267, %c0_268] : memref<128x512xf32, #tpu.memory_space<vmem>>, vector<8x512xf32>
    %770 = arith.truncf %765 : vector<8x128xf32> to vector<8x128xbf16>
    %cst_269 = arith.constant dense<0.000000e+00> : vector<8x512xf32>
    %771 = tpu.matmul %770, %418, %cst_269 {dimension_numbers = #tpu.dot_dimension_numbers<[1], [0], [0], [1], [0, 0, 1, 1], [], []>} : vector<8x128xbf16>, vector<128x512xbf16>, vector<8x512xf32> -> vector<8x512xf32>
    %772 = arith.addf %769, %771 : vector<8x512xf32>
    %773 = vector.extract_strided_slice %772 {offsets = [0, 0], sizes = [8, 384], strides = [1, 1]} : vector<8x512xf32> to vector<8x384xf32>
    %cst_270 = arith.constant 5.000000e-01 : f32
    %774 = vector.broadcast %cst_270 : f32 to vector<8x384xf32>
    %775 = arith.mulf %774, %773 : vector<8x384xf32>
    %776 = math.tanh %775 : vector<8x384xf32>
    %cst_271 = arith.constant 1.000000e+00 : f32
    %777 = vector.broadcast %cst_271 : f32 to vector<8x384xf32>
    %778 = arith.addf %776, %777 : vector<8x384xf32>
    %cst_272 = arith.constant 5.000000e-01 : f32
    %779 = vector.broadcast %cst_272 : f32 to vector<8x384xf32>
    %780 = arith.mulf %779, %778 : vector<8x384xf32>
    %781 = vector.extract_strided_slice %780 {offsets = [0, 0], sizes = [8, 128], strides = [1, 1]} : vector<8x384xf32> to vector<8x128xf32>
    %782 = vector.extract_strided_slice %780 {offsets = [0, 128], sizes = [8, 128], strides = [1, 1]} : vector<8x384xf32> to vector<8x128xf32>
    %783 = vector.extract_strided_slice %780 {offsets = [0, 256], sizes = [8, 128], strides = [1, 1]} : vector<8x384xf32> to vector<8x128xf32>
    %784 = vector.extract_strided_slice %772 {offsets = [0, 384], sizes = [8, 128], strides = [1, 1]} : vector<8x512xf32> to vector<8x128xf32>
    %785 = math.tanh %784 : vector<8x128xf32>
    %786 = arith.mulf %782, %763 : vector<8x128xf32>
    %787 = arith.mulf %781, %785 : vector<8x128xf32>
    %788 = arith.addf %786, %787 : vector<8x128xf32>
    %789 = math.tanh %788 : vector<8x128xf32>
    %790 = arith.mulf %783, %789 : vector<8x128xf32>
    %c14 = arith.constant 14 : index
    %c0_273 = arith.constant 0 : index
    %c0_274 = arith.constant 0 : index
    %791 = vector.load %arg8[%c14, %c0_273, %c0_274] : memref<16x8x128xf32, #tpu.memory_space<vmem>>, vector<1x8x128xf32>
    %792 = vector.shape_cast %791 : vector<1x8x128xf32> to vector<8x128xf32>
    %793 = vector.shape_cast %790 : vector<8x128xf32> to vector<1x8x128xf32>
    tpu.vector_store %arg8[%c14, %c0_273, %c0_274], %793 {strides = array<i32>} : memref<16x8x128xf32, #tpu.memory_space<vmem>>, vector<1x8x128xf32>,
    %c120_275 = arith.constant 120 : index
    %c0_276 = arith.constant 0 : index
    %794 = vector.load %arg12[%c120_275, %c0_276] : memref<128x512xf32, #tpu.memory_space<vmem>>, vector<8x512xf32>
    %795 = arith.truncf %790 : vector<8x128xf32> to vector<8x128xbf16>
    %cst_277 = arith.constant dense<0.000000e+00> : vector<8x512xf32>
    %796 = tpu.matmul %795, %418, %cst_277 {dimension_numbers = #tpu.dot_dimension_numbers<[1], [0], [0], [1], [0, 0, 1, 1], [], []>} : vector<8x128xbf16>, vector<128x512xbf16>, vector<8x512xf32> -> vector<8x512xf32>
    %797 = arith.addf %794, %796 : vector<8x512xf32>
    %798 = vector.extract_strided_slice %797 {offsets = [0, 0], sizes = [8, 384], strides = [1, 1]} : vector<8x512xf32> to vector<8x384xf32>
    %cst_278 = arith.constant 5.000000e-01 : f32
    %799 = vector.broadcast %cst_278 : f32 to vector<8x384xf32>
    %800 = arith.mulf %799, %798 : vector<8x384xf32>
    %801 = math.tanh %800 : vector<8x384xf32>
    %cst_279 = arith.constant 1.000000e+00 : f32
    %802 = vector.broadcast %cst_279 : f32 to vector<8x384xf32>
    %803 = arith.addf %801, %802 : vector<8x384xf32>
    %cst_280 = arith.constant 5.000000e-01 : f32
    %804 = vector.broadcast %cst_280 : f32 to vector<8x384xf32>
    %805 = arith.mulf %804, %803 : vector<8x384xf32>
    %806 = vector.extract_strided_slice %805 {offsets = [0, 0], sizes = [8, 128], strides = [1, 1]} : vector<8x384xf32> to vector<8x128xf32>
    %807 = vector.extract_strided_slice %805 {offsets = [0, 128], sizes = [8, 128], strides = [1, 1]} : vector<8x384xf32> to vector<8x128xf32>
    %808 = vector.extract_strided_slice %805 {offsets = [0, 256], sizes = [8, 128], strides = [1, 1]} : vector<8x384xf32> to vector<8x128xf32>
    %809 = vector.extract_strided_slice %797 {offsets = [0, 384], sizes = [8, 128], strides = [1, 1]} : vector<8x512xf32> to vector<8x128xf32>
    %810 = math.tanh %809 : vector<8x128xf32>
    %811 = arith.mulf %807, %788 : vector<8x128xf32>
    %812 = arith.mulf %806, %810 : vector<8x128xf32>
    %813 = arith.addf %811, %812 : vector<8x128xf32>
    %814 = math.tanh %813 : vector<8x128xf32>
    %815 = arith.mulf %808, %814 : vector<8x128xf32>
    %c15 = arith.constant 15 : index
    %c0_281 = arith.constant 0 : index
    %c0_282 = arith.constant 0 : index
    %816 = vector.load %arg8[%c15, %c0_281, %c0_282] : memref<16x8x128xf32, #tpu.memory_space<vmem>>, vector<1x8x128xf32>
    %817 = vector.shape_cast %816 : vector<1x8x128xf32> to vector<8x128xf32>
    %818 = vector.shape_cast %815 : vector<8x128xf32> to vector<1x8x128xf32>
    tpu.vector_store %arg8[%c15, %c0_281, %c0_282], %818 {strides = array<i32>} : memref<16x8x128xf32, #tpu.memory_space<vmem>>, vector<1x8x128xf32>,
    %c0_283 = arith.constant 0 : index
    %c0_284 = arith.constant 0 : index
    %c0_285 = arith.constant 0 : index
    %819 = vector.load %arg9[%c0_283, %c0_284, %c0_285] : memref<2x8x128xf32, #tpu.memory_space<vmem>>, vector<1x8x128xf32>
    %820 = vector.shape_cast %819 : vector<1x8x128xf32> to vector<8x128xf32>
    %821 = vector.shape_cast %405 : vector<8x128xf32> to vector<1x8x128xf32>
    tpu.vector_store %arg9[%c0_283, %c0_284, %c0_285], %821 {strides = array<i32>} : memref<2x8x128xf32, #tpu.memory_space<vmem>>, vector<1x8x128xf32>,
    %c0_286 = arith.constant 0 : index
    %c0_287 = arith.constant 0 : index
    %c0_288 = arith.constant 0 : index
    %822 = vector.load %arg10[%c0_286, %c0_287, %c0_288] : memref<2x8x128xf32, #tpu.memory_space<vmem>>, vector<1x8x128xf32>
    %823 = vector.shape_cast %822 : vector<1x8x128xf32> to vector<8x128xf32>
    %824 = vector.shape_cast %403 : vector<8x128xf32> to vector<1x8x128xf32>
    tpu.vector_store %arg10[%c0_286, %c0_287, %c0_288], %824 {strides = array<i32>} : memref<2x8x128xf32, #tpu.memory_space<vmem>>, vector<1x8x128xf32>,
    %c1_289 = arith.constant 1 : index
    %c0_290 = arith.constant 0 : index
    %c0_291 = arith.constant 0 : index
    %825 = vector.load %arg9[%c1_289, %c0_290, %c0_291] : memref<2x8x128xf32, #tpu.memory_space<vmem>>, vector<1x8x128xf32>
    %826 = vector.shape_cast %825 : vector<1x8x128xf32> to vector<8x128xf32>
    %827 = vector.shape_cast %815 : vector<8x128xf32> to vector<1x8x128xf32>
    tpu.vector_store %arg9[%c1_289, %c0_290, %c0_291], %827 {strides = array<i32>} : memref<2x8x128xf32, #tpu.memory_space<vmem>>, vector<1x8x128xf32>,
    %c1_292 = arith.constant 1 : index
    %c0_293 = arith.constant 0 : index
    %c0_294 = arith.constant 0 : index
    %828 = vector.load %arg10[%c1_292, %c0_293, %c0_294] : memref<2x8x128xf32, #tpu.memory_space<vmem>>, vector<1x8x128xf32>
    %829 = vector.shape_cast %828 : vector<1x8x128xf32> to vector<8x128xf32>
    %830 = vector.shape_cast %813 : vector<8x128xf32> to vector<1x8x128xf32>
    tpu.vector_store %arg10[%c1_292, %c0_293, %c0_294], %830 {strides = array<i32>} : memref<2x8x128xf32, #tpu.memory_space<vmem>>, vector<1x8x128xf32>,
    return
  }
  func.func @transform_0(%arg0: i32, %arg1: i32) -> (i32, i32, i32) {
    %c0_i32 = arith.constant 0 : i32
    %c0_i32_0 = arith.constant 0 : i32
    return %arg1, %arg0, %c0_i32 : i32, i32, i32
  }
  func.func @transform_1(%arg0: i32, %arg1: i32) -> (i32, i32, i32) {
    %c0_i32 = arith.constant 0 : i32
    %c0_i32_0 = arith.constant 0 : i32
    %c0_i32_1 = arith.constant 0 : i32
    return %c0_i32, %arg0, %c0_i32_0 : i32, i32, i32
  }
  func.func @transform_2(%arg0: i32, %arg1: i32) -> (i32, i32, i32) {
    %c0_i32 = arith.constant 0 : i32
    %c0_i32_0 = arith.constant 0 : i32
    %c0_i32_1 = arith.constant 0 : i32
    return %c0_i32, %arg0, %c0_i32_0 : i32, i32, i32
  }
  func.func @transform_3(%arg0: i32, %arg1: i32) -> (i32, i32, i32) {
    %c0_i32 = arith.constant 0 : i32
    %c0_i32_0 = arith.constant 0 : i32
    %c0_i32_1 = arith.constant 0 : i32
    %c0_i32_2 = arith.constant 0 : i32
    return %c0_i32, %c0_i32_0, %c0_i32_1 : i32, i32, i32
  }
  func.func @transform_4(%arg0: i32, %arg1: i32) -> (i32, i32, i32) {
    %c0_i32 = arith.constant 0 : i32
    %c0_i32_0 = arith.constant 0 : i32
    %c0_i32_1 = arith.constant 0 : i32
    %c0_i32_2 = arith.constant 0 : i32
    return %c0_i32, %c0_i32_0, %c0_i32_1 : i32, i32, i32
  }
  func.func @transform_5(%arg0: i32, %arg1: i32) -> (i32, i32, i32) {
    %c0_i32 = arith.constant 0 : i32
    %c0_i32_0 = arith.constant 0 : i32
    %c0_i32_1 = arith.constant 0 : i32
    %c0_i32_2 = arith.constant 0 : i32
    return %c0_i32, %c0_i32_0, %c0_i32_1 : i32, i32, i32
  }
  func.func @transform_6(%arg0: i32, %arg1: i32) -> (i32, i32, i32) {
    %c0_i32 = arith.constant 0 : i32
    %c0_i32_0 = arith.constant 0 : i32
    return %arg1, %arg0, %c0_i32 : i32, i32, i32
  }
  func.func @transform_7(%arg0: i32, %arg1: i32) -> (i32, i32, i32) {
    %c0_i32 = arith.constant 0 : i32
    %c0_i32_0 = arith.constant 0 : i32
    %c0_i32_1 = arith.constant 0 : i32
    return %c0_i32, %arg0, %c0_i32_0 : i32, i32, i32
  }
  func.func @transform_8(%arg0: i32, %arg1: i32) -> (i32, i32, i32) {
    %c0_i32 = arith.constant 0 : i32
    %c0_i32_0 = arith.constant 0 : i32
    %c0_i32_1 = arith.constant 0 : i32
    return %c0_i32, %arg0, %c0_i32_0 : i32, i32, i32
  }
}

</mosaic_0001>

<bundles_post_ra>
// kernel: tpu_custom_call.1
= control target key start
LH: loop header
LB: loop body
LE: loop exit
PB: predicated region body
PF: predicated region fallthrough
CT: control target
= control target key end

     0   :  { %s9494_s0 = inlined_call_operand.hbm [shape: f32[48,8,128], index: 0, kind: input, shape index: {}]   ;;  %s9495_s1 = inlined_call_operand.hbm [shape: f32[2,8,128], index: 1, kind: input, shape index: {}]   ;;  %s9496_s2 = inlined_call_operand.hbm [shape: f32[2,8,128], index: 2, kind: input, shape index: {}]   ;;  %s9497_s3 = inlined_call_operand.hbm [shape: bf16[2,128,512], index: 3, kind: input, shape index: {}]   ;;  %s9498_s4 = inlined_call_operand.hbm [shape: bf16[2,128,512], index: 4, kind: input, shape index: {}]   ;;  %s9499_s5 = inlined_call_operand.vmem [shape: f32[2,1,512], index: 5, kind: input, shape index: {}]   ;;  %s9500_s6 = inlined_call_operand.hbm [shape: f32[48,8,128], index: 6, kind: output, shape index: {0}]   ;;  %s9501_s7 = inlined_call_operand.hbm [shape: f32[2,8,128], index: 7, kind: output, shape index: {1}]   ;;  %s9502_s8 = inlined_call_operand.hbm [shape: f32[2,8,128], index: 8, kind: output, shape index: {2}]  }
   0x1   :  { %9525 = sst [smem:[#allocation79_spill]] %s9495_s1 }
   0x2   :  { %9526 = sst [smem:[#allocation80_spill]] %s9501_s7 }
   0x3   :  { %9527 = sst [smem:[#allocation81_spill]] %s9502_s8 }
   0x4   :  { %14 = vsyncpa [#allocation5], 0 }
   0x5   :  { %16 = vsyncpa [#allocation5 + $0x1], 0 }
   0x6   :  { %17 = vsyncpa [#allocation8], 0 }
   0x7   :  { %18 = vsyncpa [#allocation11], 0 }
   0x8   :  { %19 = vsyncpa [#allocation6], 0 }
   0x9   :  { %21 = vsyncpa [#allocation6 + $0x1], 0 }
   0xa   :  { %22 = vsyncpa [#allocation15], 0  ;;  %s6916_s27 = smov 0   ;;  %s6918_s28 = smov 0  }
   0xb   :  { %s6920_s29 = smov 0   ;;  %s6922_s30 = smov 0  }
   0xc   :  { %s6924_s9 = smov 0   ;;  %s6926_s10 = smov 0  }
   0xd LB: > { %9528 = sst [smem:[#allocation22_spill]] %s6834_s27  ;;  %s5628_s11 = sadd.s32 4294967295, %s6854_s10   ;;  %s6854_s10 = sphi %s6926_s10, %s28_s10   ;;  %s6850_s9 = sphi %s6924_s9, %s9776_s9   ;;  %s6846_s30 = sphi %s6922_s30, %s9775_s30   ;;  %s6842_s29 = sphi %s6920_s29, %s9774_s29   ;;  %s6838_s28 = sphi %s6918_s28, %s9773_s28   ;;  %s6834_s27 = sphi %s6916_s27, %s9772_s27  }
   0xe   : > { %s5629_s12 = sadd.s32 4294967294, %s6854_s10   ;;  %p62_p0 = scmp.ne.s32.totalorder %s6838_s28, %s6834_s27 }
   0xf   : > { %p6950_p1 = scmp.eq.s32.totalorder %s5628_s11, 0  ;;  %p6954_p2 = scmp.eq.s32.totalorder %s5628_s11, 2 }
  0x10   : > { %p209_p3 = scmp.eq.s32.totalorder %s5629_s12, 2  ;;  %p5630_p5 = scmp.ge.s32.totalorder %s6854_s10, 1 }
  0x11   : > { %s9529_s13 = scalar_select %p6950_p1, 1, 0 }
  0x12   : > { %s9530_s14 = scalar_select %p6954_p2, 1, 0 }
  0x13   : > { %p6960_p4 = por %p6950_p1, %p62_p0  ;;  %p6965_p6 = por %p209_p3, %p62_p0 }
  0x14   : > { %p268_p7 = scmp.lt.s32.totalorder %s6854_s10, 4  ;;  %s6856_s18 = smov [#allocation7]  }
  0x15   : > { %s9531_s15 = scalar_select %p6960_p4, 1, 0 }
  0x16   : > { %s9532_s16 = scalar_select %p6965_p6, 1, 0 }
  0x17   : > { %p6970_p8 = pnand %p5630_p5, %p268_p7  ;;  %s282_s19 = sshll.u32 %s6856_s18, 4  ;;  %s283_s19 = int_to_ptr.vmem [resolvable:$true] %s282_s19 }
  0x18   : > { %9533 = sst [smem:[#allocation23_spill]] %s9532_s16  ;;  %s6857_s21 = smov [#allocation10]  }
  0x19   : > { %s9534_s17 = scalar_select %p6970_p8, 1, 0 }
  0x1a   : > { %p5830_p9 = pneg %p6970_p8  ;;  %s310_s22 = sshll.u32 %s6857_s21, 4  ;;  %s6982_s22 = int_to_ptr.vmem [resolvable:$true] %s310_s22 }
  0x1b   : > { %s9536_s1 = sld [smem:[#allocation79_spill]] }
  0x1c   : > { %p6978_p10 = pnand %p5830_p9, %p6950_p1 }
  0x1e   : > { %p6992_p12 = pneg %p6978_p10 }
  0x21   : > { %s6566_s25 = scalar_lea.hbm %s9536_s1, 256 }
  0x22   : > { %p6567_p11 = scmp.ne.s32.totalorder %s9536_s1, %s6566_s25  ;;  %p6573_p3 = scmp.lt.u32.totalorder %s6566_s25, %s9536_s1 }
  0x24   : > { %p6569_p13 = pnand %p6992_p12, %p6567_p11 }
  0x26   : > { %p6570_p0 = pneg %p6569_p13 }
  0x28   : > { %p6575_p5 = pnand %p6573_p3, %p6570_p0 }
  0x2a   : > { %6578 = shalt.err (!%p6575_p5)
}
  0x2b   : > { %s6579_s23 = scalar_lea.vmem %s283_s19, 256  ;;  %p6587_p1 = scmp.lt.s32.totalorder %s283_s19, %s283_s19 }
  0x2c   : > { %p6580_p7 = scmp.ne.s32.totalorder %s283_s19, %s6579_s23  ;;  %p6588_p4 = scmp.lt.s32.totalorder %s6579_s23, %s6579_s23 }
  0x2e   : > { %p6582_p9 = pnand %p6580_p7, %p6992_p12  ;;  %p6589_p8 = por %p6588_p4, %p6587_p1 }
  0x30   : > { %p6583_p6 = pneg %p6582_p9 }
  0x32   : > { %p6590_p2 = pnand %p6589_p8, %p6583_p6 }
  0x34   : > { %6593 = shalt.err (!%p6590_p2)
}
  0x35   : > { %s9512_s24 = smov 128   ;;  %s9514_s26 = smov 8  }
  0x36   : > { %5833 = dma.hbm_to_vmem [thread:$0]  (!%p6978_p10), %s9536_s1, 256, %s283_s19, [#allocation8], %s9512_s24, %s9512_s24, %s9514_s26  }
  0x37   : > { %s6594_s16 = scalar_lea.hbm %s9497_s3, 8192 }
  0x38   : > { %p6595_p1 = scmp.ne.s32.totalorder %s9497_s3, %s6594_s16  ;;  %p6601_p6 = scmp.lt.u32.totalorder %s6594_s16, %s9497_s3 }
  0x3a   : > { %p6597_p2 = pnand %p6595_p1, %p6992_p12 }
  0x3c   : > { %p6598_p4 = pneg %p6597_p2 }
  0x3e   : > { %p6603_p8 = pnand %p6601_p6, %p6598_p4 }
  0x40   : > { %6606 = shalt.err (!%p6603_p8)
}
  0x41   : > { %s6607_s19 = scalar_lea.vmem %s6982_s22, 8192  ;;  %p6615_p3 = scmp.lt.s32.totalorder %s6982_s22, %s6982_s22 }
  0x42   : > { %p6608_p11 = scmp.ne.s32.totalorder %s6982_s22, %s6607_s19  ;;  %p6616_p5 = scmp.lt.s32.totalorder %s6607_s19, %s6607_s19 }
  0x44   : > { %p6610_p13 = pnand %p6608_p11, %p6992_p12  ;;  %p6617_p7 = por %p6616_p5, %p6615_p3 }
  0x46   : > { %p6611_p0 = pneg %p6610_p13 }
  0x48   : > { %p6618_p9 = pnand %p6617_p7, %p6611_p0 }
  0x4a   : > { %6621 = shalt.err (!%p6618_p9)
}
  0x4b   : > { %s9516_s27 = smov 256   ;;  %s6861_s7 = smov 16  }
  0x4c   : > { %5839 = dma.hbm_to_vmem [thread:$0]  (!%p6978_p10), %s9497_s3, 8192, %s6982_s22, [#allocation11], %s9516_s27, %s9516_s27, %s6861_s7  }
  0x4d   : > { %s6862_s25 = smov [#allocation9]   ;;  %s6863_s18 = smov [#allocation12]  }
  0x4e   : > { %s297_s11 = sshll.u32 %s6862_s25, 4  ;;  %s323_s21 = sshll.u32 %s6863_s18, 4  ;;  %s298_s11 = int_to_ptr.vmem [resolvable:$true] %s297_s11  ;;  %s7037_s21 = int_to_ptr.vmem [resolvable:$true] %s323_s21 }
  0x4f   : > { %s6622_s24 = scalar_lea.hbm %s9496_s2, 256 }
  0x50   : > { %p6623_p1 = scmp.ne.s32.totalorder %s9496_s2, %s6622_s24  ;;  %p6629_p6 = scmp.lt.u32.totalorder %s6622_s24, %s9496_s2 }
  0x52   : > { %p6625_p2 = pnand %p6623_p1, %p6992_p12 }
  0x54   : > { %p6626_p4 = pneg %p6625_p2 }
  0x56   : > { %p6631_p8 = pnand %p6629_p6, %p6626_p4 }
  0x58   : > { %6634 = shalt.err (!%p6631_p8)
}
  0x59   : > { %s6635_s16 = scalar_lea.vmem %s298_s11, 256  ;;  %p6643_p3 = scmp.lt.s32.totalorder %s298_s11, %s298_s11 }
  0x5a   : > { %p6636_p11 = scmp.ne.s32.totalorder %s298_s11, %s6635_s16  ;;  %p6644_p5 = scmp.lt.s32.totalorder %s6635_s16, %s6635_s16 }
  0x5c   : > { %p6638_p13 = pnand %p6636_p11, %p6992_p12  ;;  %p6645_p7 = por %p6644_p5, %p6643_p3 }
  0x5e   : > { %p6639_p0 = pneg %p6638_p13 }
  0x60   : > { %p6646_p9 = pnand %p6645_p7, %p6639_p0 }
  0x62   : > { %6649 = shalt.err (!%p6646_p9)
}
  0x63   : > { %s9538_s1 = smov 8   ;;  %s9539_s26 = smov 128  }
  0x64   : > { %5836 = dma.hbm_to_vmem [thread:$0]  (!%p6978_p10), %s9496_s2, 256, %s298_s11, [#allocation8], %s9539_s26, %s9539_s26, %s9538_s1  }
  0x65   : > { %s6650_s19 = scalar_lea.hbm %s9498_s4, 8192 }
  0x66   : > { %p6651_p1 = scmp.ne.s32.totalorder %s9498_s4, %s6650_s19  ;;  %p6657_p6 = scmp.lt.u32.totalorder %s6650_s19, %s9498_s4 }
  0x68   : > { %p6653_p2 = pnand %p6651_p1, %p6992_p12 }
  0x6a   : > { %p6654_p4 = pneg %p6653_p2 }
  0x6c   : > { %p6659_p8 = pnand %p6657_p6, %p6654_p4 }
  0x6e   : > { %6662 = shalt.err (!%p6659_p8)
}
  0x6f   : > { %s6663_s11 = scalar_lea.vmem %s7037_s21, 8192  ;;  %p6671_p3 = scmp.lt.s32.totalorder %s7037_s21, %s7037_s21 }
  0x70   : > { %p6664_p11 = scmp.ne.s32.totalorder %s7037_s21, %s6663_s11  ;;  %p6672_p5 = scmp.lt.s32.totalorder %s6663_s11, %s6663_s11 }
  0x72   : > { %p6666_p13 = pnand %p6664_p11, %p6992_p12  ;;  %p6673_p7 = por %p6672_p5, %p6671_p3 }
  0x74   : > { %p6667_p0 = pneg %p6666_p13 }
  0x76   : > { %p6674_p9 = pnand %p6673_p7, %p6667_p0 }
  0x78   : > { %6677 = shalt.err (!%p6674_p9)
}
  0x79   : > { %s9540_s27 = smov 256   ;;  %s37_s20 = sadd.s32 1, %s6850_s9 }
  0x7a   : > { %5842 = dma.hbm_to_vmem [thread:$0]  (!%p6978_p10), %s9498_s4, 8192, %s7037_s21, [#allocation11], %s9540_s27, %s9540_s27, %s6861_s7  }
  0x7b   : > { %s49_s12 = sadd.s32 1, %s6842_s29  ;;  %p38_p12 = scmp.ge.s32.totalorder %s37_s20, 3 }
  0x7c   : > { %p56_p1 = scmp.ne.s32.totalorder %s6842_s29, %s6838_s28  ;;  %p57_p2 = scmp.eq.s32.totalorder %s6854_s10, 0 }
  0x7d   : > { %p5855_p4 = scmp.lt.s32.totalorder %s6854_s10, 3  ;;  %s9778_s20 = smov (%p38_p12, %s37_s20), 0 }
  0x7e   : > { %p58_p6 = por %p57_p2, %p56_p1  ;;  %p9541_p8 = scmp.ne.s32.totalorder %s9530_s14, 0 }
  0x7f   : > { %s44_s23 = ssub.s32 %s6850_s9, %s9778_s20  ;;  %s340_s19 = sand.u32 1, %s6842_s29  }
  0x80   : > { %p7096_p11 = por %p9541_p8, %p56_p1  ;;  %p47_p13 = scmp.eq.s32.totalorder %s44_s23, 0 }
  0x81   : > { %s5636_s7 = sshll.u32 %s340_s19, 7  ;;  %s5800_s21 = sshll.u32 %s6850_s9, 11 }
  0x82   : > { %s7105_s8 = scalar_select %p47_p13, %s6842_s29, %s49_s12  }
  0x83   : > { %s7110_s11 = scalar_lea.hbm %s9494_s0, %s5800_s21  ;;  %s344_s27 = scalar_lea.vmem [#allocation4], %s5636_s7 }
  0x84   : > { %s352_s25 = sshll.u32 %s344_s27, 4  ;;  %p7114_p10 = pnand %p5855_p4, %p58_p6  ;;  %s7118_s25 = int_to_ptr.vmem [resolvable:$true] %s352_s25 }
  0x85   : > { %s7120_s12 = scalar_lea.sflag [#allocation5], %s340_s19  ;;  %s6678_s23 = scalar_lea.hbm %s7110_s11, 2048 }
  0x86   : > { %p6679_p0 = scmp.ne.s32.totalorder %s7110_s11, %s6678_s23  ;;  %p6680_p3 = pneg %p7114_p10 }
  0x87   : > { %s6683_s22 = scalar_lea.hbm %s9494_s0, 6144  ;;  %p6684_p9 = scmp.lt.u32.totalorder %s7110_s11, %s9494_s0 }
  0x88   : > { %p6681_p5 = pnand %p6680_p3, %p6679_p0  ;;  %p6685_p12 = scmp.lt.u32.totalorder %s6683_s22, %s6678_s23 }
  0x89   : > { %p6687_p2 = scmp.lt.u32.totalorder %s6678_s23, %s7110_s11 }
  0x8a   : > { %p6682_p7 = pneg %p6681_p5  ;;  %p6686_p1 = por %p6685_p12, %p6684_p9 }
  0x8c   : > { %p6688_p4 = por %p6687_p2, %p6686_p1 }
  0x8e   : > { %p6689_p6 = pnand %p6688_p4, %p6682_p7 }
  0x90   : > { %6692 = shalt.err (!%p6689_p6)
}
  0x91   : > { %s6693_s19 = scalar_lea.vmem %s7118_s25, 2048  ;;  %s6864_s7 = smov [#allocation4]  }
  0x92   : > { %p6694_p8 = scmp.ne.s32.totalorder %s7118_s25, %s6693_s19  ;;  %s6698_s21 = sshll.u32 %s6864_s7, 4  ;;  %s6699_s21 = int_to_ptr.vmem [resolvable:$false] %s6698_s21 }
  0x93   : > { %s6700_s16 = scalar_lea.vmem %s6699_s21, 4096  ;;  %p6701_p5 = scmp.lt.s32.totalorder %s7118_s25, %s6699_s21 }
  0x94   : > { %p6696_p13 = pnand %p6694_p8, %p6680_p3  ;;  %p6702_p9 = scmp.lt.s32.totalorder %s6700_s16, %s6693_s19 }
  0x96   : > { %p6697_p0 = pneg %p6696_p13  ;;  %p6703_p12 = por %p6702_p9, %p6701_p5 }
  0x98   : > { %p6704_p1 = pnand %p6703_p12, %p6697_p0 }
  0x9a   : > { %6707 = shalt.err (!%p6704_p1)
}
  0x9b   : > { %5846 = dma.hbm_to_vmem [thread:$0]  (!%p7114_p10), %s7110_s11, 2048, %s7118_s25, %s7120_s12, %s9539_s26, %s9539_s26, %s9538_s1  }
  0x9c   : > { %p9544_p3 = scmp.ne.s32.totalorder %s9534_s17, 0 }
  0x9e   : > { %364 = sbr.rel (%p9544_p3) target bundleno = 8403 (0x20d3), region = 44 }
  0xa5   : > { %s7154_s23 = sand.u32 1, %s6838_s28   ;;  %p9545_p7 = scmp.ne.s32.totalorder %s9531_s15, 0 }
  0xa6   : > { %s5640_s22 = sshll.u32 %s7154_s23, 7  ;;  %s367_s27 = scalar_lea.sflag [#allocation5], %s7154_s23 }
  0xa7   : > { %s7158_s19 = scalar_lea.vmem [#allocation4], %s5640_s22 }
  0xa8   : > { %6813 = dma.done.wait (%p9545_p7), %s367_s27, 2048  }
  0xa9   : > { %6815 = vsyncadd (%p9545_p7), %s367_s27, 4294965248  ;;  %p9546_p10 = scmp.ne.s32.totalorder %s9529_s13, 0 }
  0xab   : > { %6817 = dma.done.wait (%p9546_p10), [#allocation8], 512  }
  0xac   : > { %6819 = vsyncadd (%p9546_p10), [#allocation8], 4294966784 }
  0xad   : > { %6821 = dma.done.wait (%p9546_p10), [#allocation11], 16384  }
  0xae   : > { %6823 = vsyncadd (%p9546_p10), [#allocation11], 4294950912  ;;  %s7172_s17 = scalar_lea.vmem [#allocation13], %s5640_s22  ;;  %p5646_p2 = scmp.ne.s32.totalorder %s6846_s30, 0 }
  0xaf   : > { %v426_v0 = vld [vmem:[#allocation7] sm:$0xff] (!%p5646_p2)  ;;  %v427_v1 = vld [vmem:[#allocation7 + $0x8] sm:$0xff] (!%p5646_p2)  ;;  %v430_v2 = vld [vmem:[#allocation9] sm:$0xff] (!%p5646_p2) }
  0xb0   : > { %425 = sbr.rel (%p5646_p2) target bundleno = 183 (0xb7), region = 68  ;;  %428 = vst [vmem:[#allocation14] sm:$0xff] (!%p5646_p2), %v426_v0  ;;  %429 = vst [vmem:[#allocation14 + $0x8] sm:$0xff] (!%p5646_p2), %v427_v1  ;;  %v431_v3 = vld [vmem:[#allocation9 + $0x8] sm:$0xff] (!%p5646_p2) }
  0xb1   : > { %432 = vst [vmem:[#allocation16] sm:$0xff] (!%p5646_p2), %v430_v2  ;;  %433 = vst [vmem:[#allocation16 + $0x8] sm:$0xff] (!%p5646_p2), %v431_v3 }
  0xb7 PF: > { %v5926_v4 = vld [vmem:[#allocation10 + $0x4] ss:$16 sps:$4 sm:$0xff]   ;;  %v5928_v5 = vld [vmem:[#allocation10 + $0xc] ss:$16 sps:$4 sm:$0xff]   ;;  %v9521_v6 = vmov 0   ;;  %s6866_s11 = smov [#allocation14]  }
  0xb8   : > { %710 = vmatprep.mubr.bf16.mxu0 %v9521_v6  ;;  %823 = vmatprep.mubr.bf16.mxu1 %v9521_v6  ;;  %v5930_v7 = vld [vmem:[#allocation10] ss:$16 sps:$4 sm:$0xff]   ;;  %v5931_v8 = vld [vmem:[#allocation10 + $0x8] ss:$16 sps:$4 sm:$0xff]   ;;  %v5932_v9 = vld [vmem:[#allocation10 + $0x24] ss:$16 sps:$4 sm:$0xff]  }
  0xb9   : > { %678 = vmatprep.subr.bf16.mxu0 %v5926_v4  ;;  %791 = vmatprep.subr.bf16.mxu1 %v5928_v5  ;;  %v5934_v10 = vld [vmem:[#allocation10 + $0x2c] ss:$16 sps:$4 sm:$0xff]   ;;  %v5936_v11 = vld [vmem:[#allocation10 + $0x20] ss:$16 sps:$4 sm:$0xff]   ;;  %v5937_v12 = vld [vmem:[#allocation10 + $0x28] ss:$16 sps:$4 sm:$0xff]  }
  0xba   : > { %679 = vmatpush1.bf16.msra.mxu0 %v5930_v7  ;;  %792 = vmatpush1.bf16.msra.mxu1 %v5931_v8  ;;  %v5938_v13 = vld [vmem:[#allocation10 + $0x44] ss:$16 sps:$4 sm:$0xff]   ;;  %v5940_v14 = vld [vmem:[#allocation10 + $0x4c] ss:$16 sps:$4 sm:$0xff]   ;;  %v5942_v15 = vld [vmem:[#allocation10 + $0x40] ss:$16 sps:$4 sm:$0xff]  }
  0xbb   : > { %680 = vmatprep.subr.bf16.mxu0 %v5932_v9  ;;  %793 = vmatprep.subr.bf16.mxu1 %v5934_v10  ;;  %v5943_v16 = vld [vmem:[#allocation10 + $0x48] ss:$16 sps:$4 sm:$0xff]   ;;  %v5944_v17 = vld [vmem:[#allocation10 + $0x64] ss:$16 sps:$4 sm:$0xff]   ;;  %v5946_v18 = vld [vmem:[#allocation10 + $0x6c] ss:$16 sps:$4 sm:$0xff]  }
  0xbc   : > { %v5948_v19 = vld [vmem:[#allocation10 + $0x60] ss:$16 sps:$4 sm:$0xff]   ;;  %v5949_v20 = vld [vmem:[#allocation10 + $0x68] ss:$16 sps:$4 sm:$0xff]   ;;  %v5950_v21 = vld [vmem:[#allocation10 + $0x84] ss:$16 sps:$4 sm:$0xff]  }
  0xbd   : > { %v5952_v22 = vld [vmem:[#allocation10 + $0x8c] ss:$16 sps:$4 sm:$0xff]   ;;  %v5954_v23 = vld [vmem:[#allocation10 + $0x80] ss:$16 sps:$4 sm:$0xff]   ;;  %v5955_v24 = vld [vmem:[#allocation10 + $0x88] ss:$16 sps:$4 sm:$0xff]  }
  0xbe   : > { %681 = vmatpush1.bf16.msra.mxu0 %v5936_v11  ;;  %794 = vmatpush1.bf16.msra.mxu1 %v5937_v12  ;;  %v5956_v25 = vld [vmem:[#allocation10 + $0xa4] ss:$16 sps:$4 sm:$0xff]   ;;  %v5958_v26 = vld [vmem:[#allocation10 + $0xac] ss:$16 sps:$4 sm:$0xff]   ;;  %v5960_v27 = vld [vmem:[#allocation10 + $0xa0] ss:$16 sps:$4 sm:$0xff]  }
  0xbf   : > { %682 = vmatprep.subr.bf16.mxu0 %v5938_v13  ;;  %795 = vmatprep.subr.bf16.mxu1 %v5940_v14  ;;  %v5961_v28 = vld [vmem:[#allocation10 + $0xa8] ss:$16 sps:$4 sm:$0xff]   ;;  %v5962_v29 = vld [vmem:[#allocation10 + $0xc4] ss:$16 sps:$4 sm:$0xff]   ;;  %v5964_v30 = vld [vmem:[#allocation10 + $0xcc] ss:$16 sps:$4 sm:$0xff]  }
  0xc0   : > { %v5966_v31 = vld [vmem:[#allocation10 + $0xc0] ss:$16 sps:$4 sm:$0xff]   ;;  %v5967_v32 = vld [vmem:[#allocation10 + $0xc8] ss:$16 sps:$4 sm:$0xff]   ;;  %v5968_v33 = vld [vmem:[#allocation10 + $0xe4] ss:$16 sps:$4 sm:$0xff]  }
  0xc1   : > { %v5970_v34 = vld [vmem:[#allocation10 + $0xec] ss:$16 sps:$4 sm:$0xff]   ;;  %v5972_v35 = vld [vmem:[#allocation10 + $0xe0] ss:$16 sps:$4 sm:$0xff]   ;;  %v5973_v36 = vld [vmem:[#allocation10 + $0xe8] ss:$16 sps:$4 sm:$0xff]  }
  0xc2   : > { %683 = vmatpush1.bf16.msra.mxu0 %v5942_v15  ;;  %796 = vmatpush1.bf16.msra.mxu1 %v5943_v16  ;;  %v440_v37 = vld [vmem:[%s7158_s19] sm:$0xff]  ;;  %v441_v38 = vld [vmem:[%s7158_s19 + $0x8] sm:$0xff]  ;;  %v442_v46 = vld [vmem:[%s7158_s19 + $0x10] sm:$0xff]  ;;  %s5461_s25 = sshll.u32 %s6866_s11, 4  ;;  %s5801_s24 = sshll.u32 %s6846_s30, 11  ;;  %s5462_s25 = int_to_ptr.vmem [resolvable:$true] %s5461_s25 }
  0xc3   : > { %684 = vmatprep.subr.bf16.mxu0 %v5944_v17  ;;  %797 = vmatprep.subr.bf16.mxu1 %v5946_v18  ;;  %v7179_v39 = vld [vmem:[#allocation12 + $0x4] ss:$16 sps:$4 sm:$0xff]   ;;  %v7181_v40 = vld [vmem:[#allocation12 + $0xc] ss:$16 sps:$4 sm:$0xff]   ;;  %v456_v41 = vpack.c.bf16 %v441_v38, %v440_v37  ;;  %v7183_v42 = vld [vmem:[#allocation12] ss:$16 sps:$4 sm:$0xff]   ;;  %s9387_s27 = scalar_lea.hbm %s9500_s6, %s5801_s24  ;;  %p6715_p0 = scmp.lt.s32.totalorder %s5462_s25, %s5462_s25 }
  0xc4   : > { %v7187_v43 = vld [vmem:[#allocation12 + $0x8] ss:$16 sps:$4 sm:$0xff]   ;;  %v7189_v44 = vld [vmem:[#allocation12 + $0x24] ss:$16 sps:$4 sm:$0xff]   ;;  %v7191_v45 = vld [vmem:[#allocation12 + $0x2c] ss:$16 sps:$4 sm:$0xff]  }
  0xc5   : > { %v443_v47 = vld [vmem:[%s7158_s19 + $0x18] sm:$0xff]  ;;  %v7197_v48 = vld [vmem:[#allocation12 + $0x20] ss:$16 sps:$4 sm:$0xff]   ;;  %v7203_v50 = vld [vmem:[#allocation12 + $0x44] ss:$16 sps:$4 sm:$0xff]   ;;  %s5446_s12 = sshll.u32 %s7172_s17, 4  ;;  %s9389_s12 = int_to_ptr.vmem [resolvable:$true] %s5446_s12 }
  0xc6   : > { %685 = vmatpush1.bf16.msra.mxu0 %v5948_v19  ;;  %798 = vmatpush1.bf16.msra.mxu1 %v5949_v20  ;;  %v7201_v49 = vld [vmem:[#allocation12 + $0x28] ss:$16 sps:$4 sm:$0xff]   ;;  %v7207_v51 = vld [vmem:[#allocation12 + $0x4c] ss:$16 sps:$4 sm:$0xff]   ;;  %v457_v52 = vpack.c.bf16 %v443_v47, %v442_v46  ;;  %v7212_v53 = vld [vmem:[#allocation12 + $0x40] ss:$16 sps:$4 sm:$0xff]  }
  0xc7   : > { %686 = vmatprep.subr.bf16.mxu0 %v5950_v21  ;;  %799 = vmatprep.subr.bf16.mxu1 %v5952_v22  ;;  %v7214_v54 = vld [vmem:[#allocation12 + $0x48] ss:$16 sps:$4 sm:$0xff]   ;;  %v7216_v55 = vld [vmem:[#allocation12 + $0x64] ss:$16 sps:$4 sm:$0xff]   ;;  %v7219_v56 = vld [vmem:[#allocation12 + $0x6c] ss:$16 sps:$4 sm:$0xff]  }
  0xc8   : > { %v444_v57 = vld [vmem:[%s7158_s19 + $0x20] sm:$0xff]  ;;  %v445_v58 = vld [vmem:[%s7158_s19 + $0x28] sm:$0xff]  ;;  %v446_v4 = vld [vmem:[%s7158_s19 + $0x30] sm:$0xff]  ;;  %s6867_s7 = smov [#allocation16]   ;;  %p9766_p6 = scmp.ne.s32.totalorder %s9530_s14, 0 }
  0xc9   : > { %v7225_v59 = vld [vmem:[#allocation12 + $0x60] ss:$16 sps:$4 sm:$0xff]   ;;  %v7229_v60 = vld [vmem:[#allocation12 + $0x68] ss:$16 sps:$4 sm:$0xff]   ;;  %v7233_v61 = vld [vmem:[#allocation12 + $0x84] ss:$16 sps:$4 sm:$0xff]   ;;  %v458_v63 = vpack.c.bf16 %v445_v58, %v444_v57 }
  0xca   : > { %687 = vmatpush1.bf16.msra.mxu0 %v5954_v23  ;;  %800 = vmatpush1.bf16.msra.mxu1 %v5955_v24  ;;  %v7235_v62 = vld [vmem:[#allocation12 + $0x8c] ss:$16 sps:$4 sm:$0xff]   ;;  %v7237_v0 = vld [vmem:[#allocation12 + $0x80] ss:$16 sps:$4 sm:$0xff]   ;;  %v7239_v1 = vld [vmem:[#allocation12 + $0x88] ss:$16 sps:$4 sm:$0xff]  }
  0xcb   : > { %688 = vmatprep.subr.bf16.mxu0 %v5956_v25  ;;  %801 = vmatprep.subr.bf16.mxu1 %v5958_v26  ;;  %v7241_v2 = vld [vmem:[#allocation12 + $0xa4] ss:$16 sps:$4 sm:$0xff]   ;;  %v7243_v3 = vld [vmem:[#allocation12 + $0xac] ss:$16 sps:$4 sm:$0xff]   ;;  %v7251_v7 = vld [vmem:[#allocation12 + $0xa0] ss:$16 sps:$4 sm:$0xff]  }
  0xcc   : > { %v447_v5 = vld [vmem:[%s7158_s19 + $0x38] sm:$0xff]  ;;  %v7257_v9 = vld [vmem:[#allocation12 + $0xc4] ss:$16 sps:$4 sm:$0xff]   ;;  %v7265_v12 = vld [vmem:[#allocation12 + $0xc0] ss:$16 sps:$4 sm:$0xff]   ;;  %s5476_s21 = sshll.u32 %s6867_s7, 4  ;;  %s9392_s21 = int_to_ptr.vmem [resolvable:$true] %s5476_s21 }
  0xcd   : > { %v7253_v8 = vld [vmem:[#allocation12 + $0xa8] ss:$16 sps:$4 sm:$0xff]   ;;  %v7259_v10 = vld [vmem:[#allocation12 + $0xcc] ss:$16 sps:$4 sm:$0xff]   ;;  %v459_v11 = vpack.c.bf16 %v447_v5, %v446_v4  ;;  %v7269_v14 = vld [vmem:[#allocation12 + $0xe4] ss:$16 sps:$4 sm:$0xff]  }
  0xce   : > { %689 = vmatpush1.bf16.msra.mxu0 %v5960_v27  ;;  %802 = vmatpush1.bf16.msra.mxu1 %v5961_v28  ;;  %v7267_v13 = vld [vmem:[#allocation12 + $0xc8] ss:$16 sps:$4 sm:$0xff]   ;;  %v7271_v15 = vld [vmem:[#allocation12 + $0xec] ss:$16 sps:$4 sm:$0xff]   ;;  %v448_v16 = vld [vmem:[%s7158_s19 + $0x40] sm:$0xff] }
  0xcf   : > { %690 = vmatprep.subr.bf16.mxu0 %v5962_v29  ;;  %803 = vmatprep.subr.bf16.mxu1 %v5964_v30  ;;  %v449_v17 = vld [vmem:[%s7158_s19 + $0x48] sm:$0xff]  ;;  %v7279_v18 = vld [vmem:[#allocation12 + $0xe0] ss:$16 sps:$4 sm:$0xff]   ;;  %v451_v22 = vld [vmem:[%s7158_s19 + $0x58] sm:$0xff] }
  0xd0   : > { %v7281_v19 = vld [vmem:[#allocation12 + $0xe8] ss:$16 sps:$4 sm:$0xff]   ;;  %v460_v20 = vpack.c.bf16 %v449_v17, %v448_v16  ;;  %v450_v21 = vld [vmem:[%s7158_s19 + $0x50] sm:$0xff]  ;;  %v452_v24 = vld [vmem:[%s7158_s19 + $0x60] sm:$0xff] }
  0xd1   : > { %v461_v23 = vpack.c.bf16 %v451_v22, %v450_v21  ;;  %v453_v25 = vld [vmem:[%s7158_s19 + $0x68] sm:$0xff]  ;;  %v454_v27 = vld [vmem:[%s7158_s19 + $0x70] sm:$0xff]  ;;  %v455_v28 = vld [vmem:[%s7158_s19 + $0x78] sm:$0xff]  ;;  %s6708_s19 = scalar_lea.vmem %s5462_s25, 256 }
  0xd2   : > { %691 = vmatpush1.bf16.msra.mxu0 %v5966_v31  ;;  %804 = vmatpush1.bf16.msra.mxu1 %v5967_v32  ;;  %v462_v26 = vpack.c.bf16 %v453_v25, %v452_v24  ;;  %v463_v29 = vpack.c.bf16 %v455_v28, %v454_v27  ;;  %v434_v30 = vld [vmem:[#allocation14] sm:$0xff]  ;;  %v498_v32 = vlaneseq  ;;  %p6709_p4 = scmp.ne.s32.totalorder %s5462_s25, %s6708_s19  ;;  %p6716_p5 = scmp.lt.s32.totalorder %s6708_s19, %s6708_s19 }
  0xd3   : > { %692 = vmatprep.subr.bf16.mxu0 %v5968_v33  ;;  %805 = vmatprep.subr.bf16.mxu1 %v5970_v34  ;;  %v1004_v31 = vpack.c.bf16 %v434_v30, %v434_v30  ;;  %v496_v37 = vld [vmem:[%s9499_s5] sm:$0xf] }
  0xd4   : > { %v7341_v33 = vshrl.u32 %v498_v32, 7  ;;  %p6710_p8 = pnand %p6709_p4, %p9766_p6  ;;  %p6717_p9 = por %p6716_p5, %p6715_p0 }
  0xd6   : > { %693 = vmatpush1.bf16.msra.mxu0 %v5972_v35  ;;  %806 = vmatpush1.bf16.msra.mxu1 %v5973_v36  ;;  %9547 = vst [vmem:[#allocation24_spill] sm:$0xff] %v7341_v33  ;;  %v9519_v34 = vsub.s32 2, %v7341_v33  ;;  %v9517_v35 = vsub.s32 3, %v7341_v33  ;;  %v9520_v36 = vsub.s32 0, %v7341_v33  ;;  %v9518_v38 = vsub.s32 1, %v7341_v33  ;;  %p6711_p13 = pneg %p6710_p8 }
  0xd7   : > { %1165 = vmatprep.subr.bf16.mxu0 %v7179_v39  ;;  %1206 = vmatprep.subr.bf16.mxu1 %v7181_v40 }
  0xd8   : > { %v7364_v57 = vrot.slane %v496_v37, %v9520_v36  ;;  %v7372_v4 = vrot.slane %v496_v37, %v9518_v38  ;;  %p6718_p12 = pnand %p6717_p9, %p6711_p13 }
  0xd9   : > { %711 = vmatmul.mubr.bf16.vlgmr.msra.gmra.mrb[0].mxu0 %v456_v41  ;;  %824 = vmatmul.mubr.bf16.vlgmr.msra.gmra.mrb[0].mxu1 %v456_v41  ;;  %v7352_v41 = vrot.slane %v496_v37, %v9519_v34 }
  0xda   : > { %1166 = vmatpush1.bf16.msra.mxu0 %v7183_v42  ;;  %720 = vmatprep.mubr.bf16.mxu0 %v9521_v6 }
  0xdb   : > { %833 = vmatprep.mubr.bf16.mxu1 %v9521_v6  ;;  %1207 = vmatpush1.bf16.msra.mxu1 %v7187_v43 }
  0xdc   : > { %1167 = vmatprep.subr.bf16.mxu0 %v7189_v44  ;;  %1208 = vmatprep.subr.bf16.mxu1 %v7191_v45 }
  0xde   : > { %1168 = vmatpush1.bf16.msra.mxu0 %v7197_v48 }
  0xdf   : > { %1209 = vmatpush1.bf16.msra.mxu1 %v7201_v49  ;;  %1169 = vmatprep.subr.bf16.mxu0 %v7203_v50 }
  0xe0   : > { %1210 = vmatprep.subr.bf16.mxu1 %v7207_v51 }
  0xe1   : > { %721 = vmatmul.mubr.bf16.gmra.mrb[4].mxu0 %v457_v52  ;;  %834 = vmatmul.mubr.bf16.gmra.mrb[4].mxu1 %v457_v52  ;;  %v7360_v52 = vrot.slane %v496_v37, %v9517_v35 }
  0xe2   : > { %730 = vmatprep.mubr.bf16.mxu0 %v9521_v6  ;;  %843 = vmatprep.mubr.bf16.mxu1 %v9521_v6 }
  0xe3   : > { %1170 = vmatpush1.bf16.msra.mxu0 %v7212_v53  ;;  %1211 = vmatpush1.bf16.msra.mxu1 %v7214_v54 }
  0xe4   : > { %1171 = vmatprep.subr.bf16.mxu0 %v7216_v55  ;;  %1212 = vmatprep.subr.bf16.mxu1 %v7219_v56 }
  0xe7   : > { %1172 = vmatpush1.bf16.msra.mxu0 %v7225_v59  ;;  %1213 = vmatpush1.bf16.msra.mxu1 %v7229_v60 }
  0xe8   : > { %1173 = vmatprep.subr.bf16.mxu0 %v7233_v61  ;;  %1214 = vmatprep.subr.bf16.mxu1 %v7235_v62 }
  0xe9   : > { %731 = vmatmul.mubr.bf16.gmra.mrb[8].mxu0 %v458_v63  ;;  %844 = vmatmul.mubr.bf16.gmra.mrb[8].mxu1 %v458_v63 }
  0xea   : > { %740 = vmatprep.mubr.bf16.mxu0 %v9521_v6  ;;  %853 = vmatprep.mubr.bf16.mxu1 %v9521_v6 }
  0xeb   : > { %1174 = vmatpush1.bf16.msra.mxu0 %v7237_v0  ;;  %1215 = vmatpush1.bf16.msra.mxu1 %v7239_v1 }
  0xec   : > { %1175 = vmatprep.subr.bf16.mxu0 %v7241_v2  ;;  %1216 = vmatprep.subr.bf16.mxu1 %v7243_v3 }
  0xef   : > { %1176 = vmatpush1.bf16.msra.mxu0 %v7251_v7  ;;  %1217 = vmatpush1.bf16.msra.mxu1 %v7253_v8 }
  0xf0   : > { %1177 = vmatprep.subr.bf16.mxu0 %v7257_v9  ;;  %1218 = vmatprep.subr.bf16.mxu1 %v7259_v10 }
  0xf1   : > { %741 = vmatmul.mubr.bf16.gmra.mrb[12].mxu0 %v459_v11  ;;  %854 = vmatmul.mubr.bf16.gmra.mrb[12].mxu1 %v459_v11 }
  0xf2   : > { %750 = vmatprep.mubr.bf16.mxu0 %v9521_v6  ;;  %863 = vmatprep.mubr.bf16.mxu1 %v9521_v6 }
  0xf3   : > { %1178 = vmatpush1.bf16.msra.mxu0 %v7265_v12  ;;  %1219 = vmatpush1.bf16.msra.mxu1 %v7267_v13 }
  0xf4   : > { %1179 = vmatprep.subr.bf16.mxu0 %v7269_v14  ;;  %1220 = vmatprep.subr.bf16.mxu1 %v7271_v15 }
  0xf7   : > { %1180 = vmatpush1.bf16.msra.mxu0 %v7279_v18  ;;  %1221 = vmatpush1.bf16.msra.mxu1 %v7281_v19 }
  0xf8   : > { %1275 = vmatprep.subr.bf16.mxu0 %v7179_v39  ;;  %1316 = vmatprep.subr.bf16.mxu1 %v7181_v40 }
  0xf9   : > { %751 = vmatmul.mubr.bf16.gmra.mrb[16].mxu0 %v460_v20  ;;  %864 = vmatmul.mubr.bf16.gmra.mrb[16].mxu1 %v460_v20 }
  0xfa   : > { %760 = vmatprep.mubr.bf16.mxu0 %v9521_v6  ;;  %873 = vmatprep.mubr.bf16.mxu1 %v9521_v6 }
 0x101   : > { %761 = vmatmul.mubr.bf16.gmra.mrb[20].mxu0 %v461_v23  ;;  %874 = vmatmul.mubr.bf16.gmra.mrb[20].mxu1 %v461_v23 }
 0x102   : > { %770 = vmatprep.mubr.bf16.mxu0 %v9521_v6  ;;  %883 = vmatprep.mubr.bf16.mxu1 %v9521_v6 }
 0x109   : > { %771 = vmatmul.mubr.bf16.gmra.mrb[24].mxu0 %v462_v26  ;;  %884 = vmatmul.mubr.bf16.gmra.mrb[24].mxu1 %v462_v26 }
 0x10a   : > { %780 = vmatprep.mubr.bf16.mxu0 %v9521_v6  ;;  %893 = vmatprep.mubr.bf16.mxu1 %v9521_v6 }
 0x111   : > { %781 = vmatmul.mubr.bf16.gmra.mrb[28].mxu0 %v463_v29  ;;  %894 = vmatmul.mubr.bf16.gmra.mrb[28].mxu1 %v463_v29 }
 0x112   : > { %1197 = vmatprep.mubr.bf16.mxu0 %v9521_v6  ;;  %1238 = vmatprep.mubr.bf16.mxu1 %v9521_v6 }
 0x119   : > { %1198 = vmatmul.mubr.bf16.vlgmr.msra.gmra.mrb[32].mxu0 %v1004_v31  ;;  %1239 = vmatmul.mubr.bf16.vlgmr.msra.gmra.mrb[32].mxu1 %v1004_v31 }
 0x11a   : > { %1276 = vmatpush1.bf16.msra.mxu0 %v7183_v42  ;;  %1317 = vmatpush1.bf16.msra.mxu1 %v7187_v43 }
 0x11b   : > { %1277 = vmatprep.subr.bf16.mxu0 %v7189_v44  ;;  %1318 = vmatprep.subr.bf16.mxu1 %v7191_v45 }
 0x11c   : > { %1307 = vmatprep.mubr.bf16.mxu0 %v9521_v6  ;;  %1348 = vmatprep.mubr.bf16.mxu1 %v9521_v6 }
 0x11e   : > { %1278 = vmatpush1.bf16.msra.mxu0 %v7197_v48  ;;  %1319 = vmatpush1.bf16.msra.mxu1 %v7201_v49 }
 0x11f   : > { %1279 = vmatprep.subr.bf16.mxu0 %v7203_v50  ;;  %1320 = vmatprep.subr.bf16.mxu1 %v7207_v51 }
 0x122   : > { %1280 = vmatpush1.bf16.msra.mxu0 %v7212_v53  ;;  %1321 = vmatpush1.bf16.msra.mxu1 %v7214_v54 }
 0x123   : > { %1281 = vmatprep.subr.bf16.mxu0 %v7216_v55  ;;  %1322 = vmatprep.subr.bf16.mxu1 %v7219_v56 }
 0x126   : > { %1282 = vmatpush1.bf16.msra.mxu0 %v7225_v59  ;;  %1323 = vmatpush1.bf16.msra.mxu1 %v7229_v60 }
 0x127   : > { %1283 = vmatprep.subr.bf16.mxu0 %v7233_v61  ;;  %1324 = vmatprep.subr.bf16.mxu1 %v7235_v62 }
 0x12a   : > { %1284 = vmatpush1.bf16.msra.mxu0 %v7237_v0  ;;  %1325 = vmatpush1.bf16.msra.mxu1 %v7239_v1 }
 0x12b   : > { %1285 = vmatprep.subr.bf16.mxu0 %v7241_v2  ;;  %1326 = vmatprep.subr.bf16.mxu1 %v7243_v3 }
 0x12e   : > { %1286 = vmatpush1.bf16.msra.mxu0 %v7251_v7  ;;  %1327 = vmatpush1.bf16.msra.mxu1 %v7253_v8 }
 0x12f   : > { %1287 = vmatprep.subr.bf16.mxu0 %v7257_v9  ;;  %1328 = vmatprep.subr.bf16.mxu1 %v7259_v10 }
 0x132   : > { %1288 = vmatpush1.bf16.msra.mxu0 %v7265_v12  ;;  %1329 = vmatpush1.bf16.msra.mxu1 %v7267_v13 }
 0x133   : > { %1289 = vmatprep.subr.bf16.mxu0 %v7269_v14  ;;  %1330 = vmatprep.subr.bf16.mxu1 %v7271_v15 }
 0x136   : > { %1290 = vmatpush1.bf16.msra.mxu0 %v7279_v18  ;;  %1331 = vmatpush1.bf16.msra.mxu1 %v7281_v19 }
 0x137   : > { %1388 = vmatprep.subr.bf16.mxu0 %v7179_v39  ;;  %1429 = vmatprep.subr.bf16.mxu1 %v7181_v40 }
 0x1ac   : > { %v7354_v46 = vpop.f32.mrb[0].mxu0  ;;  %v7356_v47 = vpop.f32.mrb[0].mxu1 }
 0x1ad   : > { %v7366_v58 = vpop.f32.mrb[1].mxu0  ;;  %v7368_v63 = vpop.f32.mrb[1].mxu1 }
 0x1ae   : > { %v716_v5 = vpop.f32.mrb[2].mxu0  ;;  %v829_v11 = vpop.f32.mrb[2].mxu1 }
 0x1af   : > { %v7375_v16 = vadd.f32 %v716_v5, %v7364_v57  ;;  %v718_v17 = vpop.f32.mrb[3].mxu0  ;;  %v7378_v20 = vadd.f32 %v829_v11, %v7352_v41  ;;  %v831_v21 = vpop.f32.mrb[3].mxu1 }
 0x1b0   : > { %v7381_v22 = vadd.f32 %v718_v17, %v7372_v4  ;;  %v7384_v23 = vadd.f32 %v831_v21, %v7360_v52 }
 0x1b4   : > { %v722_v24 = vpop.f32.mrb[4].mxu0  ;;  %v835_v25 = vpop.f32.mrb[4].mxu1 }
 0x1b5   : > { %v7387_v26 = vadd.f32 %v722_v24, %v7364_v57  ;;  %v724_v27 = vpop.f32.mrb[5].mxu0  ;;  %v7390_v28 = vadd.f32 %v835_v25, %v7352_v41  ;;  %v837_v29 = vpop.f32.mrb[5].mxu1 }
 0x1b6   : > { %v7393_v30 = vadd.f32 %v724_v27, %v7372_v4  ;;  %v726_v31 = vpop.f32.mrb[6].mxu0  ;;  %v7396_v32 = vadd.f32 %v837_v29, %v7360_v52  ;;  %v839_v37 = vpop.f32.mrb[6].mxu1 }
 0x1b7   : > { %v7399_v5 = vadd.f32 %v726_v31, %v7364_v57  ;;  %v728_v11 = vpop.f32.mrb[7].mxu0  ;;  %v7402_v17 = vadd.f32 %v839_v37, %v7352_v41  ;;  %v841_v21 = vpop.f32.mrb[7].mxu1 }
 0x1b8   : > { %v7405_v24 = vadd.f32 %v728_v11, %v7372_v4  ;;  %v7408_v25 = vadd.f32 %v841_v21, %v7360_v52 }
 0x1b9   : > { %9548 = vst [vmem:[#allocation25_spill] sm:$0xff] %v7402_v17 }
 0x1ba   : > { %9549 = vst [vmem:[#allocation26_spill] sm:$0xff] %v7405_v24  ;;  %9550 = vst [vmem:[#allocation27_spill] sm:$0xff] %v7408_v25 }
 0x1bc   : > { %v732_v27 = vpop.f32.mrb[8].mxu0  ;;  %v845_v35 = vpop.f32.mrb[8].mxu1 }
 0x1bd   : > { %v7411_v29 = vadd.f32 %v732_v27, %v7364_v57  ;;  %v734_v38 = vpop.f32.mrb[9].mxu0  ;;  %v7414_v31 = vadd.f32 %v845_v35, %v7352_v41  ;;  %v847_v34 = vpop.f32.mrb[9].mxu1 }
 0x1be   : > { %v7417_v37 = vadd.f32 %v734_v38, %v7372_v4  ;;  %v736_v36 = vpop.f32.mrb[10].mxu0  ;;  %v7420_v11 = vadd.f32 %v847_v34, %v7360_v52  ;;  %v849_v6 = vpop.f32.mrb[10].mxu1 }
 0x1bf   : > { %9551 = vst [vmem:[#allocation28_spill] sm:$0xff] %v7411_v29  ;;  %9552 = vst [vmem:[#allocation29_spill] sm:$0xff] %v7414_v31  ;;  %v7423_v21 = vadd.f32 %v736_v36, %v7364_v57  ;;  %v738_v33 = vpop.f32.mrb[11].mxu0  ;;  %v7426_v27 = vadd.f32 %v849_v6, %v7352_v41  ;;  %v851_v29 = vpop.f32.mrb[11].mxu1 }
 0x1c0   : > { %9553 = vst [vmem:[#allocation30_spill] sm:$0xff] %v7417_v37  ;;  %9554 = vst [vmem:[#allocation31_spill] sm:$0xff] %v7420_v11  ;;  %v7429_v35 = vadd.f32 %v738_v33, %v7372_v4  ;;  %v7432_v31 = vadd.f32 %v851_v29, %v7360_v52 }
 0x1c1   : > { %9555 = vst [vmem:[#allocation32_spill] sm:$0xff] %v7423_v21  ;;  %9556 = vst [vmem:[#allocation33_spill] sm:$0xff] %v7426_v27 }
 0x1c2   : > { %9557 = vst [vmem:[#allocation34_spill] sm:$0xff] %v7429_v35  ;;  %9558 = vst [vmem:[#allocation35_spill] sm:$0xff] %v7432_v31 }
 0x1c4   : > { %v742_v38 = vpop.f32.mrb[12].mxu0  ;;  %v855_v37 = vpop.f32.mrb[12].mxu1 }
 0x1c5   : > { %v7435_v34 = vadd.f32 %v742_v38, %v7364_v57  ;;  %v744_v11 = vpop.f32.mrb[13].mxu0  ;;  %v7438_v36 = vadd.f32 %v855_v37, %v7352_v41  ;;  %v857_v21 = vpop.f32.mrb[13].mxu1 }
 0x1c6   : > { %v7441_v6 = vadd.f32 %v744_v11, %v7372_v4  ;;  %v746_v27 = vpop.f32.mrb[14].mxu0  ;;  %v7444_v33 = vadd.f32 %v857_v21, %v7360_v52  ;;  %v859_v35 = vpop.f32.mrb[14].mxu1 }
 0x1c7   : > { %9559 = vst [vmem:[#allocation36_spill] sm:$0xff] %v7435_v34  ;;  %9560 = vst [vmem:[#allocation37_spill] sm:$0xff] %v7438_v36  ;;  %v7447_v29 = vadd.f32 %v746_v27, %v7364_v57  ;;  %v748_v31 = vpop.f32.mrb[15].mxu0  ;;  %v7450_v38 = vadd.f32 %v859_v35, %v7352_v41  ;;  %v861_v34 = vpop.f32.mrb[15].mxu1 }
 0x1c8   : > { %9561 = vst [vmem:[#allocation38_spill] sm:$0xff] %v7441_v6  ;;  %9562 = vst [vmem:[#allocation39_spill] sm:$0xff] %v7444_v33  ;;  %v7453_v37 = vadd.f32 %v748_v31, %v7372_v4  ;;  %v7456_v36 = vadd.f32 %v861_v34, %v7360_v52 }
 0x1c9   : > { %9563 = vst [vmem:[#allocation40_spill] sm:$0xff] %v7447_v29  ;;  %9564 = vst [vmem:[#allocation41_spill] sm:$0xff] %v7450_v38 }
 0x1ca   : > { %9565 = vst [vmem:[#allocation42_spill] sm:$0xff] %v7453_v37  ;;  %9566 = vst [vmem:[#allocation43_spill] sm:$0xff] %v7456_v36 }
 0x1cc   : > { %v752_v11 = vpop.f32.mrb[16].mxu0  ;;  %v865_v6 = vpop.f32.mrb[16].mxu1 }
 0x1cd   : > { %v7459_v21 = vadd.f32 %v752_v11, %v7364_v57  ;;  %v754_v33 = vpop.f32.mrb[17].mxu0  ;;  %v7462_v27 = vadd.f32 %v865_v6, %v7352_v41  ;;  %v867_v29 = vpop.f32.mrb[17].mxu1 }
 0x1ce   : > { %v7465_v35 = vadd.f32 %v754_v33, %v7372_v4  ;;  %v756_v38 = vpop.f32.mrb[18].mxu0  ;;  %v7468_v31 = vadd.f32 %v867_v29, %v7360_v52  ;;  %v869_v37 = vpop.f32.mrb[18].mxu1 }
 0x1cf   : > { %9567 = vst [vmem:[#allocation44_spill] sm:$0xff] %v7459_v21  ;;  %9568 = vst [vmem:[#allocation45_spill] sm:$0xff] %v7462_v27  ;;  %v7471_v34 = vadd.f32 %v756_v38, %v7364_v57  ;;  %v758_v36 = vpop.f32.mrb[19].mxu0  ;;  %v7474_v11 = vadd.f32 %v869_v37, %v7352_v41  ;;  %v871_v21 = vpop.f32.mrb[19].mxu1 }
 0x1d0   : > { %9569 = vst [vmem:[#allocation46_spill] sm:$0xff] %v7465_v35  ;;  %9570 = vst [vmem:[#allocation47_spill] sm:$0xff] %v7468_v31  ;;  %v7477_v6 = vadd.f32 %v758_v36, %v7372_v4  ;;  %v7480_v27 = vadd.f32 %v871_v21, %v7360_v52 }
 0x1d1   : > { %9571 = vst [vmem:[#allocation48_spill] sm:$0xff] %v7471_v34  ;;  %9572 = vst [vmem:[#allocation49_spill] sm:$0xff] %v7474_v11 }
 0x1d2   : > { %9573 = vst [vmem:[#allocation50_spill] sm:$0xff] %v7477_v6  ;;  %9574 = vst [vmem:[#allocation51_spill] sm:$0xff] %v7480_v27 }
 0x1d4   : > { %v762_v33 = vpop.f32.mrb[20].mxu0  ;;  %v875_v35 = vpop.f32.mrb[20].mxu1 }
 0x1d5   : > { %v7483_v29 = vadd.f32 %v762_v33, %v7364_v57  ;;  %v764_v31 = vpop.f32.mrb[21].mxu0  ;;  %v7486_v38 = vadd.f32 %v875_v35, %v7352_v41  ;;  %v877_v34 = vpop.f32.mrb[21].mxu1 }
 0x1d6   : > { %v7489_v37 = vadd.f32 %v764_v31, %v7372_v4  ;;  %v766_v11 = vpop.f32.mrb[22].mxu0  ;;  %v7492_v36 = vadd.f32 %v877_v34, %v7360_v52  ;;  %v879_v6 = vpop.f32.mrb[22].mxu1 }
 0x1d7   : > { %9575 = vst [vmem:[#allocation52_spill] sm:$0xff] %v7483_v29  ;;  %9576 = vst [vmem:[#allocation53_spill] sm:$0xff] %v7486_v38  ;;  %v7495_v21 = vadd.f32 %v766_v11, %v7364_v57  ;;  %v768_v27 = vpop.f32.mrb[23].mxu0  ;;  %v7498_v33 = vadd.f32 %v879_v6, %v7352_v41  ;;  %v881_v29 = vpop.f32.mrb[23].mxu1 }
 0x1d8   : > { %9577 = vst [vmem:[#allocation54_spill] sm:$0xff] %v7489_v37  ;;  %9578 = vst [vmem:[#allocation55_spill] sm:$0xff] %v7492_v36  ;;  %v7501_v35 = vadd.f32 %v768_v27, %v7372_v4  ;;  %v7504_v38 = vadd.f32 %v881_v29, %v7360_v52 }
 0x1d9   : > { %9579 = vst [vmem:[#allocation56_spill] sm:$0xff] %v7495_v21  ;;  %9580 = vst [vmem:[#allocation57_spill] sm:$0xff] %v7498_v33 }
 0x1da   : > { %9581 = vst [vmem:[#allocation58_spill] sm:$0xff] %v7501_v35  ;;  %9582 = vst [vmem:[#allocation59_spill] sm:$0xff] %v7504_v38 }
 0x1dc   : > { %v772_v31 = vpop.f32.mrb[24].mxu0  ;;  %v885_v37 = vpop.f32.mrb[24].mxu1 }
 0x1dd   : > { %v7507_v34 = vadd.f32 %v772_v31, %v7364_v57  ;;  %v774_v36 = vpop.f32.mrb[25].mxu0  ;;  %v7510_v11 = vadd.f32 %v885_v37, %v7352_v41  ;;  %v887_v21 = vpop.f32.mrb[25].mxu1 }
 0x1de   : > { %v7513_v6 = vadd.f32 %v774_v36, %v7372_v4  ;;  %v776_v33 = vpop.f32.mrb[26].mxu0  ;;  %v7516_v27 = vadd.f32 %v887_v21, %v7360_v52  ;;  %v889_v35 = vpop.f32.mrb[26].mxu1 }
 0x1df   : > { %9583 = vst [vmem:[#allocation60_spill] sm:$0xff] %v7507_v34  ;;  %9584 = vst [vmem:[#allocation61_spill] sm:$0xff] %v7510_v11  ;;  %v7519_v29 = vadd.f32 %v776_v33, %v7364_v57  ;;  %v778_v38 = vpop.f32.mrb[27].mxu0  ;;  %v7522_v31 = vadd.f32 %v889_v35, %v7352_v41  ;;  %v891_v34 = vpop.f32.mrb[27].mxu1 }
 0x1e0   : > { %9585 = vst [vmem:[#allocation62_spill] sm:$0xff] %v7513_v6  ;;  %9586 = vst [vmem:[#allocation63_spill] sm:$0xff] %v7516_v27  ;;  %v7525_v37 = vadd.f32 %v778_v38, %v7372_v4  ;;  %v7528_v11 = vadd.f32 %v891_v34, %v7360_v52 }
 0x1e1   : > { %9587 = vst [vmem:[#allocation64_spill] sm:$0xff] %v7519_v29  ;;  %9588 = vst [vmem:[#allocation65_spill] sm:$0xff] %v7522_v31 }
 0x1e2   : > { %9589 = vst [vmem:[#allocation66_spill] sm:$0xff] %v7525_v37  ;;  %9590 = vst [vmem:[#allocation67_spill] sm:$0xff] %v7528_v11 }
 0x1e4   : > { %v782_v36 = vpop.f32.mrb[28].mxu0  ;;  %v895_v6 = vpop.f32.mrb[28].mxu1 }
 0x1e5   : > { %v7531_v21 = vadd.f32 %v782_v36, %v7364_v57  ;;  %v784_v27 = vpop.f32.mrb[29].mxu0  ;;  %v7534_v33 = vadd.f32 %v895_v6, %v7352_v41  ;;  %v897_v29 = vpop.f32.mrb[29].mxu1 }
 0x1e6   : > { %v7537_v35 = vadd.f32 %v784_v27, %v7372_v4  ;;  %v786_v31 = vpop.f32.mrb[30].mxu0  ;;  %v7540_v38 = vadd.f32 %v897_v29, %v7360_v52  ;;  %v899_v37 = vpop.f32.mrb[30].mxu1  ;;  %v713_v27 = vadd.f32 %v7354_v46, %v7364_v57  ;;  %v826_v29 = vadd.f32 %v7356_v47, %v7352_v41 }
 0x1e7   : > { %9591 = vst [vmem:[#allocation68_spill] sm:$0xff] %v7531_v21  ;;  %9592 = vst [vmem:[#allocation69_spill] sm:$0xff] %v7534_v33  ;;  %v7543_v34 = vadd.f32 %v786_v31, %v7364_v57  ;;  %v788_v11 = vpop.f32.mrb[31].mxu0  ;;  %v7546_v36 = vadd.f32 %v899_v37, %v7352_v41  ;;  %v901_v21 = vpop.f32.mrb[31].mxu1  ;;  %v715_v31 = vadd.f32 %v7366_v58, %v7372_v4 }
 0x1e8   : > { %9593 = vst [vmem:[#allocation70_spill] sm:$0xff] %v7537_v35  ;;  %9594 = vst [vmem:[#allocation71_spill] sm:$0xff] %v7540_v38  ;;  %v7549_v6 = vadd.f32 %v788_v11, %v7372_v4  ;;  %v7552_v33 = vadd.f32 %v901_v21, %v7360_v52  ;;  %v828_v37 = vadd.f32 %v7368_v63, %v7360_v52 }
 0x1e9   : > { %9595 = vst [vmem:[#allocation72_spill] sm:$0xff] %v7543_v34  ;;  %9596 = vst [vmem:[#allocation73_spill] sm:$0xff] %v7546_v36 }
 0x1ea   : > { %9597 = vst [vmem:[#allocation74_spill] sm:$0xff] %v7549_v6  ;;  %9598 = vst [vmem:[#allocation75_spill] sm:$0xff] %v7552_v33 }
 0x1ec   : > { %v1199_v36 = vpop.f32.mrb[32].mxu0  ;;  %v1240_v34 = vpop.f32.mrb[32].mxu1 }
 0x1ed   : > { %v1247_v38 = vadd.f32 %v1199_v36, %v713_v27  ;;  %v1249_v11 = vadd.f32 %v1240_v34, %v826_v29  ;;  %v1201_v6 = vpop.f32.mrb[33].mxu0  ;;  %v1242_v35 = vpop.f32.mrb[33].mxu1  ;;  %v437_v27 = vld [vmem:[#allocation16] sm:$0xff] }
 0x1ee   : > { %v1248_v21 = vadd.f32 %v1201_v6, %v715_v31  ;;  %v1250_v33 = vadd.f32 %v1242_v35, %v828_v37  ;;  %v1203_v25 = vpop.f32.mrb[34].mxu0  ;;  %v1244_v24 = vpop.f32.mrb[34].mxu1 }
 0x1ef   : > { %v1251_v46 = vmul.f32 0.5, %v1247_v38  ;;  %v1204_v57 = vpop.f32.mrb[35].mxu0  ;;  %v1245_v17 = vpop.f32.mrb[35].mxu1  ;;  %v1253_v47 = vmul.f32 0.5, %v1249_v11  ;;  %v9599_v11 = vmov 0  }
 0x1f0   : > { %v1252_v41 = vmul.f32 0.5, %v1248_v21 }
 0x1f1   : > { %6118 = vtanh.f32 %v1251_v46 }
 0x1f2   : > { %6120 = vtanh.f32 %v1252_v41 }
 0x1f3   : > { %6122 = vtanh.f32 %v1250_v33 }
 0x1f4   : > { %6124 = vtanh.f32 %v1253_v47 }
 0x1fb   : > { %v6119_v58 = vpop.eup %6118 }
 0x1fc   : > { %v1257_v52 = vadd.f32 1.0, %v6119_v58  ;;  %v6121_v63 = vpop.eup %6120 }
 0x1fd   : > { %v1258_v34 = vadd.f32 1.0, %v6121_v63  ;;  %v6123_v36 = vpop.eup %6122 }
 0x1fe   : > { %v1260_v4 = vmul.f32 0.5, %v1257_v52  ;;  %v6125_v17 = vpop.eup %6124 }
 0x1ff   : > { %v1261_v6 = vmul.f32 0.5, %v1258_v34  ;;  %v1259_v38 = vadd.f32 1.0, %v6125_v17 }
 0x200   : > { %v1265_v35 = vmul.f32 %v6123_v36, %v1260_v4 }
 0x201   : > { %v1264_v25 = vmul.f32 %v1261_v6, %v437_v27  ;;  %v1262_v29 = vmul.f32 0.5, %v1259_v38 }
 0x203   : > { %v7562_v24 = vadd.f32 %v1265_v35, %v1264_v25 }
 0x205   : > { %6126 = vtanh.f32 %v7562_v24 }
 0x20f   : > { %v6127_v33 = vpop.eup %6126 }
 0x210   : > { %v1268_v31 = vmul.f32 %v6127_v33, %v1262_v29 }
 0x212   : > { %v1269_v37 = vpack.c.bf16 %v1268_v31, %v1268_v31 }
 0x214   : > { %1270 = vst [vmem:[#allocation2] sm:$0xf] %v1269_v37  ;;  %1308 = vmatmul.mubr.bf16.vlgmr.msra.gmra.mrb[36].mxu0 %v1269_v37  ;;  %1349 = vmatmul.mubr.bf16.vlgmr.msra.gmra.mrb[36].mxu1 %v1269_v37 }
 0x215   : > { %1389 = vmatpush1.bf16.msra.mxu0 %v7183_v42  ;;  %1430 = vmatpush1.bf16.msra.mxu1 %v7187_v43 }
 0x216   : > { %1390 = vmatprep.subr.bf16.mxu0 %v7189_v44  ;;  %1431 = vmatprep.subr.bf16.mxu1 %v7191_v45 }
 0x217   : > { %1420 = vmatprep.mubr.bf16.mxu0 %v9599_v11  ;;  %1461 = vmatprep.mubr.bf16.mxu1 %v9599_v11 }
 0x219   : > { %1391 = vmatpush1.bf16.msra.mxu0 %v7197_v48  ;;  %1432 = vmatpush1.bf16.msra.mxu1 %v7201_v49 }
 0x21a   : > { %1392 = vmatprep.subr.bf16.mxu0 %v7203_v50  ;;  %1433 = vmatprep.subr.bf16.mxu1 %v7207_v51 }
 0x21d   : > { %1393 = vmatpush1.bf16.msra.mxu0 %v7212_v53  ;;  %1434 = vmatpush1.bf16.msra.mxu1 %v7214_v54 }
 0x21e   : > { %1394 = vmatprep.subr.bf16.mxu0 %v7216_v55  ;;  %1435 = vmatprep.subr.bf16.mxu1 %v7219_v56 }
 0x221   : > { %1395 = vmatpush1.bf16.msra.mxu0 %v7225_v59  ;;  %1436 = vmatpush1.bf16.msra.mxu1 %v7229_v60 }
 0x222   : > { %1396 = vmatprep.subr.bf16.mxu0 %v7233_v61  ;;  %1437 = vmatprep.subr.bf16.mxu1 %v7235_v62 }
 0x225   : > { %1397 = vmatpush1.bf16.msra.mxu0 %v7237_v0  ;;  %1438 = vmatpush1.bf16.msra.mxu1 %v7239_v1 }
 0x226   : > { %1398 = vmatprep.subr.bf16.mxu0 %v7241_v2  ;;  %1439 = vmatprep.subr.bf16.mxu1 %v7243_v3 }
 0x229   : > { %1399 = vmatpush1.bf16.msra.mxu0 %v7251_v7  ;;  %1440 = vmatpush1.bf16.msra.mxu1 %v7253_v8 }
 0x22a   : > { %1400 = vmatprep.subr.bf16.mxu0 %v7257_v9  ;;  %1441 = vmatprep.subr.bf16.mxu1 %v7259_v10 }
 0x22d   : > { %1401 = vmatpush1.bf16.msra.mxu0 %v7265_v12  ;;  %1442 = vmatpush1.bf16.msra.mxu1 %v7267_v13 }
 0x22e   : > { %1402 = vmatprep.subr.bf16.mxu0 %v7269_v14  ;;  %1443 = vmatprep.subr.bf16.mxu1 %v7271_v15 }
 0x231   : > { %1403 = vmatpush1.bf16.msra.mxu0 %v7279_v18  ;;  %1444 = vmatpush1.bf16.msra.mxu1 %v7281_v19 }
 0x232   : > { %1498 = vmatprep.subr.bf16.mxu0 %v7179_v39  ;;  %1539 = vmatprep.subr.bf16.mxu1 %v7181_v40 }
 0x2e7   : > { %v1309_v21 = vpop.f32.mrb[36].mxu0  ;;  %v1350_v46 = vpop.f32.mrb[36].mxu1 }
 0x2e8   : > { %v1357_v57 = vadd.f32 %v1309_v21, %v7375_v16  ;;  %v1359_v41 = vadd.f32 %v1350_v46, %v7378_v20  ;;  %v1311_v47 = vpop.f32.mrb[37].mxu0  ;;  %v1352_v58 = vpop.f32.mrb[37].mxu1 }
 0x2e9   : > { %v1358_v52 = vadd.f32 %v1311_v47, %v7381_v22  ;;  %v1360_v63 = vadd.f32 %v1352_v58, %v7384_v23  ;;  %v1313_v4 = vpop.f32.mrb[38].mxu0  ;;  %v1354_v34 = vpop.f32.mrb[38].mxu1 }
 0x2ea   : > { %v1361_v36 = vmul.f32 0.5, %v1357_v57  ;;  %v1314_v27 = vpop.f32.mrb[39].mxu0  ;;  %v1355_v6 = vpop.f32.mrb[39].mxu1  ;;  %v1363_v40 = vmul.f32 0.5, %v1359_v41 }
 0x2eb   : > { %v1362_v39 = vmul.f32 0.5, %v1358_v52 }
 0x2ec   : > { %6128 = vtanh.f32 %v1361_v36 }
 0x2ed   : > { %6130 = vtanh.f32 %v1362_v39  ;;  %v7653_v39 = vld [vmem:[#allocation12] ss:$16 sps:$4 sm:$0xff]  }
 0x2ee   : > { %6132 = vtanh.f32 %v1360_v63 }
 0x2ef   : > { %6134 = vtanh.f32 %v1363_v40  ;;  %v7656_v40 = vld [vmem:[#allocation12 + $0x8] ss:$16 sps:$4 sm:$0xff]  }
 0x2f6   : > { %v6129_v35 = vpop.eup %6128 }
 0x2f7   : > { %v1367_v16 = vadd.f32 1.0, %v6129_v35  ;;  %v6131_v25 = vpop.eup %6130  ;;  %v7659_v35 = vld [vmem:[#allocation12 + $0x24] ss:$16 sps:$4 sm:$0xff]  }
 0x2f8   : > { %v1368_v17 = vadd.f32 1.0, %v6131_v25  ;;  %v6133_v38 = vpop.eup %6132  ;;  %v7667_v25 = vld [vmem:[#allocation12 + $0x20] ss:$16 sps:$4 sm:$0xff]  }
 0x2f9   : > { %v1370_v20 = vmul.f32 0.5, %v1367_v16  ;;  %v6135_v31 = vpop.eup %6134  ;;  %v7662_v16 = vld [vmem:[#allocation12 + $0x2c] ss:$16 sps:$4 sm:$0xff]  }
 0x2fa   : > { %v1371_v22 = vmul.f32 0.5, %v1368_v17  ;;  %v1369_v37 = vadd.f32 1.0, %v6135_v31  ;;  %v7673_v17 = vld [vmem:[#allocation12 + $0x44] ss:$16 sps:$4 sm:$0xff]   ;;  %v7691_v31 = vld [vmem:[#allocation12 + $0x60] ss:$16 sps:$4 sm:$0xff]  }
 0x2fb   : > { %v1375_v29 = vmul.f32 %v6133_v38, %v1370_v20  ;;  %v7670_v20 = vld [vmem:[#allocation12 + $0x28] ss:$16 sps:$4 sm:$0xff]   ;;  %v7676_v38 = vld [vmem:[#allocation12 + $0x4c] ss:$16 sps:$4 sm:$0xff]  }
 0x2fc   : > { %v1374_v23 = vmul.f32 %v1371_v22, %v7562_v24  ;;  %v1372_v21 = vmul.f32 0.5, %v1369_v37  ;;  %v7679_v22 = vld [vmem:[#allocation12 + $0x40] ss:$16 sps:$4 sm:$0xff]   ;;  %v7694_v37 = vld [vmem:[#allocation12 + $0x68] ss:$16 sps:$4 sm:$0xff]  }
 0x2fe   : > { %v7604_v33 = vadd.f32 %v1375_v29, %v1374_v23  ;;  %v7682_v29 = vld [vmem:[#allocation12 + $0x48] ss:$16 sps:$4 sm:$0xff]   ;;  %v7685_v23 = vld [vmem:[#allocation12 + $0x64] ss:$16 sps:$4 sm:$0xff]  }
 0x300   : > { %6136 = vtanh.f32 %v7604_v33 }
 0x30a   : > { %v6137_v46 = vpop.eup %6136 }
 0x30b   : > { %v1378_v57 = vmul.f32 %v6137_v46, %v1372_v21  ;;  %v7697_v21 = vld [vmem:[#allocation12 + $0x84] ss:$16 sps:$4 sm:$0xff]   ;;  %v7700_v46 = vld [vmem:[#allocation12 + $0x8c] ss:$16 sps:$4 sm:$0xff]  }
 0x30d   : > { %v1379_v41 = vpack.c.bf16 %v1378_v57, %v1378_v57  ;;  %v7703_v57 = vld [vmem:[#allocation12 + $0x80] ss:$16 sps:$4 sm:$0xff]  }
 0x30f   : > { %v1381_v47 = vrot.slane %v1379_v41, 4  ;;  %1421 = vmatmul.mubr.bf16.vlgmr.msra.gmra.mrb[40].mxu0 %v1379_v41  ;;  %1462 = vmatmul.mubr.bf16.vlgmr.msra.gmra.mrb[40].mxu1 %v1379_v41  ;;  %v7706_v41 = vld [vmem:[#allocation12 + $0x88] ss:$16 sps:$4 sm:$0xff]  }
 0x310   : > { %1499 = vmatpush1.bf16.msra.mxu0 %v7183_v42  ;;  %1540 = vmatpush1.bf16.msra.mxu1 %v7187_v43  ;;  %v7639_v42 = vld [vmem:[#allocation12 + $0x4] ss:$16 sps:$4 sm:$0xff]   ;;  %v7642_v43 = vld [vmem:[#allocation12 + $0xc] ss:$16 sps:$4 sm:$0xff]  }
 0x311   : > { %1383 = vst [vmem:[#allocation2] sm:$0xf0] %v1381_v47  ;;  %1500 = vmatprep.subr.bf16.mxu0 %v7189_v44  ;;  %1541 = vmatprep.subr.bf16.mxu1 %v7191_v45  ;;  %v7709_v47 = vld [vmem:[#allocation12 + $0xa4] ss:$16 sps:$4 sm:$0xff]  }
 0x312   : > { %1530 = vmatprep.mubr.bf16.mxu0 %v9599_v11  ;;  %1571 = vmatprep.mubr.bf16.mxu1 %v9599_v11 }
 0x314   : > { %1501 = vmatpush1.bf16.msra.mxu0 %v7197_v48  ;;  %1542 = vmatpush1.bf16.msra.mxu1 %v7201_v49 }
 0x315   : > { %1502 = vmatprep.subr.bf16.mxu0 %v7203_v50  ;;  %1543 = vmatprep.subr.bf16.mxu1 %v7207_v51 }
 0x318   : > { %1503 = vmatpush1.bf16.msra.mxu0 %v7212_v53  ;;  %1544 = vmatpush1.bf16.msra.mxu1 %v7214_v54 }
 0x319   : > { %1504 = vmatprep.subr.bf16.mxu0 %v7216_v55  ;;  %1545 = vmatprep.subr.bf16.mxu1 %v7219_v56 }
 0x31c   : > { %1505 = vmatpush1.bf16.msra.mxu0 %v7225_v59  ;;  %1546 = vmatpush1.bf16.msra.mxu1 %v7229_v60 }
 0x31d   : > { %1506 = vmatprep.subr.bf16.mxu0 %v7233_v61  ;;  %1547 = vmatprep.subr.bf16.mxu1 %v7235_v62 }
 0x320   : > { %1507 = vmatpush1.bf16.msra.mxu0 %v7237_v0  ;;  %1548 = vmatpush1.bf16.msra.mxu1 %v7239_v1 }
 0x321   : > { %1508 = vmatprep.subr.bf16.mxu0 %v7241_v2  ;;  %1549 = vmatprep.subr.bf16.mxu1 %v7243_v3 }
 0x324   : > { %1509 = vmatpush1.bf16.msra.mxu0 %v7251_v7  ;;  %1550 = vmatpush1.bf16.msra.mxu1 %v7253_v8 }
 0x325   : > { %1510 = vmatprep.subr.bf16.mxu0 %v7257_v9  ;;  %1551 = vmatprep.subr.bf16.mxu1 %v7259_v10 }
 0x328   : > { %1511 = vmatpush1.bf16.msra.mxu0 %v7265_v12  ;;  %1552 = vmatpush1.bf16.msra.mxu1 %v7267_v13 }
 0x329   : > { %1512 = vmatprep.subr.bf16.mxu0 %v7269_v14  ;;  %1553 = vmatprep.subr.bf16.mxu1 %v7271_v15 }
 0x32c   : > { %1513 = vmatpush1.bf16.msra.mxu0 %v7279_v18  ;;  %1554 = vmatpush1.bf16.msra.mxu1 %v7281_v19 }
 0x32d   : > { %1611 = vmatprep.subr.bf16.mxu0 %v7639_v42  ;;  %1652 = vmatprep.subr.bf16.mxu1 %v7642_v43 }
 0x3e2   : > { %v1422_v44 = vpop.f32.mrb[40].mxu0  ;;  %v1463_v45 = vpop.f32.mrb[40].mxu1 }
 0x3e3   : > { %v1470_v48 = vadd.f32 %v1422_v44, %v7387_v26  ;;  %v1472_v49 = vadd.f32 %v1463_v45, %v7390_v28  ;;  %v1424_v50 = vpop.f32.mrb[41].mxu0  ;;  %v1465_v51 = vpop.f32.mrb[41].mxu1  ;;  %v7712_v44 = vld [vmem:[#allocation12 + $0xac] ss:$16 sps:$4 sm:$0xff]  }
 0x3e4   : > { %v1471_v53 = vadd.f32 %v1424_v50, %v7393_v30  ;;  %v1473_v54 = vadd.f32 %v1465_v51, %v7396_v32  ;;  %v1426_v55 = vpop.f32.mrb[42].mxu0  ;;  %v1467_v56 = vpop.f32.mrb[42].mxu1 }
 0x3e5   : > { %v1474_v59 = vmul.f32 0.5, %v1470_v48  ;;  %v1427_v60 = vpop.f32.mrb[43].mxu0  ;;  %v1468_v61 = vpop.f32.mrb[43].mxu1  ;;  %v1476_v0 = vmul.f32 0.5, %v1472_v49  ;;  %v9601_v48 = vld [vmem:[#allocation26_spill] sm:$0xff]  ;;  %v9602_v49 = vld [vmem:[#allocation27_spill] sm:$0xff] }
 0x3e6   : > { %v1475_v62 = vmul.f32 0.5, %v1471_v53 }
 0x3e7   : > { %6138 = vtanh.f32 %v1474_v59 }
 0x3e8   : > { %6140 = vtanh.f32 %v1475_v62 }
 0x3e9   : > { %6142 = vtanh.f32 %v1473_v54 }
 0x3ea   : > { %6144 = vtanh.f32 %v1476_v0 }
 0x3f1   : > { %v6139_v1 = vpop.eup %6138 }
 0x3f2   : > { %v1480_v2 = vadd.f32 1.0, %v6139_v1  ;;  %v6141_v3 = vpop.eup %6140 }
 0x3f3   : > { %v1481_v28 = vadd.f32 1.0, %v6141_v3  ;;  %v6143_v24 = vpop.eup %6142 }
 0x3f4   : > { %v1483_v26 = vmul.f32 0.5, %v1480_v2  ;;  %v6145_v63 = vpop.eup %6144 }
 0x3f5   : > { %v1484_v30 = vmul.f32 0.5, %v1481_v28  ;;  %v1482_v4 = vadd.f32 1.0, %v6145_v63 }
 0x3f6   : > { %v1488_v58 = vmul.f32 %v6143_v24, %v1483_v26 }
 0x3f7   : > { %v1487_v32 = vmul.f32 %v1484_v30, %v7604_v33  ;;  %v1485_v34 = vmul.f32 0.5, %v1482_v4  ;;  %v7688_v33 = vld [vmem:[#allocation12 + $0x6c] ss:$16 sps:$4 sm:$0xff]   ;;  %v7760_v4 = vld [vmem:[#allocation12 + $0xa8] ss:$16 sps:$4 sm:$0xff]  }
 0x3f9   : > { %v7650_v52 = vadd.f32 %v1488_v58, %v1487_v32 }
 0x3fb   : > { %6146 = vtanh.f32 %v7650_v52 }
 0x405   : > { %v6147_v36 = vpop.eup %6146 }
 0x406   : > { %v1491_v27 = vmul.f32 %v6147_v36, %v1485_v34  ;;  %v7763_v34 = vld [vmem:[#allocation12 + $0xc4] ss:$16 sps:$4 sm:$0xff]   ;;  %v7766_v36 = vld [vmem:[#allocation12 + $0xcc] ss:$16 sps:$4 sm:$0xff]  }
 0x408   : > { %v1492_v6 = vpack.c.bf16 %v1491_v27, %v1491_v27  ;;  %v7769_v27 = vld [vmem:[#allocation12 + $0xc0] ss:$16 sps:$4 sm:$0xff]  }
 0x40a   : > { %1493 = vst [vmem:[#allocation2 + $0x8] sm:$0xf] %v1492_v6  ;;  %1531 = vmatmul.mubr.bf16.vlgmr.msra.gmra.mrb[44].mxu0 %v1492_v6  ;;  %1572 = vmatmul.mubr.bf16.vlgmr.msra.gmra.mrb[44].mxu1 %v1492_v6  ;;  %v7772_v6 = vld [vmem:[#allocation12 + $0xc8] ss:$16 sps:$4 sm:$0xff]  }
 0x40b   : > { %1612 = vmatpush1.bf16.msra.mxu0 %v7653_v39  ;;  %1653 = vmatpush1.bf16.msra.mxu1 %v7656_v40 }
 0x40c   : > { %1613 = vmatprep.subr.bf16.mxu0 %v7659_v35  ;;  %1654 = vmatprep.subr.bf16.mxu1 %v7662_v16 }
 0x40d   : > { %1643 = vmatprep.mubr.bf16.mxu0 %v9599_v11  ;;  %1684 = vmatprep.mubr.bf16.mxu1 %v9599_v11 }
 0x40f   : > { %1614 = vmatpush1.bf16.msra.mxu0 %v7667_v25  ;;  %1655 = vmatpush1.bf16.msra.mxu1 %v7670_v20 }
 0x410   : > { %1615 = vmatprep.subr.bf16.mxu0 %v7673_v17  ;;  %1656 = vmatprep.subr.bf16.mxu1 %v7676_v38 }
 0x413   : > { %1616 = vmatpush1.bf16.msra.mxu0 %v7679_v22  ;;  %1657 = vmatpush1.bf16.msra.mxu1 %v7682_v29 }
 0x414   : > { %1617 = vmatprep.subr.bf16.mxu0 %v7685_v23  ;;  %1658 = vmatprep.subr.bf16.mxu1 %v7688_v33 }
 0x417   : > { %1618 = vmatpush1.bf16.msra.mxu0 %v7691_v31  ;;  %1659 = vmatpush1.bf16.msra.mxu1 %v7694_v37 }
 0x418   : > { %1619 = vmatprep.subr.bf16.mxu0 %v7697_v21  ;;  %1660 = vmatprep.subr.bf16.mxu1 %v7700_v46 }
 0x41b   : > { %1620 = vmatpush1.bf16.msra.mxu0 %v7703_v57  ;;  %1661 = vmatpush1.bf16.msra.mxu1 %v7706_v41 }
 0x41c   : > { %1621 = vmatprep.subr.bf16.mxu0 %v7709_v47  ;;  %1662 = vmatprep.subr.bf16.mxu1 %v7712_v44 }
 0x41f   : > { %1622 = vmatpush1.bf16.msra.mxu0 %v7251_v7  ;;  %1663 = vmatpush1.bf16.msra.mxu1 %v7253_v8 }
 0x420   : > { %1623 = vmatprep.subr.bf16.mxu0 %v7257_v9  ;;  %1664 = vmatprep.subr.bf16.mxu1 %v7259_v10  ;;  %v9600_v10 = vld [vmem:[#allocation25_spill] sm:$0xff] }
 0x423   : > { %1624 = vmatpush1.bf16.msra.mxu0 %v7265_v12  ;;  %1665 = vmatpush1.bf16.msra.mxu1 %v7267_v13 }
 0x424   : > { %1625 = vmatprep.subr.bf16.mxu0 %v7269_v14  ;;  %1666 = vmatprep.subr.bf16.mxu1 %v7271_v15 }
 0x427   : > { %1626 = vmatpush1.bf16.msra.mxu0 %v7279_v18  ;;  %1667 = vmatpush1.bf16.msra.mxu1 %v7281_v19 }
 0x428   : > { %1721 = vmatprep.subr.bf16.mxu0 %v7639_v42  ;;  %1762 = vmatprep.subr.bf16.mxu1 %v7642_v43 }
 0x4dd   : > { %v1532_v7 = vpop.f32.mrb[44].mxu0  ;;  %v1573_v8 = vpop.f32.mrb[44].mxu1 }
 0x4de   : > { %v1580_v9 = vadd.f32 %v1532_v7, %v7399_v5  ;;  %v1582_v12 = vadd.f32 %v1573_v8, %v9600_v10  ;;  %v1534_v45 = vpop.f32.mrb[45].mxu0  ;;  %v1575_v13 = vpop.f32.mrb[45].mxu1  ;;  %v7775_v7 = vld [vmem:[#allocation12 + $0xe4] ss:$16 sps:$4 sm:$0xff]   ;;  %v7778_v8 = vld [vmem:[#allocation12 + $0xec] ss:$16 sps:$4 sm:$0xff]  }
 0x4df   : > { %v1581_v14 = vadd.f32 %v1534_v45, %v9601_v48  ;;  %v1583_v15 = vadd.f32 %v1575_v13, %v9602_v49  ;;  %v1536_v50 = vpop.f32.mrb[46].mxu0  ;;  %v1577_v18 = vpop.f32.mrb[46].mxu1  ;;  %v7784_v10 = vld [vmem:[#allocation12 + $0xe8] ss:$16 sps:$4 sm:$0xff]   ;;  %v9603_v13 = vld [vmem:[#allocation28_spill] sm:$0xff] }
 0x4e0   : > { %v1584_v51 = vmul.f32 0.5, %v1580_v9  ;;  %v1537_v19 = vpop.f32.mrb[47].mxu0  ;;  %v1578_v53 = vpop.f32.mrb[47].mxu1  ;;  %v1586_v55 = vmul.f32 0.5, %v1582_v12  ;;  %v7781_v9 = vld [vmem:[#allocation12 + $0xe0] ss:$16 sps:$4 sm:$0xff]  }
 0x4e1   : > { %v1585_v54 = vmul.f32 0.5, %v1581_v14  ;;  %v9604_v14 = vld [vmem:[#allocation29_spill] sm:$0xff]  ;;  %v9605_v18 = vld [vmem:[#allocation30_spill] sm:$0xff]  ;;  %v9606_v19 = vld [vmem:[#allocation31_spill] sm:$0xff] }
 0x4e2   : > { %6148 = vtanh.f32 %v1584_v51 }
 0x4e3   : > { %6150 = vtanh.f32 %v1585_v54 }
 0x4e4   : > { %6152 = vtanh.f32 %v1583_v15 }
 0x4e5   : > { %6154 = vtanh.f32 %v1586_v55 }
 0x4ec   : > { %v6149_v56 = vpop.eup %6148 }
 0x4ed   : > { %v1590_v5 = vadd.f32 1.0, %v6149_v56  ;;  %v6151_v59 = vpop.eup %6150 }
 0x4ee   : > { %v1591_v61 = vadd.f32 1.0, %v6151_v59  ;;  %v6153_v62 = vpop.eup %6152 }
 0x4ef   : > { %v1593_v60 = vmul.f32 0.5, %v1590_v5  ;;  %v6155_v26 = vpop.eup %6154 }
 0x4f0   : > { %v1594_v0 = vmul.f32 0.5, %v1591_v61  ;;  %v1592_v28 = vadd.f32 1.0, %v6155_v26 }
 0x4f1   : > { %v1598_v1 = vmul.f32 %v6153_v62, %v1593_v60 }
 0x4f2   : > { %v1597_v2 = vmul.f32 %v1594_v0, %v7650_v52  ;;  %v1595_v24 = vmul.f32 0.5, %v1592_v28  ;;  %v7757_v52 = vld [vmem:[#allocation12 + $0xa0] ss:$16 sps:$4 sm:$0xff]  }
 0x4f4   : > { %v7732_v3 = vadd.f32 %v1598_v1, %v1597_v2 }
 0x4f6   : > { %6156 = vtanh.f32 %v7732_v3 }
 0x500   : > { %v6157_v30 = vpop.eup %6156 }
 0x501   : > { %v1601_v58 = vmul.f32 %v6157_v30, %v1595_v24 }
 0x503   : > { %v1602_v32 = vpack.c.bf16 %v1601_v58, %v1601_v58 }
 0x505   : > { %v1604_v63 = vrot.slane %v1602_v32, 4  ;;  %1644 = vmatmul.mubr.bf16.vlgmr.msra.gmra.mrb[48].mxu0 %v1602_v32  ;;  %1685 = vmatmul.mubr.bf16.vlgmr.msra.gmra.mrb[48].mxu1 %v1602_v32 }
 0x506   : > { %1722 = vmatpush1.bf16.msra.mxu0 %v7653_v39  ;;  %1763 = vmatpush1.bf16.msra.mxu1 %v7656_v40 }
 0x507   : > { %1606 = vst [vmem:[#allocation2 + $0x8] sm:$0xf0] %v1604_v63  ;;  %1723 = vmatprep.subr.bf16.mxu0 %v7659_v35  ;;  %1764 = vmatprep.subr.bf16.mxu1 %v7662_v16 }
 0x508   : > { %1753 = vmatprep.mubr.bf16.mxu0 %v9599_v11  ;;  %1794 = vmatprep.mubr.bf16.mxu1 %v9599_v11 }
 0x50a   : > { %1724 = vmatpush1.bf16.msra.mxu0 %v7667_v25  ;;  %1765 = vmatpush1.bf16.msra.mxu1 %v7670_v20 }
 0x50b   : > { %1725 = vmatprep.subr.bf16.mxu0 %v7673_v17  ;;  %1766 = vmatprep.subr.bf16.mxu1 %v7676_v38 }
 0x50e   : > { %1726 = vmatpush1.bf16.msra.mxu0 %v7679_v22  ;;  %1767 = vmatpush1.bf16.msra.mxu1 %v7682_v29 }
 0x50f   : > { %1727 = vmatprep.subr.bf16.mxu0 %v7685_v23  ;;  %1768 = vmatprep.subr.bf16.mxu1 %v7688_v33 }
 0x512   : > { %1728 = vmatpush1.bf16.msra.mxu0 %v7691_v31  ;;  %1769 = vmatpush1.bf16.msra.mxu1 %v7694_v37 }
 0x513   : > { %1729 = vmatprep.subr.bf16.mxu0 %v7697_v21  ;;  %1770 = vmatprep.subr.bf16.mxu1 %v7700_v46 }
 0x516   : > { %1730 = vmatpush1.bf16.msra.mxu0 %v7703_v57  ;;  %1771 = vmatpush1.bf16.msra.mxu1 %v7706_v41 }
 0x517   : > { %1731 = vmatprep.subr.bf16.mxu0 %v7709_v47  ;;  %1772 = vmatprep.subr.bf16.mxu1 %v7712_v44 }
 0x51a   : > { %1732 = vmatpush1.bf16.msra.mxu0 %v7757_v52  ;;  %1773 = vmatpush1.bf16.msra.mxu1 %v7760_v4 }
 0x51b   : > { %1733 = vmatprep.subr.bf16.mxu0 %v7763_v34  ;;  %1774 = vmatprep.subr.bf16.mxu1 %v7766_v36 }
 0x51e   : > { %1734 = vmatpush1.bf16.msra.mxu0 %v7769_v27  ;;  %1775 = vmatpush1.bf16.msra.mxu1 %v7772_v6 }
 0x51f   : > { %1735 = vmatprep.subr.bf16.mxu0 %v7775_v7  ;;  %1776 = vmatprep.subr.bf16.mxu1 %v7778_v8 }
 0x522   : > { %1736 = vmatpush1.bf16.msra.mxu0 %v7781_v9  ;;  %1777 = vmatpush1.bf16.msra.mxu1 %v7784_v10 }
 0x523   : > { %1834 = vmatprep.subr.bf16.mxu0 %v7639_v42  ;;  %1875 = vmatprep.subr.bf16.mxu1 %v7642_v43 }
 0x5d8   : > { %v1645_v12 = vpop.f32.mrb[48].mxu0  ;;  %v1686_v45 = vpop.f32.mrb[48].mxu1 }
 0x5d9   : > { %v1693_v48 = vadd.f32 %v1645_v12, %v9603_v13  ;;  %v1695_v49 = vadd.f32 %v1686_v45, %v9604_v14  ;;  %v1647_v15 = vpop.f32.mrb[49].mxu0  ;;  %v1688_v50 = vpop.f32.mrb[49].mxu1 }
 0x5da   : > { %v1694_v51 = vadd.f32 %v1647_v15, %v9605_v18  ;;  %v1696_v53 = vadd.f32 %v1688_v50, %v9606_v19  ;;  %v1649_v54 = vpop.f32.mrb[50].mxu0  ;;  %v1690_v55 = vpop.f32.mrb[50].mxu1  ;;  %v9607_v15 = vld [vmem:[#allocation32_spill] sm:$0xff]  ;;  %v9608_v18 = vld [vmem:[#allocation33_spill] sm:$0xff] }
 0x5db   : > { %v1697_v56 = vmul.f32 0.5, %v1693_v48  ;;  %v1650_v5 = vpop.f32.mrb[51].mxu0  ;;  %v1691_v59 = vpop.f32.mrb[51].mxu1  ;;  %v1699_v61 = vmul.f32 0.5, %v1695_v49  ;;  %v9609_v54 = vld [vmem:[#allocation34_spill] sm:$0xff] }
 0x5dc   : > { %v1698_v60 = vmul.f32 0.5, %v1694_v51 }
 0x5dd   : > { %6158 = vtanh.f32 %v1697_v56  ;;  %v9610_v56 = vld [vmem:[#allocation35_spill] sm:$0xff] }
 0x5de   : > { %6160 = vtanh.f32 %v1698_v60 }
 0x5df   : > { %6162 = vtanh.f32 %v1696_v53 }
 0x5e0   : > { %6164 = vtanh.f32 %v1699_v61 }
 0x5e7   : > { %v6159_v62 = vpop.eup %6158 }
 0x5e8   : > { %v1703_v0 = vadd.f32 1.0, %v6159_v62  ;;  %v6161_v1 = vpop.eup %6160 }
 0x5e9   : > { %v1704_v26 = vadd.f32 1.0, %v6161_v1  ;;  %v6163_v28 = vpop.eup %6162 }
 0x5ea   : > { %v1706_v2 = vmul.f32 0.5, %v1703_v0  ;;  %v6165_v63 = vpop.eup %6164 }
 0x5eb   : > { %v1707_v24 = vmul.f32 0.5, %v1704_v26  ;;  %v1705_v12 = vadd.f32 1.0, %v6165_v63 }
 0x5ec   : > { %v1711_v30 = vmul.f32 %v6163_v28, %v1706_v2 }
 0x5ed   : > { %v1710_v58 = vmul.f32 %v1707_v24, %v7732_v3  ;;  %v1708_v45 = vmul.f32 0.5, %v1705_v12 }
 0x5ef   : > { %v7794_v32 = vadd.f32 %v1711_v30, %v1710_v58 }
 0x5f1   : > { %6166 = vtanh.f32 %v7794_v32 }
 0x5fb   : > { %v6167_v13 = vpop.eup %6166 }
 0x5fc   : > { %v1714_v48 = vmul.f32 %v6167_v13, %v1708_v45 }
 0x5fe   : > { %v1715_v14 = vpack.c.bf16 %v1714_v48, %v1714_v48 }
 0x600   : > { %1716 = vst [vmem:[#allocation2 + $0x10] sm:$0xf] %v1715_v14  ;;  %1754 = vmatmul.mubr.bf16.vlgmr.msra.gmra.mrb[52].mxu0 %v1715_v14  ;;  %1795 = vmatmul.mubr.bf16.vlgmr.msra.gmra.mrb[52].mxu1 %v1715_v14 }
 0x601   : > { %1835 = vmatpush1.bf16.msra.mxu0 %v7653_v39  ;;  %1876 = vmatpush1.bf16.msra.mxu1 %v7656_v40 }
 0x602   : > { %1836 = vmatprep.subr.bf16.mxu0 %v7659_v35  ;;  %1877 = vmatprep.subr.bf16.mxu1 %v7662_v16 }
 0x603   : > { %1866 = vmatprep.mubr.bf16.mxu0 %v9599_v11  ;;  %1907 = vmatprep.mubr.bf16.mxu1 %v9599_v11 }
 0x605   : > { %1837 = vmatpush1.bf16.msra.mxu0 %v7667_v25  ;;  %1878 = vmatpush1.bf16.msra.mxu1 %v7670_v20 }
 0x606   : > { %1838 = vmatprep.subr.bf16.mxu0 %v7673_v17  ;;  %1879 = vmatprep.subr.bf16.mxu1 %v7676_v38 }
 0x609   : > { %1839 = vmatpush1.bf16.msra.mxu0 %v7679_v22  ;;  %1880 = vmatpush1.bf16.msra.mxu1 %v7682_v29 }
 0x60a   : > { %1840 = vmatprep.subr.bf16.mxu0 %v7685_v23  ;;  %1881 = vmatprep.subr.bf16.mxu1 %v7688_v33 }
 0x60d   : > { %1841 = vmatpush1.bf16.msra.mxu0 %v7691_v31  ;;  %1882 = vmatpush1.bf16.msra.mxu1 %v7694_v37 }
 0x60e   : > { %1842 = vmatprep.subr.bf16.mxu0 %v7697_v21  ;;  %1883 = vmatprep.subr.bf16.mxu1 %v7700_v46 }
 0x611   : > { %1843 = vmatpush1.bf16.msra.mxu0 %v7703_v57  ;;  %1884 = vmatpush1.bf16.msra.mxu1 %v7706_v41 }
 0x612   : > { %1844 = vmatprep.subr.bf16.mxu0 %v7709_v47  ;;  %1885 = vmatprep.subr.bf16.mxu1 %v7712_v44 }
 0x615   : > { %1845 = vmatpush1.bf16.msra.mxu0 %v7757_v52  ;;  %1886 = vmatpush1.bf16.msra.mxu1 %v7760_v4 }
 0x616   : > { %1846 = vmatprep.subr.bf16.mxu0 %v7763_v34  ;;  %1887 = vmatprep.subr.bf16.mxu1 %v7766_v36 }
 0x619   : > { %1847 = vmatpush1.bf16.msra.mxu0 %v7769_v27  ;;  %1888 = vmatpush1.bf16.msra.mxu1 %v7772_v6 }
 0x61a   : > { %1848 = vmatprep.subr.bf16.mxu0 %v7775_v7  ;;  %1889 = vmatprep.subr.bf16.mxu1 %v7778_v8 }
 0x61d   : > { %1849 = vmatpush1.bf16.msra.mxu0 %v7781_v9  ;;  %1890 = vmatpush1.bf16.msra.mxu1 %v7784_v10 }
 0x61e   : > { %1944 = vmatprep.subr.bf16.mxu0 %v7639_v42  ;;  %1985 = vmatprep.subr.bf16.mxu1 %v7642_v43 }
 0x6d3   : > { %v1755_v3 = vpop.f32.mrb[52].mxu0  ;;  %v1796_v49 = vpop.f32.mrb[52].mxu1 }
 0x6d4   : > { %v1803_v50 = vadd.f32 %v1755_v3, %v9607_v15  ;;  %v1805_v51 = vadd.f32 %v1796_v49, %v9608_v18  ;;  %v1757_v19 = vpop.f32.mrb[53].mxu0  ;;  %v1798_v53 = vpop.f32.mrb[53].mxu1 }
 0x6d5   : > { %v1804_v55 = vadd.f32 %v1757_v19, %v9609_v54  ;;  %v1806_v5 = vadd.f32 %v1798_v53, %v9610_v56  ;;  %v1759_v59 = vpop.f32.mrb[54].mxu0  ;;  %v1800_v60 = vpop.f32.mrb[54].mxu1  ;;  %v9611_v53 = vld [vmem:[#allocation36_spill] sm:$0xff] }
 0x6d6   : > { %v1807_v61 = vmul.f32 0.5, %v1803_v50  ;;  %v1760_v62 = vpop.f32.mrb[55].mxu0  ;;  %v1801_v0 = vpop.f32.mrb[55].mxu1  ;;  %v1809_v2 = vmul.f32 0.5, %v1805_v51  ;;  %v9613_v60 = vld [vmem:[#allocation38_spill] sm:$0xff] }
 0x6d7   : > { %v1808_v1 = vmul.f32 0.5, %v1804_v55  ;;  %v9612_v55 = vld [vmem:[#allocation37_spill] sm:$0xff]  ;;  %v9614_v62 = vld [vmem:[#allocation39_spill] sm:$0xff] }
 0x6d8   : > { %6168 = vtanh.f32 %v1807_v61 }
 0x6d9   : > { %6170 = vtanh.f32 %v1808_v1 }
 0x6da   : > { %6172 = vtanh.f32 %v1806_v5 }
 0x6db   : > { %6174 = vtanh.f32 %v1809_v2 }
 0x6e2   : > { %v6169_v26 = vpop.eup %6168 }
 0x6e3   : > { %v1813_v28 = vadd.f32 1.0, %v6169_v26  ;;  %v6171_v24 = vpop.eup %6170 }
 0x6e4   : > { %v1814_v58 = vadd.f32 1.0, %v6171_v24  ;;  %v6173_v63 = vpop.eup %6172 }
 0x6e5   : > { %v1816_v30 = vmul.f32 0.5, %v1813_v28  ;;  %v6175_v14 = vpop.eup %6174 }
 0x6e6   : > { %v1817_v12 = vmul.f32 0.5, %v1814_v58  ;;  %v1815_v3 = vadd.f32 1.0, %v6175_v14 }
 0x6e7   : > { %v1821_v45 = vmul.f32 %v6173_v63, %v1816_v30 }
 0x6e8   : > { %v1820_v13 = vmul.f32 %v1817_v12, %v7794_v32  ;;  %v1818_v49 = vmul.f32 0.5, %v1815_v3 }
 0x6ea   : > { %v7836_v48 = vadd.f32 %v1821_v45, %v1820_v13 }
 0x6ec   : > { %6176 = vtanh.f32 %v7836_v48 }
 0x6f6   : > { %v6177_v15 = vpop.eup %6176 }
 0x6f7   : > { %v1824_v50 = vmul.f32 %v6177_v15, %v1818_v49 }
 0x6f9   : > { %v1825_v18 = vpack.c.bf16 %v1824_v50, %v1824_v50 }
 0x6fb   : > { %v1827_v51 = vrot.slane %v1825_v18, 4  ;;  %1867 = vmatmul.mubr.bf16.vlgmr.msra.gmra.mrb[56].mxu0 %v1825_v18  ;;  %1908 = vmatmul.mubr.bf16.vlgmr.msra.gmra.mrb[56].mxu1 %v1825_v18 }
 0x6fc   : > { %1945 = vmatpush1.bf16.msra.mxu0 %v7653_v39  ;;  %1986 = vmatpush1.bf16.msra.mxu1 %v7656_v40 }
 0x6fd   : > { %1829 = vst [vmem:[#allocation2 + $0x10] sm:$0xf0] %v1827_v51  ;;  %1946 = vmatprep.subr.bf16.mxu0 %v7659_v35  ;;  %1987 = vmatprep.subr.bf16.mxu1 %v7662_v16 }
 0x6fe   : > { %1976 = vmatprep.mubr.bf16.mxu0 %v9599_v11  ;;  %2017 = vmatprep.mubr.bf16.mxu1 %v9599_v11 }
 0x700   : > { %1947 = vmatpush1.bf16.msra.mxu0 %v7667_v25  ;;  %1988 = vmatpush1.bf16.msra.mxu1 %v7670_v20 }
 0x701   : > { %1948 = vmatprep.subr.bf16.mxu0 %v7673_v17  ;;  %1989 = vmatprep.subr.bf16.mxu1 %v7676_v38 }
 0x704   : > { %1949 = vmatpush1.bf16.msra.mxu0 %v7679_v22  ;;  %1990 = vmatpush1.bf16.msra.mxu1 %v7682_v29 }
 0x705   : > { %1950 = vmatprep.subr.bf16.mxu0 %v7685_v23  ;;  %1991 = vmatprep.subr.bf16.mxu1 %v7688_v33 }
 0x708   : > { %1951 = vmatpush1.bf16.msra.mxu0 %v7691_v31  ;;  %1992 = vmatpush1.bf16.msra.mxu1 %v7694_v37 }
 0x709   : > { %1952 = vmatprep.subr.bf16.mxu0 %v7697_v21  ;;  %1993 = vmatprep.subr.bf16.mxu1 %v7700_v46 }
 0x70c   : > { %1953 = vmatpush1.bf16.msra.mxu0 %v7703_v57  ;;  %1994 = vmatpush1.bf16.msra.mxu1 %v7706_v41 }
 0x70d   : > { %1954 = vmatprep.subr.bf16.mxu0 %v7709_v47  ;;  %1995 = vmatprep.subr.bf16.mxu1 %v7712_v44 }
 0x710   : > { %1955 = vmatpush1.bf16.msra.mxu0 %v7757_v52  ;;  %1996 = vmatpush1.bf16.msra.mxu1 %v7760_v4 }
 0x711   : > { %1956 = vmatprep.subr.bf16.mxu0 %v7763_v34  ;;  %1997 = vmatprep.subr.bf16.mxu1 %v7766_v36 }
 0x714   : > { %1957 = vmatpush1.bf16.msra.mxu0 %v7769_v27  ;;  %1998 = vmatpush1.bf16.msra.mxu1 %v7772_v6 }
 0x715   : > { %1958 = vmatprep.subr.bf16.mxu0 %v7775_v7  ;;  %1999 = vmatprep.subr.bf16.mxu1 %v7778_v8 }
 0x718   : > { %1959 = vmatpush1.bf16.msra.mxu0 %v7781_v9  ;;  %2000 = vmatpush1.bf16.msra.mxu1 %v7784_v10 }
 0x719   : > { %2057 = vmatprep.subr.bf16.mxu0 %v7639_v42  ;;  %2098 = vmatprep.subr.bf16.mxu1 %v7642_v43 }
 0x7ce   : > { %v1868_v32 = vpop.f32.mrb[56].mxu0  ;;  %v1909_v19 = vpop.f32.mrb[56].mxu1 }
 0x7cf   : > { %v1916_v54 = vadd.f32 %v1868_v32, %v9611_v53  ;;  %v1918_v56 = vadd.f32 %v1909_v19, %v9612_v55  ;;  %v1870_v5 = vpop.f32.mrb[57].mxu0  ;;  %v1911_v59 = vpop.f32.mrb[57].mxu1 }
 0x7d0   : > { %v1917_v61 = vadd.f32 %v1870_v5, %v9613_v60  ;;  %v1919_v0 = vadd.f32 %v1911_v59, %v9614_v62  ;;  %v1872_v1 = vpop.f32.mrb[58].mxu0  ;;  %v1913_v2 = vpop.f32.mrb[58].mxu1  ;;  %v9615_v5 = vld [vmem:[#allocation40_spill] sm:$0xff]  ;;  %v9616_v60 = vld [vmem:[#allocation41_spill] sm:$0xff] }
 0x7d1   : > { %v1920_v26 = vmul.f32 0.5, %v1916_v54  ;;  %v1873_v28 = vpop.f32.mrb[59].mxu0  ;;  %v1914_v24 = vpop.f32.mrb[59].mxu1  ;;  %v1922_v58 = vmul.f32 0.5, %v1918_v56  ;;  %v9617_v1 = vld [vmem:[#allocation42_spill] sm:$0xff] }
 0x7d2   : > { %v1921_v30 = vmul.f32 0.5, %v1917_v61 }
 0x7d3   : > { %6178 = vtanh.f32 %v1920_v26  ;;  %v9618_v26 = vld [vmem:[#allocation43_spill] sm:$0xff] }
 0x7d4   : > { %6180 = vtanh.f32 %v1921_v30 }
 0x7d5   : > { %6182 = vtanh.f32 %v1919_v0 }
 0x7d6   : > { %6184 = vtanh.f32 %v1922_v58 }
 0x7dd   : > { %v6179_v63 = vpop.eup %6178 }
 0x7de   : > { %v1926_v12 = vadd.f32 1.0, %v6179_v63  ;;  %v6181_v45 = vpop.eup %6180 }
 0x7df   : > { %v1927_v14 = vadd.f32 1.0, %v6181_v45  ;;  %v6183_v3 = vpop.eup %6182 }
 0x7e0   : > { %v1929_v13 = vmul.f32 0.5, %v1926_v12  ;;  %v6185_v51 = vpop.eup %6184 }
 0x7e1   : > { %v1930_v49 = vmul.f32 0.5, %v1927_v14  ;;  %v1928_v32 = vadd.f32 1.0, %v6185_v51 }
 0x7e2   : > { %v1934_v15 = vmul.f32 %v6183_v3, %v1929_v13 }
 0x7e3   : > { %v1933_v50 = vmul.f32 %v1930_v49, %v7836_v48  ;;  %v1931_v19 = vmul.f32 0.5, %v1928_v32 }
 0x7e5   : > { %v7878_v18 = vadd.f32 %v1934_v15, %v1933_v50 }
 0x7e7   : > { %6186 = vtanh.f32 %v7878_v18 }
 0x7f1   : > { %v6187_v53 = vpop.eup %6186 }
 0x7f2   : > { %v1937_v54 = vmul.f32 %v6187_v53, %v1931_v19 }
 0x7f4   : > { %v1938_v55 = vpack.c.bf16 %v1937_v54, %v1937_v54 }
 0x7f6   : > { %1939 = vst [vmem:[#allocation2 + $0x18] sm:$0xf] %v1938_v55  ;;  %1977 = vmatmul.mubr.bf16.vlgmr.msra.gmra.mrb[60].mxu0 %v1938_v55  ;;  %2018 = vmatmul.mubr.bf16.vlgmr.msra.gmra.mrb[60].mxu1 %v1938_v55 }
 0x7f7   : > { %2058 = vmatpush1.bf16.msra.mxu0 %v7653_v39  ;;  %2099 = vmatpush1.bf16.msra.mxu1 %v7656_v40 }
 0x7f8   : > { %2059 = vmatprep.subr.bf16.mxu0 %v7659_v35  ;;  %2100 = vmatprep.subr.bf16.mxu1 %v7662_v16 }
 0x7f9   : > { %2089 = vmatprep.mubr.bf16.mxu0 %v9599_v11  ;;  %2130 = vmatprep.mubr.bf16.mxu1 %v9599_v11 }
 0x7fb   : > { %2060 = vmatpush1.bf16.msra.mxu0 %v7667_v25  ;;  %2101 = vmatpush1.bf16.msra.mxu1 %v7670_v20 }
 0x7fc   : > { %2061 = vmatprep.subr.bf16.mxu0 %v7673_v17  ;;  %2102 = vmatprep.subr.bf16.mxu1 %v7676_v38 }
 0x7ff   : > { %2062 = vmatpush1.bf16.msra.mxu0 %v7679_v22  ;;  %2103 = vmatpush1.bf16.msra.mxu1 %v7682_v29 }
 0x800   : > { %2063 = vmatprep.subr.bf16.mxu0 %v7685_v23  ;;  %2104 = vmatprep.subr.bf16.mxu1 %v7688_v33 }
 0x803   : > { %2064 = vmatpush1.bf16.msra.mxu0 %v7691_v31  ;;  %2105 = vmatpush1.bf16.msra.mxu1 %v7694_v37 }
 0x804   : > { %2065 = vmatprep.subr.bf16.mxu0 %v7697_v21  ;;  %2106 = vmatprep.subr.bf16.mxu1 %v7700_v46 }
 0x807   : > { %2066 = vmatpush1.bf16.msra.mxu0 %v7703_v57  ;;  %2107 = vmatpush1.bf16.msra.mxu1 %v7706_v41 }
 0x808   : > { %2067 = vmatprep.subr.bf16.mxu0 %v7709_v47  ;;  %2108 = vmatprep.subr.bf16.mxu1 %v7712_v44 }
 0x80b   : > { %2068 = vmatpush1.bf16.msra.mxu0 %v7757_v52  ;;  %2109 = vmatpush1.bf16.msra.mxu1 %v7760_v4 }
 0x80c   : > { %2069 = vmatprep.subr.bf16.mxu0 %v7763_v34  ;;  %2110 = vmatprep.subr.bf16.mxu1 %v7766_v36 }
 0x80f   : > { %2070 = vmatpush1.bf16.msra.mxu0 %v7769_v27  ;;  %2111 = vmatpush1.bf16.msra.mxu1 %v7772_v6 }
 0x810   : > { %2071 = vmatprep.subr.bf16.mxu0 %v7775_v7  ;;  %2112 = vmatprep.subr.bf16.mxu1 %v7778_v8 }
 0x813   : > { %2072 = vmatpush1.bf16.msra.mxu0 %v7781_v9  ;;  %2113 = vmatpush1.bf16.msra.mxu1 %v7784_v10 }
 0x814   : > { %2167 = vmatprep.subr.bf16.mxu0 %v7639_v42  ;;  %2208 = vmatprep.subr.bf16.mxu1 %v7642_v43 }
 0x8c9   : > { %v1978_v48 = vpop.f32.mrb[60].mxu0  ;;  %v2019_v56 = vpop.f32.mrb[60].mxu1 }
 0x8ca   : > { %v2026_v59 = vadd.f32 %v1978_v48, %v9615_v5  ;;  %v2028_v61 = vadd.f32 %v2019_v56, %v9616_v60  ;;  %v1980_v62 = vpop.f32.mrb[61].mxu0  ;;  %v2021_v0 = vpop.f32.mrb[61].mxu1 }
 0x8cb   : > { %v2027_v2 = vadd.f32 %v1980_v62, %v9617_v1  ;;  %v2029_v28 = vadd.f32 %v2021_v0, %v9618_v26  ;;  %v1982_v24 = vpop.f32.mrb[62].mxu0  ;;  %v2023_v30 = vpop.f32.mrb[62].mxu1  ;;  %v9619_v0 = vld [vmem:[#allocation44_spill] sm:$0xff] }
 0x8cc   : > { %v2030_v58 = vmul.f32 0.5, %v2026_v59  ;;  %v1983_v63 = vpop.f32.mrb[63].mxu0  ;;  %v2024_v12 = vpop.f32.mrb[63].mxu1  ;;  %v2032_v13 = vmul.f32 0.5, %v2028_v61  ;;  %v9621_v30 = vld [vmem:[#allocation46_spill] sm:$0xff] }
 0x8cd   : > { %v2031_v45 = vmul.f32 0.5, %v2027_v2  ;;  %v9620_v2 = vld [vmem:[#allocation45_spill] sm:$0xff]  ;;  %v9622_v63 = vld [vmem:[#allocation47_spill] sm:$0xff] }
 0x8ce   : > { %6188 = vtanh.f32 %v2030_v58 }
 0x8cf   : > { %6190 = vtanh.f32 %v2031_v45 }
 0x8d0   : > { %6192 = vtanh.f32 %v2029_v28 }
 0x8d1   : > { %6194 = vtanh.f32 %v2032_v13 }
 0x8d8   : > { %v6189_v14 = vpop.eup %6188 }
 0x8d9   : > { %v2036_v3 = vadd.f32 1.0, %v6189_v14  ;;  %v6191_v49 = vpop.eup %6190 }
 0x8da   : > { %v2037_v50 = vadd.f32 1.0, %v6191_v49  ;;  %v6193_v51 = vpop.eup %6192 }
 0x8db   : > { %v2039_v15 = vmul.f32 0.5, %v2036_v3  ;;  %v6195_v55 = vpop.eup %6194 }
 0x8dc   : > { %v2040_v32 = vmul.f32 0.5, %v2037_v50  ;;  %v2038_v48 = vadd.f32 1.0, %v6195_v55 }
 0x8dd   : > { %v2044_v19 = vmul.f32 %v6193_v51, %v2039_v15 }
 0x8de   : > { %v2043_v53 = vmul.f32 %v2040_v32, %v7878_v18  ;;  %v2041_v56 = vmul.f32 0.5, %v2038_v48 }
 0x8e0   : > { %v7920_v54 = vadd.f32 %v2044_v19, %v2043_v53 }
 0x8e2   : > { %6196 = vtanh.f32 %v7920_v54 }
 0x8ec   : > { %v6197_v5 = vpop.eup %6196 }
 0x8ed   : > { %v2047_v59 = vmul.f32 %v6197_v5, %v2041_v56 }
 0x8ef   : > { %v2048_v60 = vpack.c.bf16 %v2047_v59, %v2047_v59 }
 0x8f1   : > { %v2050_v61 = vrot.slane %v2048_v60, 4  ;;  %2090 = vmatmul.mubr.bf16.vlgmr.msra.gmra.mrb[64].mxu0 %v2048_v60  ;;  %2131 = vmatmul.mubr.bf16.vlgmr.msra.gmra.mrb[64].mxu1 %v2048_v60 }
 0x8f2   : > { %2168 = vmatpush1.bf16.msra.mxu0 %v7653_v39  ;;  %2209 = vmatpush1.bf16.msra.mxu1 %v7656_v40 }
 0x8f3   : > { %2052 = vst [vmem:[#allocation2 + $0x18] sm:$0xf0] %v2050_v61  ;;  %2169 = vmatprep.subr.bf16.mxu0 %v7659_v35  ;;  %2210 = vmatprep.subr.bf16.mxu1 %v7662_v16 }
 0x8f4   : > { %2199 = vmatprep.mubr.bf16.mxu0 %v9599_v11  ;;  %2240 = vmatprep.mubr.bf16.mxu1 %v9599_v11 }
 0x8f6   : > { %2170 = vmatpush1.bf16.msra.mxu0 %v7667_v25  ;;  %2211 = vmatpush1.bf16.msra.mxu1 %v7670_v20 }
 0x8f7   : > { %2171 = vmatprep.subr.bf16.mxu0 %v7673_v17  ;;  %2212 = vmatprep.subr.bf16.mxu1 %v7676_v38 }
 0x8fa   : > { %2172 = vmatpush1.bf16.msra.mxu0 %v7679_v22  ;;  %2213 = vmatpush1.bf16.msra.mxu1 %v7682_v29 }
 0x8fb   : > { %2173 = vmatprep.subr.bf16.mxu0 %v7685_v23  ;;  %2214 = vmatprep.subr.bf16.mxu1 %v7688_v33 }
 0x8fe   : > { %2174 = vmatpush1.bf16.msra.mxu0 %v7691_v31  ;;  %2215 = vmatpush1.bf16.msra.mxu1 %v7694_v37 }
 0x8ff   : > { %2175 = vmatprep.subr.bf16.mxu0 %v7697_v21  ;;  %2216 = vmatprep.subr.bf16.mxu1 %v7700_v46 }
 0x902   : > { %2176 = vmatpush1.bf16.msra.mxu0 %v7703_v57  ;;  %2217 = vmatpush1.bf16.msra.mxu1 %v7706_v41 }
 0x903   : > { %2177 = vmatprep.subr.bf16.mxu0 %v7709_v47  ;;  %2218 = vmatprep.subr.bf16.mxu1 %v7712_v44 }
 0x906   : > { %2178 = vmatpush1.bf16.msra.mxu0 %v7757_v52  ;;  %2219 = vmatpush1.bf16.msra.mxu1 %v7760_v4 }
 0x907   : > { %2179 = vmatprep.subr.bf16.mxu0 %v7763_v34  ;;  %2220 = vmatprep.subr.bf16.mxu1 %v7766_v36 }
 0x90a   : > { %2180 = vmatpush1.bf16.msra.mxu0 %v7769_v27  ;;  %2221 = vmatpush1.bf16.msra.mxu1 %v7772_v6 }
 0x90b   : > { %2181 = vmatprep.subr.bf16.mxu0 %v7775_v7  ;;  %2222 = vmatprep.subr.bf16.mxu1 %v7778_v8 }
 0x90e   : > { %2182 = vmatpush1.bf16.msra.mxu0 %v7781_v9  ;;  %2223 = vmatpush1.bf16.msra.mxu1 %v7784_v10 }
 0x90f   : > { %2280 = vmatprep.subr.bf16.mxu0 %v7639_v42  ;;  %2321 = vmatprep.subr.bf16.mxu1 %v7642_v43 }
 0x9c4   : > { %v2091_v18 = vpop.f32.mrb[64].mxu0  ;;  %v2132_v62 = vpop.f32.mrb[64].mxu1 }
 0x9c5   : > { %v2139_v1 = vadd.f32 %v2091_v18, %v9619_v0  ;;  %v2141_v26 = vadd.f32 %v2132_v62, %v9620_v2  ;;  %v2093_v28 = vpop.f32.mrb[65].mxu0  ;;  %v2134_v24 = vpop.f32.mrb[65].mxu1 }
 0x9c6   : > { %v2140_v58 = vadd.f32 %v2093_v28, %v9621_v30  ;;  %v2142_v12 = vadd.f32 %v2134_v24, %v9622_v63  ;;  %v2095_v45 = vpop.f32.mrb[66].mxu0  ;;  %v2136_v13 = vpop.f32.mrb[66].mxu1 }
 0x9c7   : > { %v2143_v14 = vmul.f32 0.5, %v2139_v1  ;;  %v2096_v3 = vpop.f32.mrb[67].mxu0  ;;  %v2137_v49 = vpop.f32.mrb[67].mxu1  ;;  %v2145_v43 = vmul.f32 0.5, %v2141_v26 }
 0x9c8   : > { %v2144_v42 = vmul.f32 0.5, %v2140_v58 }
 0x9c9   : > { %6198 = vtanh.f32 %v2143_v14 }
 0x9ca   : > { %6200 = vtanh.f32 %v2144_v42 }
 0x9cb   : > { %6202 = vtanh.f32 %v2142_v12 }
 0x9cc   : > { %6204 = vtanh.f32 %v2145_v43 }
 0x9d3   : > { %v6199_v15 = vpop.eup %6198 }
 0x9d4   : > { %v2149_v50 = vadd.f32 1.0, %v6199_v15  ;;  %v6201_v51 = vpop.eup %6200 }
 0x9d5   : > { %v2150_v19 = vadd.f32 1.0, %v6201_v51  ;;  %v6203_v53 = vpop.eup %6202  ;;  %v8014_v51 = vld [vmem:[#allocation12 + $0x8] ss:$16 sps:$4 sm:$0xff]  }
 0x9d6   : > { %v2152_v32 = vmul.f32 0.5, %v2149_v50  ;;  %v6205_v59 = vpop.eup %6204  ;;  %v8011_v50 = vld [vmem:[#allocation12] ss:$16 sps:$4 sm:$0xff]  }
 0x9d7   : > { %v2153_v55 = vmul.f32 0.5, %v2150_v19  ;;  %v2151_v60 = vadd.f32 1.0, %v6205_v59  ;;  %v8020_v19 = vld [vmem:[#allocation12 + $0x2c] ss:$16 sps:$4 sm:$0xff]   ;;  %v8040_v59 = vld [vmem:[#allocation12 + $0x48] ss:$16 sps:$4 sm:$0xff]  }
 0x9d8   : > { %v2157_v48 = vmul.f32 %v6203_v53, %v2152_v32  ;;  %v8017_v32 = vld [vmem:[#allocation12 + $0x24] ss:$16 sps:$4 sm:$0xff]   ;;  %v8025_v53 = vld [vmem:[#allocation12 + $0x20] ss:$16 sps:$4 sm:$0xff]  }
 0x9d9   : > { %v2156_v56 = vmul.f32 %v2153_v55, %v7920_v54  ;;  %v2154_v61 = vmul.f32 0.5, %v2151_v60  ;;  %v8028_v55 = vld [vmem:[#allocation12 + $0x28] ss:$16 sps:$4 sm:$0xff]   ;;  %v8043_v60 = vld [vmem:[#allocation12 + $0x64] ss:$16 sps:$4 sm:$0xff]  }
 0x9db   : > { %v7962_v5 = vadd.f32 %v2157_v48, %v2156_v56  ;;  %v8031_v48 = vld [vmem:[#allocation12 + $0x44] ss:$16 sps:$4 sm:$0xff]   ;;  %v8034_v56 = vld [vmem:[#allocation12 + $0x4c] ss:$16 sps:$4 sm:$0xff]  }
 0x9dd   : > { %6206 = vtanh.f32 %v7962_v5 }
 0x9e7   : > { %v6207_v18 = vpop.eup %6206 }
 0x9e8   : > { %v2160_v62 = vmul.f32 %v6207_v18, %v2154_v61  ;;  %v8046_v61 = vld [vmem:[#allocation12 + $0x6c] ss:$16 sps:$4 sm:$0xff]   ;;  %v8049_v18 = vld [vmem:[#allocation12 + $0x60] ss:$16 sps:$4 sm:$0xff]  }
 0x9ea   : > { %v2161_v0 = vpack.c.bf16 %v2160_v62, %v2160_v62  ;;  %v8052_v62 = vld [vmem:[#allocation12 + $0x68] ss:$16 sps:$4 sm:$0xff]  }
 0x9ec   : > { %2162 = vst [vmem:[#allocation2 + $0x20] sm:$0xf] %v2161_v0  ;;  %2200 = vmatmul.mubr.bf16.vlgmr.msra.gmra.mrb[68].mxu0 %v2161_v0  ;;  %2241 = vmatmul.mubr.bf16.vlgmr.msra.gmra.mrb[68].mxu1 %v2161_v0  ;;  %v8055_v0 = vld [vmem:[#allocation12 + $0x84] ss:$16 sps:$4 sm:$0xff]  }
 0x9ed   : > { %2281 = vmatpush1.bf16.msra.mxu0 %v7653_v39  ;;  %2322 = vmatpush1.bf16.msra.mxu1 %v7656_v40  ;;  %v7997_v39 = vld [vmem:[#allocation12 + $0x4] ss:$16 sps:$4 sm:$0xff]   ;;  %v8000_v40 = vld [vmem:[#allocation12 + $0xc] ss:$16 sps:$4 sm:$0xff]  }
 0x9ee   : > { %2282 = vmatprep.subr.bf16.mxu0 %v7659_v35  ;;  %2323 = vmatprep.subr.bf16.mxu1 %v7662_v16 }
 0x9ef   : > { %2312 = vmatprep.mubr.bf16.mxu0 %v9599_v11  ;;  %2353 = vmatprep.mubr.bf16.mxu1 %v9599_v11 }
 0x9f1   : > { %2283 = vmatpush1.bf16.msra.mxu0 %v7667_v25  ;;  %2324 = vmatpush1.bf16.msra.mxu1 %v7670_v20  ;;  %v9623_v25 = vld [vmem:[#allocation48_spill] sm:$0xff] }
 0x9f2   : > { %2284 = vmatprep.subr.bf16.mxu0 %v7673_v17  ;;  %2325 = vmatprep.subr.bf16.mxu1 %v7676_v38  ;;  %v9624_v17 = vld [vmem:[#allocation49_spill] sm:$0xff] }
 0x9f5   : > { %2285 = vmatpush1.bf16.msra.mxu0 %v7679_v22  ;;  %2326 = vmatpush1.bf16.msra.mxu1 %v7682_v29 }
 0x9f6   : > { %2286 = vmatprep.subr.bf16.mxu0 %v7685_v23  ;;  %2327 = vmatprep.subr.bf16.mxu1 %v7688_v33  ;;  %v9625_v23 = vld [vmem:[#allocation50_spill] sm:$0xff] }
 0x9f9   : > { %2287 = vmatpush1.bf16.msra.mxu0 %v7691_v31  ;;  %2328 = vmatpush1.bf16.msra.mxu1 %v7694_v37  ;;  %v9626_v31 = vld [vmem:[#allocation51_spill] sm:$0xff] }
 0x9fa   : > { %2288 = vmatprep.subr.bf16.mxu0 %v7697_v21  ;;  %2329 = vmatprep.subr.bf16.mxu1 %v7700_v46 }
 0x9fd   : > { %2289 = vmatpush1.bf16.msra.mxu0 %v7703_v57  ;;  %2330 = vmatpush1.bf16.msra.mxu1 %v7706_v41 }
 0x9fe   : > { %2290 = vmatprep.subr.bf16.mxu0 %v7709_v47  ;;  %2331 = vmatprep.subr.bf16.mxu1 %v7712_v44 }
 0xa01   : > { %2291 = vmatpush1.bf16.msra.mxu0 %v7757_v52  ;;  %2332 = vmatpush1.bf16.msra.mxu1 %v7760_v4 }
 0xa02   : > { %2292 = vmatprep.subr.bf16.mxu0 %v7763_v34  ;;  %2333 = vmatprep.subr.bf16.mxu1 %v7766_v36 }
 0xa05   : > { %2293 = vmatpush1.bf16.msra.mxu0 %v7769_v27  ;;  %2334 = vmatpush1.bf16.msra.mxu1 %v7772_v6 }
 0xa06   : > { %2294 = vmatprep.subr.bf16.mxu0 %v7775_v7  ;;  %2335 = vmatprep.subr.bf16.mxu1 %v7778_v8 }
 0xa09   : > { %2295 = vmatpush1.bf16.msra.mxu0 %v7781_v9  ;;  %2336 = vmatpush1.bf16.msra.mxu1 %v7784_v10 }
 0xa0a   : > { %2390 = vmatprep.subr.bf16.mxu0 %v7997_v39  ;;  %2431 = vmatprep.subr.bf16.mxu1 %v8000_v40 }
 0xabf   : > { %v2201_v35 = vpop.f32.mrb[68].mxu0  ;;  %v2242_v16 = vpop.f32.mrb[68].mxu1 }
 0xac0   : > { %v2249_v20 = vadd.f32 %v2201_v35, %v9623_v25  ;;  %v2251_v38 = vadd.f32 %v2242_v16, %v9624_v17  ;;  %v2203_v22 = vpop.f32.mrb[69].mxu0  ;;  %v2244_v29 = vpop.f32.mrb[69].mxu1  ;;  %v8058_v35 = vld [vmem:[#allocation12 + $0x8c] ss:$16 sps:$4 sm:$0xff]   ;;  %v8061_v16 = vld [vmem:[#allocation12 + $0x80] ss:$16 sps:$4 sm:$0xff]  }
 0xac1   : > { %v2250_v33 = vadd.f32 %v2203_v22, %v9625_v23  ;;  %v2252_v37 = vadd.f32 %v2244_v29, %v9626_v31  ;;  %v2205_v21 = vpop.f32.mrb[70].mxu0  ;;  %v2246_v46 = vpop.f32.mrb[70].mxu1  ;;  %v8064_v25 = vld [vmem:[#allocation12 + $0x88] ss:$16 sps:$4 sm:$0xff]   ;;  %v8070_v17 = vld [vmem:[#allocation12 + $0xac] ss:$16 sps:$4 sm:$0xff]  }
 0xac2   : > { %v2253_v57 = vmul.f32 0.5, %v2249_v20  ;;  %v2206_v41 = vpop.f32.mrb[71].mxu0  ;;  %v2247_v47 = vpop.f32.mrb[71].mxu1  ;;  %v2255_v54 = vmul.f32 0.5, %v2251_v38  ;;  %v8067_v20 = vld [vmem:[#allocation12 + $0xa4] ss:$16 sps:$4 sm:$0xff]  }
 0xac3   : > { %v2254_v44 = vmul.f32 0.5, %v2250_v33  ;;  %v9628_v38 = vld [vmem:[#allocation53_spill] sm:$0xff]  ;;  %v9629_v29 = vld [vmem:[#allocation54_spill] sm:$0xff]  ;;  %v9630_v23 = vld [vmem:[#allocation55_spill] sm:$0xff] }
 0xac4   : > { %6208 = vtanh.f32 %v2253_v57 }
 0xac5   : > { %6210 = vtanh.f32 %v2254_v44 }
 0xac6   : > { %6212 = vtanh.f32 %v2252_v37 }
 0xac7   : > { %6214 = vtanh.f32 %v2255_v54 }
 0xace   : > { %v6209_v1 = vpop.eup %6208 }
 0xacf   : > { %v2259_v2 = vadd.f32 1.0, %v6209_v1  ;;  %v6211_v26 = vpop.eup %6210 }
 0xad0   : > { %v2260_v24 = vadd.f32 1.0, %v6211_v26  ;;  %v6213_v30 = vpop.eup %6212 }
 0xad1   : > { %v2262_v28 = vmul.f32 0.5, %v2259_v2  ;;  %v6215_v13 = vpop.eup %6214 }
 0xad2   : > { %v2263_v58 = vmul.f32 0.5, %v2260_v24  ;;  %v2261_v14 = vadd.f32 1.0, %v6215_v13 }
 0xad3   : > { %v2267_v63 = vmul.f32 %v6213_v30, %v2262_v28 }
 0xad4   : > { %v2266_v12 = vmul.f32 %v2263_v58, %v7962_v5  ;;  %v2264_v3 = vmul.f32 0.5, %v2261_v14  ;;  %v8037_v5 = vld [vmem:[#allocation12 + $0x40] ss:$16 sps:$4 sm:$0xff]  }
 0xad6   : > { %v8008_v45 = vadd.f32 %v2267_v63, %v2266_v12 }
 0xad8   : > { %6216 = vtanh.f32 %v8008_v45 }
 0xae2   : > { %v6217_v49 = vpop.eup %6216 }
 0xae3   : > { %v2270_v42 = vmul.f32 %v6217_v49, %v2264_v3  ;;  %v8118_v3 = vld [vmem:[#allocation12 + $0xa8] ss:$16 sps:$4 sm:$0xff]   ;;  %v8121_v49 = vld [vmem:[#allocation12 + $0xc4] ss:$16 sps:$4 sm:$0xff]  }
 0xae5   : > { %v2271_v43 = vpack.c.bf16 %v2270_v42, %v2270_v42  ;;  %v8124_v42 = vld [vmem:[#allocation12 + $0xcc] ss:$16 sps:$4 sm:$0xff]  }
 0xae7   : > { %v2273_v15 = vrot.slane %v2271_v43, 4  ;;  %2313 = vmatmul.mubr.bf16.vlgmr.msra.gmra.mrb[72].mxu0 %v2271_v43  ;;  %2354 = vmatmul.mubr.bf16.vlgmr.msra.gmra.mrb[72].mxu1 %v2271_v43  ;;  %v8127_v43 = vld [vmem:[#allocation12 + $0xc0] ss:$16 sps:$4 sm:$0xff]  }
 0xae8   : > { %2391 = vmatpush1.bf16.msra.mxu0 %v8011_v50  ;;  %2432 = vmatpush1.bf16.msra.mxu1 %v8014_v51 }
 0xae9   : > { %2275 = vst [vmem:[#allocation2 + $0x20] sm:$0xf0] %v2273_v15  ;;  %2392 = vmatprep.subr.bf16.mxu0 %v8017_v32  ;;  %2433 = vmatprep.subr.bf16.mxu1 %v8020_v19  ;;  %v8130_v15 = vld [vmem:[#allocation12 + $0xc8] ss:$16 sps:$4 sm:$0xff]  }
 0xaea   : > { %2422 = vmatprep.mubr.bf16.mxu0 %v9599_v11  ;;  %2463 = vmatprep.mubr.bf16.mxu1 %v9599_v11 }
 0xaec   : > { %2393 = vmatpush1.bf16.msra.mxu0 %v8025_v53  ;;  %2434 = vmatpush1.bf16.msra.mxu1 %v8028_v55 }
 0xaed   : > { %2394 = vmatprep.subr.bf16.mxu0 %v8031_v48  ;;  %2435 = vmatprep.subr.bf16.mxu1 %v8034_v56 }
 0xaf0   : > { %2395 = vmatpush1.bf16.msra.mxu0 %v8037_v5  ;;  %2436 = vmatpush1.bf16.msra.mxu1 %v8040_v59 }
 0xaf1   : > { %2396 = vmatprep.subr.bf16.mxu0 %v8043_v60  ;;  %2437 = vmatprep.subr.bf16.mxu1 %v8046_v61 }
 0xaf4   : > { %2397 = vmatpush1.bf16.msra.mxu0 %v8049_v18  ;;  %2438 = vmatpush1.bf16.msra.mxu1 %v8052_v62 }
 0xaf5   : > { %2398 = vmatprep.subr.bf16.mxu0 %v8055_v0  ;;  %2439 = vmatprep.subr.bf16.mxu1 %v8058_v35 }
 0xaf8   : > { %2399 = vmatpush1.bf16.msra.mxu0 %v8061_v16  ;;  %2440 = vmatpush1.bf16.msra.mxu1 %v8064_v25 }
 0xaf9   : > { %2400 = vmatprep.subr.bf16.mxu0 %v8067_v20  ;;  %2441 = vmatprep.subr.bf16.mxu1 %v8070_v17 }
 0xafc   : > { %2401 = vmatpush1.bf16.msra.mxu0 %v7757_v52  ;;  %2442 = vmatpush1.bf16.msra.mxu1 %v7760_v4 }
 0xafd   : > { %2402 = vmatprep.subr.bf16.mxu0 %v7763_v34  ;;  %2443 = vmatprep.subr.bf16.mxu1 %v7766_v36  ;;  %v9627_v34 = vld [vmem:[#allocation52_spill] sm:$0xff] }
 0xb00   : > { %2403 = vmatpush1.bf16.msra.mxu0 %v7769_v27  ;;  %2444 = vmatpush1.bf16.msra.mxu1 %v7772_v6 }
 0xb01   : > { %2404 = vmatprep.subr.bf16.mxu0 %v7775_v7  ;;  %2445 = vmatprep.subr.bf16.mxu1 %v7778_v8 }
 0xb04   : > { %2405 = vmatpush1.bf16.msra.mxu0 %v7781_v9  ;;  %2446 = vmatpush1.bf16.msra.mxu1 %v7784_v10 }
 0xb05   : > { %2503 = vmatprep.subr.bf16.mxu0 %v7997_v39  ;;  %2544 = vmatprep.subr.bf16.mxu1 %v8000_v40 }
 0xbba   : > { %v2314_v52 = vpop.f32.mrb[72].mxu0  ;;  %v2355_v4 = vpop.f32.mrb[72].mxu1 }
 0xbbb   : > { %v2362_v36 = vadd.f32 %v2314_v52, %v9627_v34  ;;  %v2364_v27 = vadd.f32 %v2355_v4, %v9628_v38  ;;  %v2316_v22 = vpop.f32.mrb[73].mxu0  ;;  %v2357_v6 = vpop.f32.mrb[73].mxu1  ;;  %v8133_v52 = vld [vmem:[#allocation12 + $0xe4] ss:$16 sps:$4 sm:$0xff]   ;;  %v8136_v4 = vld [vmem:[#allocation12 + $0xec] ss:$16 sps:$4 sm:$0xff]  }
 0xbbc   : > { %v2363_v7 = vadd.f32 %v2316_v22, %v9629_v29  ;;  %v2365_v8 = vadd.f32 %v2357_v6, %v9630_v23  ;;  %v2318_v33 = vpop.f32.mrb[74].mxu0  ;;  %v2359_v9 = vpop.f32.mrb[74].mxu1  ;;  %v8139_v34 = vld [vmem:[#allocation12 + $0xe0] ss:$16 sps:$4 sm:$0xff]   ;;  %v9632_v29 = vld [vmem:[#allocation57_spill] sm:$0xff] }
 0xbbd   : > { %v2366_v31 = vmul.f32 0.5, %v2362_v36  ;;  %v2319_v10 = vpop.f32.mrb[75].mxu0  ;;  %v2360_v37 = vpop.f32.mrb[75].mxu1  ;;  %v2368_v46 = vmul.f32 0.5, %v2364_v27  ;;  %v8142_v36 = vld [vmem:[#allocation12 + $0xe8] ss:$16 sps:$4 sm:$0xff]  }
 0xbbe   : > { %v2367_v21 = vmul.f32 0.5, %v2363_v7  ;;  %v9631_v22 = vld [vmem:[#allocation56_spill] sm:$0xff]  ;;  %v9633_v33 = vld [vmem:[#allocation58_spill] sm:$0xff] }
 0xbbf   : > { %6218 = vtanh.f32 %v2366_v31  ;;  %v9634_v31 = vld [vmem:[#allocation59_spill] sm:$0xff] }
 0xbc0   : > { %6220 = vtanh.f32 %v2367_v21 }
 0xbc1   : > { %6222 = vtanh.f32 %v2365_v8 }
 0xbc2   : > { %6224 = vtanh.f32 %v2368_v46 }
 0xbc9   : > { %v6219_v57 = vpop.eup %6218 }
 0xbca   : > { %v2372_v41 = vadd.f32 1.0, %v6219_v57  ;;  %v6221_v47 = vpop.eup %6220 }
 0xbcb   : > { %v2373_v54 = vadd.f32 1.0, %v6221_v47  ;;  %v6223_v1 = vpop.eup %6222 }
 0xbcc   : > { %v2375_v44 = vmul.f32 0.5, %v2372_v41  ;;  %v6225_v30 = vpop.eup %6224 }
 0xbcd   : > { %v2376_v2 = vmul.f32 0.5, %v2373_v54  ;;  %v2374_v58 = vadd.f32 1.0, %v6225_v30 }
 0xbce   : > { %v2380_v26 = vmul.f32 %v6223_v1, %v2375_v44 }
 0xbcf   : > { %v2379_v28 = vmul.f32 %v2376_v2, %v8008_v45  ;;  %v2377_v63 = vmul.f32 0.5, %v2374_v58  ;;  %v8115_v45 = vld [vmem:[#allocation12 + $0xa0] ss:$16 sps:$4 sm:$0xff]  }
 0xbd1   : > { %v8090_v24 = vadd.f32 %v2380_v26, %v2379_v28 }
 0xbd3   : > { %6226 = vtanh.f32 %v8090_v24 }
 0xbdd   : > { %v6227_v12 = vpop.eup %6226 }
 0xbde   : > { %v2383_v13 = vmul.f32 %v6227_v12, %v2377_v63 }
 0xbe0   : > { %v2384_v14 = vpack.c.bf16 %v2383_v13, %v2383_v13 }
 0xbe2   : > { %2385 = vst [vmem:[#allocation2 + $0x28] sm:$0xf] %v2384_v14  ;;  %2423 = vmatmul.mubr.bf16.vlgmr.msra.gmra.mrb[76].mxu0 %v2384_v14  ;;  %2464 = vmatmul.mubr.bf16.vlgmr.msra.gmra.mrb[76].mxu1 %v2384_v14 }
 0xbe3   : > { %2504 = vmatpush1.bf16.msra.mxu0 %v8011_v50  ;;  %2545 = vmatpush1.bf16.msra.mxu1 %v8014_v51 }
 0xbe4   : > { %2505 = vmatprep.subr.bf16.mxu0 %v8017_v32  ;;  %2546 = vmatprep.subr.bf16.mxu1 %v8020_v19 }
 0xbe5   : > { %2535 = vmatprep.mubr.bf16.mxu0 %v9599_v11  ;;  %2576 = vmatprep.mubr.bf16.mxu1 %v9599_v11 }
 0xbe7   : > { %2506 = vmatpush1.bf16.msra.mxu0 %v8025_v53  ;;  %2547 = vmatpush1.bf16.msra.mxu1 %v8028_v55 }
 0xbe8   : > { %2507 = vmatprep.subr.bf16.mxu0 %v8031_v48  ;;  %2548 = vmatprep.subr.bf16.mxu1 %v8034_v56 }
 0xbeb   : > { %2508 = vmatpush1.bf16.msra.mxu0 %v8037_v5  ;;  %2549 = vmatpush1.bf16.msra.mxu1 %v8040_v59 }
 0xbec   : > { %2509 = vmatprep.subr.bf16.mxu0 %v8043_v60  ;;  %2550 = vmatprep.subr.bf16.mxu1 %v8046_v61 }
 0xbef   : > { %2510 = vmatpush1.bf16.msra.mxu0 %v8049_v18  ;;  %2551 = vmatpush1.bf16.msra.mxu1 %v8052_v62 }
 0xbf0   : > { %2511 = vmatprep.subr.bf16.mxu0 %v8055_v0  ;;  %2552 = vmatprep.subr.bf16.mxu1 %v8058_v35 }
 0xbf3   : > { %2512 = vmatpush1.bf16.msra.mxu0 %v8061_v16  ;;  %2553 = vmatpush1.bf16.msra.mxu1 %v8064_v25 }
 0xbf4   : > { %2513 = vmatprep.subr.bf16.mxu0 %v8067_v20  ;;  %2554 = vmatprep.subr.bf16.mxu1 %v8070_v17 }
 0xbf7   : > { %2514 = vmatpush1.bf16.msra.mxu0 %v8115_v45  ;;  %2555 = vmatpush1.bf16.msra.mxu1 %v8118_v3 }
 0xbf8   : > { %2515 = vmatprep.subr.bf16.mxu0 %v8121_v49  ;;  %2556 = vmatprep.subr.bf16.mxu1 %v8124_v42 }
 0xbfb   : > { %2516 = vmatpush1.bf16.msra.mxu0 %v8127_v43  ;;  %2557 = vmatpush1.bf16.msra.mxu1 %v8130_v15 }
 0xbfc   : > { %2517 = vmatprep.subr.bf16.mxu0 %v8133_v52  ;;  %2558 = vmatprep.subr.bf16.mxu1 %v8136_v4 }
 0xbff   : > { %2518 = vmatpush1.bf16.msra.mxu0 %v8139_v34  ;;  %2559 = vmatpush1.bf16.msra.mxu1 %v8142_v36 }
 0xc00   : > { %2613 = vmatprep.subr.bf16.mxu0 %v7997_v39  ;;  %2654 = vmatprep.subr.bf16.mxu1 %v8000_v40 }
 0xcb5   : > { %v2424_v38 = vpop.f32.mrb[76].mxu0  ;;  %v2465_v27 = vpop.f32.mrb[76].mxu1 }
 0xcb6   : > { %v2472_v6 = vadd.f32 %v2424_v38, %v9631_v22  ;;  %v2474_v7 = vadd.f32 %v2465_v27, %v9632_v29  ;;  %v2426_v23 = vpop.f32.mrb[77].mxu0  ;;  %v2467_v8 = vpop.f32.mrb[77].mxu1 }
 0xcb7   : > { %v2473_v9 = vadd.f32 %v2426_v23, %v9633_v33  ;;  %v2475_v10 = vadd.f32 %v2467_v8, %v9634_v31  ;;  %v2428_v37 = vpop.f32.mrb[78].mxu0  ;;  %v2469_v21 = vpop.f32.mrb[78].mxu1  ;;  %v9635_v8 = vld [vmem:[#allocation60_spill] sm:$0xff] }
 0xcb8   : > { %v2476_v46 = vmul.f32 0.5, %v2472_v6  ;;  %v2429_v57 = vpop.f32.mrb[79].mxu0  ;;  %v2470_v41 = vpop.f32.mrb[79].mxu1  ;;  %v2478_v44 = vmul.f32 0.5, %v2474_v7  ;;  %v9637_v21 = vld [vmem:[#allocation62_spill] sm:$0xff] }
 0xcb9   : > { %v2477_v47 = vmul.f32 0.5, %v2473_v9  ;;  %v9636_v9 = vld [vmem:[#allocation61_spill] sm:$0xff]  ;;  %v9638_v57 = vld [vmem:[#allocation63_spill] sm:$0xff] }
 0xcba   : > { %6228 = vtanh.f32 %v2476_v46 }
 0xcbb   : > { %6230 = vtanh.f32 %v2477_v47 }
 0xcbc   : > { %6232 = vtanh.f32 %v2475_v10 }
 0xcbd   : > { %6234 = vtanh.f32 %v2478_v44 }
 0xcc4   : > { %v6229_v54 = vpop.eup %6228 }
 0xcc5   : > { %v2482_v1 = vadd.f32 1.0, %v6229_v54  ;;  %v6231_v2 = vpop.eup %6230 }
 0xcc6   : > { %v2483_v28 = vadd.f32 1.0, %v6231_v2  ;;  %v6233_v30 = vpop.eup %6232 }
 0xcc7   : > { %v2485_v26 = vmul.f32 0.5, %v2482_v1  ;;  %v6235_v14 = vpop.eup %6234 }
 0xcc8   : > { %v2486_v58 = vmul.f32 0.5, %v2483_v28  ;;  %v2484_v38 = vadd.f32 1.0, %v6235_v14 }
 0xcc9   : > { %v2490_v63 = vmul.f32 %v6233_v30, %v2485_v26 }
 0xcca   : > { %v2489_v12 = vmul.f32 %v2486_v58, %v8090_v24  ;;  %v2487_v27 = vmul.f32 0.5, %v2484_v38 }
 0xccc   : > { %v8152_v13 = vadd.f32 %v2490_v63, %v2489_v12 }
 0xcce   : > { %6236 = vtanh.f32 %v8152_v13 }
 0xcd8   : > { %v6237_v22 = vpop.eup %6236 }
 0xcd9   : > { %v2493_v6 = vmul.f32 %v6237_v22, %v2487_v27 }
 0xcdb   : > { %v2494_v29 = vpack.c.bf16 %v2493_v6, %v2493_v6 }
 0xcdd   : > { %v2496_v7 = vrot.slane %v2494_v29, 4  ;;  %2536 = vmatmul.mubr.bf16.vlgmr.msra.gmra.mrb[80].mxu0 %v2494_v29  ;;  %2577 = vmatmul.mubr.bf16.vlgmr.msra.gmra.mrb[80].mxu1 %v2494_v29 }
 0xcde   : > { %2614 = vmatpush1.bf16.msra.mxu0 %v8011_v50  ;;  %2655 = vmatpush1.bf16.msra.mxu1 %v8014_v51 }
 0xcdf   : > { %2498 = vst [vmem:[#allocation2 + $0x28] sm:$0xf0] %v2496_v7  ;;  %2615 = vmatprep.subr.bf16.mxu0 %v8017_v32  ;;  %2656 = vmatprep.subr.bf16.mxu1 %v8020_v19 }
 0xce0   : > { %2645 = vmatprep.mubr.bf16.mxu0 %v9599_v11  ;;  %2686 = vmatprep.mubr.bf16.mxu1 %v9599_v11 }
 0xce2   : > { %2616 = vmatpush1.bf16.msra.mxu0 %v8025_v53  ;;  %2657 = vmatpush1.bf16.msra.mxu1 %v8028_v55 }
 0xce3   : > { %2617 = vmatprep.subr.bf16.mxu0 %v8031_v48  ;;  %2658 = vmatprep.subr.bf16.mxu1 %v8034_v56 }
 0xce6   : > { %2618 = vmatpush1.bf16.msra.mxu0 %v8037_v5  ;;  %2659 = vmatpush1.bf16.msra.mxu1 %v8040_v59 }
 0xce7   : > { %2619 = vmatprep.subr.bf16.mxu0 %v8043_v60  ;;  %2660 = vmatprep.subr.bf16.mxu1 %v8046_v61 }
 0xcea   : > { %2620 = vmatpush1.bf16.msra.mxu0 %v8049_v18  ;;  %2661 = vmatpush1.bf16.msra.mxu1 %v8052_v62 }
 0xceb   : > { %2621 = vmatprep.subr.bf16.mxu0 %v8055_v0  ;;  %2662 = vmatprep.subr.bf16.mxu1 %v8058_v35 }
 0xcee   : > { %2622 = vmatpush1.bf16.msra.mxu0 %v8061_v16  ;;  %2663 = vmatpush1.bf16.msra.mxu1 %v8064_v25 }
 0xcef   : > { %2623 = vmatprep.subr.bf16.mxu0 %v8067_v20  ;;  %2664 = vmatprep.subr.bf16.mxu1 %v8070_v17 }
 0xcf2   : > { %2624 = vmatpush1.bf16.msra.mxu0 %v8115_v45  ;;  %2665 = vmatpush1.bf16.msra.mxu1 %v8118_v3 }
 0xcf3   : > { %2625 = vmatprep.subr.bf16.mxu0 %v8121_v49  ;;  %2666 = vmatprep.subr.bf16.mxu1 %v8124_v42 }
 0xcf6   : > { %2626 = vmatpush1.bf16.msra.mxu0 %v8127_v43  ;;  %2667 = vmatpush1.bf16.msra.mxu1 %v8130_v15 }
 0xcf7   : > { %2627 = vmatprep.subr.bf16.mxu0 %v8133_v52  ;;  %2668 = vmatprep.subr.bf16.mxu1 %v8136_v4 }
 0xcfa   : > { %2628 = vmatpush1.bf16.msra.mxu0 %v8139_v34  ;;  %2669 = vmatpush1.bf16.msra.mxu1 %v8142_v36 }
 0xcfb   : > { %2726 = vmatprep.subr.bf16.mxu0 %v7997_v39  ;;  %2767 = vmatprep.subr.bf16.mxu1 %v8000_v40 }
 0xdb0   : > { %v2537_v24 = vpop.f32.mrb[80].mxu0  ;;  %v2578_v23 = vpop.f32.mrb[80].mxu1 }
 0xdb1   : > { %v2585_v33 = vadd.f32 %v2537_v24, %v9635_v8  ;;  %v2587_v31 = vadd.f32 %v2578_v23, %v9636_v9  ;;  %v2539_v10 = vpop.f32.mrb[81].mxu0  ;;  %v2580_v37 = vpop.f32.mrb[81].mxu1 }
 0xdb2   : > { %v2586_v46 = vadd.f32 %v2539_v10, %v9637_v21  ;;  %v2588_v41 = vadd.f32 %v2580_v37, %v9638_v57  ;;  %v2541_v47 = vpop.f32.mrb[82].mxu0  ;;  %v2582_v44 = vpop.f32.mrb[82].mxu1  ;;  %v9639_v10 = vld [vmem:[#allocation64_spill] sm:$0xff]  ;;  %v9640_v21 = vld [vmem:[#allocation65_spill] sm:$0xff] }
 0xdb3   : > { %v2589_v54 = vmul.f32 0.5, %v2585_v33  ;;  %v2542_v1 = vpop.f32.mrb[83].mxu0  ;;  %v2583_v2 = vpop.f32.mrb[83].mxu1  ;;  %v2591_v28 = vmul.f32 0.5, %v2587_v31  ;;  %v9641_v47 = vld [vmem:[#allocation66_spill] sm:$0xff] }
 0xdb4   : > { %v2590_v26 = vmul.f32 0.5, %v2586_v46 }
 0xdb5   : > { %6238 = vtanh.f32 %v2589_v54  ;;  %v9642_v54 = vld [vmem:[#allocation67_spill] sm:$0xff] }
 0xdb6   : > { %6240 = vtanh.f32 %v2590_v26 }
 0xdb7   : > { %6242 = vtanh.f32 %v2588_v41 }
 0xdb8   : > { %6244 = vtanh.f32 %v2591_v28 }
 0xdbf   : > { %v6239_v30 = vpop.eup %6238 }
 0xdc0   : > { %v2595_v58 = vadd.f32 1.0, %v6239_v30  ;;  %v6241_v63 = vpop.eup %6240 }
 0xdc1   : > { %v2596_v14 = vadd.f32 1.0, %v6241_v63  ;;  %v6243_v38 = vpop.eup %6242 }
 0xdc2   : > { %v2598_v12 = vmul.f32 0.5, %v2595_v58  ;;  %v6245_v7 = vpop.eup %6244 }
 0xdc3   : > { %v2599_v27 = vmul.f32 0.5, %v2596_v14  ;;  %v2597_v24 = vadd.f32 1.0, %v6245_v7 }
 0xdc4   : > { %v2603_v22 = vmul.f32 %v6243_v38, %v2598_v12 }
 0xdc5   : > { %v2602_v6 = vmul.f32 %v2599_v27, %v8152_v13  ;;  %v2600_v23 = vmul.f32 0.5, %v2597_v24 }
 0xdc7   : > { %v8194_v29 = vadd.f32 %v2603_v22, %v2602_v6 }
 0xdc9   : > { %6246 = vtanh.f32 %v8194_v29 }
 0xdd3   : > { %v6247_v8 = vpop.eup %6246 }
 0xdd4   : > { %v2606_v33 = vmul.f32 %v6247_v8, %v2600_v23 }
 0xdd6   : > { %v2607_v9 = vpack.c.bf16 %v2606_v33, %v2606_v33 }
 0xdd8   : > { %2608 = vst [vmem:[#allocation2 + $0x30] sm:$0xf] %v2607_v9  ;;  %2646 = vmatmul.mubr.bf16.vlgmr.msra.gmra.mrb[84].mxu0 %v2607_v9  ;;  %2687 = vmatmul.mubr.bf16.vlgmr.msra.gmra.mrb[84].mxu1 %v2607_v9 }
 0xdd9   : > { %2727 = vmatpush1.bf16.msra.mxu0 %v8011_v50  ;;  %2768 = vmatpush1.bf16.msra.mxu1 %v8014_v51 }
 0xdda   : > { %2728 = vmatprep.subr.bf16.mxu0 %v8017_v32  ;;  %2769 = vmatprep.subr.bf16.mxu1 %v8020_v19 }
 0xddb   : > { %2758 = vmatprep.mubr.bf16.mxu0 %v9599_v11  ;;  %2799 = vmatprep.mubr.bf16.mxu1 %v9599_v11 }
 0xddd   : > { %2729 = vmatpush1.bf16.msra.mxu0 %v8025_v53  ;;  %2770 = vmatpush1.bf16.msra.mxu1 %v8028_v55 }
 0xdde   : > { %2730 = vmatprep.subr.bf16.mxu0 %v8031_v48  ;;  %2771 = vmatprep.subr.bf16.mxu1 %v8034_v56 }
 0xde1   : > { %2731 = vmatpush1.bf16.msra.mxu0 %v8037_v5  ;;  %2772 = vmatpush1.bf16.msra.mxu1 %v8040_v59 }
 0xde2   : > { %2732 = vmatprep.subr.bf16.mxu0 %v8043_v60  ;;  %2773 = vmatprep.subr.bf16.mxu1 %v8046_v61 }
 0xde5   : > { %2733 = vmatpush1.bf16.msra.mxu0 %v8049_v18  ;;  %2774 = vmatpush1.bf16.msra.mxu1 %v8052_v62 }
 0xde6   : > { %2734 = vmatprep.subr.bf16.mxu0 %v8055_v0  ;;  %2775 = vmatprep.subr.bf16.mxu1 %v8058_v35 }
 0xde9   : > { %2735 = vmatpush1.bf16.msra.mxu0 %v8061_v16  ;;  %2776 = vmatpush1.bf16.msra.mxu1 %v8064_v25 }
 0xdea   : > { %2736 = vmatprep.subr.bf16.mxu0 %v8067_v20  ;;  %2777 = vmatprep.subr.bf16.mxu1 %v8070_v17 }
 0xded   : > { %2737 = vmatpush1.bf16.msra.mxu0 %v8115_v45  ;;  %2778 = vmatpush1.bf16.msra.mxu1 %v8118_v3 }
 0xdee   : > { %2738 = vmatprep.subr.bf16.mxu0 %v8121_v49  ;;  %2779 = vmatprep.subr.bf16.mxu1 %v8124_v42 }
 0xdf1   : > { %2739 = vmatpush1.bf16.msra.mxu0 %v8127_v43  ;;  %2780 = vmatpush1.bf16.msra.mxu1 %v8130_v15 }
 0xdf2   : > { %2740 = vmatprep.subr.bf16.mxu0 %v8133_v52  ;;  %2781 = vmatprep.subr.bf16.mxu1 %v8136_v4 }
 0xdf5   : > { %2741 = vmatpush1.bf16.msra.mxu0 %v8139_v34  ;;  %2782 = vmatpush1.bf16.msra.mxu1 %v8142_v36 }
 0xdf6   : > { %2836 = vmatprep.subr.bf16.mxu0 %v7997_v39  ;;  %2877 = vmatprep.subr.bf16.mxu1 %v8000_v40 }
 0xeab   : > { %v2647_v13 = vpop.f32.mrb[84].mxu0  ;;  %v2688_v31 = vpop.f32.mrb[84].mxu1 }
 0xeac   : > { %v2695_v37 = vadd.f32 %v2647_v13, %v9639_v10  ;;  %v2697_v46 = vadd.f32 %v2688_v31, %v9640_v21  ;;  %v2649_v57 = vpop.f32.mrb[85].mxu0  ;;  %v2690_v41 = vpop.f32.mrb[85].mxu1 }
 0xead   : > { %v2696_v44 = vadd.f32 %v2649_v57, %v9641_v47  ;;  %v2698_v1 = vadd.f32 %v2690_v41, %v9642_v54  ;;  %v2651_v2 = vpop.f32.mrb[86].mxu0  ;;  %v2692_v26 = vpop.f32.mrb[86].mxu1  ;;  %v6025_v54 = vld [vmem:[#allocation10 + $0x108] ss:$16 sps:$4 sm:$0xff]  }
 0xeae   : > { %v2699_v28 = vmul.f32 0.5, %v2695_v37  ;;  %v2652_v30 = vpop.f32.mrb[87].mxu0  ;;  %v2693_v58 = vpop.f32.mrb[87].mxu1  ;;  %v2701_v40 = vmul.f32 0.5, %v2697_v46  ;;  %v6030_v2 = vld [vmem:[#allocation10 + $0x124] ss:$16 sps:$4 sm:$0xff]  }
 0xeaf   : > { %v2700_v39 = vmul.f32 0.5, %v2696_v44  ;;  %v6022_v44 = vld [vmem:[#allocation10 + $0x100] ss:$16 sps:$4 sm:$0xff]   ;;  %v6033_v26 = vld [vmem:[#allocation10 + $0x12c] ss:$16 sps:$4 sm:$0xff]  }
 0xeb0   : > { %6248 = vtanh.f32 %v2699_v28  ;;  %v6028_v28 = vld [vmem:[#allocation10 + $0x120] ss:$16 sps:$4 sm:$0xff]   ;;  %v6031_v30 = vld [vmem:[#allocation10 + $0x128] ss:$16 sps:$4 sm:$0xff]   ;;  %v6036_v58 = vld [vmem:[#allocation10 + $0x144] ss:$16 sps:$4 sm:$0xff]  }
 0xeb1   : > { %6250 = vtanh.f32 %v2700_v39  ;;  %v6039_v39 = vld [vmem:[#allocation10 + $0x14c] ss:$16 sps:$4 sm:$0xff]  }
 0xeb2   : > { %6252 = vtanh.f32 %v2698_v1 }
 0xeb3   : > { %6254 = vtanh.f32 %v2701_v40  ;;  %v6034_v40 = vld [vmem:[#allocation10 + $0x140] ss:$16 sps:$4 sm:$0xff]  }
 0xeba   : > { %v6249_v63 = vpop.eup %6248 }
 0xebb   : > { %v2705_v12 = vadd.f32 1.0, %v6249_v63  ;;  %v6251_v14 = vpop.eup %6250  ;;  %v6037_v63 = vld [vmem:[#allocation10 + $0x148] ss:$16 sps:$4 sm:$0xff]  }
 0xebc   : > { %v2706_v27 = vadd.f32 1.0, %v6251_v14  ;;  %v6253_v22 = vpop.eup %6252  ;;  %v6045_v14 = vld [vmem:[#allocation10 + $0x16c] ss:$16 sps:$4 sm:$0xff]  }
 0xebd   : > { %v2708_v38 = vmul.f32 0.5, %v2705_v12  ;;  %v6255_v8 = vpop.eup %6254  ;;  %v6042_v12 = vld [vmem:[#allocation10 + $0x164] ss:$16 sps:$4 sm:$0xff]  }
 0xebe   : > { %v2709_v6 = vmul.f32 0.5, %v2706_v27  ;;  %v2707_v33 = vadd.f32 1.0, %v6255_v8  ;;  %v6043_v27 = vld [vmem:[#allocation10 + $0x168] ss:$16 sps:$4 sm:$0xff]   ;;  %v6057_v8 = vld [vmem:[#allocation10 + $0x1ac] ss:$16 sps:$4 sm:$0xff]  }
 0xebf   : > { %v2713_v7 = vmul.f32 %v6253_v22, %v2708_v38  ;;  %v6040_v38 = vld [vmem:[#allocation10 + $0x160] ss:$16 sps:$4 sm:$0xff]   ;;  %v6048_v22 = vld [vmem:[#allocation10 + $0x184] ss:$16 sps:$4 sm:$0xff]  }
 0xec0   : > { %v2712_v24 = vmul.f32 %v2709_v6, %v8194_v29  ;;  %v2710_v9 = vmul.f32 0.5, %v2707_v33  ;;  %v6051_v6 = vld [vmem:[#allocation10 + $0x18c] ss:$16 sps:$4 sm:$0xff]   ;;  %v6052_v33 = vld [vmem:[#allocation10 + $0x1a0] ss:$16 sps:$4 sm:$0xff]  }
 0xec2   : > { %v8236_v23 = vadd.f32 %v2713_v7, %v2712_v24  ;;  %v6046_v7 = vld [vmem:[#allocation10 + $0x180] ss:$16 sps:$4 sm:$0xff]   ;;  %v6049_v24 = vld [vmem:[#allocation10 + $0x188] ss:$16 sps:$4 sm:$0xff]  }
 0xec4   : > { %6256 = vtanh.f32 %v8236_v23 }
 0xece   : > { %v6257_v13 = vpop.eup %6256 }
 0xecf   : > { %v2716_v31 = vmul.f32 %v6257_v13, %v2710_v9  ;;  %v6055_v9 = vld [vmem:[#allocation10 + $0x1a8] ss:$16 sps:$4 sm:$0xff]   ;;  %v6060_v13 = vld [vmem:[#allocation10 + $0x1c4] ss:$16 sps:$4 sm:$0xff]  }
 0xed1   : > { %v2717_v10 = vpack.c.bf16 %v2716_v31, %v2716_v31  ;;  %v6063_v31 = vld [vmem:[#allocation10 + $0x1cc] ss:$16 sps:$4 sm:$0xff]  }
 0xed3   : > { %v2719_v37 = vrot.slane %v2717_v10, 4  ;;  %2759 = vmatmul.mubr.bf16.vlgmr.msra.gmra.mrb[88].mxu0 %v2717_v10  ;;  %2800 = vmatmul.mubr.bf16.vlgmr.msra.gmra.mrb[88].mxu1 %v2717_v10  ;;  %v6058_v10 = vld [vmem:[#allocation10 + $0x1c0] ss:$16 sps:$4 sm:$0xff]  }
 0xed4   : > { %2837 = vmatpush1.bf16.msra.mxu0 %v8011_v50  ;;  %2878 = vmatpush1.bf16.msra.mxu1 %v8014_v51  ;;  %v6024_v50 = vld [vmem:[#allocation10 + $0x104] ss:$16 sps:$4 sm:$0xff]   ;;  %v6027_v51 = vld [vmem:[#allocation10 + $0x10c] ss:$16 sps:$4 sm:$0xff]  }
 0xed5   : > { %2721 = vst [vmem:[#allocation2 + $0x30] sm:$0xf0] %v2719_v37  ;;  %2838 = vmatprep.subr.bf16.mxu0 %v8017_v32  ;;  %2879 = vmatprep.subr.bf16.mxu1 %v8020_v19  ;;  %v6061_v37 = vld [vmem:[#allocation10 + $0x1c8] ss:$16 sps:$4 sm:$0xff]  }
 0xed6   : > { %2868 = vmatprep.mubr.bf16.mxu0 %v9599_v11  ;;  %2909 = vmatprep.mubr.bf16.mxu1 %v9599_v11 }
 0xed8   : > { %2839 = vmatpush1.bf16.msra.mxu0 %v8025_v53  ;;  %2880 = vmatpush1.bf16.msra.mxu1 %v8028_v55  ;;  %v9643_v53 = vld [vmem:[#allocation68_spill] sm:$0xff] }
 0xed9   : > { %2840 = vmatprep.subr.bf16.mxu0 %v8031_v48  ;;  %2881 = vmatprep.subr.bf16.mxu1 %v8034_v56  ;;  %v9644_v48 = vld [vmem:[#allocation69_spill] sm:$0xff] }
 0xedc   : > { %2841 = vmatpush1.bf16.msra.mxu0 %v8037_v5  ;;  %2882 = vmatpush1.bf16.msra.mxu1 %v8040_v59 }
 0xedd   : > { %2842 = vmatprep.subr.bf16.mxu0 %v8043_v60  ;;  %2883 = vmatprep.subr.bf16.mxu1 %v8046_v61  ;;  %v9645_v60 = vld [vmem:[#allocation70_spill] sm:$0xff] }
 0xee0   : > { %2843 = vmatpush1.bf16.msra.mxu0 %v8049_v18  ;;  %2884 = vmatpush1.bf16.msra.mxu1 %v8052_v62  ;;  %v9646_v18 = vld [vmem:[#allocation71_spill] sm:$0xff] }
 0xee1   : > { %2844 = vmatprep.subr.bf16.mxu0 %v8055_v0  ;;  %2885 = vmatprep.subr.bf16.mxu1 %v8058_v35 }
 0xee4   : > { %2845 = vmatpush1.bf16.msra.mxu0 %v8061_v16  ;;  %2886 = vmatpush1.bf16.msra.mxu1 %v8064_v25 }
 0xee5   : > { %2846 = vmatprep.subr.bf16.mxu0 %v8067_v20  ;;  %2887 = vmatprep.subr.bf16.mxu1 %v8070_v17 }
 0xee8   : > { %2847 = vmatpush1.bf16.msra.mxu0 %v8115_v45  ;;  %2888 = vmatpush1.bf16.msra.mxu1 %v8118_v3 }
 0xee9   : > { %2848 = vmatprep.subr.bf16.mxu0 %v8121_v49  ;;  %2889 = vmatprep.subr.bf16.mxu1 %v8124_v42 }
 0xeec   : > { %2849 = vmatpush1.bf16.msra.mxu0 %v8127_v43  ;;  %2890 = vmatpush1.bf16.msra.mxu1 %v8130_v15 }
 0xeed   : > { %2850 = vmatprep.subr.bf16.mxu0 %v8133_v52  ;;  %2891 = vmatprep.subr.bf16.mxu1 %v8136_v4 }
 0xef0   : > { %2851 = vmatpush1.bf16.msra.mxu0 %v8139_v34  ;;  %2892 = vmatpush1.bf16.msra.mxu1 %v8142_v36 }
 0xef1   : > { %3169 = vmatprep.subr.bf16.mxu0 %v6024_v50  ;;  %3282 = vmatprep.subr.bf16.mxu1 %v6027_v51  ;;  %v6066_v50 = vld [vmem:[#allocation10 + $0x1e4] ss:$16 sps:$4 sm:$0xff]   ;;  %v6069_v51 = vld [vmem:[#allocation10 + $0x1ec] ss:$16 sps:$4 sm:$0xff]  }
 0xfa6   : > { %v2760_v32 = vpop.f32.mrb[88].mxu0  ;;  %v2801_v19 = vpop.f32.mrb[88].mxu1 }
 0xfa7   : > { %v2808_v55 = vadd.f32 %v2760_v32, %v9643_v53  ;;  %v2810_v56 = vadd.f32 %v2801_v19, %v9644_v48  ;;  %v2762_v5 = vpop.f32.mrb[89].mxu0  ;;  %v2803_v59 = vpop.f32.mrb[89].mxu1  ;;  %v6064_v32 = vld [vmem:[#allocation10 + $0x1e0] ss:$16 sps:$4 sm:$0xff]   ;;  %v6067_v19 = vld [vmem:[#allocation10 + $0x1e8] ss:$16 sps:$4 sm:$0xff]  }
 0xfa8   : > { %v2809_v61 = vadd.f32 %v2762_v5, %v9645_v60  ;;  %v2811_v62 = vadd.f32 %v2803_v59, %v9646_v18  ;;  %v2764_v0 = vpop.f32.mrb[90].mxu0  ;;  %v2805_v35 = vpop.f32.mrb[90].mxu1  ;;  %v8281_v53 = vld [vmem:[#allocation12 + $0x104] ss:$16 sps:$4 sm:$0xff]   ;;  %v2948_v59 = vld [vmem:[#allocation2 + $0x18] sm:$0xff] }
 0xfa9   : > { %v2812_v16 = vmul.f32 0.5, %v2808_v55  ;;  %v2765_v25 = vpop.f32.mrb[91].mxu0  ;;  %v2806_v20 = vpop.f32.mrb[91].mxu1  ;;  %v2814_v45 = vmul.f32 0.5, %v2810_v56  ;;  %v8284_v55 = vld [vmem:[#allocation12 + $0x100] ss:$16 sps:$4 sm:$0xff]  }
 0xfaa   : > { %v2813_v17 = vmul.f32 0.5, %v2809_v61  ;;  %v2945_v48 = vld [vmem:[#allocation2] sm:$0xff]  ;;  %v2946_v56 = vld [vmem:[#allocation2 + $0x8] sm:$0xff]  ;;  %v2947_v5 = vld [vmem:[#allocation2 + $0x10] sm:$0xff] }
 0xfab   : > { %6258 = vtanh.f32 %v2812_v16  ;;  %v2949_v60 = vld [vmem:[#allocation2 + $0x20] sm:$0xff]  ;;  %v2950_v61 = vld [vmem:[#allocation2 + $0x28] sm:$0xff]  ;;  %v2951_v18 = vld [vmem:[#allocation2 + $0x30] sm:$0xff] }
 0xfac   : > { %6260 = vtanh.f32 %v2813_v17  ;;  %v8304_v0 = vld [vmem:[#allocation12 + $0x108] ss:$16 sps:$4 sm:$0xff]   ;;  %v8307_v35 = vld [vmem:[#allocation12 + $0x124] ss:$16 sps:$4 sm:$0xff]   ;;  %v8309_v16 = vld [vmem:[#allocation12 + $0x12c] ss:$16 sps:$4 sm:$0xff]  }
 0xfad   : > { %6262 = vtanh.f32 %v2811_v62  ;;  %v8301_v62 = vld [vmem:[#allocation12 + $0x10c] ss:$16 sps:$4 sm:$0xff]   ;;  %v8311_v25 = vld [vmem:[#allocation12 + $0x120] ss:$16 sps:$4 sm:$0xff]   ;;  %v8313_v20 = vld [vmem:[#allocation12 + $0x128] ss:$16 sps:$4 sm:$0xff]  }
 0xfae   : > { %6264 = vtanh.f32 %v2814_v45  ;;  %v8319_v17 = vld [vmem:[#allocation12 + $0x144] ss:$16 sps:$4 sm:$0xff]   ;;  %v8321_v45 = vld [vmem:[#allocation12 + $0x14c] ss:$16 sps:$4 sm:$0xff]  }
 0xfb5   : > { %v6259_v3 = vpop.eup %6258 }
 0xfb6   : > { %v2818_v49 = vadd.f32 1.0, %v6259_v3  ;;  %v6261_v42 = vpop.eup %6260  ;;  %v8323_v3 = vld [vmem:[#allocation12 + $0x140] ss:$16 sps:$4 sm:$0xff]  }
 0xfb7   : > { %v2819_v15 = vadd.f32 1.0, %v6261_v42  ;;  %v6263_v52 = vpop.eup %6262  ;;  %v8331_v42 = vld [vmem:[#allocation12 + $0x164] ss:$16 sps:$4 sm:$0xff]  }
 0xfb8   : > { %v2821_v43 = vmul.f32 0.5, %v2818_v49  ;;  %v6265_v21 = vpop.eup %6264  ;;  %v8325_v49 = vld [vmem:[#allocation12 + $0x148] ss:$16 sps:$4 sm:$0xff]  }
 0xfb9   : > { %v2822_v4 = vmul.f32 0.5, %v2819_v15  ;;  %v2820_v46 = vadd.f32 1.0, %v6265_v21  ;;  %v8335_v15 = vld [vmem:[#allocation12 + $0x160] ss:$16 sps:$4 sm:$0xff]   ;;  %v8349_v21 = vld [vmem:[#allocation12 + $0x188] ss:$16 sps:$4 sm:$0xff]  }
 0xfba   : > { %v2826_v34 = vmul.f32 %v6263_v52, %v2821_v43  ;;  %v8333_v43 = vld [vmem:[#allocation12 + $0x16c] ss:$16 sps:$4 sm:$0xff]   ;;  %v8337_v52 = vld [vmem:[#allocation12 + $0x168] ss:$16 sps:$4 sm:$0xff]  }
 0xfbb   : > { %v2825_v36 = vmul.f32 %v2822_v4, %v8236_v23  ;;  %v2823_v57 = vmul.f32 0.5, %v2820_v46  ;;  %v6054_v23 = vld [vmem:[#allocation10 + $0x1a4] ss:$16 sps:$4 sm:$0xff]  }
 0xfbc   : > { %v8343_v4 = vld [vmem:[#allocation12 + $0x184] ss:$16 sps:$4 sm:$0xff]  }
 0xfbd   : > { %v8276_v29 = vadd.f32 %v2826_v34, %v2825_v36  ;;  %v8345_v34 = vld [vmem:[#allocation12 + $0x18c] ss:$16 sps:$4 sm:$0xff]   ;;  %v8347_v36 = vld [vmem:[#allocation12 + $0x180] ss:$16 sps:$4 sm:$0xff]   ;;  %v8353_v46 = vld [vmem:[#allocation12 + $0x1a4] ss:$16 sps:$4 sm:$0xff]  }
 0xfbf   : > { %6266 = vtanh.f32 %v8276_v29 }
 0xfc9   : > { %v6267_v41 = vpop.eup %6266 }
 0xfca   : > { %v2829_v47 = vmul.f32 %v6267_v41, %v2823_v57  ;;  %v8355_v57 = vld [vmem:[#allocation12 + $0x1ac] ss:$16 sps:$4 sm:$0xff]   ;;  %v8359_v41 = vld [vmem:[#allocation12 + $0x1a0] ss:$16 sps:$4 sm:$0xff]  }
 0xfcc   : > { %v2830_v1 = vpack.c.bf16 %v2829_v47, %v2829_v47  ;;  %v8361_v47 = vld [vmem:[#allocation12 + $0x1a8] ss:$16 sps:$4 sm:$0xff]  }
 0xfce   : > { %2831 = vst [vmem:[#allocation2 + $0x38] sm:$0xf] %v2830_v1  ;;  %2869 = vmatmul.mubr.bf16.vlgmr.msra.gmra.mrb[92].mxu0 %v2830_v1  ;;  %2910 = vmatmul.mubr.bf16.vlgmr.msra.gmra.mrb[92].mxu1 %v2830_v1  ;;  %v8372_v1 = vld [vmem:[#allocation12 + $0x1cc] ss:$16 sps:$4 sm:$0xff]  }
 0xfcf   : > { %3170 = vmatpush1.bf16.msra.mxu0 %v6022_v44  ;;  %3283 = vmatpush1.bf16.msra.mxu1 %v6025_v54  ;;  %v8365_v44 = vld [vmem:[#allocation12 + $0x1c4] ss:$16 sps:$4 sm:$0xff]   ;;  %v8369_v54 = vld [vmem:[#allocation12 + $0x1c0] ss:$16 sps:$4 sm:$0xff]  }
 0xfd0   : > { %3171 = vmatprep.subr.bf16.mxu0 %v6030_v2  ;;  %3284 = vmatprep.subr.bf16.mxu1 %v6033_v26  ;;  %v8374_v2 = vld [vmem:[#allocation12 + $0x1c8] ss:$16 sps:$4 sm:$0xff]   ;;  %v8379_v26 = vld [vmem:[#allocation12 + $0x1e4] ss:$16 sps:$4 sm:$0xff]  }
 0xfd1   : > { %3201 = vmatprep.mubr.bf16.mxu0 %v9599_v11  ;;  %3314 = vmatprep.mubr.bf16.mxu1 %v9599_v11 }
 0xfd3   : > { %3172 = vmatpush1.bf16.msra.mxu0 %v6028_v28  ;;  %3285 = vmatpush1.bf16.msra.mxu1 %v6031_v30  ;;  %v8381_v28 = vld [vmem:[#allocation12 + $0x1e0] ss:$16 sps:$4 sm:$0xff]   ;;  %v8383_v30 = vld [vmem:[#allocation12 + $0x1ec] ss:$16 sps:$4 sm:$0xff]  }
 0xfd4   : > { %3173 = vmatprep.subr.bf16.mxu0 %v6036_v58  ;;  %3286 = vmatprep.subr.bf16.mxu1 %v6039_v39  ;;  %v8387_v58 = vld [vmem:[#allocation12 + $0x1e8] ss:$16 sps:$4 sm:$0xff]  }
 0xfd7   : > { %3174 = vmatpush1.bf16.msra.mxu0 %v6034_v40  ;;  %3287 = vmatpush1.bf16.msra.mxu1 %v6037_v63  ;;  %v9647_v63 = vld [vmem:[#allocation72_spill] sm:$0xff] }
 0xfd8   : > { %3175 = vmatprep.subr.bf16.mxu0 %v6042_v12  ;;  %3288 = vmatprep.subr.bf16.mxu1 %v6045_v14  ;;  %v9648_v14 = vld [vmem:[#allocation73_spill] sm:$0xff] }
 0xfdb   : > { %3176 = vmatpush1.bf16.msra.mxu0 %v6040_v38  ;;  %3289 = vmatpush1.bf16.msra.mxu1 %v6043_v27 }
 0xfdc   : > { %3177 = vmatprep.subr.bf16.mxu0 %v6048_v22  ;;  %3290 = vmatprep.subr.bf16.mxu1 %v6051_v6  ;;  %v9649_v6 = vld [vmem:[#allocation74_spill] sm:$0xff] }
 0xfdf   : > { %3178 = vmatpush1.bf16.msra.mxu0 %v6046_v7  ;;  %3291 = vmatpush1.bf16.msra.mxu1 %v6049_v24  ;;  %v9650_v24 = vld [vmem:[#allocation75_spill] sm:$0xff] }
 0xfe0   : > { %3179 = vmatprep.subr.bf16.mxu0 %v6054_v23  ;;  %3292 = vmatprep.subr.bf16.mxu1 %v6057_v8 }
 0xfe3   : > { %3180 = vmatpush1.bf16.msra.mxu0 %v6052_v33  ;;  %3293 = vmatpush1.bf16.msra.mxu1 %v6055_v9 }
 0xfe4   : > { %3181 = vmatprep.subr.bf16.mxu0 %v6060_v13  ;;  %3294 = vmatprep.subr.bf16.mxu1 %v6063_v31 }
 0xfe7   : > { %3182 = vmatpush1.bf16.msra.mxu0 %v6058_v10  ;;  %3295 = vmatpush1.bf16.msra.mxu1 %v6061_v37 }
 0xfe8   : > { %3183 = vmatprep.subr.bf16.mxu0 %v6066_v50  ;;  %3296 = vmatprep.subr.bf16.mxu1 %v6069_v51 }
 0xfeb   : > { %3184 = vmatpush1.bf16.msra.mxu0 %v6064_v32  ;;  %3297 = vmatpush1.bf16.msra.mxu1 %v6067_v19 }
 0xfec   : > { %3657 = vmatprep.subr.bf16.mxu0 %v8281_v53  ;;  %3698 = vmatprep.subr.bf16.mxu1 %v8301_v62 }
 0xfee   : > { %3202 = vmatmul.mubr.bf16.vlgmr.msra.gmra.mrb[96].mxu0 %v2945_v48  ;;  %3315 = vmatmul.mubr.bf16.vlgmr.msra.gmra.mrb[96].mxu1 %v2945_v48 }
 0xfef   : > { %3211 = vmatprep.mubr.bf16.mxu0 %v9599_v11  ;;  %3324 = vmatprep.mubr.bf16.mxu1 %v9599_v11 }
 0xff0   : > { %3658 = vmatpush1.bf16.msra.mxu0 %v8284_v55  ;;  %3699 = vmatpush1.bf16.msra.mxu1 %v8304_v0 }
 0xff1   : > { %3659 = vmatprep.subr.bf16.mxu0 %v8307_v35  ;;  %3700 = vmatprep.subr.bf16.mxu1 %v8309_v16 }
 0xff4   : > { %3660 = vmatpush1.bf16.msra.mxu0 %v8311_v25  ;;  %3701 = vmatpush1.bf16.msra.mxu1 %v8313_v20 }
 0xff5   : > { %3661 = vmatprep.subr.bf16.mxu0 %v8319_v17  ;;  %3702 = vmatprep.subr.bf16.mxu1 %v8321_v45 }
 0xff6   : > { %3212 = vmatmul.mubr.bf16.gmra.mrb[100].mxu0 %v2946_v56  ;;  %3325 = vmatmul.mubr.bf16.gmra.mrb[100].mxu1 %v2946_v56 }
 0xff7   : > { %3221 = vmatprep.mubr.bf16.mxu0 %v9599_v11  ;;  %3334 = vmatprep.mubr.bf16.mxu1 %v9599_v11 }
 0xff8   : > { %3662 = vmatpush1.bf16.msra.mxu0 %v8323_v3  ;;  %3703 = vmatpush1.bf16.msra.mxu1 %v8325_v49 }
 0xff9   : > { %3663 = vmatprep.subr.bf16.mxu0 %v8331_v42  ;;  %3704 = vmatprep.subr.bf16.mxu1 %v8333_v43 }
 0xffc   : > { %3664 = vmatpush1.bf16.msra.mxu0 %v8335_v15  ;;  %3705 = vmatpush1.bf16.msra.mxu1 %v8337_v52 }
 0xffd   : > { %3665 = vmatprep.subr.bf16.mxu0 %v8343_v4  ;;  %3706 = vmatprep.subr.bf16.mxu1 %v8345_v34 }
 0xffe   : > { %3222 = vmatmul.mubr.bf16.gmra.mrb[104].mxu0 %v2947_v5  ;;  %3335 = vmatmul.mubr.bf16.gmra.mrb[104].mxu1 %v2947_v5 }
 0xfff   : > { %3231 = vmatprep.mubr.bf16.mxu0 %v9599_v11  ;;  %3344 = vmatprep.mubr.bf16.mxu1 %v9599_v11 }
0x1000   : > { %3666 = vmatpush1.bf16.msra.mxu0 %v8347_v36  ;;  %3707 = vmatpush1.bf16.msra.mxu1 %v8349_v21 }
0x1001   : > { %3667 = vmatprep.subr.bf16.mxu0 %v8353_v46  ;;  %3708 = vmatprep.subr.bf16.mxu1 %v8355_v57 }
0x1004   : > { %3668 = vmatpush1.bf16.msra.mxu0 %v8359_v41  ;;  %3709 = vmatpush1.bf16.msra.mxu1 %v8361_v47 }
0x1005   : > { %3669 = vmatprep.subr.bf16.mxu0 %v8365_v44  ;;  %3710 = vmatprep.subr.bf16.mxu1 %v8372_v1 }
0x1006   : > { %3232 = vmatmul.mubr.bf16.gmra.mrb[108].mxu0 %v2948_v59  ;;  %3345 = vmatmul.mubr.bf16.gmra.mrb[108].mxu1 %v2948_v59 }
0x1007   : > { %3241 = vmatprep.mubr.bf16.mxu0 %v9599_v11  ;;  %3354 = vmatprep.mubr.bf16.mxu1 %v9599_v11 }
0x1008   : > { %3670 = vmatpush1.bf16.msra.mxu0 %v8369_v54  ;;  %3711 = vmatpush1.bf16.msra.mxu1 %v8374_v2 }
0x1009   : > { %3671 = vmatprep.subr.bf16.mxu0 %v8379_v26  ;;  %3712 = vmatprep.subr.bf16.mxu1 %v8383_v30 }
0x100c   : > { %3672 = vmatpush1.bf16.msra.mxu0 %v8381_v28  ;;  %3713 = vmatpush1.bf16.msra.mxu1 %v8387_v58 }
0x100d   : > { %3767 = vmatprep.subr.bf16.mxu0 %v8281_v53  ;;  %3808 = vmatprep.subr.bf16.mxu1 %v8301_v62 }
0x100e   : > { %3242 = vmatmul.mubr.bf16.gmra.mrb[112].mxu0 %v2949_v60  ;;  %3355 = vmatmul.mubr.bf16.gmra.mrb[112].mxu1 %v2949_v60 }
0x100f   : > { %3251 = vmatprep.mubr.bf16.mxu0 %v9599_v11  ;;  %3364 = vmatprep.mubr.bf16.mxu1 %v9599_v11 }
0x1016   : > { %3252 = vmatmul.mubr.bf16.gmra.mrb[116].mxu0 %v2950_v61  ;;  %3365 = vmatmul.mubr.bf16.gmra.mrb[116].mxu1 %v2950_v61 }
0x1017   : > { %3261 = vmatprep.mubr.bf16.mxu0 %v9599_v11  ;;  %3374 = vmatprep.mubr.bf16.mxu1 %v9599_v11 }
0x101e   : > { %3262 = vmatmul.mubr.bf16.gmra.mrb[120].mxu0 %v2951_v18  ;;  %3375 = vmatmul.mubr.bf16.gmra.mrb[120].mxu1 %v2951_v18 }
0x101f   : > { %3271 = vmatprep.mubr.bf16.mxu0 %v9599_v11  ;;  %3384 = vmatprep.mubr.bf16.mxu1 %v9599_v11 }
0x10a1   : > { %v2870_v39 = vpop.f32.mrb[92].mxu0  ;;  %v2911_v40 = vpop.f32.mrb[92].mxu1 }
0x10a2   : > { %v2918_v12 = vadd.f32 %v2870_v39, %v9647_v63  ;;  %v2920_v38 = vadd.f32 %v2911_v40, %v9648_v14  ;;  %v2872_v27 = vpop.f32.mrb[93].mxu0  ;;  %v2913_v22 = vpop.f32.mrb[93].mxu1 }
0x10a3   : > { %v2919_v7 = vadd.f32 %v2872_v27, %v9649_v6  ;;  %v2921_v23 = vadd.f32 %v2913_v22, %v9650_v24  ;;  %v2874_v8 = vpop.f32.mrb[94].mxu0  ;;  %v2915_v33 = vpop.f32.mrb[94].mxu1 }
0x10a4   : > { %v2922_v9 = vmul.f32 0.5, %v2918_v12  ;;  %v2875_v13 = vpop.f32.mrb[95].mxu0  ;;  %v2916_v31 = vpop.f32.mrb[95].mxu1  ;;  %v2924_v37 = vmul.f32 0.5, %v2920_v38 }
0x10a5   : > { %v2923_v10 = vmul.f32 0.5, %v2919_v7 }
0x10a6   : > { %6268 = vtanh.f32 %v2922_v9 }
0x10a7   : > { %6270 = vtanh.f32 %v2923_v10 }
0x10a8   : > { %6272 = vtanh.f32 %v2921_v23 }
0x10a9   : > { %6274 = vtanh.f32 %v2924_v37 }
0x10b0   : > { %v6269_v50 = vpop.eup %6268 }
0x10b1   : > { %v2928_v51 = vadd.f32 1.0, %v6269_v50  ;;  %v6271_v32 = vpop.eup %6270 }
0x10b2   : > { %v2929_v48 = vadd.f32 1.0, %v6271_v32  ;;  %v6273_v56 = vpop.eup %6272 }
0x10b3   : > { %v2931_v19 = vmul.f32 0.5, %v2928_v51  ;;  %v6275_v18 = vpop.eup %6274 }
0x10b4   : > { %v2932_v5 = vmul.f32 0.5, %v2929_v48  ;;  %v2930_v39 = vadd.f32 1.0, %v6275_v18 }
0x10b5   : > { %v2936_v59 = vmul.f32 %v6273_v56, %v2931_v19 }
0x10b6   : > { %v2935_v60 = vmul.f32 %v2932_v5, %v8276_v29  ;;  %v2933_v22 = vmul.f32 0.5, %v2930_v39  ;;  %v436_v39 = vld [vmem:[#allocation14 + $0x8] sm:$0xff] }
0x10b8   : > { %v2937_v61 = vadd.f32 %v2936_v59, %v2935_v60 }
0x10ba   : > { %6276 = vtanh.f32 %v2937_v61  ;;  %5428 = vst [vmem:[#allocation16] sm:$0xff] %v2937_v61 }
0x10c1   : > { %v8398_v40 = vpop.f32.mrb[96].mxu0  ;;  %v8400_v63 = vpop.f32.mrb[96].mxu1 }
0x10c2   : > { %v8402_v12 = vpop.f32.mrb[97].mxu0  ;;  %v8404_v14 = vpop.f32.mrb[97].mxu1 }
0x10c3   : > { %v8406_v38 = vpop.f32.mrb[98].mxu0  ;;  %v8408_v27 = vpop.f32.mrb[98].mxu1 }
0x10c4   : > { %v8410_v6 = vpop.f32.mrb[99].mxu0  ;;  %v8412_v29 = vpop.f32.mrb[99].mxu1 }
0x10c5   : > { %v6277_v7 = vpop.eup %6276 }
0x10c6   : > { %v2939_v24 = vmul.f32 %v6277_v7, %v2933_v22  ;;  %v3496_v22 = vpack.c.bf16 %v436_v39, %v436_v39 }
0x10c8   : > { %v2940_v23 = vpack.c.bf16 %v2939_v24, %v2939_v24  ;;  %5427 = vst [vmem:[#allocation14] sm:$0xff] %v2939_v24 }
0x10c9   : > { %v8414_v8 = vpop.f32.mrb[100].mxu0  ;;  %v8416_v33 = vpop.f32.mrb[100].mxu1 }
0x10ca   : > { %9651 = vst [vmem:[#allocation25_spill] sm:$0xff] %v8416_v33  ;;  %v2942_v9 = vrot.slane %v2940_v23, 4  ;;  %v8418_v13 = vpop.f32.mrb[101].mxu0  ;;  %v8420_v31 = vpop.f32.mrb[101].mxu1 }
0x10cb   : > { %9652 = vst [vmem:[#allocation26_spill] sm:$0xff] %v8418_v13  ;;  %9653 = vst [vmem:[#allocation27_spill] sm:$0xff] %v8420_v31  ;;  %v8422_v10 = vpop.f32.mrb[102].mxu0  ;;  %v8424_v37 = vpop.f32.mrb[102].mxu1 }
0x10cc   : > { %9654 = vst [vmem:[#allocation28_spill] sm:$0xff] %v8422_v10  ;;  %9655 = vst [vmem:[#allocation29_spill] sm:$0xff] %v8424_v37  ;;  %v8426_v50 = vpop.f32.mrb[103].mxu0  ;;  %v8428_v51 = vpop.f32.mrb[103].mxu1 }
0x10cd   : > { %2944 = vst [vmem:[#allocation2 + $0x38] sm:$0xf0] %v2942_v9  ;;  %9656 = vst [vmem:[#allocation30_spill] sm:$0xff] %v8426_v50 }
0x10ce   : > { %9657 = vst [vmem:[#allocation31_spill] sm:$0xff] %v8428_v51 }
0x10d1   : > { %v8430_v32 = vpop.f32.mrb[104].mxu0  ;;  %v8432_v19 = vpop.f32.mrb[104].mxu1 }
0x10d2   : > { %9658 = vst [vmem:[#allocation32_spill] sm:$0xff] %v8430_v32  ;;  %9659 = vst [vmem:[#allocation33_spill] sm:$0xff] %v8432_v19  ;;  %v8434_v48 = vpop.f32.mrb[105].mxu0  ;;  %v8436_v56 = vpop.f32.mrb[105].mxu1 }
0x10d3   : > { %9660 = vst [vmem:[#allocation34_spill] sm:$0xff] %v8434_v48  ;;  %9661 = vst [vmem:[#allocation35_spill] sm:$0xff] %v8436_v56  ;;  %v8438_v5 = vpop.f32.mrb[106].mxu0  ;;  %v8440_v59 = vpop.f32.mrb[106].mxu1 }
0x10d4   : > { %9662 = vst [vmem:[#allocation36_spill] sm:$0xff] %v8438_v5  ;;  %9663 = vst [vmem:[#allocation37_spill] sm:$0xff] %v8440_v59  ;;  %v2952_v60 = vld [vmem:[#allocation2 + $0x38] sm:$0xff]  ;;  %v8442_v61 = vpop.f32.mrb[107].mxu0  ;;  %v8444_v18 = vpop.f32.mrb[107].mxu1 }
0x10d5   : > { %9664 = vst [vmem:[#allocation38_spill] sm:$0xff] %v8442_v61  ;;  %3272 = vmatmul.mubr.bf16.gmra.mrb[124].mxu0 %v2952_v60  ;;  %9665 = vst [vmem:[#allocation39_spill] sm:$0xff] %v8444_v18  ;;  %3385 = vmatmul.mubr.bf16.gmra.mrb[124].mxu1 %v2952_v60 }
0x10d6   : > { %3689 = vmatprep.mubr.bf16.mxu0 %v9599_v11  ;;  %3730 = vmatprep.mubr.bf16.mxu1 %v9599_v11 }
0x10d9   : > { %v8448_v7 = vpop.f32.mrb[108].mxu0  ;;  %v8450_v24 = vpop.f32.mrb[108].mxu1 }
0x10da   : > { %9666 = vst [vmem:[#allocation40_spill] sm:$0xff] %v8448_v7  ;;  %9667 = vst [vmem:[#allocation41_spill] sm:$0xff] %v8450_v24  ;;  %v8452_v23 = vpop.f32.mrb[109].mxu0  ;;  %v8454_v9 = vpop.f32.mrb[109].mxu1 }
0x10db   : > { %9668 = vst [vmem:[#allocation42_spill] sm:$0xff] %v8452_v23  ;;  %9669 = vst [vmem:[#allocation43_spill] sm:$0xff] %v8454_v9  ;;  %v8456_v59 = vpop.f32.mrb[110].mxu0  ;;  %v8458_v61 = vpop.f32.mrb[110].mxu1  ;;  %v9704_v23 = vld [vmem:[#allocation24_spill] sm:$0xff] }
0x10dc   : > { %9670 = vst [vmem:[#allocation44_spill] sm:$0xff] %v8456_v59  ;;  %9671 = vst [vmem:[#allocation45_spill] sm:$0xff] %v8458_v61  ;;  %v8460_v18 = vpop.f32.mrb[111].mxu0  ;;  %v8462_v60 = vpop.f32.mrb[111].mxu1  ;;  %v9705_v24 = vsub.s32 0, %v9704_v23  ;;  %v9706_v5 = vsub.s32 2, %v9704_v23 }
0x10dd   : > { %9672 = vst [vmem:[#allocation46_spill] sm:$0xff] %v8460_v18  ;;  %9673 = vst [vmem:[#allocation47_spill] sm:$0xff] %v8462_v60  ;;  %3690 = vmatmul.mubr.bf16.vlgmr.msra.gmra.mrb[128].mxu0 %v3496_v22  ;;  %3731 = vmatmul.mubr.bf16.vlgmr.msra.gmra.mrb[128].mxu1 %v3496_v22 }
0x10de   : > { %3768 = vmatpush1.bf16.msra.mxu0 %v8284_v55  ;;  %3809 = vmatpush1.bf16.msra.mxu1 %v8304_v0 }
0x10df   : > { %3769 = vmatprep.subr.bf16.mxu0 %v8307_v35  ;;  %3810 = vmatprep.subr.bf16.mxu1 %v8309_v16 }
0x10e0   : > { %3799 = vmatprep.mubr.bf16.mxu0 %v9599_v11  ;;  %3840 = vmatprep.mubr.bf16.mxu1 %v9599_v11 }
0x10e1   : > { %v8470_v39 = vpop.f32.mrb[112].mxu0  ;;  %v8472_v61 = vpop.f32.mrb[112].mxu1 }
0x10e2   : > { %9674 = vst [vmem:[#allocation48_spill] sm:$0xff] %v8470_v39  ;;  %9675 = vst [vmem:[#allocation49_spill] sm:$0xff] %v8472_v61  ;;  %3770 = vmatpush1.bf16.msra.mxu0 %v8311_v25  ;;  %3811 = vmatpush1.bf16.msra.mxu1 %v8313_v20  ;;  %v8476_v22 = vpop.f32.mrb[113].mxu0  ;;  %v8478_v60 = vpop.f32.mrb[113].mxu1 }
0x10e3   : > { %9676 = vst [vmem:[#allocation50_spill] sm:$0xff] %v8476_v22  ;;  %9677 = vst [vmem:[#allocation51_spill] sm:$0xff] %v8478_v60  ;;  %3771 = vmatprep.subr.bf16.mxu0 %v8319_v17  ;;  %3812 = vmatprep.subr.bf16.mxu1 %v8321_v45  ;;  %v8482_v18 = vpop.f32.mrb[114].mxu0  ;;  %v8484_v59 = vpop.f32.mrb[114].mxu1 }
0x10e4   : > { %9678 = vst [vmem:[#allocation52_spill] sm:$0xff] %v8482_v18  ;;  %9679 = vst [vmem:[#allocation53_spill] sm:$0xff] %v8484_v59  ;;  %v8486_v9 = vpop.f32.mrb[115].mxu0  ;;  %v8488_v39 = vpop.f32.mrb[115].mxu1 }
0x10e5   : > { %9680 = vst [vmem:[#allocation54_spill] sm:$0xff] %v8486_v9  ;;  %9681 = vst [vmem:[#allocation55_spill] sm:$0xff] %v8488_v39 }
0x10e6   : > { %3772 = vmatpush1.bf16.msra.mxu0 %v8323_v3  ;;  %3813 = vmatpush1.bf16.msra.mxu1 %v8325_v49 }
0x10e7   : > { %3773 = vmatprep.subr.bf16.mxu0 %v8331_v42  ;;  %3814 = vmatprep.subr.bf16.mxu1 %v8333_v43 }
0x10e9   : > { %v8494_v60 = vpop.f32.mrb[116].mxu0  ;;  %v8496_v22 = vpop.f32.mrb[116].mxu1 }
0x10ea   : > { %9682 = vst [vmem:[#allocation56_spill] sm:$0xff] %v8494_v60  ;;  %9683 = vst [vmem:[#allocation57_spill] sm:$0xff] %v8496_v22  ;;  %3774 = vmatpush1.bf16.msra.mxu0 %v8335_v15  ;;  %3815 = vmatpush1.bf16.msra.mxu1 %v8337_v52  ;;  %v8500_v59 = vpop.f32.mrb[117].mxu0  ;;  %v8502_v9 = vpop.f32.mrb[117].mxu1 }
0x10eb   : > { %9684 = vst [vmem:[#allocation58_spill] sm:$0xff] %v8500_v59  ;;  %9685 = vst [vmem:[#allocation59_spill] sm:$0xff] %v8502_v9  ;;  %3775 = vmatprep.subr.bf16.mxu0 %v8343_v4  ;;  %3816 = vmatprep.subr.bf16.mxu1 %v8345_v34  ;;  %v8506_v39 = vpop.f32.mrb[118].mxu0  ;;  %v8508_v18 = vpop.f32.mrb[118].mxu1 }
0x10ec   : > { %9686 = vst [vmem:[#allocation60_spill] sm:$0xff] %v8506_v39  ;;  %9687 = vst [vmem:[#allocation61_spill] sm:$0xff] %v8508_v18  ;;  %v8510_v61 = vpop.f32.mrb[119].mxu0  ;;  %v8512_v60 = vpop.f32.mrb[119].mxu1 }
0x10ed   : > { %9688 = vst [vmem:[#allocation62_spill] sm:$0xff] %v8510_v61  ;;  %9689 = vst [vmem:[#allocation63_spill] sm:$0xff] %v8512_v60 }
0x10ee   : > { %3776 = vmatpush1.bf16.msra.mxu0 %v8347_v36  ;;  %3817 = vmatpush1.bf16.msra.mxu1 %v8349_v21 }
0x10ef   : > { %3777 = vmatprep.subr.bf16.mxu0 %v8353_v46  ;;  %3818 = vmatprep.subr.bf16.mxu1 %v8355_v57 }
0x10f1   : > { %v8518_v9 = vpop.f32.mrb[120].mxu0  ;;  %v8520_v59 = vpop.f32.mrb[120].mxu1 }
0x10f2   : > { %9690 = vst [vmem:[#allocation64_spill] sm:$0xff] %v8518_v9  ;;  %9691 = vst [vmem:[#allocation65_spill] sm:$0xff] %v8520_v59  ;;  %3778 = vmatpush1.bf16.msra.mxu0 %v8359_v41  ;;  %3819 = vmatpush1.bf16.msra.mxu1 %v8361_v47  ;;  %v8524_v18 = vpop.f32.mrb[121].mxu0  ;;  %v8526_v61 = vpop.f32.mrb[121].mxu1 }
0x10f3   : > { %9692 = vst [vmem:[#allocation66_spill] sm:$0xff] %v8524_v18  ;;  %9693 = vst [vmem:[#allocation67_spill] sm:$0xff] %v8526_v61  ;;  %3779 = vmatprep.subr.bf16.mxu0 %v8365_v44  ;;  %3820 = vmatprep.subr.bf16.mxu1 %v8372_v1  ;;  %v8530_v60 = vpop.f32.mrb[122].mxu0  ;;  %v8532_v39 = vpop.f32.mrb[122].mxu1 }
0x10f4   : > { %9694 = vst [vmem:[#allocation68_spill] sm:$0xff] %v8530_v60  ;;  %9695 = vst [vmem:[#allocation69_spill] sm:$0xff] %v8532_v39  ;;  %v8534_v22 = vpop.f32.mrb[123].mxu0  ;;  %v8536_v9 = vpop.f32.mrb[123].mxu1 }
0x10f5   : > { %9696 = vst [vmem:[#allocation70_spill] sm:$0xff] %v8534_v22  ;;  %9697 = vst [vmem:[#allocation71_spill] sm:$0xff] %v8536_v9  ;;  %v5711_v9 = vld [vmem:[%s9499_s5 + $0x4] sm:$0xf] }
0x10f6   : > { %3780 = vmatpush1.bf16.msra.mxu0 %v8369_v54  ;;  %3821 = vmatpush1.bf16.msra.mxu1 %v8374_v2  ;;  %v8563_v7 = vrot.slane %v5711_v9, %v9705_v24  ;;  %v8567_v56 = vrot.slane %v5711_v9, %v9706_v5 }
0x10f7   : > { %3781 = vmatprep.subr.bf16.mxu0 %v8379_v26  ;;  %3822 = vmatprep.subr.bf16.mxu1 %v8383_v30 }
0x10f8   : > { %v3204_v24 = vadd.f32 %v8398_v40, %v8563_v7 }
0x10fa   : > { %3782 = vmatpush1.bf16.msra.mxu0 %v8381_v28  ;;  %3823 = vmatpush1.bf16.msra.mxu1 %v8387_v58 }
0x10fb   : > { %3878 = vmatprep.subr.bf16.mxu0 %v8281_v53  ;;  %3919 = vmatprep.subr.bf16.mxu1 %v8301_v62 }
0x11a8   : > { %v8549_v22 = vpop.f32.mrb[124].mxu0  ;;  %v8551_v39 = vpop.f32.mrb[124].mxu1 }
0x11a9   : > { %9698 = vst [vmem:[#allocation72_spill] sm:$0xff] %v8549_v22  ;;  %9699 = vst [vmem:[#allocation73_spill] sm:$0xff] %v8551_v39  ;;  %v8553_v60 = vpop.f32.mrb[125].mxu0  ;;  %v8555_v61 = vpop.f32.mrb[125].mxu1 }
0x11aa   : > { %9700 = vst [vmem:[#allocation74_spill] sm:$0xff] %v8553_v60  ;;  %9701 = vst [vmem:[#allocation75_spill] sm:$0xff] %v8555_v61  ;;  %v8557_v18 = vpop.f32.mrb[126].mxu0  ;;  %v8559_v59 = vpop.f32.mrb[126].mxu1  ;;  %v9709_v60 = vsub.s32 1, %v9704_v23 }
0x11ab   : > { %9702 = vst [vmem:[#allocation76_spill] sm:$0xff] %v8557_v18  ;;  %9703 = vst [vmem:[#allocation77_spill] sm:$0xff] %v8559_v59  ;;  %v8569_v48 = vpop.f32.mrb[127].mxu0  ;;  %v8571_v22 = vpop.f32.mrb[127].mxu1  ;;  %v9710_v18 = vsub.s32 3, %v9704_v23  ;;  %v3317_v59 = vadd.f32 %v8400_v63, %v8567_v56 }
0x11ac   : > { %9707 = vst [vmem:[#allocation24_spill] sm:$0xff] %v8569_v48  ;;  %9708 = vst [vmem:[#allocation78_spill] sm:$0xff] %v8571_v22  ;;  %v8575_v39 = vrot.slane %v5711_v9, %v9709_v60 }
0x11ad   : > { %v8579_v61 = vrot.slane %v5711_v9, %v9710_v18 }
0x11ae   : > { %v3206_v5 = vadd.f32 %v8402_v12, %v8575_v39 }
0x11af   : > { %v3319_v22 = vadd.f32 %v8404_v14, %v8579_v61 }
0x11b0   : > { %v3691_v48 = vpop.f32.mrb[128].mxu0  ;;  %v3732_v19 = vpop.f32.mrb[128].mxu1 }
0x11b1   : > { %v3739_v60 = vadd.f32 %v3691_v48, %v3204_v24  ;;  %v3741_v32 = vadd.f32 %v3732_v19, %v3317_v59  ;;  %v3693_v51 = vpop.f32.mrb[129].mxu0  ;;  %v3734_v23 = vpop.f32.mrb[129].mxu1 }
0x11b2   : > { %v3740_v18 = vadd.f32 %v3693_v51, %v3206_v5  ;;  %v3742_v9 = vadd.f32 %v3734_v23, %v3319_v22  ;;  %v3695_v50 = vpop.f32.mrb[130].mxu0  ;;  %v3736_v37 = vpop.f32.mrb[130].mxu1  ;;  %v439_v51 = vld [vmem:[#allocation16 + $0x8] sm:$0xff]  ;;  %v3321_v23 = vadd.f32 %v8408_v27, %v8567_v56 }
0x11b3   : > { %v3743_v40 = vmul.f32 0.5, %v3739_v60  ;;  %v3696_v10 = vpop.f32.mrb[131].mxu0  ;;  %v3737_v31 = vpop.f32.mrb[131].mxu1  ;;  %v3745_v12 = vmul.f32 0.5, %v3741_v32 }
0x11b4   : > { %v3744_v63 = vmul.f32 0.5, %v3740_v18  ;;  %v3210_v18 = vadd.f32 %v8410_v6, %v8575_v39 }
0x11b5   : > { %6278 = vtanh.f32 %v3743_v40 }
0x11b6   : > { %6280 = vtanh.f32 %v3744_v63 }
0x11b7   : > { %6282 = vtanh.f32 %v3742_v9  ;;  %v3323_v9 = vadd.f32 %v8412_v29, %v8579_v61 }
0x11b8   : > { %6284 = vtanh.f32 %v3745_v12 }
0x11bf   : > { %v6279_v13 = vpop.eup %6278 }
0x11c0   : > { %v3749_v14 = vadd.f32 1.0, %v6279_v13  ;;  %v6281_v33 = vpop.eup %6280 }
0x11c1   : > { %v3750_v19 = vadd.f32 1.0, %v6281_v33  ;;  %v6283_v59 = vpop.eup %6282  ;;  %v3208_v33 = vadd.f32 %v8406_v38, %v8563_v7 }
0x11c2   : > { %v3752_v48 = vmul.f32 0.5, %v3749_v14  ;;  %v6285_v31 = vpop.eup %6284 }
0x11c3   : > { %v3753_v22 = vmul.f32 0.5, %v3750_v19  ;;  %v3751_v10 = vadd.f32 1.0, %v6285_v31 }
0x11c4   : > { %v3757_v50 = vmul.f32 %v6283_v59, %v3752_v48 }
0x11c5   : > { %v3756_v37 = vmul.f32 %v3753_v22, %v439_v51  ;;  %v3754_v5 = vmul.f32 0.5, %v3751_v10 }
0x11c7   : > { %v8589_v24 = vadd.f32 %v3757_v50, %v3756_v37 }
0x11c9   : > { %6286 = vtanh.f32 %v8589_v24 }
0x11d3   : > { %v6287_v32 = vpop.eup %6286 }
0x11d4   : > { %v3760_v60 = vmul.f32 %v6287_v32, %v3754_v5 }
0x11d6   : > { %3761 = vst [vmem:[%s7172_s17] sm:$0xff] %v3760_v60  ;;  %v3766_v13 = vpack.c.bf16 %v3760_v60, %v3760_v60 }
0x11d8   : > { %3800 = vmatmul.mubr.bf16.vlgmr.msra.gmra.mrb[132].mxu0 %v3766_v13  ;;  %3841 = vmatmul.mubr.bf16.vlgmr.msra.gmra.mrb[132].mxu1 %v3766_v13 }
0x11d9   : > { %3879 = vmatpush1.bf16.msra.mxu0 %v8284_v55  ;;  %3920 = vmatpush1.bf16.msra.mxu1 %v8304_v0 }
0x11da   : > { %3880 = vmatprep.subr.bf16.mxu0 %v8307_v35  ;;  %3921 = vmatprep.subr.bf16.mxu1 %v8309_v16 }
0x11db   : > { %3910 = vmatprep.mubr.bf16.mxu0 %v9599_v11  ;;  %3951 = vmatprep.mubr.bf16.mxu1 %v9599_v11 }
0x11dd   : > { %3881 = vmatpush1.bf16.msra.mxu0 %v8311_v25  ;;  %3922 = vmatpush1.bf16.msra.mxu1 %v8313_v20 }
0x11de   : > { %3882 = vmatprep.subr.bf16.mxu0 %v8319_v17  ;;  %3923 = vmatprep.subr.bf16.mxu1 %v8321_v45 }
0x11e1   : > { %3883 = vmatpush1.bf16.msra.mxu0 %v8323_v3  ;;  %3924 = vmatpush1.bf16.msra.mxu1 %v8325_v49 }
0x11e2   : > { %3884 = vmatprep.subr.bf16.mxu0 %v8331_v42  ;;  %3925 = vmatprep.subr.bf16.mxu1 %v8333_v43 }
0x11e5   : > { %3885 = vmatpush1.bf16.msra.mxu0 %v8335_v15  ;;  %3926 = vmatpush1.bf16.msra.mxu1 %v8337_v52 }
0x11e6   : > { %3886 = vmatprep.subr.bf16.mxu0 %v8343_v4  ;;  %3927 = vmatprep.subr.bf16.mxu1 %v8345_v34 }
0x11e9   : > { %3887 = vmatpush1.bf16.msra.mxu0 %v8347_v36  ;;  %3928 = vmatpush1.bf16.msra.mxu1 %v8349_v21 }
0x11ea   : > { %3888 = vmatprep.subr.bf16.mxu0 %v8353_v46  ;;  %3929 = vmatprep.subr.bf16.mxu1 %v8355_v57 }
0x11ed   : > { %3889 = vmatpush1.bf16.msra.mxu0 %v8359_v41  ;;  %3930 = vmatpush1.bf16.msra.mxu1 %v8361_v47 }
0x11ee   : > { %3890 = vmatprep.subr.bf16.mxu0 %v8365_v44  ;;  %3931 = vmatprep.subr.bf16.mxu1 %v8372_v1 }
0x11f1   : > { %3891 = vmatpush1.bf16.msra.mxu0 %v8369_v54  ;;  %3932 = vmatpush1.bf16.msra.mxu1 %v8374_v2 }
0x11f2   : > { %3892 = vmatprep.subr.bf16.mxu0 %v8379_v26  ;;  %3933 = vmatprep.subr.bf16.mxu1 %v8383_v30 }
0x11f5   : > { %3893 = vmatpush1.bf16.msra.mxu0 %v8381_v28  ;;  %3934 = vmatpush1.bf16.msra.mxu1 %v8387_v58 }
0x11f6   : > { %3989 = vmatprep.subr.bf16.mxu0 %v8281_v53  ;;  %4030 = vmatprep.subr.bf16.mxu1 %v8301_v62 }
0x12ab   : > { %v3801_v40 = vpop.f32.mrb[132].mxu0  ;;  %v3842_v63 = vpop.f32.mrb[132].mxu1 }
0x12ac   : > { %v3849_v12 = vadd.f32 %v3801_v40, %v3208_v33  ;;  %v3851_v14 = vadd.f32 %v3842_v63, %v3321_v23  ;;  %v3803_v48 = vpop.f32.mrb[133].mxu0  ;;  %v3844_v19 = vpop.f32.mrb[133].mxu1 }
0x12ad   : > { %v3850_v59 = vadd.f32 %v3803_v48, %v3210_v18  ;;  %v3852_v51 = vadd.f32 %v3844_v19, %v3323_v9  ;;  %v3805_v22 = vpop.f32.mrb[134].mxu0  ;;  %v3846_v50 = vpop.f32.mrb[134].mxu1 }
0x12ae   : > { %v3853_v38 = vmul.f32 0.5, %v3849_v12  ;;  %v3806_v37 = vpop.f32.mrb[135].mxu0  ;;  %v3847_v31 = vpop.f32.mrb[135].mxu1  ;;  %v3855_v6 = vmul.f32 0.5, %v3851_v14  ;;  %v9712_v22 = vld [vmem:[#allocation26_spill] sm:$0xff] }
0x12af   : > { %v3854_v27 = vmul.f32 0.5, %v3850_v59  ;;  %v9711_v59 = vld [vmem:[#allocation25_spill] sm:$0xff]  ;;  %v3216_v50 = vadd.f32 %v9712_v22, %v8575_v39 }
0x12b0   : > { %6288 = vtanh.f32 %v3853_v38  ;;  %v9713_v38 = vld [vmem:[#allocation27_spill] sm:$0xff] }
0x12b1   : > { %6290 = vtanh.f32 %v3854_v27  ;;  %v3329_v37 = vadd.f32 %v9713_v38, %v8579_v61 }
0x12b2   : > { %6292 = vtanh.f32 %v3852_v51  ;;  %v3327_v51 = vadd.f32 %v9711_v59, %v8567_v56 }
0x12b3   : > { %6294 = vtanh.f32 %v3855_v6 }
0x12ba   : > { %v6289_v10 = vpop.eup %6288 }
0x12bb   : > { %v3859_v29 = vadd.f32 1.0, %v6289_v10  ;;  %v6291_v5 = vpop.eup %6290 }
0x12bc   : > { %v3860_v60 = vadd.f32 1.0, %v6291_v5  ;;  %v6293_v13 = vpop.eup %6292 }
0x12bd   : > { %v3862_v32 = vmul.f32 0.5, %v3859_v29  ;;  %v6295_v40 = vpop.eup %6294 }
0x12be   : > { %v3863_v33 = vmul.f32 0.5, %v3860_v60  ;;  %v3861_v63 = vadd.f32 1.0, %v6295_v40 }
0x12bf   : > { %v3867_v23 = vmul.f32 %v6293_v13, %v3862_v32 }
0x12c0   : > { %v3866_v18 = vmul.f32 %v3863_v33, %v8589_v24  ;;  %v3864_v12 = vmul.f32 0.5, %v3861_v63  ;;  %v3214_v24 = vadd.f32 %v8414_v8, %v8563_v7 }
0x12c2   : > { %v8636_v9 = vadd.f32 %v3867_v23, %v3866_v18 }
0x12c4   : > { %6296 = vtanh.f32 %v8636_v9 }
0x12ce   : > { %v6297_v14 = vpop.eup %6296 }
0x12cf   : > { %v3870_v48 = vmul.f32 %v6297_v14, %v3864_v12 }
0x12d1   : > { %5776 = vst [vmem:[%s7172_s17 + $0x8] sm:$0xff] %v3870_v48  ;;  %v3877_v19 = vpack.c.bf16 %v3870_v48, %v3870_v48 }
0x12d3   : > { %3911 = vmatmul.mubr.bf16.vlgmr.msra.gmra.mrb[136].mxu0 %v3877_v19  ;;  %3952 = vmatmul.mubr.bf16.vlgmr.msra.gmra.mrb[136].mxu1 %v3877_v19 }
0x12d4   : > { %3990 = vmatpush1.bf16.msra.mxu0 %v8284_v55  ;;  %4031 = vmatpush1.bf16.msra.mxu1 %v8304_v0 }
0x12d5   : > { %3991 = vmatprep.subr.bf16.mxu0 %v8307_v35  ;;  %4032 = vmatprep.subr.bf16.mxu1 %v8309_v16 }
0x12d6   : > { %4021 = vmatprep.mubr.bf16.mxu0 %v9599_v11  ;;  %4062 = vmatprep.mubr.bf16.mxu1 %v9599_v11 }
0x12d8   : > { %3992 = vmatpush1.bf16.msra.mxu0 %v8311_v25  ;;  %4033 = vmatpush1.bf16.msra.mxu1 %v8313_v20 }
0x12d9   : > { %3993 = vmatprep.subr.bf16.mxu0 %v8319_v17  ;;  %4034 = vmatprep.subr.bf16.mxu1 %v8321_v45 }
0x12dc   : > { %3994 = vmatpush1.bf16.msra.mxu0 %v8323_v3  ;;  %4035 = vmatpush1.bf16.msra.mxu1 %v8325_v49 }
0x12dd   : > { %3995 = vmatprep.subr.bf16.mxu0 %v8331_v42  ;;  %4036 = vmatprep.subr.bf16.mxu1 %v8333_v43 }
0x12e0   : > { %3996 = vmatpush1.bf16.msra.mxu0 %v8335_v15  ;;  %4037 = vmatpush1.bf16.msra.mxu1 %v8337_v52 }
0x12e1   : > { %3997 = vmatprep.subr.bf16.mxu0 %v8343_v4  ;;  %4038 = vmatprep.subr.bf16.mxu1 %v8345_v34 }
0x12e4   : > { %3998 = vmatpush1.bf16.msra.mxu0 %v8347_v36  ;;  %4039 = vmatpush1.bf16.msra.mxu1 %v8349_v21 }
0x12e5   : > { %3999 = vmatprep.subr.bf16.mxu0 %v8353_v46  ;;  %4040 = vmatprep.subr.bf16.mxu1 %v8355_v57 }
0x12e8   : > { %4000 = vmatpush1.bf16.msra.mxu0 %v8359_v41  ;;  %4041 = vmatpush1.bf16.msra.mxu1 %v8361_v47 }
0x12e9   : > { %4001 = vmatprep.subr.bf16.mxu0 %v8365_v44  ;;  %4042 = vmatprep.subr.bf16.mxu1 %v8372_v1 }
0x12ec   : > { %4002 = vmatpush1.bf16.msra.mxu0 %v8369_v54  ;;  %4043 = vmatpush1.bf16.msra.mxu1 %v8374_v2 }
0x12ed   : > { %4003 = vmatprep.subr.bf16.mxu0 %v8379_v26  ;;  %4044 = vmatprep.subr.bf16.mxu1 %v8383_v30 }
0x12f0   : > { %4004 = vmatpush1.bf16.msra.mxu0 %v8381_v28  ;;  %4045 = vmatpush1.bf16.msra.mxu1 %v8387_v58 }
0x12f1   : > { %4100 = vmatprep.subr.bf16.mxu0 %v8281_v53  ;;  %4141 = vmatprep.subr.bf16.mxu1 %v8301_v62 }
0x13a6   : > { %v3912_v31 = vpop.f32.mrb[136].mxu0  ;;  %v3953_v27 = vpop.f32.mrb[136].mxu1 }
0x13a7   : > { %v3960_v6 = vadd.f32 %v3912_v31, %v3214_v24  ;;  %v3962_v10 = vadd.f32 %v3953_v27, %v3327_v51  ;;  %v3914_v29 = vpop.f32.mrb[137].mxu0  ;;  %v3955_v5 = vpop.f32.mrb[137].mxu1 }
0x13a8   : > { %v3961_v32 = vadd.f32 %v3914_v29, %v3216_v50  ;;  %v3963_v60 = vadd.f32 %v3955_v5, %v3329_v37  ;;  %v3916_v13 = vpop.f32.mrb[138].mxu0  ;;  %v3957_v33 = vpop.f32.mrb[138].mxu1  ;;  %v9715_v5 = vld [vmem:[#allocation29_spill] sm:$0xff] }
0x13a9   : > { %v3964_v8 = vmul.f32 0.5, %v3960_v6  ;;  %v3917_v23 = vpop.f32.mrb[139].mxu0  ;;  %v3958_v18 = vpop.f32.mrb[139].mxu1  ;;  %v3966_v63 = vmul.f32 0.5, %v3962_v10  ;;  %v9717_v33 = vld [vmem:[#allocation31_spill] sm:$0xff] }
0x13aa   : > { %v3965_v40 = vmul.f32 0.5, %v3961_v32  ;;  %v3331_v32 = vadd.f32 %v9715_v5, %v8567_v56 }
0x13ab   : > { %6298 = vtanh.f32 %v3964_v8  ;;  %v3333_v8 = vadd.f32 %v9717_v33, %v8579_v61 }
0x13ac   : > { %6300 = vtanh.f32 %v3965_v40 }
0x13ad   : > { %6302 = vtanh.f32 %v3963_v60  ;;  %v9716_v60 = vld [vmem:[#allocation30_spill] sm:$0xff] }
0x13ae   : > { %6304 = vtanh.f32 %v3966_v63  ;;  %v3220_v13 = vadd.f32 %v9716_v60, %v8575_v39 }
0x13b5   : > { %v6299_v12 = vpop.eup %6298 }
0x13b6   : > { %v3970_v14 = vadd.f32 1.0, %v6299_v12  ;;  %v6301_v48 = vpop.eup %6300 }
0x13b7   : > { %v3971_v24 = vadd.f32 1.0, %v6301_v48  ;;  %v6303_v59 = vpop.eup %6302 }
0x13b8   : > { %v3973_v19 = vmul.f32 0.5, %v3970_v14  ;;  %v6305_v37 = vpop.eup %6304 }
0x13b9   : > { %v3974_v51 = vmul.f32 0.5, %v3971_v24  ;;  %v3972_v31 = vadd.f32 1.0, %v6305_v37 }
0x13ba   : > { %v3978_v22 = vmul.f32 %v6303_v59, %v3973_v19 }
0x13bb   : > { %v3977_v50 = vmul.f32 %v3974_v51, %v8636_v9  ;;  %v3975_v27 = vmul.f32 0.5, %v3972_v31 }
0x13bd   : > { %v8683_v38 = vadd.f32 %v3978_v22, %v3977_v50 }
0x13bf   : > { %6306 = vtanh.f32 %v8683_v38 }
0x13c9   : > { %v6307_v6 = vpop.eup %6306 }
0x13ca   : > { %v3981_v10 = vmul.f32 %v6307_v6, %v3975_v27 }
0x13cc   : > { %5777 = vst [vmem:[%s7172_s17 + $0x10] sm:$0xff] %v3981_v10  ;;  %v3988_v29 = vpack.c.bf16 %v3981_v10, %v3981_v10 }
0x13ce   : > { %4022 = vmatmul.mubr.bf16.vlgmr.msra.gmra.mrb[140].mxu0 %v3988_v29  ;;  %4063 = vmatmul.mubr.bf16.vlgmr.msra.gmra.mrb[140].mxu1 %v3988_v29 }
0x13cf   : > { %4101 = vmatpush1.bf16.msra.mxu0 %v8284_v55  ;;  %4142 = vmatpush1.bf16.msra.mxu1 %v8304_v0  ;;  %v9714_v55 = vld [vmem:[#allocation28_spill] sm:$0xff] }
0x13d0   : > { %4102 = vmatprep.subr.bf16.mxu0 %v8307_v35  ;;  %4143 = vmatprep.subr.bf16.mxu1 %v8309_v16  ;;  %v3218_v9 = vadd.f32 %v9714_v55, %v8563_v7 }
0x13d1   : > { %4132 = vmatprep.mubr.bf16.mxu0 %v9599_v11  ;;  %4173 = vmatprep.mubr.bf16.mxu1 %v9599_v11 }
0x13d3   : > { %4103 = vmatpush1.bf16.msra.mxu0 %v8311_v25  ;;  %4144 = vmatpush1.bf16.msra.mxu1 %v8313_v20 }
0x13d4   : > { %4104 = vmatprep.subr.bf16.mxu0 %v8319_v17  ;;  %4145 = vmatprep.subr.bf16.mxu1 %v8321_v45 }
0x13d7   : > { %4105 = vmatpush1.bf16.msra.mxu0 %v8323_v3  ;;  %4146 = vmatpush1.bf16.msra.mxu1 %v8325_v49 }
0x13d8   : > { %4106 = vmatprep.subr.bf16.mxu0 %v8331_v42  ;;  %4147 = vmatprep.subr.bf16.mxu1 %v8333_v43 }
0x13db   : > { %4107 = vmatpush1.bf16.msra.mxu0 %v8335_v15  ;;  %4148 = vmatpush1.bf16.msra.mxu1 %v8337_v52 }
0x13dc   : > { %4108 = vmatprep.subr.bf16.mxu0 %v8343_v4  ;;  %4149 = vmatprep.subr.bf16.mxu1 %v8345_v34 }
0x13df   : > { %4109 = vmatpush1.bf16.msra.mxu0 %v8347_v36  ;;  %4150 = vmatpush1.bf16.msra.mxu1 %v8349_v21 }
0x13e0   : > { %4110 = vmatprep.subr.bf16.mxu0 %v8353_v46  ;;  %4151 = vmatprep.subr.bf16.mxu1 %v8355_v57 }
0x13e3   : > { %4111 = vmatpush1.bf16.msra.mxu0 %v8359_v41  ;;  %4152 = vmatpush1.bf16.msra.mxu1 %v8361_v47 }
0x13e4   : > { %4112 = vmatprep.subr.bf16.mxu0 %v8365_v44  ;;  %4153 = vmatprep.subr.bf16.mxu1 %v8372_v1 }
0x13e7   : > { %4113 = vmatpush1.bf16.msra.mxu0 %v8369_v54  ;;  %4154 = vmatpush1.bf16.msra.mxu1 %v8374_v2 }
0x13e8   : > { %4114 = vmatprep.subr.bf16.mxu0 %v8379_v26  ;;  %4155 = vmatprep.subr.bf16.mxu1 %v8383_v30 }
0x13eb   : > { %4115 = vmatpush1.bf16.msra.mxu0 %v8381_v28  ;;  %4156 = vmatpush1.bf16.msra.mxu1 %v8387_v58 }
0x13ec   : > { %4211 = vmatprep.subr.bf16.mxu0 %v8281_v53  ;;  %4252 = vmatprep.subr.bf16.mxu1 %v8301_v62 }
0x14a1   : > { %v4023_v23 = vpop.f32.mrb[140].mxu0  ;;  %v4064_v18 = vpop.f32.mrb[140].mxu1 }
0x14a2   : > { %v4071_v40 = vadd.f32 %v4023_v23, %v3218_v9  ;;  %v4073_v63 = vadd.f32 %v4064_v18, %v3331_v32  ;;  %v4025_v12 = vpop.f32.mrb[141].mxu0  ;;  %v4066_v53 = vpop.f32.mrb[141].mxu1 }
0x14a3   : > { %v4072_v14 = vadd.f32 %v4025_v12, %v3220_v13  ;;  %v4074_v62 = vadd.f32 %v4066_v53, %v3333_v8  ;;  %v4027_v48 = vpop.f32.mrb[142].mxu0  ;;  %v4068_v19 = vpop.f32.mrb[142].mxu1 }
0x14a4   : > { %v4075_v24 = vmul.f32 0.5, %v4071_v40  ;;  %v4028_v59 = vpop.f32.mrb[143].mxu0  ;;  %v4069_v51 = vpop.f32.mrb[143].mxu1  ;;  %v4077_v50 = vmul.f32 0.5, %v4073_v63  ;;  %v8734_v40 = vld [vmem:[#allocation12 + $0x100] ss:$16 sps:$4 sm:$0xff]  }
0x14a5   : > { %v4076_v22 = vmul.f32 0.5, %v4072_v14 }
0x14a6   : > { %6308 = vtanh.f32 %v4075_v24 }
0x14a7   : > { %6310 = vtanh.f32 %v4076_v22 }
0x14a8   : > { %6312 = vtanh.f32 %v4074_v62 }
0x14a9   : > { %6314 = vtanh.f32 %v4077_v50  ;;  %v8788_v50 = vld [vmem:[#allocation12 + $0x108] ss:$16 sps:$4 sm:$0xff]  }
0x14b0   : > { %v6309_v37 = vpop.eup %6308 }
0x14b1   : > { %v4081_v31 = vadd.f32 1.0, %v6309_v37  ;;  %v6311_v27 = vpop.eup %6310  ;;  %v8791_v37 = vld [vmem:[#allocation12 + $0x124] ss:$16 sps:$4 sm:$0xff]  }
0x14b2   : > { %v4082_v10 = vadd.f32 1.0, %v6311_v27  ;;  %v6313_v29 = vpop.eup %6312  ;;  %v8799_v27 = vld [vmem:[#allocation12 + $0x120] ss:$16 sps:$4 sm:$0xff]  }
0x14b3   : > { %v4084_v6 = vmul.f32 0.5, %v4081_v31  ;;  %v6315_v60 = vpop.eup %6314  ;;  %v8794_v31 = vld [vmem:[#allocation12 + $0x12c] ss:$16 sps:$4 sm:$0xff]  }
0x14b4   : > { %v4085_v55 = vmul.f32 0.5, %v4082_v10  ;;  %v4083_v13 = vadd.f32 1.0, %v6315_v60  ;;  %v8805_v10 = vld [vmem:[#allocation12 + $0x144] ss:$16 sps:$4 sm:$0xff]   ;;  %v8823_v60 = vld [vmem:[#allocation12 + $0x160] ss:$16 sps:$4 sm:$0xff]  }
0x14b5   : > { %v4089_v9 = vmul.f32 %v6313_v29, %v4084_v6  ;;  %v8802_v6 = vld [vmem:[#allocation12 + $0x128] ss:$16 sps:$4 sm:$0xff]   ;;  %v8808_v29 = vld [vmem:[#allocation12 + $0x14c] ss:$16 sps:$4 sm:$0xff]  }
0x14b6   : > { %v4088_v5 = vmul.f32 %v4085_v55, %v8683_v38  ;;  %v4086_v33 = vmul.f32 0.5, %v4083_v13  ;;  %v8811_v55 = vld [vmem:[#allocation12 + $0x140] ss:$16 sps:$4 sm:$0xff]   ;;  %v8826_v13 = vld [vmem:[#allocation12 + $0x168] ss:$16 sps:$4 sm:$0xff]  }
0x14b8   : > { %v8730_v32 = vadd.f32 %v4089_v9, %v4088_v5  ;;  %v8814_v9 = vld [vmem:[#allocation12 + $0x148] ss:$16 sps:$4 sm:$0xff]   ;;  %v8817_v5 = vld [vmem:[#allocation12 + $0x164] ss:$16 sps:$4 sm:$0xff]  }
0x14ba   : > { %6316 = vtanh.f32 %v8730_v32 }
0x14c4   : > { %v6317_v8 = vpop.eup %6316 }
0x14c5   : > { %v4092_v23 = vmul.f32 %v6317_v8, %v4086_v33  ;;  %v8829_v33 = vld [vmem:[#allocation12 + $0x184] ss:$16 sps:$4 sm:$0xff]   ;;  %v8832_v8 = vld [vmem:[#allocation12 + $0x18c] ss:$16 sps:$4 sm:$0xff]  }
0x14c7   : > { %5778 = vst [vmem:[%s7172_s17 + $0x18] sm:$0xff] %v4092_v23  ;;  %v4099_v18 = vpack.c.bf16 %v4092_v23, %v4092_v23  ;;  %v8835_v23 = vld [vmem:[#allocation12 + $0x180] ss:$16 sps:$4 sm:$0xff]  }
0x14c9   : > { %4133 = vmatmul.mubr.bf16.vlgmr.msra.gmra.mrb[144].mxu0 %v4099_v18  ;;  %4174 = vmatmul.mubr.bf16.vlgmr.msra.gmra.mrb[144].mxu1 %v4099_v18  ;;  %v8838_v18 = vld [vmem:[#allocation12 + $0x188] ss:$16 sps:$4 sm:$0xff]  }
0x14ca   : > { %4212 = vmatpush1.bf16.msra.mxu0 %v8734_v40  ;;  %4253 = vmatpush1.bf16.msra.mxu1 %v8304_v0  ;;  %v8768_v0 = vld [vmem:[#allocation12 + $0x104] ss:$16 sps:$4 sm:$0xff]  }
0x14cb   : > { %4213 = vmatprep.subr.bf16.mxu0 %v8307_v35  ;;  %4254 = vmatprep.subr.bf16.mxu1 %v8309_v16  ;;  %v8771_v35 = vld [vmem:[#allocation12 + $0x10c] ss:$16 sps:$4 sm:$0xff]   ;;  %v9718_v16 = vld [vmem:[#allocation32_spill] sm:$0xff] }
0x14cc   : > { %4243 = vmatprep.mubr.bf16.mxu0 %v9599_v11  ;;  %4284 = vmatprep.mubr.bf16.mxu1 %v9599_v11 }
0x14ce   : > { %4214 = vmatpush1.bf16.msra.mxu0 %v8311_v25  ;;  %4255 = vmatpush1.bf16.msra.mxu1 %v8313_v20  ;;  %v3224_v25 = vadd.f32 %v9718_v16, %v8563_v7  ;;  %v9719_v20 = vld [vmem:[#allocation33_spill] sm:$0xff]  ;;  %v8841_v16 = vld [vmem:[#allocation12 + $0x1a4] ss:$16 sps:$4 sm:$0xff]  }
0x14cf   : > { %4215 = vmatprep.subr.bf16.mxu0 %v8319_v17  ;;  %4256 = vmatprep.subr.bf16.mxu1 %v8321_v45  ;;  %v3337_v17 = vadd.f32 %v9719_v20, %v8567_v56  ;;  %v9720_v45 = vld [vmem:[#allocation34_spill] sm:$0xff] }
0x14d0   : > { %v8847_v20 = vld [vmem:[#allocation12 + $0x1a0] ss:$16 sps:$4 sm:$0xff]  }
0x14d2   : > { %4216 = vmatpush1.bf16.msra.mxu0 %v8323_v3  ;;  %4257 = vmatpush1.bf16.msra.mxu1 %v8325_v49  ;;  %v3226_v3 = vadd.f32 %v9720_v45, %v8575_v39  ;;  %v9721_v49 = vld [vmem:[#allocation35_spill] sm:$0xff]  ;;  %v8853_v45 = vld [vmem:[#allocation12 + $0x1c4] ss:$16 sps:$4 sm:$0xff]  }
0x14d3   : > { %4217 = vmatprep.subr.bf16.mxu0 %v8331_v42  ;;  %4258 = vmatprep.subr.bf16.mxu1 %v8333_v43  ;;  %v3339_v42 = vadd.f32 %v9721_v49, %v8579_v61  ;;  %v8859_v49 = vld [vmem:[#allocation12 + $0x1c0] ss:$16 sps:$4 sm:$0xff]  }
0x14d6   : > { %4218 = vmatpush1.bf16.msra.mxu0 %v8335_v15  ;;  %4259 = vmatpush1.bf16.msra.mxu1 %v8337_v52 }
0x14d7   : > { %4219 = vmatprep.subr.bf16.mxu0 %v8343_v4  ;;  %4260 = vmatprep.subr.bf16.mxu1 %v8345_v34 }
0x14da   : > { %4220 = vmatpush1.bf16.msra.mxu0 %v8347_v36  ;;  %4261 = vmatpush1.bf16.msra.mxu1 %v8349_v21 }
0x14db   : > { %4221 = vmatprep.subr.bf16.mxu0 %v8353_v46  ;;  %4262 = vmatprep.subr.bf16.mxu1 %v8355_v57 }
0x14de   : > { %4222 = vmatpush1.bf16.msra.mxu0 %v8359_v41  ;;  %4263 = vmatpush1.bf16.msra.mxu1 %v8361_v47 }
0x14df   : > { %4223 = vmatprep.subr.bf16.mxu0 %v8365_v44  ;;  %4264 = vmatprep.subr.bf16.mxu1 %v8372_v1 }
0x14e2   : > { %4224 = vmatpush1.bf16.msra.mxu0 %v8369_v54  ;;  %4265 = vmatpush1.bf16.msra.mxu1 %v8374_v2 }
0x14e3   : > { %4225 = vmatprep.subr.bf16.mxu0 %v8379_v26  ;;  %4266 = vmatprep.subr.bf16.mxu1 %v8383_v30 }
0x14e6   : > { %4226 = vmatpush1.bf16.msra.mxu0 %v8381_v28  ;;  %4267 = vmatpush1.bf16.msra.mxu1 %v8387_v58 }
0x14e7   : > { %4322 = vmatprep.subr.bf16.mxu0 %v8768_v0  ;;  %4363 = vmatprep.subr.bf16.mxu1 %v8771_v35 }
0x159c   : > { %v4134_v43 = vpop.f32.mrb[144].mxu0  ;;  %v4175_v15 = vpop.f32.mrb[144].mxu1 }
0x159d   : > { %v4182_v52 = vadd.f32 %v4134_v43, %v3224_v25  ;;  %v4184_v4 = vadd.f32 %v4175_v15, %v3337_v17  ;;  %v4136_v34 = vpop.f32.mrb[145].mxu0  ;;  %v4177_v36 = vpop.f32.mrb[145].mxu1  ;;  %v8844_v25 = vld [vmem:[#allocation12 + $0x1ac] ss:$16 sps:$4 sm:$0xff]   ;;  %v8850_v17 = vld [vmem:[#allocation12 + $0x1a8] ss:$16 sps:$4 sm:$0xff]  }
0x159e   : > { %v4183_v21 = vadd.f32 %v4136_v34, %v3226_v3  ;;  %v4185_v46 = vadd.f32 %v4177_v36, %v3339_v42  ;;  %v4138_v57 = vpop.f32.mrb[146].mxu0  ;;  %v4179_v41 = vpop.f32.mrb[146].mxu1  ;;  %v8856_v3 = vld [vmem:[#allocation12 + $0x1cc] ss:$16 sps:$4 sm:$0xff]   ;;  %v8862_v42 = vld [vmem:[#allocation12 + $0x1c8] ss:$16 sps:$4 sm:$0xff]  }
0x159f   : > { %v4186_v47 = vmul.f32 0.5, %v4182_v52  ;;  %v4139_v44 = vpop.f32.mrb[147].mxu0  ;;  %v4180_v54 = vpop.f32.mrb[147].mxu1  ;;  %v4188_v2 = vmul.f32 0.5, %v4184_v4  ;;  %v8865_v43 = vld [vmem:[#allocation12 + $0x1e4] ss:$16 sps:$4 sm:$0xff]  }
0x15a0   : > { %v4187_v1 = vmul.f32 0.5, %v4183_v21  ;;  %v8868_v15 = vld [vmem:[#allocation12 + $0x1ec] ss:$16 sps:$4 sm:$0xff]   ;;  %v8871_v52 = vld [vmem:[#allocation12 + $0x1e0] ss:$16 sps:$4 sm:$0xff]  }
0x15a1   : > { %6318 = vtanh.f32 %v4186_v47  ;;  %v8874_v4 = vld [vmem:[#allocation12 + $0x1e8] ss:$16 sps:$4 sm:$0xff]   ;;  %v9722_v34 = vld [vmem:[#allocation36_spill] sm:$0xff]  ;;  %v9724_v57 = vld [vmem:[#allocation38_spill] sm:$0xff] }
0x15a2   : > { %6320 = vtanh.f32 %v4187_v1  ;;  %v3228_v36 = vadd.f32 %v9722_v34, %v8563_v7  ;;  %v9723_v21 = vld [vmem:[#allocation37_spill] sm:$0xff]  ;;  %v3230_v41 = vadd.f32 %v9724_v57, %v8575_v39  ;;  %v9725_v47 = vld [vmem:[#allocation39_spill] sm:$0xff] }
0x15a3   : > { %6322 = vtanh.f32 %v4185_v46  ;;  %v3341_v46 = vadd.f32 %v9723_v21, %v8567_v56  ;;  %v3343_v44 = vadd.f32 %v9725_v47, %v8579_v61 }
0x15a4   : > { %6324 = vtanh.f32 %v4188_v2 }
0x15ab   : > { %v6319_v26 = vpop.eup %6318 }
0x15ac   : > { %v4192_v28 = vadd.f32 1.0, %v6319_v26  ;;  %v6321_v30 = vpop.eup %6320 }
0x15ad   : > { %v4193_v38 = vadd.f32 1.0, %v6321_v30  ;;  %v6323_v63 = vpop.eup %6322 }
0x15ae   : > { %v4195_v58 = vmul.f32 0.5, %v4192_v28  ;;  %v6325_v48 = vpop.eup %6324 }
0x15af   : > { %v4196_v12 = vmul.f32 0.5, %v4193_v38  ;;  %v4194_v19 = vadd.f32 1.0, %v6325_v48 }
0x15b0   : > { %v4200_v53 = vmul.f32 %v6323_v63, %v4195_v58 }
0x15b1   : > { %v4199_v14 = vmul.f32 %v4196_v12, %v8730_v32  ;;  %v4197_v24 = vmul.f32 0.5, %v4194_v19  ;;  %v8820_v32 = vld [vmem:[#allocation12 + $0x16c] ss:$16 sps:$4 sm:$0xff]  }
0x15b3   : > { %v8783_v62 = vadd.f32 %v4200_v53, %v4199_v14 }
0x15b5   : > { %6326 = vtanh.f32 %v8783_v62 }
0x15bf   : > { %v6327_v59 = vpop.eup %6326 }
0x15c0   : > { %v4203_v51 = vmul.f32 %v6327_v59, %v4197_v24 }
0x15c2   : > { %5779 = vst [vmem:[%s7172_s17 + $0x20] sm:$0xff] %v4203_v51  ;;  %v4210_v22 = vpack.c.bf16 %v4203_v51, %v4203_v51 }
0x15c4   : > { %4244 = vmatmul.mubr.bf16.vlgmr.msra.gmra.mrb[148].mxu0 %v4210_v22  ;;  %4285 = vmatmul.mubr.bf16.vlgmr.msra.gmra.mrb[148].mxu1 %v4210_v22 }
0x15c5   : > { %4323 = vmatpush1.bf16.msra.mxu0 %v8734_v40  ;;  %4364 = vmatpush1.bf16.msra.mxu1 %v8788_v50 }
0x15c6   : > { %4324 = vmatprep.subr.bf16.mxu0 %v8791_v37  ;;  %4365 = vmatprep.subr.bf16.mxu1 %v8794_v31 }
0x15c7   : > { %4354 = vmatprep.mubr.bf16.mxu0 %v9599_v11  ;;  %4395 = vmatprep.mubr.bf16.mxu1 %v9599_v11 }
0x15c9   : > { %4325 = vmatpush1.bf16.msra.mxu0 %v8799_v27  ;;  %4366 = vmatpush1.bf16.msra.mxu1 %v8802_v6 }
0x15ca   : > { %4326 = vmatprep.subr.bf16.mxu0 %v8805_v10  ;;  %4367 = vmatprep.subr.bf16.mxu1 %v8808_v29 }
0x15cd   : > { %4327 = vmatpush1.bf16.msra.mxu0 %v8811_v55  ;;  %4368 = vmatpush1.bf16.msra.mxu1 %v8814_v9 }
0x15ce   : > { %4328 = vmatprep.subr.bf16.mxu0 %v8817_v5  ;;  %4369 = vmatprep.subr.bf16.mxu1 %v8820_v32 }
0x15d1   : > { %4329 = vmatpush1.bf16.msra.mxu0 %v8823_v60  ;;  %4370 = vmatpush1.bf16.msra.mxu1 %v8826_v13 }
0x15d2   : > { %4330 = vmatprep.subr.bf16.mxu0 %v8829_v33  ;;  %4371 = vmatprep.subr.bf16.mxu1 %v8832_v8 }
0x15d5   : > { %4331 = vmatpush1.bf16.msra.mxu0 %v8835_v23  ;;  %4372 = vmatpush1.bf16.msra.mxu1 %v8838_v18 }
0x15d6   : > { %4332 = vmatprep.subr.bf16.mxu0 %v8841_v16  ;;  %4373 = vmatprep.subr.bf16.mxu1 %v8844_v25 }
0x15d9   : > { %4333 = vmatpush1.bf16.msra.mxu0 %v8847_v20  ;;  %4374 = vmatpush1.bf16.msra.mxu1 %v8850_v17 }
0x15da   : > { %4334 = vmatprep.subr.bf16.mxu0 %v8853_v45  ;;  %4375 = vmatprep.subr.bf16.mxu1 %v8856_v3 }
0x15dd   : > { %4335 = vmatpush1.bf16.msra.mxu0 %v8859_v49  ;;  %4376 = vmatpush1.bf16.msra.mxu1 %v8862_v42 }
0x15de   : > { %4336 = vmatprep.subr.bf16.mxu0 %v8865_v43  ;;  %4377 = vmatprep.subr.bf16.mxu1 %v8868_v15 }
0x15e1   : > { %4337 = vmatpush1.bf16.msra.mxu0 %v8871_v52  ;;  %4378 = vmatpush1.bf16.msra.mxu1 %v8874_v4 }
0x15e2   : > { %4433 = vmatprep.subr.bf16.mxu0 %v8768_v0  ;;  %4474 = vmatprep.subr.bf16.mxu1 %v8771_v35 }
0x1697   : > { %v4245_v54 = vpop.f32.mrb[148].mxu0  ;;  %v4286_v1 = vpop.f32.mrb[148].mxu1 }
0x1698   : > { %v4293_v2 = vadd.f32 %v4245_v54, %v3228_v36  ;;  %v4295_v26 = vadd.f32 %v4286_v1, %v3341_v46  ;;  %v4247_v28 = vpop.f32.mrb[149].mxu0  ;;  %v4288_v30 = vpop.f32.mrb[149].mxu1 }
0x1699   : > { %v4294_v58 = vadd.f32 %v4247_v28, %v3230_v41  ;;  %v4296_v38 = vadd.f32 %v4288_v30, %v3343_v44  ;;  %v4249_v63 = vpop.f32.mrb[150].mxu0  ;;  %v4290_v12 = vpop.f32.mrb[150].mxu1 }
0x169a   : > { %v4297_v53 = vmul.f32 0.5, %v4293_v2  ;;  %v4250_v14 = vpop.f32.mrb[151].mxu0  ;;  %v4291_v48 = vpop.f32.mrb[151].mxu1  ;;  %v4299_v24 = vmul.f32 0.5, %v4295_v26  ;;  %v9728_v63 = vld [vmem:[#allocation42_spill] sm:$0xff] }
0x169b   : > { %v4298_v19 = vmul.f32 0.5, %v4294_v58  ;;  %v9727_v58 = vld [vmem:[#allocation41_spill] sm:$0xff]  ;;  %v3236_v12 = vadd.f32 %v9728_v63, %v8575_v39 }
0x169c   : > { %6328 = vtanh.f32 %v4297_v53  ;;  %v9729_v53 = vld [vmem:[#allocation43_spill] sm:$0xff] }
0x169d   : > { %6330 = vtanh.f32 %v4298_v19  ;;  %v3349_v14 = vadd.f32 %v9729_v53, %v8579_v61 }
0x169e   : > { %6332 = vtanh.f32 %v4296_v38  ;;  %v3347_v38 = vadd.f32 %v9727_v58, %v8567_v56 }
0x169f   : > { %6334 = vtanh.f32 %v4299_v24 }
0x16a6   : > { %v6329_v59 = vpop.eup %6328 }
0x16a7   : > { %v4303_v51 = vadd.f32 1.0, %v6329_v59  ;;  %v6331_v22 = vpop.eup %6330 }
0x16a8   : > { %v4304_v36 = vadd.f32 1.0, %v6331_v22  ;;  %v6333_v21 = vpop.eup %6332 }
0x16a9   : > { %v4306_v34 = vmul.f32 0.5, %v4303_v51  ;;  %v6335_v44 = vpop.eup %6334 }
0x16aa   : > { %v4307_v46 = vmul.f32 0.5, %v4304_v36  ;;  %v4305_v54 = vadd.f32 1.0, %v6335_v44 }
0x16ab   : > { %v4311_v57 = vmul.f32 %v6333_v21, %v4306_v34 }
0x16ac   : > { %v4310_v41 = vmul.f32 %v4307_v46, %v8783_v62  ;;  %v4308_v1 = vmul.f32 0.5, %v4305_v54  ;;  %v9726_v62 = vld [vmem:[#allocation40_spill] sm:$0xff] }
0x16ad   : > { %v3234_v30 = vadd.f32 %v9726_v62, %v8563_v7 }
0x16ae   : > { %v8888_v47 = vadd.f32 %v4311_v57, %v4310_v41 }
0x16b0   : > { %6336 = vtanh.f32 %v8888_v47 }
0x16ba   : > { %v6337_v2 = vpop.eup %6336 }
0x16bb   : > { %v4314_v26 = vmul.f32 %v6337_v2, %v4308_v1 }
0x16bd   : > { %5780 = vst [vmem:[%s7172_s17 + $0x28] sm:$0xff] %v4314_v26  ;;  %v4321_v28 = vpack.c.bf16 %v4314_v26, %v4314_v26 }
0x16bf   : > { %4355 = vmatmul.mubr.bf16.vlgmr.msra.gmra.mrb[152].mxu0 %v4321_v28  ;;  %4396 = vmatmul.mubr.bf16.vlgmr.msra.gmra.mrb[152].mxu1 %v4321_v28 }
0x16c0   : > { %4434 = vmatpush1.bf16.msra.mxu0 %v8734_v40  ;;  %4475 = vmatpush1.bf16.msra.mxu1 %v8788_v50 }
0x16c1   : > { %4435 = vmatprep.subr.bf16.mxu0 %v8791_v37  ;;  %4476 = vmatprep.subr.bf16.mxu1 %v8794_v31 }
0x16c2   : > { %4465 = vmatprep.mubr.bf16.mxu0 %v9599_v11  ;;  %4506 = vmatprep.mubr.bf16.mxu1 %v9599_v11 }
0x16c4   : > { %4436 = vmatpush1.bf16.msra.mxu0 %v8799_v27  ;;  %4477 = vmatpush1.bf16.msra.mxu1 %v8802_v6 }
0x16c5   : > { %4437 = vmatprep.subr.bf16.mxu0 %v8805_v10  ;;  %4478 = vmatprep.subr.bf16.mxu1 %v8808_v29 }
0x16c8   : > { %4438 = vmatpush1.bf16.msra.mxu0 %v8811_v55  ;;  %4479 = vmatpush1.bf16.msra.mxu1 %v8814_v9 }
0x16c9   : > { %4439 = vmatprep.subr.bf16.mxu0 %v8817_v5  ;;  %4480 = vmatprep.subr.bf16.mxu1 %v8820_v32 }
0x16cc   : > { %4440 = vmatpush1.bf16.msra.mxu0 %v8823_v60  ;;  %4481 = vmatpush1.bf16.msra.mxu1 %v8826_v13 }
0x16cd   : > { %4441 = vmatprep.subr.bf16.mxu0 %v8829_v33  ;;  %4482 = vmatprep.subr.bf16.mxu1 %v8832_v8 }
0x16d0   : > { %4442 = vmatpush1.bf16.msra.mxu0 %v8835_v23  ;;  %4483 = vmatpush1.bf16.msra.mxu1 %v8838_v18 }
0x16d1   : > { %4443 = vmatprep.subr.bf16.mxu0 %v8841_v16  ;;  %4484 = vmatprep.subr.bf16.mxu1 %v8844_v25 }
0x16d4   : > { %4444 = vmatpush1.bf16.msra.mxu0 %v8847_v20  ;;  %4485 = vmatpush1.bf16.msra.mxu1 %v8850_v17 }
0x16d5   : > { %4445 = vmatprep.subr.bf16.mxu0 %v8853_v45  ;;  %4486 = vmatprep.subr.bf16.mxu1 %v8856_v3 }
0x16d8   : > { %4446 = vmatpush1.bf16.msra.mxu0 %v8859_v49  ;;  %4487 = vmatpush1.bf16.msra.mxu1 %v8862_v42 }
0x16d9   : > { %4447 = vmatprep.subr.bf16.mxu0 %v8865_v43  ;;  %4488 = vmatprep.subr.bf16.mxu1 %v8868_v15 }
0x16dc   : > { %4448 = vmatpush1.bf16.msra.mxu0 %v8871_v52  ;;  %4489 = vmatpush1.bf16.msra.mxu1 %v8874_v4 }
0x16dd   : > { %4544 = vmatprep.subr.bf16.mxu0 %v8768_v0  ;;  %4585 = vmatprep.subr.bf16.mxu1 %v8771_v35 }
0x1792   : > { %v4356_v48 = vpop.f32.mrb[152].mxu0  ;;  %v4397_v19 = vpop.f32.mrb[152].mxu1 }
0x1793   : > { %v4404_v24 = vadd.f32 %v4356_v48, %v3234_v30  ;;  %v4406_v59 = vadd.f32 %v4397_v19, %v3347_v38  ;;  %v4358_v51 = vpop.f32.mrb[153].mxu0  ;;  %v4399_v22 = vpop.f32.mrb[153].mxu1 }
0x1794   : > { %v4405_v34 = vadd.f32 %v4358_v51, %v3236_v12  ;;  %v4407_v36 = vadd.f32 %v4399_v22, %v3349_v14  ;;  %v4360_v21 = vpop.f32.mrb[154].mxu0  ;;  %v4401_v46 = vpop.f32.mrb[154].mxu1 }
0x1795   : > { %v4408_v57 = vmul.f32 0.5, %v4404_v24  ;;  %v4361_v41 = vpop.f32.mrb[155].mxu0  ;;  %v4402_v44 = vpop.f32.mrb[155].mxu1  ;;  %v4410_v1 = vmul.f32 0.5, %v4406_v59  ;;  %v9732_v21 = vld [vmem:[#allocation46_spill] sm:$0xff] }
0x1796   : > { %v4409_v54 = vmul.f32 0.5, %v4405_v34  ;;  %v9731_v34 = vld [vmem:[#allocation45_spill] sm:$0xff]  ;;  %v3240_v46 = vadd.f32 %v9732_v21, %v8575_v39 }
0x1797   : > { %6338 = vtanh.f32 %v4408_v57  ;;  %v9733_v57 = vld [vmem:[#allocation47_spill] sm:$0xff] }
0x1798   : > { %6340 = vtanh.f32 %v4409_v54  ;;  %v3353_v41 = vadd.f32 %v9733_v57, %v8579_v61 }
0x1799   : > { %6342 = vtanh.f32 %v4407_v36  ;;  %v3351_v36 = vadd.f32 %v9731_v34, %v8567_v56 }
0x179a   : > { %6344 = vtanh.f32 %v4410_v1 }
0x17a1   : > { %v6339_v2 = vpop.eup %6338 }
0x17a2   : > { %v4414_v26 = vadd.f32 1.0, %v6339_v2  ;;  %v6341_v28 = vpop.eup %6340 }
0x17a3   : > { %v4415_v30 = vadd.f32 1.0, %v6341_v28  ;;  %v6343_v58 = vpop.eup %6342 }
0x17a4   : > { %v4417_v62 = vmul.f32 0.5, %v4414_v26  ;;  %v6345_v14 = vpop.eup %6344 }
0x17a5   : > { %v4418_v38 = vmul.f32 0.5, %v4415_v30  ;;  %v4416_v48 = vadd.f32 1.0, %v6345_v14 }
0x17a6   : > { %v4422_v63 = vmul.f32 %v6343_v58, %v4417_v62 }
0x17a7   : > { %v4421_v12 = vmul.f32 %v4418_v38, %v8888_v47  ;;  %v4419_v19 = vmul.f32 0.5, %v4416_v48  ;;  %v9730_v47 = vld [vmem:[#allocation44_spill] sm:$0xff] }
0x17a8   : > { %v3238_v22 = vadd.f32 %v9730_v47, %v8563_v7 }
0x17a9   : > { %v8935_v53 = vadd.f32 %v4422_v63, %v4421_v12 }
0x17ab   : > { %6346 = vtanh.f32 %v8935_v53 }
0x17b5   : > { %v6347_v24 = vpop.eup %6346 }
0x17b6   : > { %v4425_v59 = vmul.f32 %v6347_v24, %v4419_v19 }
0x17b8   : > { %5781 = vst [vmem:[%s7172_s17 + $0x30] sm:$0xff] %v4425_v59  ;;  %v4432_v51 = vpack.c.bf16 %v4425_v59, %v4425_v59 }
0x17ba   : > { %4466 = vmatmul.mubr.bf16.vlgmr.msra.gmra.mrb[156].mxu0 %v4432_v51  ;;  %4507 = vmatmul.mubr.bf16.vlgmr.msra.gmra.mrb[156].mxu1 %v4432_v51 }
0x17bb   : > { %4545 = vmatpush1.bf16.msra.mxu0 %v8734_v40  ;;  %4586 = vmatpush1.bf16.msra.mxu1 %v8788_v50 }
0x17bc   : > { %4546 = vmatprep.subr.bf16.mxu0 %v8791_v37  ;;  %4587 = vmatprep.subr.bf16.mxu1 %v8794_v31 }
0x17bd   : > { %4576 = vmatprep.mubr.bf16.mxu0 %v9599_v11  ;;  %4617 = vmatprep.mubr.bf16.mxu1 %v9599_v11 }
0x17bf   : > { %4547 = vmatpush1.bf16.msra.mxu0 %v8799_v27  ;;  %4588 = vmatpush1.bf16.msra.mxu1 %v8802_v6 }
0x17c0   : > { %4548 = vmatprep.subr.bf16.mxu0 %v8805_v10  ;;  %4589 = vmatprep.subr.bf16.mxu1 %v8808_v29 }
0x17c3   : > { %4549 = vmatpush1.bf16.msra.mxu0 %v8811_v55  ;;  %4590 = vmatpush1.bf16.msra.mxu1 %v8814_v9 }
0x17c4   : > { %4550 = vmatprep.subr.bf16.mxu0 %v8817_v5  ;;  %4591 = vmatprep.subr.bf16.mxu1 %v8820_v32 }
0x17c7   : > { %4551 = vmatpush1.bf16.msra.mxu0 %v8823_v60  ;;  %4592 = vmatpush1.bf16.msra.mxu1 %v8826_v13 }
0x17c8   : > { %4552 = vmatprep.subr.bf16.mxu0 %v8829_v33  ;;  %4593 = vmatprep.subr.bf16.mxu1 %v8832_v8 }
0x17cb   : > { %4553 = vmatpush1.bf16.msra.mxu0 %v8835_v23  ;;  %4594 = vmatpush1.bf16.msra.mxu1 %v8838_v18 }
0x17cc   : > { %4554 = vmatprep.subr.bf16.mxu0 %v8841_v16  ;;  %4595 = vmatprep.subr.bf16.mxu1 %v8844_v25 }
0x17cf   : > { %4555 = vmatpush1.bf16.msra.mxu0 %v8847_v20  ;;  %4596 = vmatpush1.bf16.msra.mxu1 %v8850_v17 }
0x17d0   : > { %4556 = vmatprep.subr.bf16.mxu0 %v8853_v45  ;;  %4597 = vmatprep.subr.bf16.mxu1 %v8856_v3 }
0x17d3   : > { %4557 = vmatpush1.bf16.msra.mxu0 %v8859_v49  ;;  %4598 = vmatpush1.bf16.msra.mxu1 %v8862_v42 }
0x17d4   : > { %4558 = vmatprep.subr.bf16.mxu0 %v8865_v43  ;;  %4599 = vmatprep.subr.bf16.mxu1 %v8868_v15 }
0x17d7   : > { %4559 = vmatpush1.bf16.msra.mxu0 %v8871_v52  ;;  %4600 = vmatpush1.bf16.msra.mxu1 %v8874_v4 }
0x17d8   : > { %4655 = vmatprep.subr.bf16.mxu0 %v8768_v0  ;;  %4696 = vmatprep.subr.bf16.mxu1 %v8771_v35 }
0x188d   : > { %v4467_v44 = vpop.f32.mrb[156].mxu0  ;;  %v4508_v54 = vpop.f32.mrb[156].mxu1 }
0x188e   : > { %v4515_v1 = vadd.f32 %v4467_v44, %v3238_v22  ;;  %v4517_v2 = vadd.f32 %v4508_v54, %v3351_v36  ;;  %v4469_v26 = vpop.f32.mrb[157].mxu0  ;;  %v4510_v28 = vpop.f32.mrb[157].mxu1 }
0x188f   : > { %v4516_v62 = vadd.f32 %v4469_v26, %v3240_v46  ;;  %v4518_v30 = vadd.f32 %v4510_v28, %v3353_v41  ;;  %v4471_v58 = vpop.f32.mrb[158].mxu0  ;;  %v4512_v38 = vpop.f32.mrb[158].mxu1 }
0x1890   : > { %v4519_v63 = vmul.f32 0.5, %v4515_v1  ;;  %v4472_v12 = vpop.f32.mrb[159].mxu0  ;;  %v4513_v14 = vpop.f32.mrb[159].mxu1  ;;  %v4521_v19 = vmul.f32 0.5, %v4517_v2  ;;  %v9736_v58 = vld [vmem:[#allocation50_spill] sm:$0xff] }
0x1891   : > { %v4520_v48 = vmul.f32 0.5, %v4516_v62  ;;  %v9735_v62 = vld [vmem:[#allocation49_spill] sm:$0xff]  ;;  %v3246_v38 = vadd.f32 %v9736_v58, %v8575_v39 }
0x1892   : > { %6348 = vtanh.f32 %v4519_v63  ;;  %v9737_v63 = vld [vmem:[#allocation51_spill] sm:$0xff] }
0x1893   : > { %6350 = vtanh.f32 %v4520_v48  ;;  %v3359_v12 = vadd.f32 %v9737_v63, %v8579_v61 }
0x1894   : > { %6352 = vtanh.f32 %v4518_v30  ;;  %v3357_v30 = vadd.f32 %v9735_v62, %v8567_v56 }
0x1895   : > { %6354 = vtanh.f32 %v4521_v19 }
0x189c   : > { %v6349_v24 = vpop.eup %6348 }
0x189d   : > { %v4525_v59 = vadd.f32 1.0, %v6349_v24  ;;  %v6351_v51 = vpop.eup %6350 }
0x189e   : > { %v4526_v22 = vadd.f32 1.0, %v6351_v51  ;;  %v6353_v34 = vpop.eup %6352 }
0x189f   : > { %v4528_v47 = vmul.f32 0.5, %v4525_v59  ;;  %v6355_v41 = vpop.eup %6354 }
0x18a0   : > { %v4529_v36 = vmul.f32 0.5, %v4526_v22  ;;  %v4527_v44 = vadd.f32 1.0, %v6355_v41 }
0x18a1   : > { %v4533_v21 = vmul.f32 %v6353_v34, %v4528_v47 }
0x18a2   : > { %v4532_v46 = vmul.f32 %v4529_v36, %v8935_v53  ;;  %v4530_v54 = vmul.f32 0.5, %v4527_v44  ;;  %v9734_v53 = vld [vmem:[#allocation48_spill] sm:$0xff] }
0x18a3   : > { %v3244_v28 = vadd.f32 %v9734_v53, %v8563_v7 }
0x18a4   : > { %v8982_v57 = vadd.f32 %v4533_v21, %v4532_v46 }
0x18a6   : > { %6356 = vtanh.f32 %v8982_v57 }
0x18b0   : > { %v6357_v1 = vpop.eup %6356 }
0x18b1   : > { %v4536_v2 = vmul.f32 %v6357_v1, %v4530_v54 }
0x18b3   : > { %5782 = vst [vmem:[%s7172_s17 + $0x38] sm:$0xff] %v4536_v2  ;;  %v4543_v26 = vpack.c.bf16 %v4536_v2, %v4536_v2 }
0x18b5   : > { %4577 = vmatmul.mubr.bf16.vlgmr.msra.gmra.mrb[160].mxu0 %v4543_v26  ;;  %4618 = vmatmul.mubr.bf16.vlgmr.msra.gmra.mrb[160].mxu1 %v4543_v26 }
0x18b6   : > { %4656 = vmatpush1.bf16.msra.mxu0 %v8734_v40  ;;  %4697 = vmatpush1.bf16.msra.mxu1 %v8788_v50 }
0x18b7   : > { %4657 = vmatprep.subr.bf16.mxu0 %v8791_v37  ;;  %4698 = vmatprep.subr.bf16.mxu1 %v8794_v31 }
0x18b8   : > { %4687 = vmatprep.mubr.bf16.mxu0 %v9599_v11  ;;  %4728 = vmatprep.mubr.bf16.mxu1 %v9599_v11 }
0x18ba   : > { %4658 = vmatpush1.bf16.msra.mxu0 %v8799_v27  ;;  %4699 = vmatpush1.bf16.msra.mxu1 %v8802_v6 }
0x18bb   : > { %4659 = vmatprep.subr.bf16.mxu0 %v8805_v10  ;;  %4700 = vmatprep.subr.bf16.mxu1 %v8808_v29 }
0x18be   : > { %4660 = vmatpush1.bf16.msra.mxu0 %v8811_v55  ;;  %4701 = vmatpush1.bf16.msra.mxu1 %v8814_v9 }
0x18bf   : > { %4661 = vmatprep.subr.bf16.mxu0 %v8817_v5  ;;  %4702 = vmatprep.subr.bf16.mxu1 %v8820_v32 }
0x18c2   : > { %4662 = vmatpush1.bf16.msra.mxu0 %v8823_v60  ;;  %4703 = vmatpush1.bf16.msra.mxu1 %v8826_v13 }
0x18c3   : > { %4663 = vmatprep.subr.bf16.mxu0 %v8829_v33  ;;  %4704 = vmatprep.subr.bf16.mxu1 %v8832_v8 }
0x18c6   : > { %4664 = vmatpush1.bf16.msra.mxu0 %v8835_v23  ;;  %4705 = vmatpush1.bf16.msra.mxu1 %v8838_v18 }
0x18c7   : > { %4665 = vmatprep.subr.bf16.mxu0 %v8841_v16  ;;  %4706 = vmatprep.subr.bf16.mxu1 %v8844_v25 }
0x18ca   : > { %4666 = vmatpush1.bf16.msra.mxu0 %v8847_v20  ;;  %4707 = vmatpush1.bf16.msra.mxu1 %v8850_v17 }
0x18cb   : > { %4667 = vmatprep.subr.bf16.mxu0 %v8853_v45  ;;  %4708 = vmatprep.subr.bf16.mxu1 %v8856_v3 }
0x18ce   : > { %4668 = vmatpush1.bf16.msra.mxu0 %v8859_v49  ;;  %4709 = vmatpush1.bf16.msra.mxu1 %v8862_v42 }
0x18cf   : > { %4669 = vmatprep.subr.bf16.mxu0 %v8865_v43  ;;  %4710 = vmatprep.subr.bf16.mxu1 %v8868_v15 }
0x18d2   : > { %4670 = vmatpush1.bf16.msra.mxu0 %v8871_v52  ;;  %4711 = vmatpush1.bf16.msra.mxu1 %v8874_v4 }
0x18d3   : > { %4766 = vmatprep.subr.bf16.mxu0 %v8768_v0  ;;  %4807 = vmatprep.subr.bf16.mxu1 %v8771_v35 }
0x1988   : > { %v4578_v14 = vpop.f32.mrb[160].mxu0  ;;  %v4619_v48 = vpop.f32.mrb[160].mxu1 }
0x1989   : > { %v4626_v19 = vadd.f32 %v4578_v14, %v3244_v28  ;;  %v4628_v24 = vadd.f32 %v4619_v48, %v3357_v30  ;;  %v4580_v59 = vpop.f32.mrb[161].mxu0  ;;  %v4621_v51 = vpop.f32.mrb[161].mxu1 }
0x198a   : > { %v4627_v47 = vadd.f32 %v4580_v59, %v3246_v38  ;;  %v4629_v22 = vadd.f32 %v4621_v51, %v3359_v12  ;;  %v4582_v34 = vpop.f32.mrb[162].mxu0  ;;  %v4623_v36 = vpop.f32.mrb[162].mxu1 }
0x198b   : > { %v4630_v21 = vmul.f32 0.5, %v4626_v19  ;;  %v4583_v46 = vpop.f32.mrb[163].mxu0  ;;  %v4624_v41 = vpop.f32.mrb[163].mxu1  ;;  %v4632_v54 = vmul.f32 0.5, %v4628_v24  ;;  %v9740_v34 = vld [vmem:[#allocation54_spill] sm:$0xff] }
0x198c   : > { %v4631_v44 = vmul.f32 0.5, %v4627_v47  ;;  %v9739_v47 = vld [vmem:[#allocation53_spill] sm:$0xff]  ;;  %v3250_v36 = vadd.f32 %v9740_v34, %v8575_v39 }
0x198d   : > { %6358 = vtanh.f32 %v4630_v21  ;;  %v9741_v21 = vld [vmem:[#allocation55_spill] sm:$0xff] }
0x198e   : > { %6360 = vtanh.f32 %v4631_v44  ;;  %v3363_v46 = vadd.f32 %v9741_v21, %v8579_v61 }
0x198f   : > { %6362 = vtanh.f32 %v4629_v22  ;;  %v3361_v22 = vadd.f32 %v9739_v47, %v8567_v56 }
0x1990   : > { %6364 = vtanh.f32 %v4632_v54 }
0x1997   : > { %v6359_v1 = vpop.eup %6358 }
0x1998   : > { %v4636_v2 = vadd.f32 1.0, %v6359_v1  ;;  %v6361_v26 = vpop.eup %6360 }
0x1999   : > { %v4637_v28 = vadd.f32 1.0, %v6361_v26  ;;  %v6363_v62 = vpop.eup %6362 }
0x199a   : > { %v4639_v53 = vmul.f32 0.5, %v4636_v2  ;;  %v6365_v12 = vpop.eup %6364 }
0x199b   : > { %v4640_v30 = vmul.f32 0.5, %v4637_v28  ;;  %v4638_v14 = vadd.f32 1.0, %v6365_v12 }
0x199c   : > { %v4644_v58 = vmul.f32 %v6363_v62, %v4639_v53 }
0x199d   : > { %v4643_v38 = vmul.f32 %v4640_v30, %v8982_v57  ;;  %v4641_v48 = vmul.f32 0.5, %v4638_v14  ;;  %v9738_v57 = vld [vmem:[#allocation52_spill] sm:$0xff] }
0x199e   : > { %v3248_v51 = vadd.f32 %v9738_v57, %v8563_v7 }
0x199f   : > { %v9029_v63 = vadd.f32 %v4644_v58, %v4643_v38 }
0x19a1   : > { %6366 = vtanh.f32 %v9029_v63 }
0x19ab   : > { %v6367_v19 = vpop.eup %6366 }
0x19ac   : > { %v4647_v24 = vmul.f32 %v6367_v19, %v4641_v48 }
0x19ae   : > { %5783 = vst [vmem:[%s7172_s17 + $0x40] sm:$0xff] %v4647_v24  ;;  %v4654_v59 = vpack.c.bf16 %v4647_v24, %v4647_v24 }
0x19b0   : > { %4688 = vmatmul.mubr.bf16.vlgmr.msra.gmra.mrb[164].mxu0 %v4654_v59  ;;  %4729 = vmatmul.mubr.bf16.vlgmr.msra.gmra.mrb[164].mxu1 %v4654_v59 }
0x19b1   : > { %4767 = vmatpush1.bf16.msra.mxu0 %v8734_v40  ;;  %4808 = vmatpush1.bf16.msra.mxu1 %v8788_v50 }
0x19b2   : > { %4768 = vmatprep.subr.bf16.mxu0 %v8791_v37  ;;  %4809 = vmatprep.subr.bf16.mxu1 %v8794_v31 }
0x19b3   : > { %4798 = vmatprep.mubr.bf16.mxu0 %v9599_v11  ;;  %4839 = vmatprep.mubr.bf16.mxu1 %v9599_v11 }
0x19b5   : > { %4769 = vmatpush1.bf16.msra.mxu0 %v8799_v27  ;;  %4810 = vmatpush1.bf16.msra.mxu1 %v8802_v6 }
0x19b6   : > { %4770 = vmatprep.subr.bf16.mxu0 %v8805_v10  ;;  %4811 = vmatprep.subr.bf16.mxu1 %v8808_v29 }
0x19b9   : > { %4771 = vmatpush1.bf16.msra.mxu0 %v8811_v55  ;;  %4812 = vmatpush1.bf16.msra.mxu1 %v8814_v9 }
0x19ba   : > { %4772 = vmatprep.subr.bf16.mxu0 %v8817_v5  ;;  %4813 = vmatprep.subr.bf16.mxu1 %v8820_v32 }
0x19bd   : > { %4773 = vmatpush1.bf16.msra.mxu0 %v8823_v60  ;;  %4814 = vmatpush1.bf16.msra.mxu1 %v8826_v13 }
0x19be   : > { %4774 = vmatprep.subr.bf16.mxu0 %v8829_v33  ;;  %4815 = vmatprep.subr.bf16.mxu1 %v8832_v8 }
0x19c1   : > { %4775 = vmatpush1.bf16.msra.mxu0 %v8835_v23  ;;  %4816 = vmatpush1.bf16.msra.mxu1 %v8838_v18 }
0x19c2   : > { %4776 = vmatprep.subr.bf16.mxu0 %v8841_v16  ;;  %4817 = vmatprep.subr.bf16.mxu1 %v8844_v25 }
0x19c5   : > { %4777 = vmatpush1.bf16.msra.mxu0 %v8847_v20  ;;  %4818 = vmatpush1.bf16.msra.mxu1 %v8850_v17 }
0x19c6   : > { %4778 = vmatprep.subr.bf16.mxu0 %v8853_v45  ;;  %4819 = vmatprep.subr.bf16.mxu1 %v8856_v3 }
0x19c9   : > { %4779 = vmatpush1.bf16.msra.mxu0 %v8859_v49  ;;  %4820 = vmatpush1.bf16.msra.mxu1 %v8862_v42 }
0x19ca   : > { %4780 = vmatprep.subr.bf16.mxu0 %v8865_v43  ;;  %4821 = vmatprep.subr.bf16.mxu1 %v8868_v15 }
0x19cd   : > { %4781 = vmatpush1.bf16.msra.mxu0 %v8871_v52  ;;  %4822 = vmatpush1.bf16.msra.mxu1 %v8874_v4 }
0x19ce   : > { %4877 = vmatprep.subr.bf16.mxu0 %v8768_v0  ;;  %4918 = vmatprep.subr.bf16.mxu1 %v8771_v35 }
0x1a83   : > { %v4689_v41 = vpop.f32.mrb[164].mxu0  ;;  %v4730_v44 = vpop.f32.mrb[164].mxu1 }
0x1a84   : > { %v4737_v54 = vadd.f32 %v4689_v41, %v3248_v51  ;;  %v4739_v1 = vadd.f32 %v4730_v44, %v3361_v22  ;;  %v4691_v2 = vpop.f32.mrb[165].mxu0  ;;  %v4732_v26 = vpop.f32.mrb[165].mxu1 }
0x1a85   : > { %v4738_v53 = vadd.f32 %v4691_v2, %v3250_v36  ;;  %v4740_v28 = vadd.f32 %v4732_v26, %v3363_v46  ;;  %v4693_v62 = vpop.f32.mrb[166].mxu0  ;;  %v4734_v30 = vpop.f32.mrb[166].mxu1  ;;  %v9743_v26 = vld [vmem:[#allocation57_spill] sm:$0xff] }
0x1a86   : > { %v4741_v58 = vmul.f32 0.5, %v4737_v54  ;;  %v4694_v38 = vpop.f32.mrb[167].mxu0  ;;  %v4735_v12 = vpop.f32.mrb[167].mxu1  ;;  %v4743_v48 = vmul.f32 0.5, %v4739_v1  ;;  %v9745_v30 = vld [vmem:[#allocation59_spill] sm:$0xff] }
0x1a87   : > { %v4742_v14 = vmul.f32 0.5, %v4738_v53  ;;  %v3367_v53 = vadd.f32 %v9743_v26, %v8567_v56 }
0x1a88   : > { %6368 = vtanh.f32 %v4741_v58  ;;  %v3369_v58 = vadd.f32 %v9745_v30, %v8579_v61 }
0x1a89   : > { %6370 = vtanh.f32 %v4742_v14 }
0x1a8a   : > { %6372 = vtanh.f32 %v4740_v28  ;;  %v9744_v28 = vld [vmem:[#allocation58_spill] sm:$0xff] }
0x1a8b   : > { %6374 = vtanh.f32 %v4743_v48  ;;  %v3256_v62 = vadd.f32 %v9744_v28, %v8575_v39 }
0x1a92   : > { %v6369_v19 = vpop.eup %6368 }
0x1a93   : > { %v4747_v24 = vadd.f32 1.0, %v6369_v19  ;;  %v6371_v59 = vpop.eup %6370 }
0x1a94   : > { %v4748_v51 = vadd.f32 1.0, %v6371_v59  ;;  %v6373_v47 = vpop.eup %6372 }
0x1a95   : > { %v4750_v57 = vmul.f32 0.5, %v4747_v24  ;;  %v6375_v46 = vpop.eup %6374 }
0x1a96   : > { %v4751_v22 = vmul.f32 0.5, %v4748_v51  ;;  %v4749_v41 = vadd.f32 1.0, %v6375_v46 }
0x1a97   : > { %v4755_v34 = vmul.f32 %v6373_v47, %v4750_v57 }
0x1a98   : > { %v4754_v36 = vmul.f32 %v4751_v22, %v9029_v63  ;;  %v4752_v44 = vmul.f32 0.5, %v4749_v41 }
0x1a9a   : > { %v9076_v21 = vadd.f32 %v4755_v34, %v4754_v36 }
0x1a9c   : > { %6376 = vtanh.f32 %v9076_v21 }
0x1aa6   : > { %v6377_v54 = vpop.eup %6376 }
0x1aa7   : > { %v4758_v1 = vmul.f32 %v6377_v54, %v4752_v44 }
0x1aa9   : > { %5784 = vst [vmem:[%s7172_s17 + $0x48] sm:$0xff] %v4758_v1  ;;  %v4765_v2 = vpack.c.bf16 %v4758_v1, %v4758_v1 }
0x1aab   : > { %4799 = vmatmul.mubr.bf16.vlgmr.msra.gmra.mrb[168].mxu0 %v4765_v2  ;;  %4840 = vmatmul.mubr.bf16.vlgmr.msra.gmra.mrb[168].mxu1 %v4765_v2 }
0x1aac   : > { %4878 = vmatpush1.bf16.msra.mxu0 %v8734_v40  ;;  %4919 = vmatpush1.bf16.msra.mxu1 %v8788_v50  ;;  %v9742_v40 = vld [vmem:[#allocation56_spill] sm:$0xff] }
0x1aad   : > { %4879 = vmatprep.subr.bf16.mxu0 %v8791_v37  ;;  %4920 = vmatprep.subr.bf16.mxu1 %v8794_v31  ;;  %v3254_v63 = vadd.f32 %v9742_v40, %v8563_v7 }
0x1aae   : > { %4909 = vmatprep.mubr.bf16.mxu0 %v9599_v11  ;;  %4950 = vmatprep.mubr.bf16.mxu1 %v9599_v11 }
0x1ab0   : > { %4880 = vmatpush1.bf16.msra.mxu0 %v8799_v27  ;;  %4921 = vmatpush1.bf16.msra.mxu1 %v8802_v6 }
0x1ab1   : > { %4881 = vmatprep.subr.bf16.mxu0 %v8805_v10  ;;  %4922 = vmatprep.subr.bf16.mxu1 %v8808_v29 }
0x1ab4   : > { %4882 = vmatpush1.bf16.msra.mxu0 %v8811_v55  ;;  %4923 = vmatpush1.bf16.msra.mxu1 %v8814_v9 }
0x1ab5   : > { %4883 = vmatprep.subr.bf16.mxu0 %v8817_v5  ;;  %4924 = vmatprep.subr.bf16.mxu1 %v8820_v32 }
0x1ab8   : > { %4884 = vmatpush1.bf16.msra.mxu0 %v8823_v60  ;;  %4925 = vmatpush1.bf16.msra.mxu1 %v8826_v13 }
0x1ab9   : > { %4885 = vmatprep.subr.bf16.mxu0 %v8829_v33  ;;  %4926 = vmatprep.subr.bf16.mxu1 %v8832_v8 }
0x1abc   : > { %4886 = vmatpush1.bf16.msra.mxu0 %v8835_v23  ;;  %4927 = vmatpush1.bf16.msra.mxu1 %v8838_v18 }
0x1abd   : > { %4887 = vmatprep.subr.bf16.mxu0 %v8841_v16  ;;  %4928 = vmatprep.subr.bf16.mxu1 %v8844_v25 }
0x1ac0   : > { %4888 = vmatpush1.bf16.msra.mxu0 %v8847_v20  ;;  %4929 = vmatpush1.bf16.msra.mxu1 %v8850_v17 }
0x1ac1   : > { %4889 = vmatprep.subr.bf16.mxu0 %v8853_v45  ;;  %4930 = vmatprep.subr.bf16.mxu1 %v8856_v3 }
0x1ac4   : > { %4890 = vmatpush1.bf16.msra.mxu0 %v8859_v49  ;;  %4931 = vmatpush1.bf16.msra.mxu1 %v8862_v42 }
0x1ac5   : > { %4891 = vmatprep.subr.bf16.mxu0 %v8865_v43  ;;  %4932 = vmatprep.subr.bf16.mxu1 %v8868_v15 }
0x1ac8   : > { %4892 = vmatpush1.bf16.msra.mxu0 %v8871_v52  ;;  %4933 = vmatpush1.bf16.msra.mxu1 %v8874_v4 }
0x1ac9   : > { %4988 = vmatprep.subr.bf16.mxu0 %v8768_v0  ;;  %5029 = vmatprep.subr.bf16.mxu1 %v8771_v35 }
0x1b7e   : > { %v4800_v38 = vpop.f32.mrb[168].mxu0  ;;  %v4841_v12 = vpop.f32.mrb[168].mxu1 }
0x1b7f   : > { %v4848_v14 = vadd.f32 %v4800_v38, %v3254_v63  ;;  %v4850_v48 = vadd.f32 %v4841_v12, %v3367_v53  ;;  %v4802_v19 = vpop.f32.mrb[169].mxu0  ;;  %v4843_v0 = vpop.f32.mrb[169].mxu1 }
0x1b80   : > { %v4849_v24 = vadd.f32 %v4802_v19, %v3256_v62  ;;  %v4851_v35 = vadd.f32 %v4843_v0, %v3369_v58  ;;  %v4804_v59 = vpop.f32.mrb[170].mxu0  ;;  %v4845_v57 = vpop.f32.mrb[170].mxu1 }
0x1b81   : > { %v4852_v51 = vmul.f32 0.5, %v4848_v14  ;;  %v4805_v47 = vpop.f32.mrb[171].mxu0  ;;  %v4846_v22 = vpop.f32.mrb[171].mxu1  ;;  %v4854_v36 = vmul.f32 0.5, %v4850_v48  ;;  %v9127_v14 = vld [vmem:[#allocation12 + $0x100] ss:$16 sps:$4 sm:$0xff]  }
0x1b82   : > { %v4853_v34 = vmul.f32 0.5, %v4849_v24 }
0x1b83   : > { %6378 = vtanh.f32 %v4852_v51 }
0x1b84   : > { %6380 = vtanh.f32 %v4853_v34 }
0x1b85   : > { %6382 = vtanh.f32 %v4851_v35 }
0x1b86   : > { %6384 = vtanh.f32 %v4854_v36  ;;  %v9181_v36 = vld [vmem:[#allocation12 + $0x108] ss:$16 sps:$4 sm:$0xff]  }
0x1b8d   : > { %v6379_v46 = vpop.eup %6378 }
0x1b8e   : > { %v4858_v41 = vadd.f32 1.0, %v6379_v46  ;;  %v6381_v44 = vpop.eup %6380  ;;  %v9184_v46 = vld [vmem:[#allocation12 + $0x124] ss:$16 sps:$4 sm:$0xff]  }
0x1b8f   : > { %v4859_v1 = vadd.f32 1.0, %v6381_v44  ;;  %v6383_v2 = vpop.eup %6382  ;;  %v9192_v44 = vld [vmem:[#allocation12 + $0x120] ss:$16 sps:$4 sm:$0xff]  }
0x1b90   : > { %v4861_v54 = vmul.f32 0.5, %v4858_v41  ;;  %v6385_v28 = vpop.eup %6384  ;;  %v9187_v41 = vld [vmem:[#allocation12 + $0x12c] ss:$16 sps:$4 sm:$0xff]  }
0x1b91   : > { %v4862_v40 = vmul.f32 0.5, %v4859_v1  ;;  %v4860_v62 = vadd.f32 1.0, %v6385_v28  ;;  %v9198_v1 = vld [vmem:[#allocation12 + $0x144] ss:$16 sps:$4 sm:$0xff]   ;;  %v9216_v28 = vld [vmem:[#allocation12 + $0x160] ss:$16 sps:$4 sm:$0xff]  }
0x1b92   : > { %v4866_v63 = vmul.f32 %v6383_v2, %v4861_v54  ;;  %v9195_v54 = vld [vmem:[#allocation12 + $0x128] ss:$16 sps:$4 sm:$0xff]   ;;  %v9201_v2 = vld [vmem:[#allocation12 + $0x14c] ss:$16 sps:$4 sm:$0xff]  }
0x1b93   : > { %v4865_v26 = vmul.f32 %v4862_v40, %v9076_v21  ;;  %v4863_v30 = vmul.f32 0.5, %v4860_v62  ;;  %v9204_v40 = vld [vmem:[#allocation12 + $0x140] ss:$16 sps:$4 sm:$0xff]   ;;  %v9219_v62 = vld [vmem:[#allocation12 + $0x168] ss:$16 sps:$4 sm:$0xff]  }
0x1b95   : > { %v9123_v53 = vadd.f32 %v4866_v63, %v4865_v26  ;;  %v9207_v63 = vld [vmem:[#allocation12 + $0x148] ss:$16 sps:$4 sm:$0xff]   ;;  %v9210_v26 = vld [vmem:[#allocation12 + $0x164] ss:$16 sps:$4 sm:$0xff]  }
0x1b97   : > { %6386 = vtanh.f32 %v9123_v53 }
0x1ba1   : > { %v6387_v58 = vpop.eup %6386 }
0x1ba2   : > { %v4869_v38 = vmul.f32 %v6387_v58, %v4863_v30  ;;  %v9222_v30 = vld [vmem:[#allocation12 + $0x184] ss:$16 sps:$4 sm:$0xff]   ;;  %v9225_v58 = vld [vmem:[#allocation12 + $0x18c] ss:$16 sps:$4 sm:$0xff]  }
0x1ba4   : > { %5785 = vst [vmem:[%s7172_s17 + $0x50] sm:$0xff] %v4869_v38  ;;  %v4876_v12 = vpack.c.bf16 %v4869_v38, %v4869_v38  ;;  %v9228_v38 = vld [vmem:[#allocation12 + $0x180] ss:$16 sps:$4 sm:$0xff]  }
0x1ba6   : > { %4910 = vmatmul.mubr.bf16.vlgmr.msra.gmra.mrb[172].mxu0 %v4876_v12  ;;  %4951 = vmatmul.mubr.bf16.vlgmr.msra.gmra.mrb[172].mxu1 %v4876_v12  ;;  %v9231_v12 = vld [vmem:[#allocation12 + $0x188] ss:$16 sps:$4 sm:$0xff]  }
0x1ba7   : > { %4989 = vmatpush1.bf16.msra.mxu0 %v9127_v14  ;;  %5030 = vmatpush1.bf16.msra.mxu1 %v8788_v50  ;;  %v9161_v50 = vld [vmem:[#allocation12 + $0x104] ss:$16 sps:$4 sm:$0xff]  }
0x1ba8   : > { %4990 = vmatprep.subr.bf16.mxu0 %v8791_v37  ;;  %5031 = vmatprep.subr.bf16.mxu1 %v8794_v31  ;;  %v9164_v37 = vld [vmem:[#allocation12 + $0x10c] ss:$16 sps:$4 sm:$0xff]   ;;  %v9746_v31 = vld [vmem:[#allocation60_spill] sm:$0xff] }
0x1ba9   : > { %5020 = vmatprep.mubr.bf16.mxu0 %v9599_v11  ;;  %5061 = vmatprep.mubr.bf16.mxu1 %v9599_v11 }
0x1bab   : > { %4991 = vmatpush1.bf16.msra.mxu0 %v8799_v27  ;;  %5032 = vmatpush1.bf16.msra.mxu1 %v8802_v6  ;;  %v3258_v27 = vadd.f32 %v9746_v31, %v8563_v7  ;;  %v9747_v6 = vld [vmem:[#allocation61_spill] sm:$0xff]  ;;  %v9234_v31 = vld [vmem:[#allocation12 + $0x1a4] ss:$16 sps:$4 sm:$0xff]  }
0x1bac   : > { %4992 = vmatprep.subr.bf16.mxu0 %v8805_v10  ;;  %5033 = vmatprep.subr.bf16.mxu1 %v8808_v29  ;;  %v3371_v10 = vadd.f32 %v9747_v6, %v8567_v56  ;;  %v9748_v29 = vld [vmem:[#allocation62_spill] sm:$0xff] }
0x1bad   : > { %v9240_v6 = vld [vmem:[#allocation12 + $0x1a0] ss:$16 sps:$4 sm:$0xff]  }
0x1baf   : > { %4993 = vmatpush1.bf16.msra.mxu0 %v8811_v55  ;;  %5034 = vmatpush1.bf16.msra.mxu1 %v8814_v9  ;;  %v3260_v55 = vadd.f32 %v9748_v29, %v8575_v39  ;;  %v9749_v9 = vld [vmem:[#allocation63_spill] sm:$0xff]  ;;  %v9246_v29 = vld [vmem:[#allocation12 + $0x1c4] ss:$16 sps:$4 sm:$0xff]  }
0x1bb0   : > { %4994 = vmatprep.subr.bf16.mxu0 %v8817_v5  ;;  %5035 = vmatprep.subr.bf16.mxu1 %v8820_v32  ;;  %v3373_v5 = vadd.f32 %v9749_v9, %v8579_v61  ;;  %v9252_v9 = vld [vmem:[#allocation12 + $0x1c0] ss:$16 sps:$4 sm:$0xff]  }
0x1bb3   : > { %4995 = vmatpush1.bf16.msra.mxu0 %v8823_v60  ;;  %5036 = vmatpush1.bf16.msra.mxu1 %v8826_v13 }
0x1bb4   : > { %4996 = vmatprep.subr.bf16.mxu0 %v8829_v33  ;;  %5037 = vmatprep.subr.bf16.mxu1 %v8832_v8 }
0x1bb7   : > { %4997 = vmatpush1.bf16.msra.mxu0 %v8835_v23  ;;  %5038 = vmatpush1.bf16.msra.mxu1 %v8838_v18 }
0x1bb8   : > { %4998 = vmatprep.subr.bf16.mxu0 %v8841_v16  ;;  %5039 = vmatprep.subr.bf16.mxu1 %v8844_v25 }
0x1bbb   : > { %4999 = vmatpush1.bf16.msra.mxu0 %v8847_v20  ;;  %5040 = vmatpush1.bf16.msra.mxu1 %v8850_v17 }
0x1bbc   : > { %5000 = vmatprep.subr.bf16.mxu0 %v8853_v45  ;;  %5041 = vmatprep.subr.bf16.mxu1 %v8856_v3 }
0x1bbf   : > { %5001 = vmatpush1.bf16.msra.mxu0 %v8859_v49  ;;  %5042 = vmatpush1.bf16.msra.mxu1 %v8862_v42 }
0x1bc0   : > { %5002 = vmatprep.subr.bf16.mxu0 %v8865_v43  ;;  %5043 = vmatprep.subr.bf16.mxu1 %v8868_v15 }
0x1bc3   : > { %5003 = vmatpush1.bf16.msra.mxu0 %v8871_v52  ;;  %5044 = vmatpush1.bf16.msra.mxu1 %v8874_v4 }
0x1bc4   : > { %5099 = vmatprep.subr.bf16.mxu0 %v9161_v50  ;;  %5140 = vmatprep.subr.bf16.mxu1 %v9164_v37 }
0x1c79   : > { %v4911_v32 = vpop.f32.mrb[172].mxu0  ;;  %v4952_v60 = vpop.f32.mrb[172].mxu1 }
0x1c7a   : > { %v4959_v13 = vadd.f32 %v4911_v32, %v3258_v27  ;;  %v4961_v33 = vadd.f32 %v4952_v60, %v3371_v10  ;;  %v4913_v8 = vpop.f32.mrb[173].mxu0  ;;  %v4954_v23 = vpop.f32.mrb[173].mxu1  ;;  %v9237_v27 = vld [vmem:[#allocation12 + $0x1ac] ss:$16 sps:$4 sm:$0xff]   ;;  %v9243_v10 = vld [vmem:[#allocation12 + $0x1a8] ss:$16 sps:$4 sm:$0xff]  }
0x1c7b   : > { %v4960_v18 = vadd.f32 %v4913_v8, %v3260_v55  ;;  %v4962_v16 = vadd.f32 %v4954_v23, %v3373_v5  ;;  %v4915_v25 = vpop.f32.mrb[174].mxu0  ;;  %v4956_v20 = vpop.f32.mrb[174].mxu1  ;;  %v9249_v55 = vld [vmem:[#allocation12 + $0x1cc] ss:$16 sps:$4 sm:$0xff]   ;;  %v9255_v5 = vld [vmem:[#allocation12 + $0x1c8] ss:$16 sps:$4 sm:$0xff]  }
0x1c7c   : > { %v4963_v17 = vmul.f32 0.5, %v4959_v13  ;;  %v4916_v45 = vpop.f32.mrb[175].mxu0  ;;  %v4957_v3 = vpop.f32.mrb[175].mxu1  ;;  %v4965_v42 = vmul.f32 0.5, %v4961_v33  ;;  %v9258_v32 = vld [vmem:[#allocation12 + $0x1e4] ss:$16 sps:$4 sm:$0xff]  }
0x1c7d   : > { %v4964_v49 = vmul.f32 0.5, %v4960_v18  ;;  %v9261_v60 = vld [vmem:[#allocation12 + $0x1ec] ss:$16 sps:$4 sm:$0xff]   ;;  %v9264_v13 = vld [vmem:[#allocation12 + $0x1e0] ss:$16 sps:$4 sm:$0xff]  }
0x1c7e   : > { %6388 = vtanh.f32 %v4963_v17  ;;  %v9267_v33 = vld [vmem:[#allocation12 + $0x1e8] ss:$16 sps:$4 sm:$0xff]   ;;  %v9750_v8 = vld [vmem:[#allocation64_spill] sm:$0xff]  ;;  %v9752_v25 = vld [vmem:[#allocation66_spill] sm:$0xff] }
0x1c7f   : > { %6390 = vtanh.f32 %v4964_v49  ;;  %v3264_v23 = vadd.f32 %v9750_v8, %v8563_v7  ;;  %v9751_v18 = vld [vmem:[#allocation65_spill] sm:$0xff]  ;;  %v3266_v20 = vadd.f32 %v9752_v25, %v8575_v39  ;;  %v9753_v17 = vld [vmem:[#allocation67_spill] sm:$0xff] }
0x1c80   : > { %6392 = vtanh.f32 %v4962_v16  ;;  %v3377_v16 = vadd.f32 %v9751_v18, %v8567_v56  ;;  %v3379_v45 = vadd.f32 %v9753_v17, %v8579_v61 }
0x1c81   : > { %6394 = vtanh.f32 %v4965_v42 }
0x1c88   : > { %v6389_v43 = vpop.eup %6388 }
0x1c89   : > { %v4969_v15 = vadd.f32 1.0, %v6389_v43  ;;  %v6391_v52 = vpop.eup %6390 }
0x1c8a   : > { %v4970_v21 = vadd.f32 1.0, %v6391_v52  ;;  %v6393_v48 = vpop.eup %6392 }
0x1c8b   : > { %v4972_v4 = vmul.f32 0.5, %v4969_v15  ;;  %v6395_v59 = vpop.eup %6394 }
0x1c8c   : > { %v4973_v19 = vmul.f32 0.5, %v4970_v21  ;;  %v4971_v57 = vadd.f32 1.0, %v6395_v59 }
0x1c8d   : > { %v4977_v0 = vmul.f32 %v6393_v48, %v4972_v4 }
0x1c8e   : > { %v4976_v24 = vmul.f32 %v4973_v19, %v9123_v53  ;;  %v4974_v51 = vmul.f32 0.5, %v4971_v57  ;;  %v9213_v53 = vld [vmem:[#allocation12 + $0x16c] ss:$16 sps:$4 sm:$0xff]  }
0x1c90   : > { %v9176_v35 = vadd.f32 %v4977_v0, %v4976_v24 }
0x1c92   : > { %6396 = vtanh.f32 %v9176_v35 }
0x1c9c   : > { %v6397_v47 = vpop.eup %6396 }
0x1c9d   : > { %v4980_v22 = vmul.f32 %v6397_v47, %v4974_v51 }
0x1c9f   : > { %5786 = vst [vmem:[%s7172_s17 + $0x58] sm:$0xff] %v4980_v22  ;;  %v4987_v34 = vpack.c.bf16 %v4980_v22, %v4980_v22 }
0x1ca1   : > { %5021 = vmatmul.mubr.bf16.vlgmr.msra.gmra.mrb[176].mxu0 %v4987_v34  ;;  %5062 = vmatmul.mubr.bf16.vlgmr.msra.gmra.mrb[176].mxu1 %v4987_v34 }
0x1ca2   : > { %5100 = vmatpush1.bf16.msra.mxu0 %v9127_v14  ;;  %5141 = vmatpush1.bf16.msra.mxu1 %v9181_v36 }
0x1ca3   : > { %5101 = vmatprep.subr.bf16.mxu0 %v9184_v46  ;;  %5142 = vmatprep.subr.bf16.mxu1 %v9187_v41 }
0x1ca4   : > { %5131 = vmatprep.mubr.bf16.mxu0 %v9599_v11  ;;  %5172 = vmatprep.mubr.bf16.mxu1 %v9599_v11 }
0x1ca6   : > { %5102 = vmatpush1.bf16.msra.mxu0 %v9192_v44  ;;  %5143 = vmatpush1.bf16.msra.mxu1 %v9195_v54 }
0x1ca7   : > { %5103 = vmatprep.subr.bf16.mxu0 %v9198_v1  ;;  %5144 = vmatprep.subr.bf16.mxu1 %v9201_v2 }
0x1caa   : > { %5104 = vmatpush1.bf16.msra.mxu0 %v9204_v40  ;;  %5145 = vmatpush1.bf16.msra.mxu1 %v9207_v63 }
0x1cab   : > { %5105 = vmatprep.subr.bf16.mxu0 %v9210_v26  ;;  %5146 = vmatprep.subr.bf16.mxu1 %v9213_v53 }
0x1cae   : > { %5106 = vmatpush1.bf16.msra.mxu0 %v9216_v28  ;;  %5147 = vmatpush1.bf16.msra.mxu1 %v9219_v62 }
0x1caf   : > { %5107 = vmatprep.subr.bf16.mxu0 %v9222_v30  ;;  %5148 = vmatprep.subr.bf16.mxu1 %v9225_v58 }
0x1cb2   : > { %5108 = vmatpush1.bf16.msra.mxu0 %v9228_v38  ;;  %5149 = vmatpush1.bf16.msra.mxu1 %v9231_v12 }
0x1cb3   : > { %5109 = vmatprep.subr.bf16.mxu0 %v9234_v31  ;;  %5150 = vmatprep.subr.bf16.mxu1 %v9237_v27 }
0x1cb6   : > { %5110 = vmatpush1.bf16.msra.mxu0 %v9240_v6  ;;  %5151 = vmatpush1.bf16.msra.mxu1 %v9243_v10 }
0x1cb7   : > { %5111 = vmatprep.subr.bf16.mxu0 %v9246_v29  ;;  %5152 = vmatprep.subr.bf16.mxu1 %v9249_v55 }
0x1cba   : > { %5112 = vmatpush1.bf16.msra.mxu0 %v9252_v9  ;;  %5153 = vmatpush1.bf16.msra.mxu1 %v9255_v5 }
0x1cbb   : > { %5113 = vmatprep.subr.bf16.mxu0 %v9258_v32  ;;  %5154 = vmatprep.subr.bf16.mxu1 %v9261_v60 }
0x1cbe   : > { %5114 = vmatpush1.bf16.msra.mxu0 %v9264_v13  ;;  %5155 = vmatpush1.bf16.msra.mxu1 %v9267_v33 }
0x1cbf   : > { %5210 = vmatprep.subr.bf16.mxu0 %v9161_v50  ;;  %5251 = vmatprep.subr.bf16.mxu1 %v9164_v37 }
0x1d74   : > { %v5022_v3 = vpop.f32.mrb[176].mxu0  ;;  %v5063_v49 = vpop.f32.mrb[176].mxu1 }
0x1d75   : > { %v5070_v42 = vadd.f32 %v5022_v3, %v3264_v23  ;;  %v5072_v43 = vadd.f32 %v5063_v49, %v3377_v16  ;;  %v5024_v15 = vpop.f32.mrb[177].mxu0  ;;  %v5065_v52 = vpop.f32.mrb[177].mxu1 }
0x1d76   : > { %v5071_v4 = vadd.f32 %v5024_v15, %v3266_v20  ;;  %v5073_v21 = vadd.f32 %v5065_v52, %v3379_v45  ;;  %v5026_v48 = vpop.f32.mrb[178].mxu0  ;;  %v5067_v19 = vpop.f32.mrb[178].mxu1 }
0x1d77   : > { %v5074_v0 = vmul.f32 0.5, %v5070_v42  ;;  %v5027_v24 = vpop.f32.mrb[179].mxu0  ;;  %v5068_v59 = vpop.f32.mrb[179].mxu1  ;;  %v5076_v51 = vmul.f32 0.5, %v5072_v43  ;;  %v9756_v48 = vld [vmem:[#allocation70_spill] sm:$0xff] }
0x1d78   : > { %v5075_v57 = vmul.f32 0.5, %v5071_v4  ;;  %v9755_v4 = vld [vmem:[#allocation69_spill] sm:$0xff]  ;;  %v3270_v19 = vadd.f32 %v9756_v48, %v8575_v39 }
0x1d79   : > { %6398 = vtanh.f32 %v5074_v0  ;;  %v9757_v0 = vld [vmem:[#allocation71_spill] sm:$0xff] }
0x1d7a   : > { %6400 = vtanh.f32 %v5075_v57  ;;  %v3383_v24 = vadd.f32 %v9757_v0, %v8579_v61 }
0x1d7b   : > { %6402 = vtanh.f32 %v5073_v21  ;;  %v3381_v21 = vadd.f32 %v9755_v4, %v8567_v56 }
0x1d7c   : > { %6404 = vtanh.f32 %v5076_v51 }
0x1d83   : > { %v6399_v47 = vpop.eup %6398 }
0x1d84   : > { %v5080_v22 = vadd.f32 1.0, %v6399_v47  ;;  %v6401_v34 = vpop.eup %6400 }
0x1d85   : > { %v5081_v23 = vadd.f32 1.0, %v6401_v34  ;;  %v6403_v18 = vpop.eup %6402 }
0x1d86   : > { %v5083_v8 = vmul.f32 0.5, %v5080_v22  ;;  %v6405_v45 = vpop.eup %6404 }
0x1d87   : > { %v5084_v16 = vmul.f32 0.5, %v5081_v23  ;;  %v5082_v3 = vadd.f32 1.0, %v6405_v45 }
0x1d88   : > { %v5088_v25 = vmul.f32 %v6403_v18, %v5083_v8 }
0x1d89   : > { %v5087_v20 = vmul.f32 %v5084_v16, %v9176_v35  ;;  %v5085_v49 = vmul.f32 0.5, %v5082_v3  ;;  %v9754_v35 = vld [vmem:[#allocation68_spill] sm:$0xff] }
0x1d8a   : > { %v3268_v52 = vadd.f32 %v9754_v35, %v8563_v7 }
0x1d8b   : > { %v9281_v17 = vadd.f32 %v5088_v25, %v5087_v20 }
0x1d8d   : > { %6406 = vtanh.f32 %v9281_v17 }
0x1d97   : > { %v6407_v42 = vpop.eup %6406 }
0x1d98   : > { %v5091_v43 = vmul.f32 %v6407_v42, %v5085_v49 }
0x1d9a   : > { %5787 = vst [vmem:[%s7172_s17 + $0x60] sm:$0xff] %v5091_v43  ;;  %v5098_v15 = vpack.c.bf16 %v5091_v43, %v5091_v43 }
0x1d9c   : > { %5132 = vmatmul.mubr.bf16.vlgmr.msra.gmra.mrb[180].mxu0 %v5098_v15  ;;  %5173 = vmatmul.mubr.bf16.vlgmr.msra.gmra.mrb[180].mxu1 %v5098_v15 }
0x1d9d   : > { %5211 = vmatpush1.bf16.msra.mxu0 %v9127_v14  ;;  %5252 = vmatpush1.bf16.msra.mxu1 %v9181_v36 }
0x1d9e   : > { %5212 = vmatprep.subr.bf16.mxu0 %v9184_v46  ;;  %5253 = vmatprep.subr.bf16.mxu1 %v9187_v41 }
0x1d9f   : > { %5242 = vmatprep.mubr.bf16.mxu0 %v9599_v11  ;;  %5283 = vmatprep.mubr.bf16.mxu1 %v9599_v11 }
0x1da1   : > { %5213 = vmatpush1.bf16.msra.mxu0 %v9192_v44  ;;  %5254 = vmatpush1.bf16.msra.mxu1 %v9195_v54 }
0x1da2   : > { %5214 = vmatprep.subr.bf16.mxu0 %v9198_v1  ;;  %5255 = vmatprep.subr.bf16.mxu1 %v9201_v2 }
0x1da5   : > { %5215 = vmatpush1.bf16.msra.mxu0 %v9204_v40  ;;  %5256 = vmatpush1.bf16.msra.mxu1 %v9207_v63 }
0x1da6   : > { %5216 = vmatprep.subr.bf16.mxu0 %v9210_v26  ;;  %5257 = vmatprep.subr.bf16.mxu1 %v9213_v53 }
0x1da9   : > { %5217 = vmatpush1.bf16.msra.mxu0 %v9216_v28  ;;  %5258 = vmatpush1.bf16.msra.mxu1 %v9219_v62 }
0x1daa   : > { %5218 = vmatprep.subr.bf16.mxu0 %v9222_v30  ;;  %5259 = vmatprep.subr.bf16.mxu1 %v9225_v58 }
0x1dad   : > { %5219 = vmatpush1.bf16.msra.mxu0 %v9228_v38  ;;  %5260 = vmatpush1.bf16.msra.mxu1 %v9231_v12 }
0x1dae   : > { %5220 = vmatprep.subr.bf16.mxu0 %v9234_v31  ;;  %5261 = vmatprep.subr.bf16.mxu1 %v9237_v27 }
0x1db1   : > { %5221 = vmatpush1.bf16.msra.mxu0 %v9240_v6  ;;  %5262 = vmatpush1.bf16.msra.mxu1 %v9243_v10 }
0x1db2   : > { %5222 = vmatprep.subr.bf16.mxu0 %v9246_v29  ;;  %5263 = vmatprep.subr.bf16.mxu1 %v9249_v55 }
0x1db5   : > { %5223 = vmatpush1.bf16.msra.mxu0 %v9252_v9  ;;  %5264 = vmatpush1.bf16.msra.mxu1 %v9255_v5 }
0x1db6   : > { %5224 = vmatprep.subr.bf16.mxu0 %v9258_v32  ;;  %5265 = vmatprep.subr.bf16.mxu1 %v9261_v60 }
0x1db9   : > { %5225 = vmatpush1.bf16.msra.mxu0 %v9264_v13  ;;  %5266 = vmatpush1.bf16.msra.mxu1 %v9267_v33 }
0x1dba   : > { %5321 = vmatprep.subr.bf16.mxu0 %v9161_v50  ;;  %5362 = vmatprep.subr.bf16.mxu1 %v9164_v37 }
0x1e6f   : > { %v5133_v59 = vpop.f32.mrb[180].mxu0  ;;  %v5174_v57 = vpop.f32.mrb[180].mxu1 }
0x1e70   : > { %v5181_v51 = vadd.f32 %v5133_v59, %v3268_v52  ;;  %v5183_v47 = vadd.f32 %v5174_v57, %v3381_v21  ;;  %v5135_v22 = vpop.f32.mrb[181].mxu0  ;;  %v5176_v50 = vpop.f32.mrb[181].mxu1 }
0x1e71   : > { %v5182_v34 = vadd.f32 %v5135_v22, %v3270_v19  ;;  %v5184_v37 = vadd.f32 %v5176_v50, %v3383_v24  ;;  %v5137_v8 = vpop.f32.mrb[182].mxu0  ;;  %v5178_v23 = vpop.f32.mrb[182].mxu1 }
0x1e72   : > { %v5185_v18 = vmul.f32 0.5, %v5181_v51  ;;  %v5138_v16 = vpop.f32.mrb[183].mxu0  ;;  %v5179_v25 = vpop.f32.mrb[183].mxu1  ;;  %v5187_v45 = vmul.f32 0.5, %v5183_v47 }
0x1e73   : > { %v5186_v20 = vmul.f32 0.5, %v5182_v34  ;;  %v9763_v25 = vld [vmem:[#allocation77_spill] sm:$0xff] }
0x1e74   : > { %6408 = vtanh.f32 %v5185_v18  ;;  %v9762_v18 = vld [vmem:[#allocation76_spill] sm:$0xff] }
0x1e75   : > { %6410 = vtanh.f32 %v5186_v20  ;;  %v3278_v16 = vadd.f32 %v9762_v18, %v8563_v7  ;;  %v3391_v20 = vadd.f32 %v9763_v25, %v8567_v56 }
0x1e76   : > { %6412 = vtanh.f32 %v5184_v37 }
0x1e77   : > { %6414 = vtanh.f32 %v5187_v45  ;;  %v9764_v45 = vld [vmem:[#allocation24_spill] sm:$0xff] }
0x1e7e   : > { %v6409_v3 = vpop.eup %6408 }
0x1e7f   : > { %v5191_v49 = vadd.f32 1.0, %v6409_v3  ;;  %v6411_v42 = vpop.eup %6410  ;;  %v3280_v3 = vadd.f32 %v9764_v45, %v8575_v39 }
0x1e80   : > { %v5192_v15 = vadd.f32 1.0, %v6411_v42  ;;  %v6413_v35 = vpop.eup %6412 }
0x1e81   : > { %v5194_v43 = vmul.f32 0.5, %v5191_v49  ;;  %v6415_v19 = vpop.eup %6414  ;;  %v9765_v49 = vld [vmem:[#allocation78_spill] sm:$0xff] }
0x1e82   : > { %v5195_v52 = vmul.f32 0.5, %v5192_v15  ;;  %v5193_v0 = vadd.f32 1.0, %v6415_v19  ;;  %v3393_v42 = vadd.f32 %v9765_v49, %v8579_v61 }
0x1e83   : > { %v5199_v4 = vmul.f32 %v6413_v35, %v5194_v43 }
0x1e84   : > { %v5198_v21 = vmul.f32 %v5195_v52, %v9281_v17  ;;  %v5196_v24 = vmul.f32 0.5, %v5193_v0 }
0x1e86   : > { %v9328_v48 = vadd.f32 %v5199_v4, %v5198_v21 }
0x1e88   : > { %6416 = vtanh.f32 %v9328_v48 }
0x1e92   : > { %v6417_v59 = vpop.eup %6416 }
0x1e93   : > { %v5202_v57 = vmul.f32 %v6417_v59, %v5196_v24 }
0x1e95   : > { %5788 = vst [vmem:[%s7172_s17 + $0x68] sm:$0xff] %v5202_v57  ;;  %v5209_v51 = vpack.c.bf16 %v5202_v57, %v5202_v57 }
0x1e97   : > { %5243 = vmatmul.mubr.bf16.vlgmr.msra.gmra.mrb[184].mxu0 %v5209_v51  ;;  %5284 = vmatmul.mubr.bf16.vlgmr.msra.gmra.mrb[184].mxu1 %v5209_v51 }
0x1e98   : > { %5322 = vmatpush1.bf16.msra.mxu0 %v9127_v14  ;;  %5363 = vmatpush1.bf16.msra.mxu1 %v9181_v36  ;;  %v9759_v36 = vld [vmem:[#allocation73_spill] sm:$0xff] }
0x1e99   : > { %5323 = vmatprep.subr.bf16.mxu0 %v9184_v46  ;;  %5364 = vmatprep.subr.bf16.mxu1 %v9187_v41  ;;  %v3387_v46 = vadd.f32 %v9759_v36, %v8567_v56  ;;  %v9760_v41 = vld [vmem:[#allocation74_spill] sm:$0xff] }
0x1e9a   : > { %5353 = vmatprep.mubr.bf16.mxu0 %v9599_v11  ;;  %5394 = vmatprep.mubr.bf16.mxu1 %v9599_v11  ;;  %v9758_v11 = vld [vmem:[#allocation72_spill] sm:$0xff] }
0x1e9b   : > { %v3274_v14 = vadd.f32 %v9758_v11, %v8563_v7 }
0x1e9c   : > { %5324 = vmatpush1.bf16.msra.mxu0 %v9192_v44  ;;  %5365 = vmatpush1.bf16.msra.mxu1 %v9195_v54  ;;  %v3276_v44 = vadd.f32 %v9760_v41, %v8575_v39  ;;  %v9761_v54 = vld [vmem:[#allocation75_spill] sm:$0xff] }
0x1e9d   : > { %5325 = vmatprep.subr.bf16.mxu0 %v9198_v1  ;;  %5366 = vmatprep.subr.bf16.mxu1 %v9201_v2  ;;  %v3389_v1 = vadd.f32 %v9761_v54, %v8579_v61 }
0x1ea0   : > { %5326 = vmatpush1.bf16.msra.mxu0 %v9204_v40  ;;  %5367 = vmatpush1.bf16.msra.mxu1 %v9207_v63 }
0x1ea1   : > { %5327 = vmatprep.subr.bf16.mxu0 %v9210_v26  ;;  %5368 = vmatprep.subr.bf16.mxu1 %v9213_v53 }
0x1ea4   : > { %5328 = vmatpush1.bf16.msra.mxu0 %v9216_v28  ;;  %5369 = vmatpush1.bf16.msra.mxu1 %v9219_v62 }
0x1ea5   : > { %5329 = vmatprep.subr.bf16.mxu0 %v9222_v30  ;;  %5370 = vmatprep.subr.bf16.mxu1 %v9225_v58 }
0x1ea8   : > { %5330 = vmatpush1.bf16.msra.mxu0 %v9228_v38  ;;  %5371 = vmatpush1.bf16.msra.mxu1 %v9231_v12 }
0x1ea9   : > { %5331 = vmatprep.subr.bf16.mxu0 %v9234_v31  ;;  %5372 = vmatprep.subr.bf16.mxu1 %v9237_v27 }
0x1eac   : > { %5332 = vmatpush1.bf16.msra.mxu0 %v9240_v6  ;;  %5373 = vmatpush1.bf16.msra.mxu1 %v9243_v10 }
0x1ead   : > { %5333 = vmatprep.subr.bf16.mxu0 %v9246_v29  ;;  %5374 = vmatprep.subr.bf16.mxu1 %v9249_v55 }
0x1eb0   : > { %5334 = vmatpush1.bf16.msra.mxu0 %v9252_v9  ;;  %5375 = vmatpush1.bf16.msra.mxu1 %v9255_v5 }
0x1eb1   : > { %5335 = vmatprep.subr.bf16.mxu0 %v9258_v32  ;;  %5376 = vmatprep.subr.bf16.mxu1 %v9261_v60 }
0x1eb4   : > { %5336 = vmatpush1.bf16.msra.mxu0 %v9264_v13  ;;  %5377 = vmatpush1.bf16.msra.mxu1 %v9267_v33 }
0x1f6a   : > { %v5244_v2 = vpop.f32.mrb[184].mxu0  ;;  %v5285_v40 = vpop.f32.mrb[184].mxu1 }
0x1f6b   : > { %v5292_v63 = vadd.f32 %v5244_v2, %v3274_v14  ;;  %v5294_v26 = vadd.f32 %v5285_v40, %v3387_v46  ;;  %v5246_v53 = vpop.f32.mrb[185].mxu0  ;;  %v5287_v28 = vpop.f32.mrb[185].mxu1 }
0x1f6c   : > { %v5293_v62 = vadd.f32 %v5246_v53, %v3276_v44  ;;  %v5295_v30 = vadd.f32 %v5287_v28, %v3389_v1  ;;  %v5248_v58 = vpop.f32.mrb[186].mxu0  ;;  %v5289_v38 = vpop.f32.mrb[186].mxu1 }
0x1f6d   : > { %v5296_v12 = vmul.f32 0.5, %v5292_v63  ;;  %v5249_v31 = vpop.f32.mrb[187].mxu0  ;;  %v5290_v27 = vpop.f32.mrb[187].mxu1  ;;  %v5298_v10 = vmul.f32 0.5, %v5294_v26 }
0x1f6e   : > { %v5297_v6 = vmul.f32 0.5, %v5293_v62 }
0x1f6f   : > { %6418 = vtanh.f32 %v5296_v12 }
0x1f70   : > { %6420 = vtanh.f32 %v5297_v6 }
0x1f71   : > { %6422 = vtanh.f32 %v5295_v30 }
0x1f72   : > { %6424 = vtanh.f32 %v5298_v10 }
0x1f79   : > { %v6419_v29 = vpop.eup %6418 }
0x1f7a   : > { %v5302_v55 = vadd.f32 1.0, %v6419_v29  ;;  %v6421_v9 = vpop.eup %6420 }
0x1f7b   : > { %v5303_v32 = vadd.f32 1.0, %v6421_v9  ;;  %v6423_v60 = vpop.eup %6422 }
0x1f7c   : > { %v5305_v5 = vmul.f32 0.5, %v5302_v55  ;;  %v6425_v22 = vpop.eup %6424 }
0x1f7d   : > { %v5306_v13 = vmul.f32 0.5, %v5303_v32  ;;  %v5304_v50 = vadd.f32 1.0, %v6425_v22 }
0x1f7e   : > { %v5310_v33 = vmul.f32 %v6423_v60, %v5305_v5 }
0x1f7f   : > { %v5309_v17 = vmul.f32 %v5306_v13, %v9328_v48  ;;  %v5307_v34 = vmul.f32 0.5, %v5304_v50 }
0x1f81   : > { %v5311_v47 = vadd.f32 %v5310_v33, %v5309_v17 }
0x1f83   : > { %6426 = vtanh.f32 %v5311_v47 }
0x1f8d   : > { %v6427_v37 = vpop.eup %6426 }
0x1f8e   : > { %v5313_v8 = vmul.f32 %v6427_v37, %v5307_v34 }
0x1f90   : > { %5789 = vst [vmem:[%s7172_s17 + $0x70] sm:$0xff] %v5313_v8  ;;  %v5320_v23 = vpack.c.bf16 %v5313_v8, %v5313_v8 }
0x1f92   : > { %5354 = vmatmul.mubr.bf16.vlgmr.msra.gmra.mrb[188].mxu0 %v5320_v23  ;;  %5395 = vmatmul.mubr.bf16.vlgmr.msra.gmra.mrb[188].mxu1 %v5320_v23 }
0x2065   : > { %v5355_v43 = vpop.f32.mrb[188].mxu0  ;;  %v5396_v15 = vpop.f32.mrb[188].mxu1 }
0x2066   : > { %v5403_v35 = vadd.f32 %v5355_v43, %v3278_v16  ;;  %v5405_v52 = vadd.f32 %v5396_v15, %v3391_v20  ;;  %v5357_v4 = vpop.f32.mrb[189].mxu0  ;;  %v5398_v21 = vpop.f32.mrb[189].mxu1 }
0x2067   : > { %v5404_v48 = vadd.f32 %v5357_v4, %v3280_v3  ;;  %v5406_v19 = vadd.f32 %v5398_v21, %v3393_v42  ;;  %v5359_v0 = vpop.f32.mrb[190].mxu0  ;;  %v5400_v24 = vpop.f32.mrb[190].mxu1 }
0x2068   : > { %v5407_v7 = vmul.f32 0.5, %v5403_v35  ;;  %v5360_v59 = vpop.f32.mrb[191].mxu0  ;;  %v5401_v57 = vpop.f32.mrb[191].mxu1  ;;  %v5409_v39 = vmul.f32 0.5, %v5405_v52 }
0x2069   : > { %v5408_v56 = vmul.f32 0.5, %v5404_v48 }
0x206a   : > { %6428 = vtanh.f32 %v5407_v7 }
0x206b   : > { %6430 = vtanh.f32 %v5408_v56 }
0x206c   : > { %6432 = vtanh.f32 %v5406_v19 }
0x206d   : > { %6434 = vtanh.f32 %v5409_v39 }
0x2074   : > { %v6429_v51 = vpop.eup %6428 }
0x2075   : > { %v5413_v61 = vadd.f32 1.0, %v6429_v51  ;;  %v6431_v11 = vpop.eup %6430 }
0x2076   : > { %v5414_v36 = vadd.f32 1.0, %v6431_v11  ;;  %v6433_v46 = vpop.eup %6432 }
0x2077   : > { %v5416_v14 = vmul.f32 0.5, %v5413_v61  ;;  %v6435_v2 = vpop.eup %6434 }
0x2078   : > { %v5417_v41 = vmul.f32 0.5, %v5414_v36  ;;  %v5415_v40 = vadd.f32 1.0, %v6435_v2 }
0x2079   : > { %v5421_v44 = vmul.f32 %v6433_v46, %v5416_v14 }
0x207a   : > { %v5420_v54 = vmul.f32 %v5417_v41, %v5311_v47  ;;  %v5418_v63 = vmul.f32 0.5, %v5415_v40 }
0x207c   : > { %v5422_v1 = vadd.f32 %v5421_v44, %v5420_v54 }
0x207e   : > { %6436 = vtanh.f32 %v5422_v1  ;;  %5430 = vst [vmem:[#allocation16 + $0x8] sm:$0xff] %v5422_v1 }
0x2088   : > { %v6437_v26 = vpop.eup %6436 }
0x2089   : > { %v5424_v53 = vmul.f32 %v6437_v26, %v5418_v63 }
0x208b   : > { %5790 = vst [vmem:[%s7172_s17 + $0x78] sm:$0xff] %v5424_v53  ;;  %5429 = vst [vmem:[#allocation14 + $0x8] sm:$0xff] %v5424_v53 }
0x208c   : > { %6721 = shalt.err (!%p6718_p12)
}
0x208d   : > { %s9767_s15 = sld [smem:[#allocation80_spill]] }
0x2093   : > { %s6722_s1 = scalar_lea.hbm %s9767_s15, 256 }
0x2094   : > { %p6723_p1 = scmp.ne.s32.totalorder %s9767_s15, %s6722_s1  ;;  %p6728_p10 = scmp.lt.u32.totalorder %s6722_s1, %s9767_s15 }
0x2096   : > { %p6724_p3 = pnand %p6723_p1, %p9766_p6 }
0x2098   : > { %p6725_p7 = pneg %p6724_p3 }
0x209a   : > { %p6730_p2 = pnand %p6728_p10, %p6725_p7 }
0x209c   : > { %6733 = shalt.err (!%p6730_p2)
}
0x209d   : > { %s6868_s7 = smov 128   ;;  %s6869_s16 = smov 8  }
0x209e   : > { %5822 = dma.vmem_to_hbm [thread:$0]  (%p9766_p6), %s5462_s25, 256, %s9767_s15, [#allocation15], %s6868_s7, %s6868_s7, %s6869_s16  }
0x209f   : > { %s5432_s30 = scalar_lea.sflag [#allocation6], %s7154_s23  ;;  %s6734_s13 = scalar_lea.vmem %s9389_s12, 2048 }
0x20a0   : > { %p6735_p4 = scmp.ne.s32.totalorder %s9389_s12, %s6734_s13  ;;  %s6870_s1 = smov [#allocation13]  }
0x20a1   : > { %s6738_s26 = sshll.u32 %s6870_s1, 4  ;;  %s6739_s26 = int_to_ptr.vmem [resolvable:$false] %s6738_s26 }
0x20a2   : > { %p6736_p8 = pnand %p6735_p4, %p7096_p11  ;;  %s6740_s17 = scalar_lea.vmem %s6739_s26, 4096 }
0x20a3   : > { %p6741_p0 = scmp.lt.s32.totalorder %s9389_s12, %s6739_s26  ;;  %p6742_p5 = scmp.lt.s32.totalorder %s6740_s17, %s6734_s13 }
0x20a4   : > { %p6737_p13 = pneg %p6736_p8 }
0x20a5   : > { %p6743_p9 = por %p6742_p5, %p6741_p0 }
0x20a7   : > { %p6744_p12 = pnand %p6743_p9, %p6737_p13 }
0x20a9   : > { %6747 = shalt.err (!%p6744_p12)
}
0x20aa   : > { %s6748_s25 = scalar_lea.hbm %s9387_s27, 2048  ;;  %s6752_s22 = scalar_lea.hbm %s9500_s6, 6144 }
0x20ab   : > { %p6749_p1 = scmp.ne.s32.totalorder %s9387_s27, %s6748_s25  ;;  %p6753_p10 = scmp.lt.u32.totalorder %s9387_s27, %s9500_s6 }
0x20ac   : > { %p6754_p2 = scmp.lt.u32.totalorder %s6752_s22, %s6748_s25  ;;  %p6756_p8 = scmp.lt.u32.totalorder %s6748_s25, %s9387_s27 }
0x20ad   : > { %p6750_p3 = pnand %p6749_p1, %p7096_p11 }
0x20ae   : > { %p6755_p4 = por %p6754_p2, %p6753_p10 }
0x20af   : > { %p6751_p7 = pneg %p6750_p3 }
0x20b0   : > { %p6757_p13 = por %p6756_p8, %p6755_p4 }
0x20b2   : > { %p6758_p0 = pnand %p6757_p13, %p6751_p7 }
0x20b4   : > { %6761 = shalt.err (!%p6758_p0)
}
0x20b5   : > { %5820 = dma.vmem_to_hbm [thread:$0]  (%p7096_p11), %s9389_s12, 2048, %s9387_s27, %s5432_s30, %s6868_s7, %s6868_s7, %s6869_s16  }
0x20b6   : > { %s6762_s13 = scalar_lea.vmem %s9392_s21, 256  ;;  %p6769_p1 = scmp.lt.s32.totalorder %s9392_s21, %s9392_s21 }
0x20b7   : > { %p6763_p5 = scmp.ne.s32.totalorder %s9392_s21, %s6762_s13  ;;  %p6770_p3 = scmp.lt.s32.totalorder %s6762_s13, %s6762_s13 }
0x20b9   : > { %p6764_p9 = pnand %p6763_p5, %p9766_p6  ;;  %p6771_p7 = por %p6770_p3, %p6769_p1 }
0x20bb   : > { %p6765_p12 = pneg %p6764_p9 }
0x20bd   : > { %p6772_p10 = pnand %p6771_p7, %p6765_p12 }
0x20bf   : > { %6775 = shalt.err (!%p6772_p10)
}
0x20c0   : > { %s9768_s26 = sld [smem:[#allocation81_spill]] }
0x20c6   : > { %s6776_s17 = scalar_lea.hbm %s9768_s26, 256 }
0x20c7   : > { %p6777_p11 = scmp.ne.s32.totalorder %s9768_s26, %s6776_s17  ;;  %p6782_p8 = scmp.lt.u32.totalorder %s6776_s17, %s9768_s26 }
0x20c9   : > { %p6778_p2 = pnand %p6777_p11, %p9766_p6 }
0x20cb   : > { %p6779_p4 = pneg %p6778_p2 }
0x20cd   : > { %p6784_p13 = pnand %p6782_p8, %p6779_p4 }
0x20cf   : > { %6787 = shalt.err (!%p6784_p13)
}
0x20d0   : > { %5824 = dma.vmem_to_hbm [thread:$0]  (%p9766_p6), %s9392_s21, 256, %s9768_s26, [#allocation15], %s6868_s7, %s6868_s7, %s6869_s16  }
0x20d1   : > { %6825 = dma.done.wait (%p9766_p6), [#allocation15], 512  }
0x20d2   : > { %6827 = vsyncadd (%p9766_p6), [#allocation15], 4294966784 }
0x20d3 PF: > { %s9769_s22 = sld [smem:[#allocation22_spill]]  ;;  %s9770_s19 = sld [smem:[#allocation23_spill]] }
0x20d4   : > { %p5864_p0 = scmp.ge.s32.totalorder %s6854_s10, 2 }
0x20d9   : > { %s5499_s1 = sand.u32 1, %s9769_s22   ;;  %p9771_p5 = scmp.ne.s32.totalorder %s9770_s19, 0 }
0x20da   : > { %s5500_s13 = scalar_lea.sflag [#allocation6], %s5499_s1 }
0x20db   : > { %p5848_p9 = pnand %p5864_p0, %p9771_p5 }
0x20dd   : > { %6829 = dma.done.wait (!%p5848_p9), %s5500_s13, 2048  }
0x20de   : > { %6831 = vsyncadd (!%p5848_p9), %s5500_s13, 4294965248  ;;  %s28_s10 = sadd.s32 1, %s6854_s10   ;;  %s9772_s27 = smov %s6838_s28 }
0x20df   : > { %p25_p12 = scmp.ge.s32.totalorder %s28_s10, 5   ;;  %s9773_s28 = smov %s6842_s29 }
0x20e0   : > { %s9774_s29 = smov %s7105_s8  ;;  %s9775_s30 = smov %s6850_s9 }
0x20e1   : > { %s9776_s9 = smov %s9778_s20  ;;  %27 = sbr.rel (!%p25_p12) target bundleno = 13 (0xd), region = 149 }
0x20e8   :  { %5505 = vsyncpa [#allocation5], 1 }
0x20e9   :  { %5507 = vsyncpa [#allocation5 + $0x1], 1 }
0x20ea   :  { %5508 = vsyncpa [#allocation8], 1 }
0x20eb   :  { %5509 = vsyncpa [#allocation11], 1 }
0x20ec   :  { %5510 = vsyncpa [#allocation6], 1 }
0x20ed   :  { %5512 = vsyncpa [#allocation6 + $0x1], 1 }
0x20ee   :  { %5513 = vsyncpa [#allocation15], 1 }

</bundles_post_ra>
